<compile_context>
chip_gen: v7x
topology: tpu7x:2x2x1
jax: 0.10.0
libtpu: 0.0.40
codegen_flags: <defaults>
</compile_context>

<pallas_src>
import functools

import jax
import jax.numpy as jnp
import numpy as np
from jax.experimental import pallas as pl
from jax.experimental.pallas import tpu as pltpu

_EPS = 1e-5
_VMEM = pl.BlockSpec(memory_space=pltpu.MemorySpace.VMEM)


def conv_out(size, kernel_size=5, stride=2):
    return (size - (kernel_size - 1) - 1) // stride + 1


def _round8(n):
    return ((n + 7) // 8) * 8


def _network_dims(batch, h, w):
    h1, w1 = conv_out(h), conv_out(w)
    h2, w2 = conv_out(h1), conv_out(w1)
    h3, w3 = conv_out(h2), conv_out(w2)
    return dict(h1=h1, w1=w1, h2=h2, w2=w2, h3=h3, w3=w3,
                rows1=_round8(h1 * batch), rows2=_round8(h2 * batch),
                head_stride=_round8(batch))


# ----------------------------------------------------------------------------
# Fused Pallas kernel: conv/bn/relu x3  ->  head  ->  fc1  ->  softmax
# ----------------------------------------------------------------------------
def _policy_kernel(x_ref,
                   r1_ref, m1_ref, s1_ref, t1_ref,
                   r2_ref, m2_ref, s2_ref, t2_ref,
                   r3_ref, m3_ref, s3_ref, t3_ref,
                   wh_ref, wf_ref, vec_ref, o_ref,
                   *, layers, batch, h3, head_stride, outputs, action_dim,
                   eps, compute_dtype):
    vec = vec_ref[...]  # (8, Lmax) f32: beta_wide x3, head bias, fc1 bias.

    def conv_bn_relu(a, r_ref, m_ref, s_ref, t_ref, beta_wide, cfg):
        blocks, rows_pad, lanes, count = cfg
        # im2col along H (and, for layer 1, the NCHW->wide relayout) as one MXU
        # matmul against a constant 0/1 selection matrix.  Each block is padded
        # to a multiple of 8 sublanes so the per-block slices below are aligned.
        rsel = jnp.dot(r_ref[...], a, preferred_element_type=compute_dtype)
        # Conv2d(k=5, s=2, bias folded away by training-mode BN): accumulate the
        # per-block matmuls against the W-scattered weights.  Pure MXU work;
        # slice starts/sizes are all multiples of 8.
        y = jnp.dot(rsel[0:rows_pad, :], m_ref[0],
                    preferred_element_type=jnp.float32)
        for j in range(1, blocks):
            y = y + jnp.dot(rsel[j * rows_pad:(j + 1) * rows_pad, :], m_ref[j],
                            preferred_element_type=jnp.float32)
        # One-pass training-mode BatchNorm fused with ReLU.  Per-channel
        # reduction / broadcast-back go through small constant matrices
        # (s_ref, and t_ref with gamma folded in) on the MXU instead of lane
        # slice/concat loops.  Padded rows of y are exactly zero, so they do
        # not perturb the sums; `count` only counts valid elements.
        inv = 1.0 / count
        rs = jnp.sum(y, axis=0, keepdims=True)
        rss = jnp.sum(y * y, axis=0, keepdims=True)
        mean = jnp.dot(rs, s_ref[...], preferred_element_type=jnp.float32) * inv
        esq = jnp.dot(rss, s_ref[...], preferred_element_type=jnp.float32) * inv
        rstd = jax.lax.rsqrt(jnp.maximum(esq - mean * mean, 0.0) + eps)
        scale_l = jnp.dot(rstd, t_ref[...], preferred_element_type=jnp.float32)
        shift_l = beta_wide - jnp.dot(mean * rstd, t_ref[...],
                                      preferred_element_type=jnp.float32)
        return jnp.maximum(y * scale_l + shift_l, 0.0).astype(compute_dtype)

    l1, l2, l3 = layers
    a = x_ref[...].astype(compute_dtype)        # NCHW-flat input (N*3*H0, W0)
    a = conv_bn_relu(a, r1_ref, m1_ref, s1_ref, t1_ref, vec[0:1, 0:l1[2]], l1)
    a = conv_bn_relu(a, r2_ref, m2_ref, s2_ref, t2_ref, vec[1:2, 0:l2[2]], l2)
    a = conv_bn_relu(a, r3_ref, m3_ref, s3_ref, t3_ref, vec[2:3, 0:l3[2]], l3)

    # Linear head.  Rows of `a` are 8-aligned (ho, n) blocks, lanes are (wo, c);
    # the head weight was pre-permuted into per-ho-block form, so this is h3
    # small matmuls with 8-aligned row-slice starts.
    hvec = jnp.dot(a[0:batch, :], wh_ref[0], preferred_element_type=jnp.float32)
    for hh in range(1, h3):
        hvec = hvec + jnp.dot(a[hh * head_stride:hh * head_stride + batch, :],
                              wh_ref[hh], preferred_element_type=jnp.float32)
    hvec = hvec + vec[3:4, 0:outputs]

    # fc1 + softmax(dim=1).
    logits = jnp.dot(hvec.astype(compute_dtype), wf_ref[...],
                     preferred_element_type=jnp.float32) + vec[4:5, 0:action_dim]
    z = logits - jnp.max(logits, axis=1, keepdims=True)
    e = jnp.exp(z)
    o_ref[...] = e / jnp.sum(e, axis=1, keepdims=True)


# ----------------------------------------------------------------------------
# Parameter preparation (amortized across forward calls)
# ----------------------------------------------------------------------------
def prepare_params(params, batch, h, w, compute_dtype=jnp.float32):
    N = batch
    d = _network_dims(batch, h, w)
    h0, w0 = h, w
    h1, w1, h2, w2, h3, w3 = d['h1'], d['w1'], d['h2'], d['w2'], d['h3'], d['w3']
    rows1, rows2, head_stride = d['rows1'], d['rows2'], d['head_stride']
    rows3 = h3 * head_stride
    c0, c1, c2, c3 = 3, 16, 32, 32
    outputs = params['head_w'].shape[0]
    action_dim = params['fc1_w'].shape[0]

    def scatter_w(w_in, w_out):
        s = np.zeros((5, w_in, w_out), np.float32)
        for kw in range(5):
            for wo in range(w_out):
                wi = 2 * wo + kw
                if wi < w_in:
                    s[kw, wi, wo] = 1.0
        return s

    # Layer 1: (kh, cin) blocks fold the NCHW->wide relayout into R1 / M1.
    r1 = np.zeros((5 * c0, rows1, N * c0 * h0), np.float32)
    for kh in range(5):
        for c in range(c0):
            j = kh * c0 + c
            for ho in range(h1):
                for n in range(N):
                    r1[j, ho * N + n, (n * c0 + c) * h0 + 2 * ho + kh] = 1.0
    r1 = r1.reshape(5 * c0 * rows1, N * c0 * h0)
    m1 = np.einsum('ockq,qiw->kciwo', np.asarray(params['conv1_w']),
                   scatter_w(w0, w1)).reshape(5 * c0, w0, w1 * c1)

    # Layers 2/3: (kh) blocks over the wide (h*N rows, w*C lanes) activations.
    def row_select(rows_in, h_out, stride_out, rows_out):
        r = np.zeros((5, rows_out, rows_in), np.float32)
        for kh in range(5):
            for ho in range(h_out):
                for n in range(N):
                    r[kh, ho * stride_out + n, (2 * ho + kh) * N + n] = 1.0
        return r.reshape(5 * rows_out, rows_in)

    def col_weight(wt, w_in, w_out):
        wt = np.asarray(wt)
        cout, cin = wt.shape[0], wt.shape[1]
        m = np.einsum('ockq,qiw->kicwo', wt, scatter_w(w_in, w_out))
        return m.reshape(5, w_in * cin, w_out * cout)

    r2 = row_select(rows1, h2, N, rows2)
    m2 = col_weight(params['conv2_w'], w1, w2)
    r3 = row_select(rows2, h3, head_stride, rows3)
    m3 = col_weight(params['conv3_w'], w2, w3)

    # BN plumbing: constant per-channel reduce matrix S, gamma-folded broadcast
    # matrix S^T*diag(gamma), and lane-wide beta.
    def bn_mats(gamma, beta, w_out, c):
        g, b = np.asarray(gamma), np.asarray(beta)
        s = np.tile(np.eye(c, dtype=np.float32), (w_out, 1))     # (w_out*c, c)
        tg = np.ascontiguousarray((s * g[None, :]).T)             # (c, w_out*c)
        return s, tg, np.tile(b, w_out)

    s1, t1, bw1 = bn_mats(params['bn1_g'], params['bn1_b'], w1, c1)
    s2, t2, bw2 = bn_mats(params['bn2_g'], params['bn2_b'], w2, c2)
    s3, t3, bw3 = bn_mats(params['bn3_g'], params['bn3_b'], w3, c3)

    # Head / fc1 weights, permuted to the (ho-block rows) x (wo, c lanes) layout.
    wh = np.asarray(params['head_w']).reshape(outputs, c3, h3, w3)
    wh = wh.transpose(2, 3, 1, 0).reshape(h3, w3 * c3, outputs)
    wf = np.ascontiguousarray(np.asarray(params['fc1_w']).T)

    # Pack every remaining tiny vector into a single (8, Lmax) f32 array.
    lmax = max(w1 * c1, w2 * c2, w3 * c3, outputs, action_dim)
    vecs = np.zeros((8, lmax), np.float32)
    vecs[0, :w1 * c1] = bw1
    vecs[1, :w2 * c2] = bw2
    vecs[2, :w3 * c3] = bw3
    vecs[3, :outputs] = np.asarray(params['head_b'])
    vecs[4, :action_dim] = np.asarray(params['fc1_b'])

    # NOTE: conv{1,2,3}_b are intentionally unused -- training-mode BatchNorm
    # subtracts them back out, so dropping them is numerically exact.
    ct, f32 = compute_dtype, jnp.float32
    return {
        'r1': jnp.asarray(r1, ct), 'm1': jnp.asarray(m1, ct),
        's1': jnp.asarray(s1, f32), 't1': jnp.asarray(t1, f32),
        'r2': jnp.asarray(r2, ct), 'm2': jnp.asarray(m2, ct),
        's2': jnp.asarray(s2, f32), 't2': jnp.asarray(t2, f32),
        'r3': jnp.asarray(r3, ct), 'm3': jnp.asarray(m3, ct),
        's3': jnp.asarray(s3, f32), 't3': jnp.asarray(t3, f32),
        'wh': jnp.asarray(wh, ct), 'wf': jnp.asarray(wf, ct),
        'vecs': jnp.asarray(vecs, f32),
    }


def build_forward(batch, h, w, outputs, action_dim, compute_dtype=jnp.float32):
    d = _network_dims(batch, h, w)
    c1, c2, c3 = 16, 32, 32
    rows3 = d['h3'] * d['head_stride']
    layers = (
        (15, d['rows1'], d['w1'] * c1, float(batch * d['h1'] * d['w1'])),
        (5,  d['rows2'], d['w2'] * c2, float(batch * d['h2'] * d['w2'])),
        (5,  rows3,      d['w3'] * c3, float(batch * d['h3'] * d['w3'])),
    )
    kernel = functools.partial(
        _policy_kernel, layers=layers, batch=batch, h3=d['h3'],
        head_stride=d['head_stride'], outputs=outputs, action_dim=action_dim,
        eps=_EPS, compute_dtype=compute_dtype)
    call = pl.pallas_call(
        kernel,
        out_shape=jax.ShapeDtypeStruct((batch, action_dim), jnp.float32),
        in_specs=[_VMEM] * 16,
        out_specs=_VMEM,
    )

    def forward(prep, x):
        # Only per-step glue: a free row-major reshape of the NCHW input.
        x_flat = x.reshape(batch * 3 * h, w)
        return call(x_flat,
                    prep['r1'], prep['m1'], prep['s1'], prep['t1'],
                    prep['r2'], prep['m2'], prep['s2'], prep['t2'],
                    prep['r3'], prep['m3'], prep['s3'], prep['t3'],
                    prep['wh'], prep['wf'], prep['vecs'])

    return jax.jit(forward)


# ----------------------------------------------------------------------------
# Parameter init (PyTorch-default-style) and plain-JAX reference
# ----------------------------------------------------------------------------
def init_params(key, h, w, outputs, action_dim):
    def uniform(key, shape, fan_in):
        bound = 1.0 / np.sqrt(float(fan_in))
        return jax.random.uniform(key, shape, jnp.float32, -bound, bound)

    ks = jax.random.split(key, 10)
    lin_in = conv_out(conv_out(conv_out(w))) * conv_out(conv_out(conv_out(h))) * 32
    return {
        'conv1_w': uniform(ks[0], (16, 3, 5, 5), 3 * 25),
        'conv1_b': uniform(ks[1], (16,), 3 * 25),
        'bn1_g': jnp.ones((16,), jnp.float32), 'bn1_b': jnp.zeros((16,), jnp.float32),
        'conv2_w': uniform(ks[2], (32, 16, 5, 5), 16 * 25),
        'conv2_b': uniform(ks[3], (32,), 16 * 25),
        'bn2_g': jnp.ones((32,), jnp.float32), 'bn2_b': jnp.zeros((32,), jnp.float32),
        'conv3_w': uniform(ks[4], (32, 32, 5, 5), 32 * 25),
        'conv3_b': uniform(ks[5], (32,), 32 * 25),
        'bn3_g': jnp.ones((32,), jnp.float32), 'bn3_b': jnp.zeros((32,), jnp.float32),
        'head_w': uniform(ks[6], (outputs, lin_in), lin_in),
        'head_b': uniform(ks[7], (outputs,), lin_in),
        'fc1_w': uniform(ks[8], (action_dim, outputs), outputs),
        'fc1_b': uniform(ks[9], (action_dim,), outputs),
    }


def _ref_forward(params, x, eps=_EPS):
    """Plain-JAX reference matching the PyTorch module (training-mode BN)."""
    def conv_bn_relu(x, w, b, g, beta):
        y = jax.lax.conv_general_dilated(
            x, w, (2, 2), 'VALID', dimension_numbers=('NCHW', 'OIHW', 'NCHW'))
        y = y + b[None, :, None, None]
        mean = jnp.mean(y, axis=(0, 2, 3), keepdims=True)
        var = jnp.mean((y - mean) ** 2, axis=(0, 2, 3), keepdims=True)
        y = (y - mean) * jax.lax.rsqrt(var + eps)
        y = y * g[None, :, None, None] + beta[None, :, None, None]
        return jnp.maximum(y, 0.0)

    x = conv_bn_relu(x, params['conv1_w'], params['conv1_b'], params['bn1_g'], params['bn1_b'])
    x = conv_bn_relu(x, params['conv2_w'], params['conv2_b'], params['bn2_g'], params['bn2_b'])
    x = conv_bn_relu(x, params['conv3_w'], params['conv3_b'], params['bn3_g'], params['bn3_b'])
    x = x.reshape(x.shape[0], -1)
    h = x @ params['head_w'].T + params['head_b']
    logits = h @ params['fc1_w'].T + params['fc1_b']
    return jax.nn.softmax(logits, axis=1)


if __name__ == "__main__":
    H = W = 40          # smallest-ish spatial size that survives 3 stride-2 k=5 convs
    BATCH = 2
    OUTPUTS = 4
    ACTION_DIM = 2      # the PyTorch spec references a free global `action_dim`

    key = jax.random.PRNGKey(0)
    k_param, k_x = jax.random.split(key)
    params = init_params(k_param, H, W, OUTPUTS, ACTION_DIM)
    x = jax.random.normal(k_x, (BATCH, 3, H, W), jnp.float32)
    ref = _ref_forward(params, x)

    # f32 matmul operands: tight validation against the reference.
    prep32 = prepare_params(params, BATCH, H, W, jnp.float32)
    fwd32 = build_forward(BATCH, H, W, OUTPUTS, ACTION_DIM, jnp.float32)
    out32 = jax.block_until_ready(fwd32(prep32, x))
    assert out32.shape == (BATCH, ACTION_DIM), out32.shape
    assert jnp.allclose(out32, ref, atol=1e-3, rtol=1e-3), (out32, ref)

    # bf16 matmul operands (v6e/v7x MXU-native, halves weight DMA); BN stats,
    # rsqrt and all elementwise math stay f32.  Looser tolerance for bf16.
    prep16 = prepare_params(params, BATCH, H, W, jnp.bfloat16)
    fwd16 = build_forward(BATCH, H, W, OUTPUTS, ACTION_DIM, jnp.bfloat16)
    out16 = jax.block_until_ready(fwd16(prep16, x))
    assert out16.shape == (BATCH, ACTION_DIM), out16.shape
    assert jnp.allclose(out16, ref, atol=2e-2, rtol=2e-2), (out16, ref)

    print("KERNEL_OK")
</pallas_src>

<mosaic_0001>
module attributes {stable_mosaic.version = 11 : i64} {
  func.func @_policy_kernel(%arg0: memref<240x40xf32, #tpu.memory_space<vmem>>, %arg1: memref<600x240xf32, #tpu.memory_space<vmem>>, %arg2: memref<15x40x288xf32, #tpu.memory_space<vmem>>, %arg3: memref<288x16xf32, #tpu.memory_space<vmem>>, %arg4: memref<16x288xf32, #tpu.memory_space<vmem>>, %arg5: memref<80x40xf32, #tpu.memory_space<vmem>>, %arg6: memref<5x288x224xf32, #tpu.memory_space<vmem>>, %arg7: memref<224x32xf32, #tpu.memory_space<vmem>>, %arg8: memref<32x224xf32, #tpu.memory_space<vmem>>, %arg9: memref<80x16xf32, #tpu.memory_space<vmem>>, %arg10: memref<5x224x64xf32, #tpu.memory_space<vmem>>, %arg11: memref<64x32xf32, #tpu.memory_space<vmem>>, %arg12: memref<32x64xf32, #tpu.memory_space<vmem>>, %arg13: memref<2x64x4xf32, #tpu.memory_space<vmem>>, %arg14: memref<4x2xf32, #tpu.memory_space<vmem>>, %arg15: memref<8x288xf32, #tpu.memory_space<vmem>>, %arg16: memref<2x2xf32, #tpu.memory_space<vmem>>) attributes {dimension_semantics = [], scalar_prefetch = 0 : i64, scratch_operands = 0 : i64, tpu.core_type = #tpu.core_type<tc>} {
    %c0 = arith.constant 0 : index
    %c0_0 = arith.constant 0 : index
    %0 = vector.load %arg15[%c0, %c0_0] : memref<8x288xf32, #tpu.memory_space<vmem>>, vector<8x288xf32>
    %c0_1 = arith.constant 0 : index
    %c0_2 = arith.constant 0 : index
    %1 = vector.load %arg0[%c0_1, %c0_2] : memref<240x40xf32, #tpu.memory_space<vmem>>, vector<240x40xf32>
    %2 = vector.extract_strided_slice %0 {offsets = [0, 0], sizes = [1, 288], strides = [1, 1]} : vector<8x288xf32> to vector<1x288xf32>
    %c0_3 = arith.constant 0 : index
    %c0_4 = arith.constant 0 : index
    %3 = vector.load %arg1[%c0_3, %c0_4] : memref<600x240xf32, #tpu.memory_space<vmem>>, vector<600x240xf32>
    %cst = arith.constant dense<0.000000e+00> : vector<600x40xf32>
    %4 = tpu.matmul %3, %1, %cst {dimension_numbers = #tpu.dot_dimension_numbers<[1], [0], [0], [1], [0, 0, 1, 1], [], []>} : vector<600x240xf32>, vector<240x40xf32>, vector<600x40xf32> -> vector<600x40xf32>
    %5 = vector.extract_strided_slice %4 {offsets = [0, 0], sizes = [40, 40], strides = [1, 1]} : vector<600x40xf32> to vector<40x40xf32>
    %c0_5 = arith.constant 0 : index
    %c0_6 = arith.constant 0 : index
    %c0_7 = arith.constant 0 : index
    %6 = vector.load %arg2[%c0_5, %c0_6, %c0_7] : memref<15x40x288xf32, #tpu.memory_space<vmem>>, vector<1x40x288xf32>
    %7 = vector.shape_cast %6 : vector<1x40x288xf32> to vector<40x288xf32>
    %cst_8 = arith.constant dense<0.000000e+00> : vector<40x288xf32>
    %8 = tpu.matmul %5, %7, %cst_8 {dimension_numbers = #tpu.dot_dimension_numbers<[1], [0], [0], [1], [0, 0, 1, 1], [], []>} : vector<40x40xf32>, vector<40x288xf32>, vector<40x288xf32> -> vector<40x288xf32>
    %9 = vector.extract_strided_slice %4 {offsets = [40, 0], sizes = [40, 40], strides = [1, 1]} : vector<600x40xf32> to vector<40x40xf32>
    %c1 = arith.constant 1 : index
    %c0_9 = arith.constant 0 : index
    %c0_10 = arith.constant 0 : index
    %10 = vector.load %arg2[%c1, %c0_9, %c0_10] : memref<15x40x288xf32, #tpu.memory_space<vmem>>, vector<1x40x288xf32>
    %11 = vector.shape_cast %10 : vector<1x40x288xf32> to vector<40x288xf32>
    %cst_11 = arith.constant dense<0.000000e+00> : vector<40x288xf32>
    %12 = tpu.matmul %9, %11, %cst_11 {dimension_numbers = #tpu.dot_dimension_numbers<[1], [0], [0], [1], [0, 0, 1, 1], [], []>} : vector<40x40xf32>, vector<40x288xf32>, vector<40x288xf32> -> vector<40x288xf32>
    %13 = arith.addf %8, %12 : vector<40x288xf32>
    %14 = vector.extract_strided_slice %4 {offsets = [80, 0], sizes = [40, 40], strides = [1, 1]} : vector<600x40xf32> to vector<40x40xf32>
    %c2 = arith.constant 2 : index
    %c0_12 = arith.constant 0 : index
    %c0_13 = arith.constant 0 : index
    %15 = vector.load %arg2[%c2, %c0_12, %c0_13] : memref<15x40x288xf32, #tpu.memory_space<vmem>>, vector<1x40x288xf32>
    %16 = vector.shape_cast %15 : vector<1x40x288xf32> to vector<40x288xf32>
    %cst_14 = arith.constant dense<0.000000e+00> : vector<40x288xf32>
    %17 = tpu.matmul %14, %16, %cst_14 {dimension_numbers = #tpu.dot_dimension_numbers<[1], [0], [0], [1], [0, 0, 1, 1], [], []>} : vector<40x40xf32>, vector<40x288xf32>, vector<40x288xf32> -> vector<40x288xf32>
    %18 = arith.addf %13, %17 : vector<40x288xf32>
    %19 = vector.extract_strided_slice %4 {offsets = [120, 0], sizes = [40, 40], strides = [1, 1]} : vector<600x40xf32> to vector<40x40xf32>
    %c3 = arith.constant 3 : index
    %c0_15 = arith.constant 0 : index
    %c0_16 = arith.constant 0 : index
    %20 = vector.load %arg2[%c3, %c0_15, %c0_16] : memref<15x40x288xf32, #tpu.memory_space<vmem>>, vector<1x40x288xf32>
    %21 = vector.shape_cast %20 : vector<1x40x288xf32> to vector<40x288xf32>
    %cst_17 = arith.constant dense<0.000000e+00> : vector<40x288xf32>
    %22 = tpu.matmul %19, %21, %cst_17 {dimension_numbers = #tpu.dot_dimension_numbers<[1], [0], [0], [1], [0, 0, 1, 1], [], []>} : vector<40x40xf32>, vector<40x288xf32>, vector<40x288xf32> -> vector<40x288xf32>
    %23 = arith.addf %18, %22 : vector<40x288xf32>
    %24 = vector.extract_strided_slice %4 {offsets = [160, 0], sizes = [40, 40], strides = [1, 1]} : vector<600x40xf32> to vector<40x40xf32>
    %c4 = arith.constant 4 : index
    %c0_18 = arith.constant 0 : index
    %c0_19 = arith.constant 0 : index
    %25 = vector.load %arg2[%c4, %c0_18, %c0_19] : memref<15x40x288xf32, #tpu.memory_space<vmem>>, vector<1x40x288xf32>
    %26 = vector.shape_cast %25 : vector<1x40x288xf32> to vector<40x288xf32>
    %cst_20 = arith.constant dense<0.000000e+00> : vector<40x288xf32>
    %27 = tpu.matmul %24, %26, %cst_20 {dimension_numbers = #tpu.dot_dimension_numbers<[1], [0], [0], [1], [0, 0, 1, 1], [], []>} : vector<40x40xf32>, vector<40x288xf32>, vector<40x288xf32> -> vector<40x288xf32>
    %28 = arith.addf %23, %27 : vector<40x288xf32>
    %29 = vector.extract_strided_slice %4 {offsets = [200, 0], sizes = [40, 40], strides = [1, 1]} : vector<600x40xf32> to vector<40x40xf32>
    %c5 = arith.constant 5 : index
    %c0_21 = arith.constant 0 : index
    %c0_22 = arith.constant 0 : index
    %30 = vector.load %arg2[%c5, %c0_21, %c0_22] : memref<15x40x288xf32, #tpu.memory_space<vmem>>, vector<1x40x288xf32>
    %31 = vector.shape_cast %30 : vector<1x40x288xf32> to vector<40x288xf32>
    %cst_23 = arith.constant dense<0.000000e+00> : vector<40x288xf32>
    %32 = tpu.matmul %29, %31, %cst_23 {dimension_numbers = #tpu.dot_dimension_numbers<[1], [0], [0], [1], [0, 0, 1, 1], [], []>} : vector<40x40xf32>, vector<40x288xf32>, vector<40x288xf32> -> vector<40x288xf32>
    %33 = arith.addf %28, %32 : vector<40x288xf32>
    %34 = vector.extract_strided_slice %4 {offsets = [240, 0], sizes = [40, 40], strides = [1, 1]} : vector<600x40xf32> to vector<40x40xf32>
    %c6 = arith.constant 6 : index
    %c0_24 = arith.constant 0 : index
    %c0_25 = arith.constant 0 : index
    %35 = vector.load %arg2[%c6, %c0_24, %c0_25] : memref<15x40x288xf32, #tpu.memory_space<vmem>>, vector<1x40x288xf32>
    %36 = vector.shape_cast %35 : vector<1x40x288xf32> to vector<40x288xf32>
    %cst_26 = arith.constant dense<0.000000e+00> : vector<40x288xf32>
    %37 = tpu.matmul %34, %36, %cst_26 {dimension_numbers = #tpu.dot_dimension_numbers<[1], [0], [0], [1], [0, 0, 1, 1], [], []>} : vector<40x40xf32>, vector<40x288xf32>, vector<40x288xf32> -> vector<40x288xf32>
    %38 = arith.addf %33, %37 : vector<40x288xf32>
    %39 = vector.extract_strided_slice %4 {offsets = [280, 0], sizes = [40, 40], strides = [1, 1]} : vector<600x40xf32> to vector<40x40xf32>
    %c7 = arith.constant 7 : index
    %c0_27 = arith.constant 0 : index
    %c0_28 = arith.constant 0 : index
    %40 = vector.load %arg2[%c7, %c0_27, %c0_28] : memref<15x40x288xf32, #tpu.memory_space<vmem>>, vector<1x40x288xf32>
    %41 = vector.shape_cast %40 : vector<1x40x288xf32> to vector<40x288xf32>
    %cst_29 = arith.constant dense<0.000000e+00> : vector<40x288xf32>
    %42 = tpu.matmul %39, %41, %cst_29 {dimension_numbers = #tpu.dot_dimension_numbers<[1], [0], [0], [1], [0, 0, 1, 1], [], []>} : vector<40x40xf32>, vector<40x288xf32>, vector<40x288xf32> -> vector<40x288xf32>
    %43 = arith.addf %38, %42 : vector<40x288xf32>
    %44 = vector.extract_strided_slice %4 {offsets = [320, 0], sizes = [40, 40], strides = [1, 1]} : vector<600x40xf32> to vector<40x40xf32>
    %c8 = arith.constant 8 : index
    %c0_30 = arith.constant 0 : index
    %c0_31 = arith.constant 0 : index
    %45 = vector.load %arg2[%c8, %c0_30, %c0_31] : memref<15x40x288xf32, #tpu.memory_space<vmem>>, vector<1x40x288xf32>
    %46 = vector.shape_cast %45 : vector<1x40x288xf32> to vector<40x288xf32>
    %cst_32 = arith.constant dense<0.000000e+00> : vector<40x288xf32>
    %47 = tpu.matmul %44, %46, %cst_32 {dimension_numbers = #tpu.dot_dimension_numbers<[1], [0], [0], [1], [0, 0, 1, 1], [], []>} : vector<40x40xf32>, vector<40x288xf32>, vector<40x288xf32> -> vector<40x288xf32>
    %48 = arith.addf %43, %47 : vector<40x288xf32>
    %49 = vector.extract_strided_slice %4 {offsets = [360, 0], sizes = [40, 40], strides = [1, 1]} : vector<600x40xf32> to vector<40x40xf32>
    %c9 = arith.constant 9 : index
    %c0_33 = arith.constant 0 : index
    %c0_34 = arith.constant 0 : index
    %50 = vector.load %arg2[%c9, %c0_33, %c0_34] : memref<15x40x288xf32, #tpu.memory_space<vmem>>, vector<1x40x288xf32>
    %51 = vector.shape_cast %50 : vector<1x40x288xf32> to vector<40x288xf32>
    %cst_35 = arith.constant dense<0.000000e+00> : vector<40x288xf32>
    %52 = tpu.matmul %49, %51, %cst_35 {dimension_numbers = #tpu.dot_dimension_numbers<[1], [0], [0], [1], [0, 0, 1, 1], [], []>} : vector<40x40xf32>, vector<40x288xf32>, vector<40x288xf32> -> vector<40x288xf32>
    %53 = arith.addf %48, %52 : vector<40x288xf32>
    %54 = vector.extract_strided_slice %4 {offsets = [400, 0], sizes = [40, 40], strides = [1, 1]} : vector<600x40xf32> to vector<40x40xf32>
    %c10 = arith.constant 10 : index
    %c0_36 = arith.constant 0 : index
    %c0_37 = arith.constant 0 : index
    %55 = vector.load %arg2[%c10, %c0_36, %c0_37] : memref<15x40x288xf32, #tpu.memory_space<vmem>>, vector<1x40x288xf32>
    %56 = vector.shape_cast %55 : vector<1x40x288xf32> to vector<40x288xf32>
    %cst_38 = arith.constant dense<0.000000e+00> : vector<40x288xf32>
    %57 = tpu.matmul %54, %56, %cst_38 {dimension_numbers = #tpu.dot_dimension_numbers<[1], [0], [0], [1], [0, 0, 1, 1], [], []>} : vector<40x40xf32>, vector<40x288xf32>, vector<40x288xf32> -> vector<40x288xf32>
    %58 = arith.addf %53, %57 : vector<40x288xf32>
    %59 = vector.extract_strided_slice %4 {offsets = [440, 0], sizes = [40, 40], strides = [1, 1]} : vector<600x40xf32> to vector<40x40xf32>
    %c11 = arith.constant 11 : index
    %c0_39 = arith.constant 0 : index
    %c0_40 = arith.constant 0 : index
    %60 = vector.load %arg2[%c11, %c0_39, %c0_40] : memref<15x40x288xf32, #tpu.memory_space<vmem>>, vector<1x40x288xf32>
    %61 = vector.shape_cast %60 : vector<1x40x288xf32> to vector<40x288xf32>
    %cst_41 = arith.constant dense<0.000000e+00> : vector<40x288xf32>
    %62 = tpu.matmul %59, %61, %cst_41 {dimension_numbers = #tpu.dot_dimension_numbers<[1], [0], [0], [1], [0, 0, 1, 1], [], []>} : vector<40x40xf32>, vector<40x288xf32>, vector<40x288xf32> -> vector<40x288xf32>
    %63 = arith.addf %58, %62 : vector<40x288xf32>
    %64 = vector.extract_strided_slice %4 {offsets = [480, 0], sizes = [40, 40], strides = [1, 1]} : vector<600x40xf32> to vector<40x40xf32>
    %c12 = arith.constant 12 : index
    %c0_42 = arith.constant 0 : index
    %c0_43 = arith.constant 0 : index
    %65 = vector.load %arg2[%c12, %c0_42, %c0_43] : memref<15x40x288xf32, #tpu.memory_space<vmem>>, vector<1x40x288xf32>
    %66 = vector.shape_cast %65 : vector<1x40x288xf32> to vector<40x288xf32>
    %cst_44 = arith.constant dense<0.000000e+00> : vector<40x288xf32>
    %67 = tpu.matmul %64, %66, %cst_44 {dimension_numbers = #tpu.dot_dimension_numbers<[1], [0], [0], [1], [0, 0, 1, 1], [], []>} : vector<40x40xf32>, vector<40x288xf32>, vector<40x288xf32> -> vector<40x288xf32>
    %68 = arith.addf %63, %67 : vector<40x288xf32>
    %69 = vector.extract_strided_slice %4 {offsets = [520, 0], sizes = [40, 40], strides = [1, 1]} : vector<600x40xf32> to vector<40x40xf32>
    %c13 = arith.constant 13 : index
    %c0_45 = arith.constant 0 : index
    %c0_46 = arith.constant 0 : index
    %70 = vector.load %arg2[%c13, %c0_45, %c0_46] : memref<15x40x288xf32, #tpu.memory_space<vmem>>, vector<1x40x288xf32>
    %71 = vector.shape_cast %70 : vector<1x40x288xf32> to vector<40x288xf32>
    %cst_47 = arith.constant dense<0.000000e+00> : vector<40x288xf32>
    %72 = tpu.matmul %69, %71, %cst_47 {dimension_numbers = #tpu.dot_dimension_numbers<[1], [0], [0], [1], [0, 0, 1, 1], [], []>} : vector<40x40xf32>, vector<40x288xf32>, vector<40x288xf32> -> vector<40x288xf32>
    %73 = arith.addf %68, %72 : vector<40x288xf32>
    %74 = vector.extract_strided_slice %4 {offsets = [560, 0], sizes = [40, 40], strides = [1, 1]} : vector<600x40xf32> to vector<40x40xf32>
    %c14 = arith.constant 14 : index
    %c0_48 = arith.constant 0 : index
    %c0_49 = arith.constant 0 : index
    %75 = vector.load %arg2[%c14, %c0_48, %c0_49] : memref<15x40x288xf32, #tpu.memory_space<vmem>>, vector<1x40x288xf32>
    %76 = vector.shape_cast %75 : vector<1x40x288xf32> to vector<40x288xf32>
    %cst_50 = arith.constant dense<0.000000e+00> : vector<40x288xf32>
    %77 = tpu.matmul %74, %76, %cst_50 {dimension_numbers = #tpu.dot_dimension_numbers<[1], [0], [0], [1], [0, 0, 1, 1], [], []>} : vector<40x40xf32>, vector<40x288xf32>, vector<40x288xf32> -> vector<40x288xf32>
    %78 = arith.addf %73, %77 : vector<40x288xf32>
    %cst_51 = arith.constant dense<0.000000e+00> : vector<288xf32>
    %79 = vector.multi_reduction <add>, %78, %cst_51 [0] : vector<40x288xf32> to vector<288xf32>
    %80 = vector.shape_cast %79 : vector<288xf32> to vector<1x288xf32>
    %81 = arith.mulf %78, %78 : vector<40x288xf32>
    %cst_52 = arith.constant dense<0.000000e+00> : vector<288xf32>
    %82 = vector.multi_reduction <add>, %81, %cst_52 [0] : vector<40x288xf32> to vector<288xf32>
    %83 = vector.shape_cast %82 : vector<288xf32> to vector<1x288xf32>
    %c0_53 = arith.constant 0 : index
    %c0_54 = arith.constant 0 : index
    %84 = vector.load %arg3[%c0_53, %c0_54] : memref<288x16xf32, #tpu.memory_space<vmem>>, vector<288x16xf32>
    %cst_55 = arith.constant dense<0.000000e+00> : vector<1x16xf32>
    %85 = tpu.matmul %80, %84, %cst_55 {dimension_numbers = #tpu.dot_dimension_numbers<[1], [0], [0], [1], [0, 0, 1, 1], [], []>} : vector<1x288xf32>, vector<288x16xf32>, vector<1x16xf32> -> vector<1x16xf32>
    %cst_56 = arith.constant 0.00154320989 : f32
    %86 = vector.broadcast %cst_56 : f32 to vector<1x16xf32>
    %87 = arith.mulf %85, %86 : vector<1x16xf32>
    %c0_57 = arith.constant 0 : index
    %c0_58 = arith.constant 0 : index
    %88 = vector.load %arg3[%c0_57, %c0_58] : memref<288x16xf32, #tpu.memory_space<vmem>>, vector<288x16xf32>
    %cst_59 = arith.constant dense<0.000000e+00> : vector<1x16xf32>
    %89 = tpu.matmul %83, %88, %cst_59 {dimension_numbers = #tpu.dot_dimension_numbers<[1], [0], [0], [1], [0, 0, 1, 1], [], []>} : vector<1x288xf32>, vector<288x16xf32>, vector<1x16xf32> -> vector<1x16xf32>
    %cst_60 = arith.constant 0.00154320989 : f32
    %90 = vector.broadcast %cst_60 : f32 to vector<1x16xf32>
    %91 = arith.mulf %89, %90 : vector<1x16xf32>
    %92 = arith.mulf %87, %87 : vector<1x16xf32>
    %93 = arith.subf %91, %92 : vector<1x16xf32>
    %cst_61 = arith.constant 0.000000e+00 : f32
    %94 = vector.broadcast %cst_61 : f32 to vector<1x16xf32>
    %95 = arith.maximumf %93, %94 : vector<1x16xf32>
    %cst_62 = arith.constant 9.99999974E-6 : f32
    %96 = vector.broadcast %cst_62 : f32 to vector<1x16xf32>
    %97 = arith.addf %95, %96 : vector<1x16xf32>
    %98 = math.rsqrt %97 : vector<1x16xf32>
    %c0_63 = arith.constant 0 : index
    %c0_64 = arith.constant 0 : index
    %99 = vector.load %arg4[%c0_63, %c0_64] : memref<16x288xf32, #tpu.memory_space<vmem>>, vector<16x288xf32>
    %cst_65 = arith.constant dense<0.000000e+00> : vector<1x288xf32>
    %100 = tpu.matmul %98, %99, %cst_65 {dimension_numbers = #tpu.dot_dimension_numbers<[1], [0], [0], [1], [0, 0, 1, 1], [], []>} : vector<1x16xf32>, vector<16x288xf32>, vector<1x288xf32> -> vector<1x288xf32>
    %101 = arith.mulf %87, %98 : vector<1x16xf32>
    %c0_66 = arith.constant 0 : index
    %c0_67 = arith.constant 0 : index
    %102 = vector.load %arg4[%c0_66, %c0_67] : memref<16x288xf32, #tpu.memory_space<vmem>>, vector<16x288xf32>
    %cst_68 = arith.constant dense<0.000000e+00> : vector<1x288xf32>
    %103 = tpu.matmul %101, %102, %cst_68 {dimension_numbers = #tpu.dot_dimension_numbers<[1], [0], [0], [1], [0, 0, 1, 1], [], []>} : vector<1x16xf32>, vector<16x288xf32>, vector<1x288xf32> -> vector<1x288xf32>
    %104 = arith.subf %2, %103 : vector<1x288xf32>
    %105 = vector.broadcast %100 : vector<1x288xf32> to vector<40x288xf32>
    %106 = arith.mulf %78, %105 : vector<40x288xf32>
    %107 = vector.broadcast %104 : vector<1x288xf32> to vector<40x288xf32>
    %108 = arith.addf %106, %107 : vector<40x288xf32>
    %cst_69 = arith.constant 0.000000e+00 : f32
    %109 = vector.broadcast %cst_69 : f32 to vector<40x288xf32>
    %110 = arith.maximumf %108, %109 : vector<40x288xf32>
    %111 = vector.extract_strided_slice %0 {offsets = [1, 0], sizes = [1, 224], strides = [1, 1]} : vector<8x288xf32> to vector<1x224xf32>
    %c0_70 = arith.constant 0 : index
    %c0_71 = arith.constant 0 : index
    %112 = vector.load %arg5[%c0_70, %c0_71] : memref<80x40xf32, #tpu.memory_space<vmem>>, vector<80x40xf32>
    %cst_72 = arith.constant dense<0.000000e+00> : vector<80x288xf32>
    %113 = tpu.matmul %112, %110, %cst_72 {dimension_numbers = #tpu.dot_dimension_numbers<[1], [0], [0], [1], [0, 0, 1, 1], [], []>} : vector<80x40xf32>, vector<40x288xf32>, vector<80x288xf32> -> vector<80x288xf32>
    %114 = vector.extract_strided_slice %113 {offsets = [0, 0], sizes = [16, 288], strides = [1, 1]} : vector<80x288xf32> to vector<16x288xf32>
    %c0_73 = arith.constant 0 : index
    %c0_74 = arith.constant 0 : index
    %c0_75 = arith.constant 0 : index
    %115 = vector.load %arg6[%c0_73, %c0_74, %c0_75] : memref<5x288x224xf32, #tpu.memory_space<vmem>>, vector<1x288x224xf32>
    %116 = vector.shape_cast %115 : vector<1x288x224xf32> to vector<288x224xf32>
    %cst_76 = arith.constant dense<0.000000e+00> : vector<16x224xf32>
    %117 = tpu.matmul %114, %116, %cst_76 {dimension_numbers = #tpu.dot_dimension_numbers<[1], [0], [0], [1], [0, 0, 1, 1], [], []>} : vector<16x288xf32>, vector<288x224xf32>, vector<16x224xf32> -> vector<16x224xf32>
    %118 = vector.extract_strided_slice %113 {offsets = [16, 0], sizes = [16, 288], strides = [1, 1]} : vector<80x288xf32> to vector<16x288xf32>
    %c1_77 = arith.constant 1 : index
    %c0_78 = arith.constant 0 : index
    %c0_79 = arith.constant 0 : index
    %119 = vector.load %arg6[%c1_77, %c0_78, %c0_79] : memref<5x288x224xf32, #tpu.memory_space<vmem>>, vector<1x288x224xf32>
    %120 = vector.shape_cast %119 : vector<1x288x224xf32> to vector<288x224xf32>
    %cst_80 = arith.constant dense<0.000000e+00> : vector<16x224xf32>
    %121 = tpu.matmul %118, %120, %cst_80 {dimension_numbers = #tpu.dot_dimension_numbers<[1], [0], [0], [1], [0, 0, 1, 1], [], []>} : vector<16x288xf32>, vector<288x224xf32>, vector<16x224xf32> -> vector<16x224xf32>
    %122 = arith.addf %117, %121 : vector<16x224xf32>
    %123 = vector.extract_strided_slice %113 {offsets = [32, 0], sizes = [16, 288], strides = [1, 1]} : vector<80x288xf32> to vector<16x288xf32>
    %c2_81 = arith.constant 2 : index
    %c0_82 = arith.constant 0 : index
    %c0_83 = arith.constant 0 : index
    %124 = vector.load %arg6[%c2_81, %c0_82, %c0_83] : memref<5x288x224xf32, #tpu.memory_space<vmem>>, vector<1x288x224xf32>
    %125 = vector.shape_cast %124 : vector<1x288x224xf32> to vector<288x224xf32>
    %cst_84 = arith.constant dense<0.000000e+00> : vector<16x224xf32>
    %126 = tpu.matmul %123, %125, %cst_84 {dimension_numbers = #tpu.dot_dimension_numbers<[1], [0], [0], [1], [0, 0, 1, 1], [], []>} : vector<16x288xf32>, vector<288x224xf32>, vector<16x224xf32> -> vector<16x224xf32>
    %127 = arith.addf %122, %126 : vector<16x224xf32>
    %128 = vector.extract_strided_slice %113 {offsets = [48, 0], sizes = [16, 288], strides = [1, 1]} : vector<80x288xf32> to vector<16x288xf32>
    %c3_85 = arith.constant 3 : index
    %c0_86 = arith.constant 0 : index
    %c0_87 = arith.constant 0 : index
    %129 = vector.load %arg6[%c3_85, %c0_86, %c0_87] : memref<5x288x224xf32, #tpu.memory_space<vmem>>, vector<1x288x224xf32>
    %130 = vector.shape_cast %129 : vector<1x288x224xf32> to vector<288x224xf32>
    %cst_88 = arith.constant dense<0.000000e+00> : vector<16x224xf32>
    %131 = tpu.matmul %128, %130, %cst_88 {dimension_numbers = #tpu.dot_dimension_numbers<[1], [0], [0], [1], [0, 0, 1, 1], [], []>} : vector<16x288xf32>, vector<288x224xf32>, vector<16x224xf32> -> vector<16x224xf32>
    %132 = arith.addf %127, %131 : vector<16x224xf32>
    %133 = vector.extract_strided_slice %113 {offsets = [64, 0], sizes = [16, 288], strides = [1, 1]} : vector<80x288xf32> to vector<16x288xf32>
    %c4_89 = arith.constant 4 : index
    %c0_90 = arith.constant 0 : index
    %c0_91 = arith.constant 0 : index
    %134 = vector.load %arg6[%c4_89, %c0_90, %c0_91] : memref<5x288x224xf32, #tpu.memory_space<vmem>>, vector<1x288x224xf32>
    %135 = vector.shape_cast %134 : vector<1x288x224xf32> to vector<288x224xf32>
    %cst_92 = arith.constant dense<0.000000e+00> : vector<16x224xf32>
    %136 = tpu.matmul %133, %135, %cst_92 {dimension_numbers = #tpu.dot_dimension_numbers<[1], [0], [0], [1], [0, 0, 1, 1], [], []>} : vector<16x288xf32>, vector<288x224xf32>, vector<16x224xf32> -> vector<16x224xf32>
    %137 = arith.addf %132, %136 : vector<16x224xf32>
    %cst_93 = arith.constant dense<0.000000e+00> : vector<224xf32>
    %138 = vector.multi_reduction <add>, %137, %cst_93 [0] : vector<16x224xf32> to vector<224xf32>
    %139 = vector.shape_cast %138 : vector<224xf32> to vector<1x224xf32>
    %140 = arith.mulf %137, %137 : vector<16x224xf32>
    %cst_94 = arith.constant dense<0.000000e+00> : vector<224xf32>
    %141 = vector.multi_reduction <add>, %140, %cst_94 [0] : vector<16x224xf32> to vector<224xf32>
    %142 = vector.shape_cast %141 : vector<224xf32> to vector<1x224xf32>
    %c0_95 = arith.constant 0 : index
    %c0_96 = arith.constant 0 : index
    %143 = vector.load %arg7[%c0_95, %c0_96] : memref<224x32xf32, #tpu.memory_space<vmem>>, vector<224x32xf32>
    %cst_97 = arith.constant dense<0.000000e+00> : vector<1x32xf32>
    %144 = tpu.matmul %139, %143, %cst_97 {dimension_numbers = #tpu.dot_dimension_numbers<[1], [0], [0], [1], [0, 0, 1, 1], [], []>} : vector<1x224xf32>, vector<224x32xf32>, vector<1x32xf32> -> vector<1x32xf32>
    %cst_98 = arith.constant 0.0102040814 : f32
    %145 = vector.broadcast %cst_98 : f32 to vector<1x32xf32>
    %146 = arith.mulf %144, %145 : vector<1x32xf32>
    %c0_99 = arith.constant 0 : index
    %c0_100 = arith.constant 0 : index
    %147 = vector.load %arg7[%c0_99, %c0_100] : memref<224x32xf32, #tpu.memory_space<vmem>>, vector<224x32xf32>
    %cst_101 = arith.constant dense<0.000000e+00> : vector<1x32xf32>
    %148 = tpu.matmul %142, %147, %cst_101 {dimension_numbers = #tpu.dot_dimension_numbers<[1], [0], [0], [1], [0, 0, 1, 1], [], []>} : vector<1x224xf32>, vector<224x32xf32>, vector<1x32xf32> -> vector<1x32xf32>
    %cst_102 = arith.constant 0.0102040814 : f32
    %149 = vector.broadcast %cst_102 : f32 to vector<1x32xf32>
    %150 = arith.mulf %148, %149 : vector<1x32xf32>
    %151 = arith.mulf %146, %146 : vector<1x32xf32>
    %152 = arith.subf %150, %151 : vector<1x32xf32>
    %cst_103 = arith.constant 0.000000e+00 : f32
    %153 = vector.broadcast %cst_103 : f32 to vector<1x32xf32>
    %154 = arith.maximumf %152, %153 : vector<1x32xf32>
    %cst_104 = arith.constant 9.99999974E-6 : f32
    %155 = vector.broadcast %cst_104 : f32 to vector<1x32xf32>
    %156 = arith.addf %154, %155 : vector<1x32xf32>
    %157 = math.rsqrt %156 : vector<1x32xf32>
    %c0_105 = arith.constant 0 : index
    %c0_106 = arith.constant 0 : index
    %158 = vector.load %arg8[%c0_105, %c0_106] : memref<32x224xf32, #tpu.memory_space<vmem>>, vector<32x224xf32>
    %cst_107 = arith.constant dense<0.000000e+00> : vector<1x224xf32>
    %159 = tpu.matmul %157, %158, %cst_107 {dimension_numbers = #tpu.dot_dimension_numbers<[1], [0], [0], [1], [0, 0, 1, 1], [], []>} : vector<1x32xf32>, vector<32x224xf32>, vector<1x224xf32> -> vector<1x224xf32>
    %160 = arith.mulf %146, %157 : vector<1x32xf32>
    %c0_108 = arith.constant 0 : index
    %c0_109 = arith.constant 0 : index
    %161 = vector.load %arg8[%c0_108, %c0_109] : memref<32x224xf32, #tpu.memory_space<vmem>>, vector<32x224xf32>
    %cst_110 = arith.constant dense<0.000000e+00> : vector<1x224xf32>
    %162 = tpu.matmul %160, %161, %cst_110 {dimension_numbers = #tpu.dot_dimension_numbers<[1], [0], [0], [1], [0, 0, 1, 1], [], []>} : vector<1x32xf32>, vector<32x224xf32>, vector<1x224xf32> -> vector<1x224xf32>
    %163 = arith.subf %111, %162 : vector<1x224xf32>
    %164 = vector.broadcast %159 : vector<1x224xf32> to vector<16x224xf32>
    %165 = arith.mulf %137, %164 : vector<16x224xf32>
    %166 = vector.broadcast %163 : vector<1x224xf32> to vector<16x224xf32>
    %167 = arith.addf %165, %166 : vector<16x224xf32>
    %cst_111 = arith.constant 0.000000e+00 : f32
    %168 = vector.broadcast %cst_111 : f32 to vector<16x224xf32>
    %169 = arith.maximumf %167, %168 : vector<16x224xf32>
    %170 = vector.extract_strided_slice %0 {offsets = [2, 0], sizes = [1, 64], strides = [1, 1]} : vector<8x288xf32> to vector<1x64xf32>
    %c0_112 = arith.constant 0 : index
    %c0_113 = arith.constant 0 : index
    %171 = vector.load %arg9[%c0_112, %c0_113] : memref<80x16xf32, #tpu.memory_space<vmem>>, vector<80x16xf32>
    %cst_114 = arith.constant dense<0.000000e+00> : vector<80x224xf32>
    %172 = tpu.matmul %171, %169, %cst_114 {dimension_numbers = #tpu.dot_dimension_numbers<[1], [0], [0], [1], [0, 0, 1, 1], [], []>} : vector<80x16xf32>, vector<16x224xf32>, vector<80x224xf32> -> vector<80x224xf32>
    %173 = vector.extract_strided_slice %172 {offsets = [0, 0], sizes = [16, 224], strides = [1, 1]} : vector<80x224xf32> to vector<16x224xf32>
    %c0_115 = arith.constant 0 : index
    %c0_116 = arith.constant 0 : index
    %c0_117 = arith.constant 0 : index
    %174 = vector.load %arg10[%c0_115, %c0_116, %c0_117] : memref<5x224x64xf32, #tpu.memory_space<vmem>>, vector<1x224x64xf32>
    %175 = vector.shape_cast %174 : vector<1x224x64xf32> to vector<224x64xf32>
    %cst_118 = arith.constant dense<0.000000e+00> : vector<16x64xf32>
    %176 = tpu.matmul %173, %175, %cst_118 {dimension_numbers = #tpu.dot_dimension_numbers<[1], [0], [0], [1], [0, 0, 1, 1], [], []>} : vector<16x224xf32>, vector<224x64xf32>, vector<16x64xf32> -> vector<16x64xf32>
    %177 = vector.extract_strided_slice %172 {offsets = [16, 0], sizes = [16, 224], strides = [1, 1]} : vector<80x224xf32> to vector<16x224xf32>
    %c1_119 = arith.constant 1 : index
    %c0_120 = arith.constant 0 : index
    %c0_121 = arith.constant 0 : index
    %178 = vector.load %arg10[%c1_119, %c0_120, %c0_121] : memref<5x224x64xf32, #tpu.memory_space<vmem>>, vector<1x224x64xf32>
    %179 = vector.shape_cast %178 : vector<1x224x64xf32> to vector<224x64xf32>
    %cst_122 = arith.constant dense<0.000000e+00> : vector<16x64xf32>
    %180 = tpu.matmul %177, %179, %cst_122 {dimension_numbers = #tpu.dot_dimension_numbers<[1], [0], [0], [1], [0, 0, 1, 1], [], []>} : vector<16x224xf32>, vector<224x64xf32>, vector<16x64xf32> -> vector<16x64xf32>
    %181 = arith.addf %176, %180 : vector<16x64xf32>
    %182 = vector.extract_strided_slice %172 {offsets = [32, 0], sizes = [16, 224], strides = [1, 1]} : vector<80x224xf32> to vector<16x224xf32>
    %c2_123 = arith.constant 2 : index
    %c0_124 = arith.constant 0 : index
    %c0_125 = arith.constant 0 : index
    %183 = vector.load %arg10[%c2_123, %c0_124, %c0_125] : memref<5x224x64xf32, #tpu.memory_space<vmem>>, vector<1x224x64xf32>
    %184 = vector.shape_cast %183 : vector<1x224x64xf32> to vector<224x64xf32>
    %cst_126 = arith.constant dense<0.000000e+00> : vector<16x64xf32>
    %185 = tpu.matmul %182, %184, %cst_126 {dimension_numbers = #tpu.dot_dimension_numbers<[1], [0], [0], [1], [0, 0, 1, 1], [], []>} : vector<16x224xf32>, vector<224x64xf32>, vector<16x64xf32> -> vector<16x64xf32>
    %186 = arith.addf %181, %185 : vector<16x64xf32>
    %187 = vector.extract_strided_slice %172 {offsets = [48, 0], sizes = [16, 224], strides = [1, 1]} : vector<80x224xf32> to vector<16x224xf32>
    %c3_127 = arith.constant 3 : index
    %c0_128 = arith.constant 0 : index
    %c0_129 = arith.constant 0 : index
    %188 = vector.load %arg10[%c3_127, %c0_128, %c0_129] : memref<5x224x64xf32, #tpu.memory_space<vmem>>, vector<1x224x64xf32>
    %189 = vector.shape_cast %188 : vector<1x224x64xf32> to vector<224x64xf32>
    %cst_130 = arith.constant dense<0.000000e+00> : vector<16x64xf32>
    %190 = tpu.matmul %187, %189, %cst_130 {dimension_numbers = #tpu.dot_dimension_numbers<[1], [0], [0], [1], [0, 0, 1, 1], [], []>} : vector<16x224xf32>, vector<224x64xf32>, vector<16x64xf32> -> vector<16x64xf32>
    %191 = arith.addf %186, %190 : vector<16x64xf32>
    %192 = vector.extract_strided_slice %172 {offsets = [64, 0], sizes = [16, 224], strides = [1, 1]} : vector<80x224xf32> to vector<16x224xf32>
    %c4_131 = arith.constant 4 : index
    %c0_132 = arith.constant 0 : index
    %c0_133 = arith.constant 0 : index
    %193 = vector.load %arg10[%c4_131, %c0_132, %c0_133] : memref<5x224x64xf32, #tpu.memory_space<vmem>>, vector<1x224x64xf32>
    %194 = vector.shape_cast %193 : vector<1x224x64xf32> to vector<224x64xf32>
    %cst_134 = arith.constant dense<0.000000e+00> : vector<16x64xf32>
    %195 = tpu.matmul %192, %194, %cst_134 {dimension_numbers = #tpu.dot_dimension_numbers<[1], [0], [0], [1], [0, 0, 1, 1], [], []>} : vector<16x224xf32>, vector<224x64xf32>, vector<16x64xf32> -> vector<16x64xf32>
    %196 = arith.addf %191, %195 : vector<16x64xf32>
    %cst_135 = arith.constant dense<0.000000e+00> : vector<64xf32>
    %197 = vector.multi_reduction <add>, %196, %cst_135 [0] : vector<16x64xf32> to vector<64xf32>
    %198 = vector.shape_cast %197 : vector<64xf32> to vector<1x64xf32>
    %199 = arith.mulf %196, %196 : vector<16x64xf32>
    %cst_136 = arith.constant dense<0.000000e+00> : vector<64xf32>
    %200 = vector.multi_reduction <add>, %199, %cst_136 [0] : vector<16x64xf32> to vector<64xf32>
    %201 = vector.shape_cast %200 : vector<64xf32> to vector<1x64xf32>
    %c0_137 = arith.constant 0 : index
    %c0_138 = arith.constant 0 : index
    %202 = vector.load %arg11[%c0_137, %c0_138] : memref<64x32xf32, #tpu.memory_space<vmem>>, vector<64x32xf32>
    %cst_139 = arith.constant dense<0.000000e+00> : vector<1x32xf32>
    %203 = tpu.matmul %198, %202, %cst_139 {dimension_numbers = #tpu.dot_dimension_numbers<[1], [0], [0], [1], [0, 0, 1, 1], [], []>} : vector<1x64xf32>, vector<64x32xf32>, vector<1x32xf32> -> vector<1x32xf32>
    %cst_140 = arith.constant 1.250000e-01 : f32
    %204 = vector.broadcast %cst_140 : f32 to vector<1x32xf32>
    %205 = arith.mulf %203, %204 : vector<1x32xf32>
    %c0_141 = arith.constant 0 : index
    %c0_142 = arith.constant 0 : index
    %206 = vector.load %arg11[%c0_141, %c0_142] : memref<64x32xf32, #tpu.memory_space<vmem>>, vector<64x32xf32>
    %cst_143 = arith.constant dense<0.000000e+00> : vector<1x32xf32>
    %207 = tpu.matmul %201, %206, %cst_143 {dimension_numbers = #tpu.dot_dimension_numbers<[1], [0], [0], [1], [0, 0, 1, 1], [], []>} : vector<1x64xf32>, vector<64x32xf32>, vector<1x32xf32> -> vector<1x32xf32>
    %cst_144 = arith.constant 1.250000e-01 : f32
    %208 = vector.broadcast %cst_144 : f32 to vector<1x32xf32>
    %209 = arith.mulf %207, %208 : vector<1x32xf32>
    %210 = arith.mulf %205, %205 : vector<1x32xf32>
    %211 = arith.subf %209, %210 : vector<1x32xf32>
    %cst_145 = arith.constant 0.000000e+00 : f32
    %212 = vector.broadcast %cst_145 : f32 to vector<1x32xf32>
    %213 = arith.maximumf %211, %212 : vector<1x32xf32>
    %cst_146 = arith.constant 9.99999974E-6 : f32
    %214 = vector.broadcast %cst_146 : f32 to vector<1x32xf32>
    %215 = arith.addf %213, %214 : vector<1x32xf32>
    %216 = math.rsqrt %215 : vector<1x32xf32>
    %c0_147 = arith.constant 0 : index
    %c0_148 = arith.constant 0 : index
    %217 = vector.load %arg12[%c0_147, %c0_148] : memref<32x64xf32, #tpu.memory_space<vmem>>, vector<32x64xf32>
    %cst_149 = arith.constant dense<0.000000e+00> : vector<1x64xf32>
    %218 = tpu.matmul %216, %217, %cst_149 {dimension_numbers = #tpu.dot_dimension_numbers<[1], [0], [0], [1], [0, 0, 1, 1], [], []>} : vector<1x32xf32>, vector<32x64xf32>, vector<1x64xf32> -> vector<1x64xf32>
    %219 = arith.mulf %205, %216 : vector<1x32xf32>
    %c0_150 = arith.constant 0 : index
    %c0_151 = arith.constant 0 : index
    %220 = vector.load %arg12[%c0_150, %c0_151] : memref<32x64xf32, #tpu.memory_space<vmem>>, vector<32x64xf32>
    %cst_152 = arith.constant dense<0.000000e+00> : vector<1x64xf32>
    %221 = tpu.matmul %219, %220, %cst_152 {dimension_numbers = #tpu.dot_dimension_numbers<[1], [0], [0], [1], [0, 0, 1, 1], [], []>} : vector<1x32xf32>, vector<32x64xf32>, vector<1x64xf32> -> vector<1x64xf32>
    %222 = arith.subf %170, %221 : vector<1x64xf32>
    %223 = vector.broadcast %218 : vector<1x64xf32> to vector<16x64xf32>
    %224 = arith.mulf %196, %223 : vector<16x64xf32>
    %225 = vector.broadcast %222 : vector<1x64xf32> to vector<16x64xf32>
    %226 = arith.addf %224, %225 : vector<16x64xf32>
    %cst_153 = arith.constant 0.000000e+00 : f32
    %227 = vector.broadcast %cst_153 : f32 to vector<16x64xf32>
    %228 = arith.maximumf %226, %227 : vector<16x64xf32>
    %229 = vector.extract_strided_slice %228 {offsets = [0, 0], sizes = [2, 64], strides = [1, 1]} : vector<16x64xf32> to vector<2x64xf32>
    %c0_154 = arith.constant 0 : index
    %c0_155 = arith.constant 0 : index
    %c0_156 = arith.constant 0 : index
    %230 = vector.load %arg13[%c0_154, %c0_155, %c0_156] : memref<2x64x4xf32, #tpu.memory_space<vmem>>, vector<1x64x4xf32>
    %231 = vector.shape_cast %230 : vector<1x64x4xf32> to vector<64x4xf32>
    %cst_157 = arith.constant dense<0.000000e+00> : vector<2x4xf32>
    %232 = tpu.matmul %229, %231, %cst_157 {dimension_numbers = #tpu.dot_dimension_numbers<[1], [0], [0], [1], [0, 0, 1, 1], [], []>} : vector<2x64xf32>, vector<64x4xf32>, vector<2x4xf32> -> vector<2x4xf32>
    %233 = vector.extract_strided_slice %228 {offsets = [8, 0], sizes = [2, 64], strides = [1, 1]} : vector<16x64xf32> to vector<2x64xf32>
    %c1_158 = arith.constant 1 : index
    %c0_159 = arith.constant 0 : index
    %c0_160 = arith.constant 0 : index
    %234 = vector.load %arg13[%c1_158, %c0_159, %c0_160] : memref<2x64x4xf32, #tpu.memory_space<vmem>>, vector<1x64x4xf32>
    %235 = vector.shape_cast %234 : vector<1x64x4xf32> to vector<64x4xf32>
    %cst_161 = arith.constant dense<0.000000e+00> : vector<2x4xf32>
    %236 = tpu.matmul %233, %235, %cst_161 {dimension_numbers = #tpu.dot_dimension_numbers<[1], [0], [0], [1], [0, 0, 1, 1], [], []>} : vector<2x64xf32>, vector<64x4xf32>, vector<2x4xf32> -> vector<2x4xf32>
    %237 = arith.addf %232, %236 : vector<2x4xf32>
    %238 = vector.extract_strided_slice %0 {offsets = [3, 0], sizes = [1, 4], strides = [1, 1]} : vector<8x288xf32> to vector<1x4xf32>
    %239 = vector.broadcast %238 : vector<1x4xf32> to vector<2x4xf32>
    %240 = arith.addf %237, %239 : vector<2x4xf32>
    %c0_162 = arith.constant 0 : index
    %c0_163 = arith.constant 0 : index
    %241 = vector.load %arg14[%c0_162, %c0_163] : memref<4x2xf32, #tpu.memory_space<vmem>>, vector<4x2xf32>
    %cst_164 = arith.constant dense<0.000000e+00> : vector<2x2xf32>
    %242 = tpu.matmul %240, %241, %cst_164 {dimension_numbers = #tpu.dot_dimension_numbers<[1], [0], [0], [1], [0, 0, 1, 1], [], []>} : vector<2x4xf32>, vector<4x2xf32>, vector<2x2xf32> -> vector<2x2xf32>
    %243 = vector.extract_strided_slice %0 {offsets = [4, 0], sizes = [1, 2], strides = [1, 1]} : vector<8x288xf32> to vector<1x2xf32>
    %244 = vector.broadcast %243 : vector<1x2xf32> to vector<2x2xf32>
    %245 = arith.addf %242, %244 : vector<2x2xf32>
    %cst_165 = arith.constant dense<0xFF800000> : vector<2xf32>
    %246 = vector.multi_reduction <maximumf>, %245, %cst_165 [1] : vector<2x2xf32> to vector<2xf32>
    %247 = vector.shape_cast %246 : vector<2xf32> to vector<2x1xf32>
    %248 = vector.broadcast %247 : vector<2x1xf32> to vector<2x2xf32>
    %249 = arith.subf %245, %248 : vector<2x2xf32>
    %250 = math.exp %249 : vector<2x2xf32>
    %cst_166 = arith.constant dense<0.000000e+00> : vector<2xf32>
    %251 = vector.multi_reduction <add>, %250, %cst_166 [1] : vector<2x2xf32> to vector<2xf32>
    %252 = vector.shape_cast %251 : vector<2xf32> to vector<2x1xf32>
    %253 = vector.broadcast %252 : vector<2x1xf32> to vector<2x2xf32>
    %254 = arith.divf %250, %253 : vector<2x2xf32>
    %c0_167 = arith.constant 0 : index
    %c0_168 = arith.constant 0 : index
    %255 = vector.load %arg16[%c0_167, %c0_168] : memref<2x2xf32, #tpu.memory_space<vmem>>, vector<2x2xf32>
    tpu.vector_store %arg16[%c0_167, %c0_168], %254 {strides = array<i32>} : memref<2x2xf32, #tpu.memory_space<vmem>>, vector<2x2xf32>,
    return
  }
}

</mosaic_0001>

<bundles_post_ra>
// kernel: forward.1
= control target key start
LH: loop header
LB: loop body
LE: loop exit
PB: predicated region body
PF: predicated region fallthrough
CT: control target
= control target key end

     0   :  { %s14488_s0 = inlined_call_operand.vmem [shape: f32[240,40], index: 0, kind: input, shape index: {}]   ;;  %s14489_s1 = inlined_call_operand.hbm [shape: f32[600,240], index: 1, kind: input, shape index: {}]   ;;  %s14490_s2 = inlined_call_operand.vmem [shape: f32[15,40,288], index: 2, kind: input, shape index: {}]   ;;  %s14491_s3 = inlined_call_operand.vmem [shape: f32[288,16], index: 3, kind: input, shape index: {}]   ;;  %s14492_s4 = inlined_call_operand.vmem [shape: f32[16,288], index: 4, kind: input, shape index: {}]   ;;  %s14493_s5 = inlined_call_operand.vmem [shape: f32[80,40], index: 5, kind: input, shape index: {}]   ;;  %s14494_s6 = inlined_call_operand.hbm [shape: f32[5,288,224], index: 6, kind: input, shape index: {}]   ;;  %s14495_s7 = inlined_call_operand.vmem [shape: f32[224,32], index: 7, kind: input, shape index: {}]   ;;  %s14496_s8 = inlined_call_operand.vmem [shape: f32[32,224], index: 8, kind: input, shape index: {}]   ;;  %s14497_s9 = inlined_call_operand.vmem [shape: f32[80,16], index: 9, kind: input, shape index: {}]   ;;  %s14498_s10 = inlined_call_operand.vmem [shape: f32[5,224,64], index: 10, kind: input, shape index: {}]   ;;  %s14499_s11 = inlined_call_operand.vmem [shape: f32[64,32], index: 11, kind: input, shape index: {}]   ;;  %s14500_s12 = inlined_call_operand.vmem [shape: f32[32,64], index: 12, kind: input, shape index: {}]   ;;  %s14501_s13 = inlined_call_operand.vmem [shape: f32[2,64,4], index: 13, kind: input, shape index: {}]   ;;  %s14502_s14 = inlined_call_operand.vmem [shape: f32[4,2], index: 14, kind: input, shape index: {}]   ;;  %s14503_s15 = inlined_call_operand.vmem [shape: f32[8,288], index: 15, kind: input, shape index: {}]   ;;  %s14504_s16 = inlined_call_operand.hbm [shape: f32[2,2], index: 16, kind: output, shape index: {}]  }
   0x1   :  { %14506 = sst [smem:[#allocation11_spill]] %s14488_s0 }
   0x2   :  { %21 = vsyncpa [#allocation3], 0 }
   0x3   :  { %22 = vsyncpa [#allocation6], 0 }
   0x4   :  { %23 = vsyncpa [#allocation4], 0  ;;  %s11348_s21 = smov [#allocation2]   ;;  %s11276_s25 = scalar_lea.hbm %s14489_s1, 19200 }
   0x5   :  { %s31_s22 = sshll.u32 %s11348_s21, 4  ;;  %p11277_p0 = scmp.ne.s32.totalorder %s14489_s1, %s11276_s25  ;;  %s32_s22 = int_to_ptr.vmem [resolvable:$true] %s31_s22 }
   0x6   :  { %p11280_p1 = scmp.lt.u32.totalorder %s11276_s25, %s14489_s1 }
   0x8   :  { %p11282_p2 = pnand %p11280_p1, %p11277_p0 }
   0xa   :  { %11285 = shalt.err (!%p11282_p2)
}
   0xb   :  { %s11286_s30 = scalar_lea.vmem %s32_s22, 19200  ;;  %p11291_p4 = scmp.lt.s32.totalorder %s32_s22, %s32_s22 }
   0xc   :  { %p11287_p3 = scmp.ne.s32.totalorder %s32_s22, %s11286_s30  ;;  %p11292_p5 = scmp.lt.s32.totalorder %s11286_s30, %s11286_s30 }
   0xe   :  { %p11293_p6 = por %p11292_p5, %p11291_p4 }
  0x10   :  { %p11294_p7 = pnand %p11293_p6, %p11287_p3 }
  0x12   :  { %11297 = shalt.err (!%p11294_p7)
}
  0x13   :  { %s11349_s0 = smov 256   ;;  %s11350_s17 = smov 16  }
  0x14   :  { %37 = dma.hbm_to_vmem [thread:$0]  %s14489_s1, 19200, %s32_s22, [#allocation3], %s11349_s0, %s11349_s0, %s11350_s17  }
  0x15   :  { %s11351_s20 = smov [#allocation5]   ;;  %s11298_s25 = scalar_lea.hbm %s14494_s6, 46080 }
  0x16   :  { %s51_s21 = sshll.u32 %s11351_s20, 4  ;;  %p11299_p8 = scmp.ne.s32.totalorder %s14494_s6, %s11298_s25  ;;  %s52_s21 = int_to_ptr.vmem [resolvable:$true] %s51_s21 }
  0x17   :  { %p11302_p9 = scmp.lt.u32.totalorder %s11298_s25, %s14494_s6 }
  0x19   :  { %p11304_p10 = pnand %p11302_p9, %p11299_p8 }
  0x1b   :  { %11307 = shalt.err (!%p11304_p10)
}
  0x1c   :  { %s11308_s30 = scalar_lea.vmem %s52_s21, 46080  ;;  %p11313_p12 = scmp.lt.s32.totalorder %s52_s21, %s52_s21 }
  0x1d   :  { %p11309_p11 = scmp.ne.s32.totalorder %s52_s21, %s11308_s30  ;;  %p11314_p13 = scmp.lt.s32.totalorder %s11308_s30, %s11308_s30 }
  0x1f   :  { %p11315_p0 = por %p11314_p13, %p11313_p12 }
  0x21   :  { %p11316_p1 = pnand %p11315_p0, %p11309_p11 }
  0x23   :  { %11319 = shalt.err (!%p11316_p1)
}
  0x24   :  { %57 = dma.hbm_to_vmem [thread:$0]  %s14494_s6, 46080, %s52_s21, [#allocation6], %s11349_s0, %s11349_s0, %s11350_s17  }
  0x25   :  { %11342 = dma.done.wait [#allocation3], 19200  }
  0x26   :  { %11343 = vsyncadd [#allocation3], 4294948096 }
  0x27   :  { %11344 = dma.done.wait [#allocation6], 46080  }
  0x28   :  { %11345 = vsyncadd [#allocation6], 4294921216  ;;  %v11352_v0 = vmov 0.0|0.0   ;;  %s14507_s20 = sld [smem:[#allocation11_spill]]  ;;  %vm265_vm0 = vcmask 916480   ;;  %v116_v12 = vld [vmem:[#allocation2 + $0x8] sm:$0xff] }
  0x29   :  { %9828 = vmatprep.subr.bf16.mxu0 %v11352_v0  ;;  %8367 = vmatprep.mubr.msk.f32.mxu0 %vm265_vm0, %v116_v12  ;;  %v115_v47 = vld [vmem:[#allocation2] sm:$0xff]  ;;  %v118_v48 = vld [vmem:[#allocation2 + $0x18] sm:$0xff]  ;;  %v117_v49 = vld [vmem:[#allocation2 + $0x10] sm:$0xff]  ;;  %vm962_vm1 = vcmask 326656   ;;  %vm11354_vm2 = vmmov 0   ;;  %vm4386_vm3 = vcmask 261120  }
  0x2a   :  { %v120_v50 = vld [vmem:[#allocation2 + $0x28] sm:$0xff]  ;;  %v119_v51 = vld [vmem:[#allocation2 + $0x20] sm:$0xff]  ;;  %v122_v52 = vld [vmem:[#allocation2 + $0x38] sm:$0xff]  ;;  %vm4787_vm4 = vcmask 130048   ;;  %vm6612_vm5 = vcmask 785408   ;;  %vm7736_vm6 = vcmask 523264  }
  0x2b   :  { %v121_v53 = vld [vmem:[#allocation2 + $0x30] sm:$0xff]  ;;  %v124_v54 = vld [vmem:[#allocation2 + $0x48] sm:$0xff]  ;;  %v123_v55 = vld [vmem:[#allocation2 + $0x40] sm:$0xff]  ;;  %vm8264_vm7 = vcmask 1043456   ;;  %vm8260_vm8 = vcmask 31744   ;;  %vm8338_vm9 = vcmask 9216  }
  0x2c   :  { %v126_v56 = vld [vmem:[#allocation2 + $0x58] sm:$0xff]  ;;  %v125_v57 = vld [vmem:[#allocation2 + $0x50] sm:$0xff]  ;;  %v128_v58 = vld [vmem:[#allocation2 + $0x68] sm:$0xff] }
  0x2d   :  { %v127_v59 = vld [vmem:[#allocation2 + $0x60] sm:$0xff]  ;;  %v130_v60 = vld [vmem:[#allocation2 + $0x78] sm:$0xff]  ;;  %v129_v61 = vld [vmem:[#allocation2 + $0x70] sm:$0xff] }
  0x2e   :  { %v85_v1 = vld [vmem:[%s14507_s20] sm:$0xff]  ;;  %v86_v2 = vld [vmem:[%s14507_s20 + $0x8] sm:$0xff]  ;;  %v87_v3 = vld [vmem:[%s14507_s20 + $0x10] sm:$0xff] }
  0x2f   :  { %v9829_v4 = vpack.c.bf16 %v86_v2, %v85_v1  ;;  %v88_v5 = vld [vmem:[%s14507_s20 + $0x18] sm:$0xff]  ;;  %v89_v7 = vld [vmem:[%s14507_s20 + $0x20] sm:$0xff]  ;;  %v90_v8 = vld [vmem:[%s14507_s20 + $0x28] sm:$0xff] }
  0x30   :  { %v9832_v6 = vpack.c.bf16 %v88_v5, %v87_v3  ;;  %v9835_v9 = vpack.c.bf16 %v90_v8, %v89_v7  ;;  %v91_v10 = vld [vmem:[%s14507_s20 + $0x30] sm:$0xff]  ;;  %v92_v11 = vld [vmem:[%s14507_s20 + $0x38] sm:$0xff]  ;;  %v93_v14 = vld [vmem:[%s14507_s20 + $0x40] sm:$0xff] }
  0x31   :  { %9830 = vmatpush1.bf16.msra.mxu0 %v9829_v4  ;;  %v9838_v13 = vpack.c.bf16 %v92_v11, %v91_v10  ;;  %v94_v15 = vld [vmem:[%s14507_s20 + $0x48] sm:$0xff]  ;;  %v95_v17 = vld [vmem:[%s14507_s20 + $0x50] sm:$0xff]  ;;  %v96_v18 = vld [vmem:[%s14507_s20 + $0x58] sm:$0xff] }
  0x32   :  { %9831 = vmatprep.subr.bf16.mxu0 %v11352_v0  ;;  %v9841_v16 = vpack.c.bf16 %v94_v15, %v93_v14  ;;  %v9844_v19 = vpack.c.bf16 %v96_v18, %v95_v17  ;;  %v97_v20 = vld [vmem:[%s14507_s20 + $0x60] sm:$0xff]  ;;  %v98_v21 = vld [vmem:[%s14507_s20 + $0x68] sm:$0xff]  ;;  %v99_v23 = vld [vmem:[%s14507_s20 + $0x70] sm:$0xff] }
  0x33   :  { %v9847_v22 = vpack.c.bf16 %v98_v21, %v97_v20  ;;  %v100_v24 = vld [vmem:[%s14507_s20 + $0x78] sm:$0xff]  ;;  %v101_v26 = vld [vmem:[%s14507_s20 + $0x80] sm:$0xff]  ;;  %v102_v27 = vld [vmem:[%s14507_s20 + $0x88] sm:$0xff] }
  0x34   :  { %v9850_v25 = vpack.c.bf16 %v100_v24, %v99_v23  ;;  %v9853_v28 = vpack.c.bf16 %v102_v27, %v101_v26  ;;  %v103_v29 = vld [vmem:[%s14507_s20 + $0x90] sm:$0xff]  ;;  %v104_v30 = vld [vmem:[%s14507_s20 + $0x98] sm:$0xff]  ;;  %v105_v32 = vld [vmem:[%s14507_s20 + $0xa0] sm:$0xff] }
  0x35   :  { %9833 = vmatpush1.bf16.msra.mxu0 %v9832_v6  ;;  %v9856_v31 = vpack.c.bf16 %v104_v30, %v103_v29  ;;  %v106_v33 = vld [vmem:[%s14507_s20 + $0xa8] sm:$0xff]  ;;  %v107_v35 = vld [vmem:[%s14507_s20 + $0xb0] sm:$0xff]  ;;  %v108_v36 = vld [vmem:[%s14507_s20 + $0xb8] sm:$0xff] }
  0x36   :  { %9834 = vmatprep.subr.bf16.mxu0 %v11352_v0  ;;  %v9859_v34 = vpack.c.bf16 %v106_v33, %v105_v32  ;;  %v9862_v37 = vpack.c.bf16 %v108_v36, %v107_v35  ;;  %v109_v38 = vld [vmem:[%s14507_s20 + $0xc0] sm:$0xff]  ;;  %v110_v39 = vld [vmem:[%s14507_s20 + $0xc8] sm:$0xff]  ;;  %v111_v41 = vld [vmem:[%s14507_s20 + $0xd0] sm:$0xff] }
  0x37   :  { %v9865_v40 = vpack.c.bf16 %v110_v39, %v109_v38  ;;  %v112_v42 = vld [vmem:[%s14507_s20 + $0xd8] sm:$0xff]  ;;  %v113_v44 = vld [vmem:[%s14507_s20 + $0xe0] sm:$0xff]  ;;  %v114_v45 = vld [vmem:[%s14507_s20 + $0xe8] sm:$0xff] }
  0x38   :  { %v9868_v43 = vpack.c.bf16 %v112_v42, %v111_v41  ;;  %v9871_v46 = vpack.c.bf16 %v114_v45, %v113_v44  ;;  %v132_v62 = vld [vmem:[#allocation2 + $0x88] sm:$0xff]  ;;  %v131_v63 = vld [vmem:[#allocation2 + $0x80] sm:$0xff]  ;;  %v134_v1 = vld [vmem:[#allocation2 + $0x98] sm:$0xff] }
  0x39   :  { %9836 = vmatpush1.bf16.msra.mxu0 %v9835_v9  ;;  %v133_v2 = vld [vmem:[#allocation2 + $0x90] sm:$0xff]  ;;  %v136_v3 = vld [vmem:[#allocation2 + $0xa8] sm:$0xff]  ;;  %v135_v4 = vld [vmem:[#allocation2 + $0xa0] sm:$0xff] }
  0x3a   :  { %9837 = vmatprep.subr.bf16.mxu0 %v11352_v0  ;;  %v138_v5 = vld [vmem:[#allocation2 + $0xb8] sm:$0xff]  ;;  %v137_v6 = vld [vmem:[#allocation2 + $0xb0] sm:$0xff]  ;;  %v140_v7 = vld [vmem:[#allocation2 + $0xc8] sm:$0xff] }
  0x3b   :  { %v139_v8 = vld [vmem:[#allocation2 + $0xc0] sm:$0xff]  ;;  %v142_v9 = vld [vmem:[#allocation2 + $0xd8] sm:$0xff]  ;;  %v141_v10 = vld [vmem:[#allocation2 + $0xd0] sm:$0xff] }
  0x3c   :  { %v144_v11 = vld [vmem:[#allocation2 + $0xe8] sm:$0xff]  ;;  %v143_v12 = vld [vmem:[#allocation2 + $0xe0] sm:$0xff]  ;;  %v145_v14 = vld [vmem:[#allocation2 + $0xf0] sm:$0xff] }
  0x3d   :  { %9839 = vmatpush1.bf16.msra.mxu0 %v9838_v13  ;;  %v146_v13 = vld [vmem:[#allocation2 + $0xf8] sm:$0xff]  ;;  %v148_v15 = vld [vmem:[#allocation2 + $0x108] sm:$0xff]  ;;  %v149_v18 = vld [vmem:[#allocation2 + $0x110] sm:$0xff] }
  0x3e   :  { %9840 = vmatprep.subr.bf16.mxu0 %v11352_v0  ;;  %v150_v17 = vld [vmem:[#allocation2 + $0x118] sm:$0xff]  ;;  %v151_v20 = vld [vmem:[#allocation2 + $0x120] sm:$0xff]  ;;  %v156_v23 = vld [vmem:[#allocation2 + $0x148] sm:$0xff] }
  0x3f   :  { %v154_v21 = vld [vmem:[#allocation2 + $0x138] sm:$0xff]  ;;  %v155_v24 = vld [vmem:[#allocation2 + $0x140] sm:$0xff]  ;;  %v157_v26 = vld [vmem:[#allocation2 + $0x150] sm:$0xff] }
  0x40   :  { %v160_v27 = vld [vmem:[#allocation2 + $0x168] sm:$0xff]  ;;  %v162_v29 = vld [vmem:[#allocation2 + $0x178] sm:$0xff]  ;;  %v161_v30 = vld [vmem:[#allocation2 + $0x170] sm:$0xff] }
  0x41   :  { %9842 = vmatpush1.bf16.msra.mxu0 %v9841_v16  ;;  %v147_v16 = vld [vmem:[#allocation2 + $0x100] sm:$0xff]  ;;  %v8446_v33 = vld [vmem:[%s14490_s2 + $0x98] sm:$0xff]  ;;  %v8445_v36 = vld [vmem:[%s14490_s2 + $0x90] sm:$0xff] }
  0x42   :  { %9843 = vmatprep.subr.bf16.mxu0 %v11352_v0  ;;  %v8443_v32 = vld [vmem:[%s14490_s2 + $0x80] sm:$0xff]  ;;  %v8442_v35 = vld [vmem:[%s14490_s2 + $0x78] sm:$0xff]  ;;  %v8452_v41 = vld [vmem:[%s14490_s2 + $0xc8] sm:$0xff] }
  0x43   :  { %v9875_v38 = vpack.c.bf16 %v8445_v36, %v8442_v35  ;;  %v166_v39 = vld [vmem:[#allocation2 + $0x198] sm:$0xff]  ;;  %v8451_v44 = vld [vmem:[%s14490_s2 + $0xc0] sm:$0xff]  ;;  %v165_v45 = vld [vmem:[#allocation2 + $0x190] sm:$0xff] }
  0x45   :  { %9845 = vmatpush1.bf16.msra.mxu0 %v9844_v19  ;;  %v152_v19 = vld [vmem:[#allocation2 + $0x128] sm:$0xff] }
  0x46   :  { %9846 = vmatprep.subr.bf16.mxu0 %v11352_v0 }
  0x49   :  { %9848 = vmatpush1.bf16.msra.mxu0 %v9847_v22  ;;  %v153_v22 = vld [vmem:[#allocation2 + $0x130] sm:$0xff] }
  0x4a   :  { %9849 = vmatprep.subr.bf16.mxu0 %v11352_v0 }
  0x4d   :  { %9851 = vmatpush1.bf16.msra.mxu0 %v9850_v25  ;;  %v158_v25 = vld [vmem:[#allocation2 + $0x158] sm:$0xff] }
  0x4e   :  { %9852 = vmatprep.subr.bf16.mxu0 %v11352_v0 }
  0x51   :  { %9854 = vmatpush1.bf16.msra.mxu0 %v9853_v28  ;;  %v159_v28 = vld [vmem:[#allocation2 + $0x160] sm:$0xff] }
  0x52   :  { %9855 = vmatprep.subr.bf16.mxu0 %v11352_v0 }
  0x55   :  { %9857 = vmatpush1.bf16.msra.mxu0 %v9856_v31  ;;  %v164_v31 = vld [vmem:[#allocation2 + $0x188] sm:$0xff] }
  0x56   :  { %9858 = vmatprep.subr.bf16.mxu0 %v11352_v0 }
  0x59   :  { %9860 = vmatpush1.bf16.msra.mxu0 %v9859_v34  ;;  %v9873_v34 = vpack.c.bf16 %v8446_v33, %v8443_v32  ;;  %v203_v32 = vld [vmem:[#allocation2 + $0x2c0] sm:$0xff]  ;;  %v8444_v33 = vld [vmem:[%s14490_s2 + $0x88] sm:$0xff] }
  0x5a   :  { %9861 = vmatprep.subr.bf16.mxu0 %v11352_v0 }
  0x5b   :  { %9874 = vmatprep.subr.bf16.mxu1 %v9873_v34  ;;  %v8447_v34 = vld [vmem:[%s14490_s2 + $0xa0] sm:$0xff] }
  0x5c   :  { %9876 = vmatpush1.bf16.msra.mxu1 %v9875_v38  ;;  %v8450_v38 = vld [vmem:[%s14490_s2 + $0xb8] sm:$0xff] }
  0x5d   :  { %9863 = vmatpush1.bf16.msra.mxu0 %v9862_v37  ;;  %v163_v37 = vld [vmem:[#allocation2 + $0x180] sm:$0xff] }
  0x5e   :  { %9864 = vmatprep.subr.bf16.mxu0 %v11352_v0 }
  0x61   :  { %9866 = vmatpush1.bf16.msra.mxu0 %v9865_v40  ;;  %v8449_v40 = vld [vmem:[%s14490_s2 + $0xb0] sm:$0xff] }
  0x62   :  { %9867 = vmatprep.subr.bf16.mxu0 %v11352_v0  ;;  %v9877_v42 = vpack.c.bf16 %v8452_v41, %v8449_v40 }
  0x64   :  { %9878 = vmatprep.subr.bf16.mxu1 %v9877_v42 }
  0x65   :  { %9869 = vmatpush1.bf16.msra.mxu0 %v9868_v43  ;;  %v8448_v43 = vld [vmem:[%s14490_s2 + $0xa8] sm:$0xff] }
  0x66   :  { %9870 = vmatprep.subr.bf16.mxu0 %v11352_v0 }
  0x69   :  { %9872 = vmatpush1.bf16.msra.mxu0 %v9871_v46  ;;  %v9879_v46 = vpack.c.bf16 %v8451_v44, %v8448_v43  ;;  %v932_v44 = vld [vmem:[%s14490_s2 + $0x8] sm:$0xff] }
  0x6b   :  { %9880 = vmatpush1.bf16.msra.mxu1 %v9879_v46 }
  0x6c   :  { %556 = vmatmul.mubr.f32.vlgmr.msra.gmra.mrb[0].mxu0 %v115_v47  ;;  %v168_v47 = vld [vmem:[#allocation2 + $0x1a8] sm:$0xff] }
  0x6d   :  { %8368 = vmatprep.mubr.msk.f32.mxu0 %vm265_vm0, %v118_v48  ;;  %v8455_v48 = vld [vmem:[%s14490_s2 + $0xe0] sm:$0xff] }
  0x6e   :  { %986 = vmatprep.subr.mxu1 %v8455_v48 }
  0x70   :  { %561 = vmatmul.mubr.f32.gmra.mrb[2].mxu0 %v117_v49  ;;  %v167_v49 = vld [vmem:[#allocation2 + $0x1a0] sm:$0xff] }
  0x71   :  { %8369 = vmatprep.mubr.msk.f32.mxu0 %vm265_vm0, %v120_v50  ;;  %v170_v50 = vld [vmem:[#allocation2 + $0x1b8] sm:$0xff] }
  0x74   :  { %566 = vmatmul.mubr.f32.gmra.mrb[4].mxu0 %v119_v51  ;;  %v8454_v51 = vld [vmem:[%s14490_s2 + $0xd8] sm:$0xff] }
  0x75   :  { %8370 = vmatprep.mubr.msk.f32.mxu0 %vm265_vm0, %v122_v52  ;;  %987 = vmatpush1.msra.mxu1 %v8454_v51  ;;  %v11353_v52 = vmov 0.0  }
  0x76   :  { %1042 = vmatprep.mubr.f32.mxu1 %v11353_v52  ;;  %9881 = vmatprep.subr.bf16.mxu1 %v11352_v0 }
  0x78   :  { %571 = vmatmul.mubr.f32.gmra.mrb[6].mxu0 %v121_v53  ;;  %v169_v53 = vld [vmem:[#allocation2 + $0x1b0] sm:$0xff] }
  0x79   :  { %8371 = vmatprep.mubr.msk.f32.mxu0 %vm265_vm0, %v124_v54  ;;  %v172_v54 = vld [vmem:[#allocation2 + $0x1c8] sm:$0xff] }
  0x7c   :  { %576 = vmatmul.mubr.f32.gmra.mrb[8].mxu0 %v123_v55  ;;  %v171_v55 = vld [vmem:[#allocation2 + $0x1c0] sm:$0xff] }
  0x7d   :  { %8372 = vmatprep.mubr.msk.f32.mxu0 %vm265_vm0, %v126_v56  ;;  %v174_v56 = vld [vmem:[#allocation2 + $0x1d8] sm:$0xff] }
  0x80   :  { %581 = vmatmul.mubr.f32.gmra.mrb[10].mxu0 %v125_v57  ;;  %v173_v57 = vld [vmem:[#allocation2 + $0x1d0] sm:$0xff] }
  0x81   :  { %8373 = vmatprep.mubr.msk.f32.mxu0 %vm265_vm0, %v128_v58  ;;  %v176_v58 = vld [vmem:[#allocation2 + $0x1e8] sm:$0xff] }
  0x84   :  { %586 = vmatmul.mubr.f32.gmra.mrb[12].mxu0 %v127_v59  ;;  %v175_v59 = vld [vmem:[#allocation2 + $0x1e0] sm:$0xff] }
  0x85   :  { %8374 = vmatprep.mubr.msk.f32.mxu0 %vm265_vm0, %v130_v60  ;;  %v178_v60 = vld [vmem:[#allocation2 + $0x1f8] sm:$0xff] }
  0x88   :  { %591 = vmatmul.mubr.f32.gmra.mrb[14].mxu0 %v129_v61  ;;  %v177_v61 = vld [vmem:[#allocation2 + $0x1f0] sm:$0xff] }
  0x89   :  { %8375 = vmatprep.mubr.msk.f32.mxu0 %vm265_vm0, %v132_v62  ;;  %v180_v62 = vld [vmem:[#allocation2 + $0x208] sm:$0xff] }
  0x8c   :  { %596 = vmatmul.mubr.f32.gmra.mrb[16].mxu0 %v131_v63  ;;  %v179_v63 = vld [vmem:[#allocation2 + $0x200] sm:$0xff] }
  0x8d   :  { %8376 = vmatprep.mubr.msk.f32.mxu0 %vm265_vm0, %v134_v1  ;;  %v182_v1 = vld [vmem:[#allocation2 + $0x218] sm:$0xff] }
  0x90   :  { %601 = vmatmul.mubr.f32.gmra.mrb[18].mxu0 %v133_v2  ;;  %v181_v2 = vld [vmem:[#allocation2 + $0x210] sm:$0xff] }
  0x91   :  { %8377 = vmatprep.mubr.msk.f32.mxu0 %vm265_vm0, %v136_v3  ;;  %v184_v3 = vld [vmem:[#allocation2 + $0x228] sm:$0xff] }
  0x94   :  { %606 = vmatmul.mubr.f32.gmra.mrb[20].mxu0 %v135_v4  ;;  %v183_v4 = vld [vmem:[#allocation2 + $0x220] sm:$0xff] }
  0x95   :  { %8378 = vmatprep.mubr.msk.f32.mxu0 %vm265_vm0, %v138_v5  ;;  %v186_v5 = vld [vmem:[#allocation2 + $0x238] sm:$0xff] }
  0x98   :  { %611 = vmatmul.mubr.f32.gmra.mrb[22].mxu0 %v137_v6  ;;  %v185_v6 = vld [vmem:[#allocation2 + $0x230] sm:$0xff] }
  0x99   :  { %8379 = vmatprep.mubr.msk.f32.mxu0 %vm265_vm0, %v140_v7  ;;  %v188_v7 = vld [vmem:[#allocation2 + $0x248] sm:$0xff] }
  0x9c   :  { %616 = vmatmul.mubr.f32.gmra.mrb[24].mxu0 %v139_v8  ;;  %v187_v8 = vld [vmem:[#allocation2 + $0x240] sm:$0xff] }
  0x9d   :  { %8380 = vmatprep.mubr.msk.f32.mxu0 %vm265_vm0, %v142_v9  ;;  %v190_v9 = vld [vmem:[#allocation2 + $0x258] sm:$0xff] }
  0xa0   :  { %621 = vmatmul.mubr.f32.gmra.mrb[26].mxu0 %v141_v10  ;;  %v189_v10 = vld [vmem:[#allocation2 + $0x250] sm:$0xff] }
  0xa1   :  { %8381 = vmatprep.mubr.msk.f32.mxu0 %vm265_vm0, %v144_v11  ;;  %v192_v11 = vld [vmem:[#allocation2 + $0x268] sm:$0xff] }
  0xa4   :  { %626 = vmatmul.mubr.f32.gmra.mrb[28].mxu0 %v143_v12  ;;  %v191_v12 = vld [vmem:[#allocation2 + $0x260] sm:$0xff] }
  0xa5   :  { %8382 = vmatprep.mubr.msk.f32.mxu0 %vm265_vm0, %v146_v13  ;;  %v194_v13 = vld [vmem:[#allocation2 + $0x278] sm:$0xff] }
  0xa8   :  { %631 = vmatmul.mubr.f32.gmra.mrb[30].mxu0 %v145_v14  ;;  %v193_v14 = vld [vmem:[#allocation2 + $0x270] sm:$0xff] }
  0xa9   :  { %8383 = vmatprep.mubr.msk.f32.mxu0 %vm265_vm0, %v148_v15  ;;  %v196_v15 = vld [vmem:[#allocation2 + $0x288] sm:$0xff] }
  0xac   :  { %636 = vmatmul.mubr.f32.gmra.mrb[32].mxu0 %v147_v16  ;;  %v195_v16 = vld [vmem:[#allocation2 + $0x280] sm:$0xff] }
  0xad   :  { %8384 = vmatprep.mubr.msk.f32.mxu0 %vm265_vm0, %v150_v17 }
  0xb0   :  { %641 = vmatmul.mubr.f32.gmra.mrb[34].mxu0 %v149_v18 }
  0xb1   :  { %8385 = vmatprep.mubr.msk.f32.mxu0 %vm265_vm0, %v152_v19  ;;  %v198_v19 = vld [vmem:[#allocation2 + $0x298] sm:$0xff] }
  0xb4   :  { %646 = vmatmul.mubr.f32.gmra.mrb[36].mxu0 %v151_v20  ;;  %v197_v20 = vld [vmem:[#allocation2 + $0x290] sm:$0xff] }
  0xb5   :  { %8386 = vmatprep.mubr.msk.f32.mxu0 %vm265_vm0, %v154_v21 }
  0xb8   :  { %651 = vmatmul.mubr.f32.gmra.mrb[38].mxu0 %v153_v22 }
  0xb9   :  { %8387 = vmatprep.mubr.msk.f32.mxu0 %vm265_vm0, %v156_v23  ;;  %v200_v23 = vld [vmem:[#allocation2 + $0x2a8] sm:$0xff] }
  0xbc   :  { %656 = vmatmul.mubr.f32.gmra.mrb[40].mxu0 %v155_v24  ;;  %v199_v24 = vld [vmem:[#allocation2 + $0x2a0] sm:$0xff] }
  0xbd   :  { %8388 = vmatprep.mubr.msk.f32.mxu0 %vm265_vm0, %v158_v25 }
  0xc0   :  { %661 = vmatmul.mubr.f32.gmra.mrb[42].mxu0 %v157_v26 }
  0xc1   :  { %8389 = vmatprep.mubr.msk.f32.mxu0 %vm265_vm0, %v160_v27  ;;  %v202_v27 = vld [vmem:[#allocation2 + $0x2b8] sm:$0xff] }
  0xc4   :  { %666 = vmatmul.mubr.f32.gmra.mrb[44].mxu0 %v159_v28  ;;  %v201_v28 = vld [vmem:[#allocation2 + $0x2b0] sm:$0xff] }
  0xc5   :  { %8390 = vmatprep.mubr.msk.f32.mxu0 %vm265_vm0, %v162_v29 }
  0xc8   :  { %671 = vmatmul.mubr.f32.gmra.mrb[46].mxu0 %v161_v30 }
  0xc9   :  { %8391 = vmatprep.mubr.msk.f32.mxu0 %vm265_vm0, %v164_v31  ;;  %v204_v31 = vld [vmem:[#allocation2 + $0x2c8] sm:$0xff] }
  0xcc   :  { %676 = vmatmul.mubr.f32.gmra.mrb[48].mxu0 %v163_v37  ;;  %v9882_v37 = vpack.c.bf16 %v8447_v34, %v8444_v33 }
  0xcd   :  { %8392 = vmatprep.mubr.msk.f32.mxu0 %vm265_vm0, %v166_v39  ;;  %v8453_v39 = vld [vmem:[%s14490_s2 + $0xd0] sm:$0xff] }
  0xce   :  { %v9885_v42 = vpack.c.bf16 %v8453_v39, %v8450_v38  ;;  %v8481_v38 = vld [vmem:[%s14490_s2 + $0x110] sm:$0xff] }
  0xd0   :  { %681 = vmatmul.mubr.f32.gmra.mrb[50].mxu0 %v165_v45  ;;  %v935_v45 = vld [vmem:[%s14490_s2 + $0x20] sm:$0xff] }
  0xd1   :  { %8393 = vmatprep.mubr.msk.f32.mxu0 %vm265_vm0, %v168_v47  ;;  %v8456_v47 = vld [vmem:[%s14490_s2 + $0xe8] sm:$0xff]  ;;  %v9887_v48 = vpack.c.bf16 %v935_v45, %v932_v44 }
  0xd4   :  { %686 = vmatmul.mubr.f32.gmra.mrb[52].mxu0 %v167_v49 }
  0xd5   :  { %8394 = vmatprep.mubr.msk.f32.mxu0 %vm265_vm0, %v170_v50 }
  0xd8   :  { %691 = vmatmul.mubr.f32.gmra.mrb[54].mxu0 %v169_v53 }
  0xd9   :  { %8395 = vmatprep.mubr.msk.f32.mxu0 %vm265_vm0, %v172_v54  ;;  %v931_v54 = vld [vmem:[%s14490_s2] sm:$0xff] }
  0xdc   :  { %696 = vmatmul.mubr.f32.gmra.mrb[56].mxu0 %v171_v55  ;;  %v934_v55 = vld [vmem:[%s14490_s2 + $0x18] sm:$0xff] }
  0xdd   :  { %8396 = vmatprep.mubr.msk.f32.mxu0 %vm265_vm0, %v174_v56 }
  0xe0   :  { %701 = vmatmul.mubr.f32.gmra.mrb[58].mxu0 %v173_v57  ;;  %v938_v57 = vld [vmem:[%s14490_s2 + $0x38] sm:$0xff] }
  0xe1   :  { %8397 = vmatprep.mubr.msk.f32.mxu0 %vm265_vm0, %v176_v58  ;;  %v941_v58 = vld [vmem:[%s14490_s2 + $0x50] sm:$0xff] }
  0xe4   :  { %706 = vmatmul.mubr.f32.gmra.mrb[60].mxu0 %v175_v59 }
  0xe5   :  { %8398 = vmatprep.mubr.msk.f32.mxu0 %vm265_vm0, %v178_v60  ;;  %v206_v60 = vld [vmem:[#allocation2 + $0x2d8] sm:$0xff] }
  0xe8   :  { %711 = vmatmul.mubr.f32.gmra.mrb[62].mxu0 %v177_v61  ;;  %v205_v61 = vld [vmem:[#allocation2 + $0x2d0] sm:$0xff] }
  0xe9   :  { %8399 = vmatprep.mubr.msk.f32.mxu0 %vm265_vm0, %v180_v62  ;;  %v9889_v62 = vpack.c.bf16 %v934_v55, %v931_v54  ;;  %v216_v54 = vld [vmem:[#allocation2 + $0x328] sm:$0xff]  ;;  %v215_v55 = vld [vmem:[#allocation2 + $0x320] sm:$0xff] }
  0xec   :  { %716 = vmatmul.mubr.f32.gmra.mrb[64].mxu0 %v179_v63  ;;  %v9891_v63 = vpack.c.bf16 %v941_v58, %v938_v57  ;;  %v8483_v58 = vld [vmem:[%s14490_s2 + $0x120] sm:$0xff] }
  0xed   :  { %8400 = vmatprep.mubr.msk.f32.mxu0 %vm265_vm0, %v182_v1  ;;  %v937_v1 = vld [vmem:[%s14490_s2 + $0x30] sm:$0xff] }
  0xf0   :  { %721 = vmatmul.mubr.f32.gmra.mrb[66].mxu0 %v181_v2  ;;  %v940_v2 = vld [vmem:[%s14490_s2 + $0x48] sm:$0xff] }
  0xf1   :  { %8401 = vmatprep.mubr.msk.f32.mxu0 %vm265_vm0, %v184_v3 }
  0xf4   :  { %726 = vmatmul.mubr.f32.gmra.mrb[68].mxu0 %v183_v4 }
  0xf5   :  { %8402 = vmatprep.mubr.msk.f32.mxu0 %vm265_vm0, %v186_v5  ;;  %v208_v5 = vld [vmem:[#allocation2 + $0x2e8] sm:$0xff] }
  0xf8   :  { %731 = vmatmul.mubr.f32.gmra.mrb[70].mxu0 %v185_v6  ;;  %v9893_v6 = vpack.c.bf16 %v940_v2, %v937_v1  ;;  %v217_v1 = vld [vmem:[#allocation2 + $0x330] sm:$0xff]  ;;  %v8490_v2 = vld [vmem:[%s14490_s2 + $0x158] sm:$0xff] }
  0xf9   :  { %8403 = vmatprep.mubr.msk.f32.mxu0 %vm265_vm0, %v188_v7  ;;  %v207_v7 = vld [vmem:[#allocation2 + $0x2e0] sm:$0xff] }
  0xfc   :  { %736 = vmatmul.mubr.f32.gmra.mrb[72].mxu0 %v187_v8  ;;  %v944_v8 = vld [vmem:[%s14490_s2 + $0x68] sm:$0xff] }
  0xfd   :  { %8404 = vmatprep.mubr.msk.f32.mxu0 %vm265_vm0, %v190_v9 }
 0x100   :  { %741 = vmatmul.mubr.f32.gmra.mrb[74].mxu0 %v189_v10 }
 0x101   :  { %8405 = vmatprep.mubr.msk.f32.mxu0 %vm265_vm0, %v192_v11  ;;  %v210_v11 = vld [vmem:[#allocation2 + $0x2f8] sm:$0xff] }
 0x104   :  { %746 = vmatmul.mubr.f32.gmra.mrb[76].mxu0 %v191_v12  ;;  %v209_v12 = vld [vmem:[#allocation2 + $0x2f0] sm:$0xff] }
 0x105   :  { %8406 = vmatprep.mubr.msk.f32.mxu0 %vm265_vm0, %v194_v13  ;;  %v943_v13 = vld [vmem:[%s14490_s2 + $0x60] sm:$0xff] }
 0x108   :  { %751 = vmatmul.mubr.f32.gmra.mrb[78].mxu0 %v193_v14 }
 0x109   :  { %8407 = vmatprep.mubr.msk.f32.mxu0 %vm265_vm0, %v196_v15 }
 0x10c   :  { %756 = vmatmul.mubr.f32.gmra.mrb[80].mxu0 %v195_v16  ;;  %v212_v16 = vld [vmem:[#allocation2 + $0x308] sm:$0xff] }
 0x10d   :  { %8408 = vmatprep.mubr.msk.f32.mxu0 %vm265_vm0, %v198_v19 }
 0x110   :  { %761 = vmatmul.mubr.f32.gmra.mrb[82].mxu0 %v197_v20 }
 0x111   :  { %8409 = vmatprep.mubr.msk.f32.mxu0 %vm265_vm0, %v200_v23  ;;  %v213_v23 = vld [vmem:[#allocation2 + $0x310] sm:$0xff] }
 0x114   :  { %766 = vmatmul.mubr.f32.gmra.mrb[84].mxu0 %v199_v24  ;;  %v933_v24 = vld [vmem:[%s14490_s2 + $0x10] sm:$0xff] }
 0x115   :  { %8410 = vmatprep.mubr.msk.f32.mxu0 %vm265_vm0, %v202_v27 }
 0x118   :  { %771 = vmatmul.mubr.f32.gmra.mrb[86].mxu0 %v201_v28 }
 0x119   :  { %8411 = vmatprep.mubr.msk.f32.mxu0 %vm265_vm0, %v204_v31  ;;  %v939_v31 = vld [vmem:[%s14490_s2 + $0x40] sm:$0xff] }
 0x11c   :  { %776 = vmatmul.mubr.f32.gmra.mrb[88].mxu0 %v203_v32  ;;  %v942_v32 = vld [vmem:[%s14490_s2 + $0x58] sm:$0xff] }
 0x11d   :  { %8412 = vmatprep.mubr.msk.f32.mxu0 %vm265_vm0, %v206_v60 }
 0x120   :  { %781 = vmatmul.mubr.f32.gmra.mrb[90].mxu0 %v205_v61 }
 0x121   :  { %8413 = vmatprep.mubr.msk.f32.mxu0 %vm265_vm0, %v208_v5  ;;  %v220_v5 = vld [vmem:[#allocation2 + $0x348] sm:$0xff] }
 0x124   :  { %786 = vmatmul.mubr.f32.gmra.mrb[92].mxu0 %v207_v7  ;;  %v8489_v7 = vld [vmem:[%s14490_s2 + $0x150] sm:$0xff] }
 0x125   :  { %8414 = vmatprep.mubr.msk.f32.mxu0 %vm265_vm0, %v210_v11  ;;  %v221_v11 = vld [vmem:[#allocation2 + $0x350] sm:$0xff] }
 0x128   :  { %791 = vmatmul.mubr.f32.gmra.mrb[94].mxu0 %v209_v12 }
 0x129   :  { %8415 = vmatprep.mubr.msk.f32.mxu0 %vm265_vm0, %v212_v16  ;;  %v8479_v16 = vld [vmem:[%s14490_s2 + $0x100] sm:$0xff] }
 0x13f   :  { %v11643_v17 = vpop.f32.mrb[0].mxu0 }
 0x140   :  { %v559_v18 = vpop.f32.mrb[1].mxu0 }
 0x141   :  { %v211_v18 = vld [vmem:[#allocation2 + $0x300] sm:$0xff] }
 0x142   :  { %796 = vmatmul.mubr.f32.gmra.mrb[96].mxu0 %v211_v18  ;;  %v8482_v18 = vld [vmem:[%s14490_s2 + $0x118] sm:$0xff] }
 0x143   :  { %v11646_v21 = vpop.f32.mrb[2].mxu0 }
 0x144   :  { %v564_v22 = vpop.f32.mrb[3].mxu0 }
 0x145   :  { %v214_v22 = vld [vmem:[#allocation2 + $0x318] sm:$0xff] }
 0x146   :  { %8416 = vmatprep.mubr.msk.f32.mxu0 %vm265_vm0, %v214_v22  ;;  %v9910_v22 = vpack.c.bf16 %v8482_v18, %v8479_v16  ;;  %v8513_v16 = vld [vmem:[%s14490_s2 + $0x1c0] sm:$0xff] }
 0x147   :  { %v11649_v25 = vpop.f32.mrb[4].mxu0  ;;  %801 = vmatmul.mubr.f32.gmra.mrb[98].mxu0 %v213_v23  ;;  %v8485_v23 = vld [vmem:[%s14490_s2 + $0x130] sm:$0xff] }
 0x148   :  { %v569_v26 = vpop.f32.mrb[5].mxu0  ;;  %8417 = vmatprep.mubr.msk.f32.mxu0 %vm265_vm0, %v216_v54  ;;  %v225_v54 = vld [vmem:[#allocation2 + $0x370] sm:$0xff] }
 0x149   :  { %v936_v26 = vld [vmem:[%s14490_s2 + $0x28] sm:$0xff] }
 0x14b   :  { %v11652_v29 = vpop.f32.mrb[6].mxu0  ;;  %806 = vmatmul.mubr.f32.gmra.mrb[100].mxu0 %v215_v55 }
 0x14c   :  { %v574_v30 = vpop.f32.mrb[7].mxu0 }
 0x14d   :  { %v9896_v30 = vpack.c.bf16 %v936_v26, %v933_v24  ;;  %v8488_v24 = vld [vmem:[%s14490_s2 + $0x148] sm:$0xff] }
 0x14f   :  { %v11661_v35 = vpop.f32.mrb[8].mxu0 }
 0x150   :  { %v579_v36 = vpop.f32.mrb[9].mxu0 }
 0x151   :  { %v9899_v36 = vpack.c.bf16 %v942_v32, %v939_v31  ;;  %v8506_v31 = vld [vmem:[%s14490_s2 + $0x188] sm:$0xff] }
 0x153   :  { %v582_v40 = vpop.f32.mrb[10].mxu0 }
 0x154   :  { %v584_v41 = vpop.f32.mrb[11].mxu0  ;;  %8457 = vmatmul.mubr.msk.f32.vlgmr.msra.gmra.mrb[0].mxu1 %vm962_vm1, %v582_v40 }
 0x155   :  { %9883 = vmatpush3.bf16.msra.mxu1 %v9882_v37  ;;  %1048 = vmatprep.mubr.f32.mxu1 %v11353_v52  ;;  %v8478_v37 = vld [vmem:[%s14490_s2 + $0xf8] sm:$0xff]  ;;  %v945_v41 = vld [vmem:[%s14490_s2 + $0x70] sm:$0xff] }
 0x156   :  { %9884 = vmatprep.subr.bf16.mxu1 %v11352_v0 }
 0x157   :  { %v587_v43 = vpop.f32.mrb[12].mxu0 }
 0x158   :  { %v589_v46 = vpop.f32.mrb[13].mxu0  ;;  %8458 = vmatmul.mubr.msk.f32.gmra.mrb[2].mxu1 %vm962_vm1, %v587_v43 }
 0x159   :  { %1054 = vmatprep.mubr.f32.mxu1 %v11353_v52  ;;  %9886 = vmatpush3.bf16.msra.mxu1 %v9885_v42  ;;  %v9901_v42 = vpack.c.bf16 %v8481_v38, %v8478_v37 }
 0x15a   :  { %9297 = vmatprep.subr.mxu1 %v11353_v52 }
 0x15b   :  { %v592_v49 = vpop.f32.mrb[14].mxu0 }
 0x15c   :  { %v594_v50 = vpop.f32.mrb[15].mxu0  ;;  %8459 = vmatmul.mubr.msk.f32.gmra.mrb[4].mxu1 %vm962_vm1, %v592_v49 }
 0x15d   :  { %1060 = vmatprep.mubr.f32.mxu1 %v11353_v52  ;;  %9298 = vmatpush3.msra.mxu1 %v8456_v47  ;;  %v8477_v47 = vld [vmem:[%s14490_s2 + $0xf0] sm:$0xff]  ;;  %v8487_v50 = vld [vmem:[%s14490_s2 + $0x140] sm:$0xff] }
 0x15e   :  { %9888 = vmatprep.subr.bf16.mxu1 %v9887_v48  ;;  %v8480_v48 = vld [vmem:[%s14490_s2 + $0x108] sm:$0xff] }
 0x15f   :  { %v597_v51 = vpop.f32.mrb[16].mxu0 }
 0x160   :  { %v599_v53 = vpop.f32.mrb[17].mxu0  ;;  %8460 = vmatmul.mubr.msk.f32.gmra.mrb[6].mxu1 %vm962_vm1, %v597_v51 }
 0x161   :  { %1066 = vmatprep.mubr.f32.mxu1 %v11353_v52 }
 0x163   :  { %v602_v56 = vpop.f32.mrb[18].mxu0 }
 0x164   :  { %v604_v59 = vpop.f32.mrb[19].mxu0  ;;  %8461 = vmatmul.mubr.msk.f32.gmra.mrb[8].mxu1 %vm962_vm1, %v602_v56 }
 0x165   :  { %9299 = vmatprep.mubr.msk.f32.mxu1 %vm11354_vm2, %v11353_v52  ;;  %v8486_v59 = vld [vmem:[%s14490_s2 + $0x138] sm:$0xff] }
 0x167   :  { %v11710_v3 = vpop.f32.mrb[20].mxu0 }
 0x168   :  { %9300 = vmatmul.mubr.msk.f32.vlgmr.msra.gmra.mrb[10].mxu1 %vm962_vm1, %v582_v40  ;;  %v609_v4 = vpop.f32.mrb[21].mxu0 }
 0x169   :  { %9890 = vmatpush1.bf16.msra.mxu1 %v9889_v62  ;;  %9302 = vmatprep.mubr.msk.f32.mxu1 %vm11354_vm2, %v11353_v52  ;;  %v218_v62 = vld [vmem:[#allocation2 + $0x338] sm:$0xff] }
 0x16a   :  { %9892 = vmatprep.subr.bf16.mxu1 %v9891_v63  ;;  %v9907_v63 = vpack.c.bf16 %v8486_v59, %v8483_v58  ;;  %8418 = vmatprep.mubr.msk.f32.mxu0 %vm265_vm0, %v218_v62  ;;  %v8511_v58 = vld [vmem:[%s14490_s2 + $0x1b0] sm:$0xff]  ;;  %v228_v59 = vld [vmem:[#allocation2 + $0x388] sm:$0xff]  ;;  %v227_v62 = vld [vmem:[#allocation2 + $0x380] sm:$0xff] }
 0x16b   :  { %v11719_v9 = vpop.f32.mrb[22].mxu0  ;;  %811 = vmatmul.mubr.f32.gmra.mrb[102].mxu0 %v217_v1  ;;  %v230_v1 = vld [vmem:[#allocation2 + $0x398] sm:$0xff] }
 0x16c   :  { %9303 = vmatmul.mubr.msk.f32.gmra.mrb[12].mxu1 %vm962_vm1, %v587_v43  ;;  %v614_v10 = vpop.f32.mrb[23].mxu0  ;;  %8419 = vmatprep.mubr.msk.f32.mxu0 %vm265_vm0, %v220_v5  ;;  %v231_v5 = vld [vmem:[#allocation2 + $0x3a0] sm:$0xff] }
 0x16d   :  { %9305 = vmatprep.mubr.msk.f32.mxu1 %vm11354_vm2, %v11353_v52  ;;  %9894 = vmatpush1.bf16.msra.mxu1 %v9893_v6  ;;  %v219_v6 = vld [vmem:[#allocation2 + $0x340] sm:$0xff]  ;;  %v222_v10 = vld [vmem:[#allocation2 + $0x358] sm:$0xff] }
 0x16e   :  { %1186 = vmatprep.subr.mxu1 %v944_v8 }
 0x16f   :  { %v11728_v14 = vpop.f32.mrb[24].mxu0  ;;  %816 = vmatmul.mubr.f32.gmra.mrb[104].mxu0 %v219_v6 }
 0x170   :  { %9306 = vmatmul.mubr.msk.f32.gmra.mrb[14].mxu1 %vm962_vm1, %v592_v49  ;;  %v619_v15 = vpop.f32.mrb[25].mxu0  ;;  %v8484_v49 = vld [vmem:[%s14490_s2 + $0x128] sm:$0xff]  ;;  %8420 = vmatprep.mubr.msk.f32.mxu0 %vm265_vm0, %v222_v10  ;;  %v8504_v10 = vld [vmem:[%s14490_s2 + $0x178] sm:$0xff] }
 0x171   :  { %9308 = vmatprep.mubr.msk.f32.mxu1 %vm11354_vm2, %v11353_v52  ;;  %1187 = vmatpush1.msra.mxu1 %v943_v13  ;;  %v9905_v57 = vpack.c.bf16 %v8487_v50, %v8484_v49  ;;  %v223_v15 = vld [vmem:[#allocation2 + $0x360] sm:$0xff] }
 0x172   :  { %9895 = vmatprep.subr.bf16.mxu1 %v11352_v0 }
 0x173   :  { %v11735_v19 = vpop.f32.mrb[26].mxu0  ;;  %821 = vmatmul.mubr.f32.gmra.mrb[106].mxu0 %v221_v11  ;;  %v8507_v11 = vld [vmem:[%s14490_s2 + $0x190] sm:$0xff] }
 0x174   :  { %9309 = vmatmul.mubr.msk.f32.gmra.mrb[16].mxu1 %vm962_vm1, %v597_v51  ;;  %v624_v20 = vpop.f32.mrb[27].mxu0 }
 0x175   :  { %9311 = vmatprep.mubr.msk.f32.mxu1 %vm11354_vm2, %v11353_v52 }
 0x177   :  { %v11747_v27 = vpop.f32.mrb[28].mxu0 }
 0x178   :  { %9312 = vmatmul.mubr.msk.f32.gmra.mrb[18].mxu1 %vm962_vm1, %v602_v56  ;;  %v629_v28 = vpop.f32.mrb[29].mxu0  ;;  %v9903_v56 = vpack.c.bf16 %v8480_v48, %v8477_v47  ;;  %v8509_v47 = vld [vmem:[%s14490_s2 + $0x1a0] sm:$0xff]  ;;  %v8512_v48 = vld [vmem:[%s14490_s2 + $0x1b8] sm:$0xff] }
 0x179   :  { %1242 = vmatprep.mubr.f32.mxu1 %v11353_v52 }
 0x17b   :  { %v11757_v33 = vpop.f32.mrb[30].mxu0 }
 0x17c   :  { %8467 = vmatmul.mubr.msk.f32.vlgmr.msra.gmra.mrb[0].mxu1 %vm962_vm1, %v11643_v17  ;;  %v634_v34 = vpop.f32.mrb[31].mxu0 }
 0x17d   :  { %9897 = vmatpush3.bf16.msra.mxu1 %v9896_v30  ;;  %1248 = vmatprep.mubr.f32.mxu1 %v11353_v52  ;;  %v8503_v30 = vld [vmem:[%s14490_s2 + $0x170] sm:$0xff] }
 0x17e   :  { %9898 = vmatprep.subr.bf16.mxu1 %v11352_v0  ;;  %v9915_v37 = vpack.c.bf16 %v8506_v31, %v8503_v30 }
 0x17f   :  { %v11769_v39 = vpop.f32.mrb[32].mxu0 }
 0x180   :  { %8468 = vmatmul.mubr.msk.f32.gmra.mrb[2].mxu1 %vm962_vm1, %v11646_v21  ;;  %v639_v40 = vpop.f32.mrb[33].mxu0 }
 0x181   :  { %1254 = vmatprep.mubr.f32.mxu1 %v11353_v52  ;;  %9900 = vmatpush3.bf16.msra.mxu1 %v9899_v36  ;;  %v8491_v36 = vld [vmem:[%s14490_s2 + $0x160] sm:$0xff] }
 0x182   :  { %9322 = vmatprep.subr.mxu1 %v11353_v52 }
 0x183   :  { %v11778_v43 = vpop.f32.mrb[34].mxu0 }
 0x184   :  { %8469 = vmatmul.mubr.msk.f32.gmra.mrb[4].mxu1 %vm962_vm1, %v11649_v25  ;;  %v644_v44 = vpop.f32.mrb[35].mxu0 }
 0x185   :  { %1260 = vmatprep.mubr.f32.mxu1 %v11353_v52  ;;  %9323 = vmatpush3.msra.mxu1 %v945_v41  ;;  %v8502_v44 = vld [vmem:[%s14490_s2 + $0x168] sm:$0xff] }
 0x186   :  { %9902 = vmatprep.subr.bf16.mxu1 %v9901_v42 }
 0x187   :  { %v11783_v45 = vpop.f32.mrb[36].mxu0 }
 0x188   :  { %8470 = vmatmul.mubr.msk.f32.gmra.mrb[6].mxu1 %vm962_vm1, %v11652_v29  ;;  %v649_v46 = vpop.f32.mrb[37].mxu0 }
 0x189   :  { %1266 = vmatprep.mubr.f32.mxu1 %v11353_v52  ;;  %v8505_v46 = vld [vmem:[%s14490_s2 + $0x180] sm:$0xff] }
 0x18a   :  { %v9917_v55 = vpack.c.bf16 %v8505_v46, %v8502_v44  ;;  %v235_v44 = vld [vmem:[#allocation2 + $0x3c0] sm:$0xff] }
 0x18b   :  { %v11800_v51 = vpop.f32.mrb[38].mxu0 }
 0x18c   :  { %8471 = vmatmul.mubr.msk.f32.gmra.mrb[8].mxu1 %vm962_vm1, %v11661_v35  ;;  %v654_v53 = vpop.f32.mrb[39].mxu0 }
 0x18d   :  { %9324 = vmatprep.mubr.msk.f32.mxu1 %vm11354_vm2, %v11353_v52  ;;  %v226_v53 = vld [vmem:[#allocation2 + $0x378] sm:$0xff] }
 0x18f   :  { %v11813_v60 = vpop.f32.mrb[40].mxu0 }
 0x190   :  { %9325 = vmatmul.mubr.msk.f32.vlgmr.msra.gmra.mrb[10].mxu1 %vm962_vm1, %v11643_v17  ;;  %v659_v61 = vpop.f32.mrb[41].mxu0 }
 0x191   :  { %9904 = vmatpush1.bf16.msra.mxu1 %v9903_v56  ;;  %9327 = vmatprep.mubr.msk.f32.mxu1 %vm11354_vm2, %v11353_v52  ;;  %v9919_v56 = vpack.c.bf16 %v8512_v48, %v8509_v47  ;;  %v8533_v48 = vld [vmem:[%s14490_s2 + $0x210] sm:$0xff] }
 0x192   :  { %9906 = vmatprep.subr.bf16.mxu1 %v9905_v57  ;;  %v8508_v57 = vld [vmem:[%s14490_s2 + $0x198] sm:$0xff] }
 0x193   :  { %v11823_v4 = vpop.f32.mrb[42].mxu0  ;;  %v9921_v61 = vpack.c.bf16 %v8511_v58, %v8508_v57  ;;  %v240_v57 = vld [vmem:[#allocation2 + $0x3e8] sm:$0xff]  ;;  %v8539_v58 = vld [vmem:[%s14490_s2 + $0x240] sm:$0xff] }
 0x194   :  { %9328 = vmatmul.mubr.msk.f32.gmra.mrb[12].mxu1 %vm962_vm1, %v11646_v21  ;;  %v664_v17 = vpop.f32.mrb[43].mxu0 }
 0x195   :  { %9330 = vmatprep.mubr.msk.f32.mxu1 %vm11354_vm2, %v11353_v52  ;;  %9908 = vmatpush1.bf16.msra.mxu1 %v9907_v63  ;;  %v8515_v63 = vld [vmem:[%s14490_s2 + $0x1d0] sm:$0xff]  ;;  %v232_v17 = vld [vmem:[#allocation2 + $0x3a8] sm:$0xff] }
 0x196   :  { %1402 = vmatprep.subr.mxu1 %v8490_v2  ;;  %v8514_v2 = vld [vmem:[%s14490_s2 + $0x1c8] sm:$0xff] }
 0x197   :  { %v11833_v8 = vpop.f32.mrb[44].mxu0 }
 0x198   :  { %9331 = vmatmul.mubr.msk.f32.gmra.mrb[14].mxu1 %vm962_vm1, %v11649_v25  ;;  %v669_v21 = vpop.f32.mrb[45].mxu0  ;;  %v224_v25 = vld [vmem:[#allocation2 + $0x368] sm:$0xff] }
 0x199   :  { %9333 = vmatprep.mubr.msk.f32.mxu1 %vm11354_vm2, %v11353_v52  ;;  %1403 = vmatpush1.msra.mxu1 %v8489_v7  ;;  %v234_v7 = vld [vmem:[#allocation2 + $0x3b8] sm:$0xff]  ;;  %v233_v21 = vld [vmem:[#allocation2 + $0x3b0] sm:$0xff] }
 0x19a   :  { %9909 = vmatprep.subr.bf16.mxu1 %v11352_v0  ;;  %8421 = vmatprep.mubr.msk.f32.mxu0 %vm265_vm0, %v224_v25 }
 0x19b   :  { %v11841_v12 = vpop.f32.mrb[46].mxu0  ;;  %826 = vmatmul.mubr.f32.gmra.mrb[108].mxu0 %v223_v15  ;;  %v8510_v15 = vld [vmem:[%s14490_s2 + $0x1a8] sm:$0xff] }
 0x19c   :  { %9334 = vmatmul.mubr.msk.f32.gmra.mrb[16].mxu1 %vm962_vm1, %v11652_v29  ;;  %v674_v13 = vpop.f32.mrb[47].mxu0  ;;  %8422 = vmatprep.mubr.msk.f32.mxu0 %vm265_vm0, %v226_v53  ;;  %v238_v53 = vld [vmem:[#allocation2 + $0x3d8] sm:$0xff] }
 0x19d   :  { %9336 = vmatprep.mubr.msk.f32.mxu1 %vm11354_vm2, %v11353_v52 }
 0x19f   :  { %v11854_v20 = vpop.f32.mrb[48].mxu0  ;;  %831 = vmatmul.mubr.f32.gmra.mrb[110].mxu0 %v225_v54 }
 0x1a0   :  { %9337 = vmatmul.mubr.msk.f32.gmra.mrb[18].mxu1 %vm962_vm1, %v11661_v35  ;;  %v679_v29 = vpop.f32.mrb[49].mxu0  ;;  %v9913_v35 = vpack.c.bf16 %v8488_v24, %v8485_v23  ;;  %8423 = vmatprep.mubr.msk.f32.mxu0 %vm265_vm0, %v228_v59  ;;  %v8528_v23 = vld [vmem:[%s14490_s2 + $0x1e8] sm:$0xff]  ;;  %v8531_v24 = vld [vmem:[%s14490_s2 + $0x200] sm:$0xff]  ;;  %v242_v59 = vld [vmem:[#allocation2 + $0x3f8] sm:$0xff] }
 0x1a1   :  { %1458 = vmatprep.mubr.f32.mxu1 %v11353_v52 }
 0x1a3   :  { %v11865_v26 = vpop.f32.mrb[50].mxu0  ;;  %836 = vmatmul.mubr.f32.gmra.mrb[112].mxu0 %v227_v62 }
 0x1a4   :  { %8492 = vmatmul.mubr.msk.f32.vlgmr.msra.gmra.mrb[0].mxu1 %vm962_vm1, %v11710_v3  ;;  %v684_v28 = vpop.f32.mrb[51].mxu0  ;;  %8424 = vmatprep.mubr.msk.f32.mxu0 %vm265_vm0, %v230_v1  ;;  %v243_v1 = vld [vmem:[#allocation2 + $0x400] sm:$0xff] }
 0x1a5   :  { %9911 = vmatpush3.bf16.msra.mxu1 %v9910_v22  ;;  %1464 = vmatprep.mubr.f32.mxu1 %v11353_v52  ;;  %v8516_v28 = vld [vmem:[%s14490_s2 + $0x1d8] sm:$0xff] }
 0x1a6   :  { %9912 = vmatprep.subr.bf16.mxu1 %v11352_v0 }
 0x1a7   :  { %v11877_v32 = vpop.f32.mrb[52].mxu0 }
 0x1a8   :  { %8493 = vmatmul.mubr.msk.f32.gmra.mrb[2].mxu1 %vm962_vm1, %v11719_v9  ;;  %v689_v34 = vpop.f32.mrb[53].mxu0 }
 0x1a9   :  { %1470 = vmatprep.mubr.f32.mxu1 %v11353_v52  ;;  %9914 = vmatpush3.bf16.msra.mxu1 %v9913_v35  ;;  %v9929_v35 = vpack.c.bf16 %v8531_v24, %v8528_v23  ;;  %v8527_v34 = vld [vmem:[%s14490_s2 + $0x1e0] sm:$0xff]  ;;  %v8555_v23 = vld [vmem:[%s14490_s2 + $0x270] sm:$0xff] }
 0x1aa   :  { %9347 = vmatprep.subr.mxu1 %v11353_v52  ;;  %v8559_v24 = vld [vmem:[%s14490_s2 + $0x290] sm:$0xff] }
 0x1ab   :  { %v11886_v38 = vpop.f32.mrb[54].mxu0 }
 0x1ac   :  { %8494 = vmatmul.mubr.msk.f32.gmra.mrb[4].mxu1 %vm962_vm1, %v11728_v14  ;;  %v694_v40 = vpop.f32.mrb[55].mxu0 }
 0x1ad   :  { %1476 = vmatprep.mubr.f32.mxu1 %v11353_v52  ;;  %9348 = vmatpush3.msra.mxu1 %v8491_v36  ;;  %v8530_v36 = vld [vmem:[%s14490_s2 + $0x1f8] sm:$0xff]  ;;  %v8537_v40 = vld [vmem:[%s14490_s2 + $0x230] sm:$0xff] }
 0x1ae   :  { %9916 = vmatprep.subr.bf16.mxu1 %v9915_v37  ;;  %v8534_v37 = vld [vmem:[%s14490_s2 + $0x218] sm:$0xff]  ;;  %v9931_v46 = vpack.c.bf16 %v8530_v36, %v8527_v34 }
 0x1af   :  { %v11891_v41 = vpop.f32.mrb[56].mxu0  ;;  %v9933_v47 = vpack.c.bf16 %v8537_v40, %v8534_v37  ;;  %v8558_v37 = vld [vmem:[%s14490_s2 + $0x288] sm:$0xff]  ;;  %v8561_v40 = vld [vmem:[%s14490_s2 + $0x2a0] sm:$0xff] }
 0x1b0   :  { %8495 = vmatmul.mubr.msk.f32.gmra.mrb[6].mxu1 %vm962_vm1, %v11735_v19  ;;  %v699_v42 = vpop.f32.mrb[57].mxu0 }
 0x1b1   :  { %1482 = vmatprep.mubr.f32.mxu1 %v11353_v52  ;;  %v236_v42 = vld [vmem:[#allocation2 + $0x3c8] sm:$0xff] }
 0x1b3   :  { %v11908_v49 = vpop.f32.mrb[58].mxu0 }
 0x1b4   :  { %8496 = vmatmul.mubr.msk.f32.gmra.mrb[8].mxu1 %vm962_vm1, %v11747_v27  ;;  %v704_v50 = vpop.f32.mrb[59].mxu0 }
 0x1b5   :  { %9349 = vmatprep.mubr.msk.f32.mxu1 %vm11354_vm2, %v11353_v52  ;;  %v8536_v50 = vld [vmem:[%s14490_s2 + $0x228] sm:$0xff] }
 0x1b6   :  { %v9935_v54 = vpack.c.bf16 %v8536_v50, %v8533_v48  ;;  %v250_v48 = vld [vmem:[#allocation2 + $0x438] sm:$0xff] }
 0x1b7   :  { %v8564_v50 = vld [vmem:[%s14490_s2 + $0x2b8] sm:$0xff] }
 0x1b8   :  { %9350 = vmatmul.mubr.msk.f32.vlgmr.msra.gmra.mrb[10].mxu1 %vm962_vm1, %v11710_v3  ;;  %v229_v3 = vld [vmem:[#allocation2 + $0x390] sm:$0xff] }
 0x1b9   :  { %9918 = vmatpush1.bf16.msra.mxu1 %v9917_v55  ;;  %9352 = vmatprep.mubr.msk.f32.mxu1 %vm11354_vm2, %v11353_v52  ;;  %v237_v55 = vld [vmem:[#allocation2 + $0x3d0] sm:$0xff] }
 0x1ba   :  { %9920 = vmatprep.subr.bf16.mxu1 %v9919_v56  ;;  %841 = vmatmul.mubr.f32.gmra.mrb[114].mxu0 %v229_v3  ;;  %v8540_v56 = vld [vmem:[%s14490_s2 + $0x248] sm:$0xff]  ;;  %v8529_v3 = vld [vmem:[%s14490_s2 + $0x1f0] sm:$0xff] }
 0x1bb   :  { %8425 = vmatprep.mubr.msk.f32.mxu0 %vm265_vm0, %v232_v17 }
 0x1bc   :  { %9353 = vmatmul.mubr.msk.f32.gmra.mrb[12].mxu1 %vm962_vm1, %v11719_v9  ;;  %v11941_v9 = vpop.f32.mrb[60].mxu0 }
 0x1bd   :  { %9355 = vmatprep.mubr.msk.f32.mxu1 %vm11354_vm2, %v11353_v52  ;;  %9922 = vmatpush1.bf16.msra.mxu1 %v9921_v61  ;;  %v709_v6 = vpop.f32.mrb[61].mxu0  ;;  %v241_v61 = vld [vmem:[#allocation2 + $0x3f0] sm:$0xff] }
 0x1be   :  { %1633 = vmatprep.subr.mxu1 %v8515_v63  ;;  %846 = vmatmul.mubr.f32.gmra.mrb[116].mxu0 %v231_v5  ;;  %v244_v63 = vld [vmem:[#allocation2 + $0x408] sm:$0xff]  ;;  %v8535_v6 = vld [vmem:[%s14490_s2 + $0x220] sm:$0xff] }
 0x1bf   :  { %8426 = vmatprep.mubr.msk.f32.mxu0 %vm265_vm0, %v234_v7  ;;  %v8538_v7 = vld [vmem:[%s14490_s2 + $0x238] sm:$0xff] }
 0x1c0   :  { %9356 = vmatmul.mubr.msk.f32.gmra.mrb[14].mxu1 %vm962_vm1, %v11728_v14  ;;  %v11949_v14 = vpop.f32.mrb[62].mxu0 }
 0x1c1   :  { %9358 = vmatprep.mubr.msk.f32.mxu1 %vm11354_vm2, %v11353_v52  ;;  %1634 = vmatpush1.msra.mxu1 %v8514_v2  ;;  %v714_v13 = vpop.f32.mrb[63].mxu0  ;;  %v8532_v2 = vld [vmem:[%s14490_s2 + $0x208] sm:$0xff] }
 0x1c2   :  { %9923 = vmatprep.subr.bf16.mxu1 %v11352_v0  ;;  %851 = vmatmul.mubr.f32.gmra.mrb[118].mxu0 %v233_v21  ;;  %v11961_v25 = vpop.f32.mrb[64].mxu0  ;;  %v8553_v13 = vld [vmem:[%s14490_s2 + $0x260] sm:$0xff] }
 0x1c3   :  { %v719_v18 = vpop.f32.mrb[65].mxu0  ;;  %8427 = vmatprep.mubr.msk.f32.mxu0 %vm265_vm0, %v236_v42  ;;  %v248_v42 = vld [vmem:[#allocation2 + $0x428] sm:$0xff] }
 0x1c4   :  { %9359 = vmatmul.mubr.msk.f32.gmra.mrb[16].mxu1 %vm962_vm1, %v11735_v19  ;;  %v9924_v19 = vpack.c.bf16 %v8507_v11, %v8504_v10  ;;  %v11972_v29 = vpop.f32.mrb[66].mxu0 }
 0x1c5   :  { %9361 = vmatprep.mubr.msk.f32.mxu1 %vm11354_vm2, %v11353_v52  ;;  %v724_v22 = vpop.f32.mrb[67].mxu0 }
 0x1c6   :  { %856 = vmatmul.mubr.f32.gmra.mrb[120].mxu0 %v235_v44  ;;  %v8552_v22 = vld [vmem:[%s14490_s2 + $0x258] sm:$0xff]  ;;  %v9949_v44 = vpack.c.bf16 %v8561_v40, %v8558_v37  ;;  %v260_v37 = vld [vmem:[#allocation2 + $0x488] sm:$0xff]  ;;  %v8589_v40 = vld [vmem:[%s14490_s2 + $0x330] sm:$0xff] }
 0x1c7   :  { %v11988_v30 = vpop.f32.mrb[68].mxu0  ;;  %8428 = vmatprep.mubr.msk.f32.mxu0 %vm265_vm0, %v238_v53  ;;  %v9945_v34 = vpack.c.bf16 %v8555_v23, %v8552_v22  ;;  %v252_v53 = vld [vmem:[#allocation2 + $0x448] sm:$0xff] }
 0x1c8   :  { %9362 = vmatmul.mubr.msk.f32.gmra.mrb[18].mxu1 %vm962_vm1, %v11747_v27  ;;  %v9927_v27 = vpack.c.bf16 %v8513_v16, %v8510_v15  ;;  %v729_v31 = vpop.f32.mrb[69].mxu0  ;;  %v8541_v15 = vld [vmem:[%s14490_s2 + $0x250] sm:$0xff] }
 0x1c9   :  { %1689 = vmatprep.mubr.f32.mxu1 %v11353_v52  ;;  %v245_v31 = vld [vmem:[#allocation2 + $0x410] sm:$0xff] }
 0x1ca   :  { %861 = vmatmul.mubr.f32.gmra.mrb[122].mxu0 %v237_v55 }
 0x1cb   :  { %8429 = vmatprep.mubr.msk.f32.mxu0 %vm265_vm0, %v240_v57  ;;  %v253_v57 = vld [vmem:[#allocation2 + $0x450] sm:$0xff] }
 0x1cc   :  { %8517 = vmatmul.mubr.msk.f32.vlgmr.msra.gmra.mrb[0].mxu1 %vm962_vm1, %v11757_v33 }
 0x1cd   :  { %9925 = vmatpush3.bf16.msra.mxu1 %v9924_v19  ;;  %1695 = vmatprep.mubr.f32.mxu1 %v11353_v52  ;;  %v8556_v19 = vld [vmem:[%s14490_s2 + $0x278] sm:$0xff] }
 0x1ce   :  { %9926 = vmatprep.subr.bf16.mxu1 %v11352_v0  ;;  %v9943_v16 = vpack.c.bf16 %v8556_v19, %v8553_v13  ;;  %v8580_v13 = vld [vmem:[%s14490_s2 + $0x2e8] sm:$0xff] }
 0x1cf   :  { %v8584_v19 = vld [vmem:[%s14490_s2 + $0x308] sm:$0xff] }
 0x1d0   :  { %8518 = vmatmul.mubr.msk.f32.gmra.mrb[2].mxu1 %vm962_vm1, %v11769_v39 }
 0x1d1   :  { %1701 = vmatprep.mubr.f32.mxu1 %v11353_v52  ;;  %9928 = vmatpush3.bf16.msra.mxu1 %v9927_v27 }
 0x1d2   :  { %9372 = vmatprep.subr.mxu1 %v11353_v52 }
 0x1d4   :  { %8519 = vmatmul.mubr.msk.f32.gmra.mrb[4].mxu1 %vm962_vm1, %v11778_v43 }
 0x1d5   :  { %1707 = vmatprep.mubr.f32.mxu1 %v11353_v52  ;;  %9373 = vmatpush3.msra.mxu1 %v8516_v28  ;;  %v8562_v28 = vld [vmem:[%s14490_s2 + $0x2a8] sm:$0xff] }
 0x1d6   :  { %9930 = vmatprep.subr.bf16.mxu1 %v9929_v35  ;;  %v246_v35 = vld [vmem:[#allocation2 + $0x418] sm:$0xff]  ;;  %v9947_v36 = vpack.c.bf16 %v8562_v28, %v8559_v24  ;;  %v8583_v24 = vld [vmem:[%s14490_s2 + $0x300] sm:$0xff] }
 0x1d7   :  { %v8586_v28 = vld [vmem:[%s14490_s2 + $0x318] sm:$0xff] }
 0x1d8   :  { %8520 = vmatmul.mubr.msk.f32.gmra.mrb[6].mxu1 %vm962_vm1, %v11783_v45 }
 0x1d9   :  { %1713 = vmatprep.mubr.f32.mxu1 %v11353_v52 }
 0x1dc   :  { %8521 = vmatmul.mubr.msk.f32.gmra.mrb[8].mxu1 %vm962_vm1, %v11800_v51 }
 0x1dd   :  { %9374 = vmatprep.mubr.msk.f32.mxu1 %vm11354_vm2, %v11353_v52 }
 0x1e0   :  { %9375 = vmatmul.mubr.msk.f32.vlgmr.msra.gmra.mrb[10].mxu1 %vm962_vm1, %v11757_v33  ;;  %v239_v33 = vld [vmem:[#allocation2 + $0x3e0] sm:$0xff] }
 0x1e1   :  { %9932 = vmatpush1.bf16.msra.mxu1 %v9931_v46  ;;  %9377 = vmatprep.mubr.msk.f32.mxu1 %vm11354_vm2, %v11353_v52  ;;  %v247_v46 = vld [vmem:[#allocation2 + $0x420] sm:$0xff] }
 0x1e2   :  { %9934 = vmatprep.subr.bf16.mxu1 %v9933_v47  ;;  %866 = vmatmul.mubr.f32.gmra.mrb[124].mxu0 %v239_v33  ;;  %v8565_v47 = vld [vmem:[%s14490_s2 + $0x2c0] sm:$0xff]  ;;  %v8554_v33 = vld [vmem:[%s14490_s2 + $0x268] sm:$0xff] }
 0x1e3   :  { %8430 = vmatprep.mubr.msk.f32.mxu0 %vm265_vm0, %v242_v59 }
 0x1e4   :  { %9378 = vmatmul.mubr.msk.f32.gmra.mrb[12].mxu1 %vm962_vm1, %v11769_v39  ;;  %v12039_v39 = vpop.f32.mrb[70].mxu0 }
 0x1e5   :  { %9380 = vmatprep.mubr.msk.f32.mxu1 %vm11354_vm2, %v11353_v52  ;;  %9936 = vmatpush1.bf16.msra.mxu1 %v9935_v54  ;;  %v734_v62 = vpop.f32.mrb[71].mxu0  ;;  %v251_v54 = vld [vmem:[#allocation2 + $0x440] sm:$0xff] }
 0x1e6   :  { %1864 = vmatprep.subr.mxu1 %v8540_v56  ;;  %871 = vmatmul.mubr.f32.gmra.mrb[126].mxu0 %v241_v61  ;;  %v254_v56 = vld [vmem:[#allocation2 + $0x458] sm:$0xff] }
 0x1e7   :  { %8431 = vmatprep.mubr.msk.f32.mxu0 %vm265_vm0, %v244_v63  ;;  %v8560_v62 = vld [vmem:[%s14490_s2 + $0x298] sm:$0xff]  ;;  %v8563_v63 = vld [vmem:[%s14490_s2 + $0x2b0] sm:$0xff] }
 0x1e8   :  { %9381 = vmatmul.mubr.msk.f32.gmra.mrb[14].mxu1 %vm962_vm1, %v11778_v43  ;;  %v12047_v43 = vpop.f32.mrb[72].mxu0 }
 0x1e9   :  { %9383 = vmatprep.mubr.msk.f32.mxu1 %vm11354_vm2, %v11353_v52  ;;  %1865 = vmatpush1.msra.mxu1 %v8539_v58  ;;  %v739_v17 = vpop.f32.mrb[73].mxu0  ;;  %v8557_v58 = vld [vmem:[%s14490_s2 + $0x280] sm:$0xff] }
 0x1ea   :  { %9937 = vmatprep.subr.bf16.mxu1 %v11352_v0  ;;  %876 = vmatmul.mubr.f32.gmra.mrb[128].mxu0 %v243_v1  ;;  %v12059_v5 = vpop.f32.mrb[74].mxu0  ;;  %v8578_v17 = vld [vmem:[%s14490_s2 + $0x2d8] sm:$0xff] }
 0x1eb   :  { %v744_v21 = vpop.f32.mrb[75].mxu0  ;;  %8432 = vmatprep.mubr.msk.f32.mxu0 %vm265_vm0, %v246_v35  ;;  %v258_v35 = vld [vmem:[#allocation2 + $0x478] sm:$0xff] }
 0x1ec   :  { %9384 = vmatmul.mubr.msk.f32.gmra.mrb[16].mxu1 %vm962_vm1, %v11783_v45  ;;  %v9938_v45 = vpack.c.bf16 %v8532_v2, %v8529_v3  ;;  %v12070_v10 = vpop.f32.mrb[76].mxu0 }
 0x1ed   :  { %9386 = vmatprep.mubr.msk.f32.mxu1 %vm11354_vm2, %v11353_v52  ;;  %v749_v11 = vpop.f32.mrb[77].mxu0 }
 0x1ee   :  { %v12086_v18 = vpop.f32.mrb[78].mxu0  ;;  %881 = vmatmul.mubr.f32.gmra.mrb[130].mxu0 %v245_v31  ;;  %v8577_v11 = vld [vmem:[%s14490_s2 + $0x2d0] sm:$0xff]  ;;  %v9963_v31 = vpack.c.bf16 %v8586_v28, %v8583_v24  ;;  %v8610_v24 = vld [vmem:[%s14490_s2 + $0x388] sm:$0xff]  ;;  %v8613_v28 = vld [vmem:[%s14490_s2 + $0x3a0] sm:$0xff] }
 0x1ef   :  { %v754_v27 = vpop.f32.mrb[79].mxu0  ;;  %8433 = vmatprep.mubr.msk.f32.mxu0 %vm265_vm0, %v248_v42  ;;  %v9959_v22 = vpack.c.bf16 %v8580_v13, %v8577_v11  ;;  %v262_v42 = vld [vmem:[#allocation2 + $0x498] sm:$0xff]  ;;  %v8611_v13 = vld [vmem:[%s14490_s2 + $0x390] sm:$0xff] }
 0x1f0   :  { %9387 = vmatmul.mubr.msk.f32.gmra.mrb[18].mxu1 %vm962_vm1, %v11800_v51  ;;  %v9941_v51 = vpack.c.bf16 %v8538_v7, %v8535_v6  ;;  %v8566_v6 = vld [vmem:[%s14490_s2 + $0x2c8] sm:$0xff]  ;;  %v255_v27 = vld [vmem:[#allocation2 + $0x460] sm:$0xff]  ;;  %v8608_v11 = vld [vmem:[%s14490_s2 + $0x378] sm:$0xff] }
 0x1f1   :  { %1920 = vmatprep.mubr.f32.mxu1 %v11353_v52 }
 0x1f2   :  { %886 = vmatmul.mubr.f32.gmra.mrb[132].mxu0 %v247_v46 }
 0x1f3   :  { %8434 = vmatprep.mubr.msk.f32.mxu0 %vm265_vm0, %v250_v48  ;;  %v8579_v48 = vld [vmem:[%s14490_s2 + $0x2e0] sm:$0xff] }
 0x1f4   :  { %8542 = vmatmul.mubr.msk.f32.vlgmr.msra.gmra.mrb[0].mxu1 %vm962_vm1, %v11813_v60 }
 0x1f5   :  { %9939 = vmatpush3.bf16.msra.mxu1 %v9938_v45  ;;  %1926 = vmatprep.mubr.f32.mxu1 %v11353_v52  ;;  %v8581_v45 = vld [vmem:[%s14490_s2 + $0x2f0] sm:$0xff] }
 0x1f6   :  { %9940 = vmatprep.subr.bf16.mxu1 %v11352_v0  ;;  %v9957_v7 = vpack.c.bf16 %v8581_v45, %v8578_v17  ;;  %v8605_v17 = vld [vmem:[%s14490_s2 + $0x360] sm:$0xff] }
 0x1f7   :  { %v8609_v45 = vld [vmem:[%s14490_s2 + $0x380] sm:$0xff] }
 0x1f8   :  { %8543 = vmatmul.mubr.msk.f32.gmra.mrb[2].mxu1 %vm962_vm1, %v11823_v4 }
 0x1f9   :  { %1932 = vmatprep.mubr.f32.mxu1 %v11353_v52  ;;  %9942 = vmatpush3.bf16.msra.mxu1 %v9941_v51 }
 0x1fa   :  { %9397 = vmatprep.subr.mxu1 %v11353_v52 }
 0x1fc   :  { %8544 = vmatmul.mubr.msk.f32.gmra.mrb[4].mxu1 %vm962_vm1, %v11833_v8 }
 0x1fd   :  { %1938 = vmatprep.mubr.f32.mxu1 %v11353_v52  ;;  %9398 = vmatpush3.msra.mxu1 %v8541_v15  ;;  %v8587_v15 = vld [vmem:[%s14490_s2 + $0x320] sm:$0xff] }
 0x1fe   :  { %9944 = vmatprep.subr.bf16.mxu1 %v9943_v16  ;;  %v256_v16 = vld [vmem:[#allocation2 + $0x468] sm:$0xff]  ;;  %v9961_v23 = vpack.c.bf16 %v8587_v15, %v8584_v19  ;;  %v9977_v19 = vpack.c.bf16 %v8611_v13, %v8608_v11  ;;  %v8615_v15 = vld [vmem:[%s14490_s2 + $0x3b0] sm:$0xff] }
 0x1ff   :  { %v8641_v11 = vld [vmem:[%s14490_s2 + $0x430] sm:$0xff] }
 0x200   :  { %8545 = vmatmul.mubr.msk.f32.gmra.mrb[6].mxu1 %vm962_vm1, %v11841_v12 }
 0x201   :  { %1944 = vmatprep.mubr.f32.mxu1 %v11353_v52 }
 0x204   :  { %8546 = vmatmul.mubr.msk.f32.gmra.mrb[8].mxu1 %vm962_vm1, %v11854_v20 }
 0x205   :  { %9399 = vmatprep.mubr.msk.f32.mxu1 %vm11354_vm2, %v11353_v52 }
 0x208   :  { %9400 = vmatmul.mubr.msk.f32.vlgmr.msra.gmra.mrb[10].mxu1 %vm962_vm1, %v11813_v60  ;;  %v249_v60 = vld [vmem:[#allocation2 + $0x430] sm:$0xff] }
 0x209   :  { %9946 = vmatpush1.bf16.msra.mxu1 %v9945_v34  ;;  %9402 = vmatprep.mubr.msk.f32.mxu1 %vm11354_vm2, %v11353_v52  ;;  %v257_v34 = vld [vmem:[#allocation2 + $0x470] sm:$0xff] }
 0x20a   :  { %9948 = vmatprep.subr.bf16.mxu1 %v9947_v36  ;;  %891 = vmatmul.mubr.f32.gmra.mrb[134].mxu0 %v249_v60  ;;  %v8590_v36 = vld [vmem:[%s14490_s2 + $0x338] sm:$0xff] }
 0x20b   :  { %8435 = vmatprep.mubr.msk.f32.mxu0 %vm265_vm0, %v252_v53  ;;  %v8582_v60 = vld [vmem:[%s14490_s2 + $0x2f8] sm:$0xff] }
 0x20c   :  { %9403 = vmatmul.mubr.msk.f32.gmra.mrb[12].mxu1 %vm962_vm1, %v11823_v4  ;;  %v12137_v4 = vpop.f32.mrb[80].mxu0 }
 0x20d   :  { %9405 = vmatprep.mubr.msk.f32.mxu1 %vm11354_vm2, %v11353_v52  ;;  %9950 = vmatpush1.bf16.msra.mxu1 %v9949_v44  ;;  %v759_v55 = vpop.f32.mrb[81].mxu0  ;;  %v261_v44 = vld [vmem:[#allocation2 + $0x490] sm:$0xff] }
 0x20e   :  { %2095 = vmatprep.subr.mxu1 %v8565_v47  ;;  %896 = vmatmul.mubr.f32.gmra.mrb[136].mxu0 %v251_v54  ;;  %v263_v47 = vld [vmem:[#allocation2 + $0x4a0] sm:$0xff]  ;;  %v8585_v54 = vld [vmem:[%s14490_s2 + $0x310] sm:$0xff]  ;;  %v8588_v55 = vld [vmem:[%s14490_s2 + $0x328] sm:$0xff] }
 0x20f   :  { %8436 = vmatprep.mubr.msk.f32.mxu0 %vm265_vm0, %v254_v56 }
 0x210   :  { %9406 = vmatmul.mubr.msk.f32.gmra.mrb[14].mxu1 %vm962_vm1, %v11833_v8  ;;  %v12145_v8 = vpop.f32.mrb[82].mxu0 }
 0x211   :  { %9408 = vmatprep.mubr.msk.f32.mxu1 %vm11354_vm2, %v11353_v52  ;;  %2096 = vmatpush1.msra.mxu1 %v8564_v50  ;;  %v764_v59 = vpop.f32.mrb[83].mxu0 }
 0x212   :  { %9951 = vmatprep.subr.bf16.mxu1 %v11352_v0  ;;  %901 = vmatmul.mubr.f32.gmra.mrb[138].mxu0 %v253_v57  ;;  %v12157_v61 = vpop.f32.mrb[84].mxu0  ;;  %v8606_v59 = vld [vmem:[%s14490_s2 + $0x368] sm:$0xff] }
 0x213   :  { %v769_v1 = vpop.f32.mrb[85].mxu0  ;;  %8437 = vmatprep.mubr.msk.f32.mxu0 %vm265_vm0, %v256_v16 }
 0x214   :  { %9409 = vmatmul.mubr.msk.f32.gmra.mrb[16].mxu1 %vm962_vm1, %v11841_v12  ;;  %v9952_v12 = vpack.c.bf16 %v8557_v58, %v8554_v33  ;;  %v12168_v3 = vpop.f32.mrb[86].mxu0  ;;  %v8603_v58 = vld [vmem:[%s14490_s2 + $0x350] sm:$0xff] }
 0x215   :  { %9411 = vmatprep.mubr.msk.f32.mxu1 %vm11354_vm2, %v11353_v52  ;;  %v774_v2 = vpop.f32.mrb[87].mxu0 }
 0x216   :  { %v12184_v21 = vpop.f32.mrb[88].mxu0  ;;  %906 = vmatmul.mubr.f32.gmra.mrb[140].mxu0 %v255_v27  ;;  %v8602_v2 = vld [vmem:[%s14490_s2 + $0x348] sm:$0xff]  ;;  %v8604_v27 = vld [vmem:[%s14490_s2 + $0x358] sm:$0xff] }
 0x217   :  { %v779_v51 = vpop.f32.mrb[89].mxu0  ;;  %8438 = vmatprep.mubr.msk.f32.mxu0 %vm265_vm0, %v258_v35 }
 0x218   :  { %9412 = vmatmul.mubr.msk.f32.gmra.mrb[18].mxu1 %vm962_vm1, %v11854_v20  ;;  %v9955_v20 = vpack.c.bf16 %v8563_v63, %v8560_v62  ;;  %v8591_v62 = vld [vmem:[%s14490_s2 + $0x340] sm:$0xff]  ;;  %v9971_v63 = vpack.c.bf16 %v8606_v59, %v8603_v58  ;;  %v8629_v59 = vld [vmem:[%s14490_s2 + $0x3d0] sm:$0xff] }
 0x219   :  { %2151 = vmatprep.mubr.f32.mxu1 %v11353_v52 }
 0x21a   :  { %911 = vmatmul.mubr.f32.gmra.mrb[142].mxu0 %v257_v34 }
 0x21b   :  { %8439 = vmatprep.mubr.msk.f32.mxu0 %vm265_vm0, %v260_v37  ;;  %v8631_v37 = vld [vmem:[%s14490_s2 + $0x3e0] sm:$0xff] }
 0x21c   :  { %8567 = vmatmul.mubr.msk.f32.vlgmr.msra.gmra.mrb[0].mxu1 %vm962_vm1, %v11865_v26 }
 0x21d   :  { %9953 = vmatpush3.bf16.msra.mxu1 %v9952_v12  ;;  %2157 = vmatprep.mubr.f32.mxu1 %v11353_v52 }
 0x21e   :  { %9954 = vmatprep.subr.bf16.mxu1 %v11352_v0 }
 0x220   :  { %8568 = vmatmul.mubr.msk.f32.gmra.mrb[2].mxu1 %vm962_vm1, %v11877_v32 }
 0x221   :  { %2163 = vmatprep.mubr.f32.mxu1 %v11353_v52  ;;  %9956 = vmatpush3.bf16.msra.mxu1 %v9955_v20 }
 0x222   :  { %9422 = vmatprep.subr.mxu1 %v11353_v52 }
 0x224   :  { %8569 = vmatmul.mubr.msk.f32.gmra.mrb[4].mxu1 %vm962_vm1, %v11886_v38 }
 0x225   :  { %2169 = vmatprep.mubr.f32.mxu1 %v11353_v52  ;;  %9423 = vmatpush3.msra.mxu1 %v8566_v6  ;;  %v8612_v6 = vld [vmem:[%s14490_s2 + $0x398] sm:$0xff] }
 0x226   :  { %9958 = vmatprep.subr.bf16.mxu1 %v9957_v7  ;;  %v9973_v7 = vpack.c.bf16 %v8605_v17, %v8602_v2  ;;  %v9975_v51 = vpack.c.bf16 %v8612_v6, %v8609_v45  ;;  %v8653_v6 = vld [vmem:[%s14490_s2 + $0x440] sm:$0xff] }
 0x228   :  { %8570 = vmatmul.mubr.msk.f32.gmra.mrb[6].mxu1 %vm962_vm1, %v11891_v41 }
 0x229   :  { %2175 = vmatprep.mubr.f32.mxu1 %v11353_v52 }
 0x22c   :  { %8571 = vmatmul.mubr.msk.f32.gmra.mrb[8].mxu1 %vm962_vm1, %v11908_v49 }
 0x22d   :  { %9424 = vmatprep.mubr.msk.f32.mxu1 %vm11354_vm2, %v11353_v52 }
 0x230   :  { %9425 = vmatmul.mubr.msk.f32.vlgmr.msra.gmra.mrb[10].mxu1 %vm962_vm1, %v11865_v26  ;;  %v259_v26 = vld [vmem:[#allocation2 + $0x480] sm:$0xff] }
 0x231   :  { %9960 = vmatpush1.bf16.msra.mxu1 %v9959_v22  ;;  %9427 = vmatprep.mubr.msk.f32.mxu1 %vm11354_vm2, %v11353_v52 }
 0x232   :  { %9962 = vmatprep.subr.bf16.mxu1 %v9961_v23  ;;  %916 = vmatmul.mubr.f32.gmra.mrb[144].mxu0 %v259_v26 }
 0x233   :  { %8440 = vmatprep.mubr.msk.f32.mxu0 %vm265_vm0, %v262_v42 }
 0x234   :  { %9428 = vmatmul.mubr.msk.f32.gmra.mrb[12].mxu1 %vm962_vm1, %v11877_v32  ;;  %v12235_v32 = vpop.f32.mrb[90].mxu0 }
 0x235   :  { %9430 = vmatprep.mubr.msk.f32.mxu1 %vm11354_vm2, %v11353_v52  ;;  %9964 = vmatpush1.bf16.msra.mxu1 %v9963_v31  ;;  %v784_v46 = vpop.f32.mrb[91].mxu0 }
 0x236   :  { %2326 = vmatprep.subr.mxu1 %v8590_v36  ;;  %921 = vmatmul.mubr.f32.gmra.mrb[146].mxu0 %v261_v44  ;;  %v12249_v50 = vpop.f32.mrb[92].mxu0  ;;  %v8628_v36 = vld [vmem:[%s14490_s2 + $0x3c8] sm:$0xff] }
 0x237   :  { %v789_v53 = vpop.f32.mrb[93].mxu0  ;;  %v9985_v42 = vpack.c.bf16 %v8631_v37, %v8628_v36  ;;  %v8654_v37 = vld [vmem:[%s14490_s2 + $0x448] sm:$0xff] }
 0x238   :  { %9431 = vmatmul.mubr.msk.f32.gmra.mrb[14].mxu1 %vm962_vm1, %v11886_v38  ;;  %v264_v38 = vld [vmem:[#allocation2 + $0x4a8] sm:$0xff]  ;;  %v12261_v56 = vpop.f32.mrb[94].mxu0 }
 0x239   :  { %9433 = vmatprep.mubr.msk.f32.mxu1 %vm11354_vm2, %v11353_v52  ;;  %2327 = vmatpush1.msra.mxu1 %v8589_v40  ;;  %v794_v57 = vpop.f32.mrb[95].mxu0  ;;  %v8616_v40 = vld [vmem:[%s14490_s2 + $0x3b8] sm:$0xff] }
 0x23a   :  { %9965 = vmatprep.subr.bf16.mxu1 %v11352_v0  ;;  %8441 = vmatprep.mubr.msk.f32.mxu0 %vm265_vm0, %v264_v38  ;;  %v12267_v33 = vpop.f32.mrb[96].mxu0  ;;  %v8627_v38 = vld [vmem:[%s14490_s2 + $0x3c0] sm:$0xff] }
 0x23b   :  { %926 = vmatmul.mubr.f32.gmra.mrb[148].mxu0 %v263_v47  ;;  %v799_v12 = vpop.f32.mrb[97].mxu0  ;;  %v8630_v47 = vld [vmem:[%s14490_s2 + $0x3d8] sm:$0xff] }
 0x23c   :  { %9434 = vmatmul.mubr.msk.f32.gmra.mrb[16].mxu1 %vm962_vm1, %v11891_v41  ;;  %v9966_v41 = vpack.c.bf16 %v8582_v60, %v8579_v48  ;;  %v12282_v1 = vpop.f32.mrb[98].mxu0  ;;  %v8634_v48 = vld [vmem:[%s14490_s2 + $0x3f8] sm:$0xff]  ;;  %v8637_v60 = vld [vmem:[%s14490_s2 + $0x410] sm:$0xff]  ;;  %v9987_v53 = vpack.c.bf16 %v8630_v47, %v8627_v38 }
 0x23d   :  { %9436 = vmatprep.mubr.msk.f32.mxu1 %vm11354_vm2, %v11353_v52  ;;  %v804_v20 = vpop.f32.mrb[99].mxu0 }
 0x23e   :  { %v12330_v16 = vpop.f32.mrb[100].mxu0  ;;  %v8638_v20 = vld [vmem:[%s14490_s2 + $0x418] sm:$0xff] }
 0x240   :  { %9437 = vmatmul.mubr.msk.f32.gmra.mrb[18].mxu1 %vm962_vm1, %v11908_v49  ;;  %v9969_v49 = vpack.c.bf16 %v8588_v55, %v8585_v54  ;;  %v8633_v54 = vld [vmem:[%s14490_s2 + $0x3f0] sm:$0xff]  ;;  %v8636_v55 = vld [vmem:[%s14490_s2 + $0x408] sm:$0xff] }
 0x241   :  { %2382 = vmatprep.mubr.f32.mxu1 %v11353_v52  ;;  %v9991_v57 = vpack.c.bf16 %v8636_v55, %v8633_v54  ;;  %v8666_v54 = vld [vmem:[%s14490_s2 + $0x4a8] sm:$0xff] }
 0x244   :  { %8592 = vmatmul.mubr.msk.f32.vlgmr.msra.gmra.mrb[0].mxu1 %vm962_vm1, %v11941_v9 }
 0x245   :  { %9967 = vmatpush3.bf16.msra.mxu1 %v9966_v41  ;;  %2388 = vmatprep.mubr.f32.mxu1 %v11353_v52  ;;  %v9989_v41 = vpack.c.bf16 %v8637_v60, %v8634_v48  ;;  %v8678_v60 = vld [vmem:[%s14490_s2 + $0x4b8] sm:$0xff] }
 0x246   :  { %9968 = vmatprep.subr.bf16.mxu1 %v11352_v0 }
 0x248   :  { %8593 = vmatmul.mubr.msk.f32.gmra.mrb[2].mxu1 %vm962_vm1, %v11949_v14 }
 0x249   :  { %2394 = vmatprep.mubr.f32.mxu1 %v11353_v52  ;;  %9970 = vmatpush3.bf16.msra.mxu1 %v9969_v49  ;;  %v8640_v49 = vld [vmem:[%s14490_s2 + $0x428] sm:$0xff] }
 0x24a   :  { %9447 = vmatprep.subr.mxu1 %v11353_v52 }
 0x24c   :  { %8594 = vmatmul.mubr.msk.f32.gmra.mrb[4].mxu1 %vm962_vm1, %v11961_v25 }
 0x24d   :  { %2400 = vmatprep.mubr.f32.mxu1 %v11353_v52  ;;  %9448 = vmatpush3.msra.mxu1 %v8591_v62 }
 0x24e   :  { %9972 = vmatprep.subr.bf16.mxu1 %v9971_v63  ;;  %v8635_v63 = vld [vmem:[%s14490_s2 + $0x400] sm:$0xff] }
 0x250   :  { %8595 = vmatmul.mubr.msk.f32.gmra.mrb[6].mxu1 %vm962_vm1, %v11972_v29 }
 0x251   :  { %2406 = vmatprep.mubr.f32.mxu1 %v11353_v52 }
 0x254   :  { %8596 = vmatmul.mubr.msk.f32.gmra.mrb[8].mxu1 %vm962_vm1, %v11988_v30 }
 0x255   :  { %9449 = vmatprep.mubr.msk.f32.mxu1 %vm11354_vm2, %v11353_v52 }
 0x258   :  { %9450 = vmatmul.mubr.msk.f32.vlgmr.msra.gmra.mrb[10].mxu1 %vm962_vm1, %v11941_v9  ;;  %v8614_v9 = vld [vmem:[%s14490_s2 + $0x3a8] sm:$0xff] }
 0x259   :  { %9974 = vmatpush1.bf16.msra.mxu1 %v9973_v7  ;;  %9452 = vmatprep.mubr.msk.f32.mxu1 %vm11354_vm2, %v11353_v52  ;;  %v8656_v7 = vld [vmem:[%s14490_s2 + $0x458] sm:$0xff] }
 0x25a   :  { %9976 = vmatprep.subr.bf16.mxu1 %v9975_v51  ;;  %v9999_v13 = vpack.c.bf16 %v8656_v7, %v8653_v6  ;;  %v4469_v6 = vld [vmem:[%s14491_s3 + $0x88] sm:$0xff]  ;;  %v8689_v7 = vld [vmem:[%s14490_s2 + $0x510] sm:$0xff] }
 0x25c   :  { %9453 = vmatmul.mubr.msk.f32.gmra.mrb[12].mxu1 %vm962_vm1, %v11949_v14  ;;  %v809_v14 = vpop.f32.mrb[101].mxu0 }
 0x25d   :  { %9455 = vmatprep.mubr.msk.f32.mxu1 %vm11354_vm2, %v11353_v52  ;;  %9978 = vmatpush1.bf16.msra.mxu1 %v9977_v19  ;;  %v12343_v22 = vpop.f32.mrb[102].mxu0  ;;  %v8655_v14 = vld [vmem:[%s14490_s2 + $0x450] sm:$0xff] }
 0x25e   :  { %2557 = vmatprep.subr.mxu1 %v8615_v15  ;;  %v814_v23 = vpop.f32.mrb[103].mxu0 }
 0x25f   :  { %v12354_v35 = vpop.f32.mrb[104].mxu0 }
 0x260   :  { %9456 = vmatmul.mubr.msk.f32.gmra.mrb[14].mxu1 %vm962_vm1, %v11961_v25  ;;  %v8607_v25 = vld [vmem:[%s14490_s2 + $0x370] sm:$0xff]  ;;  %v819_v31 = vpop.f32.mrb[105].mxu0 }
 0x261   :  { %9458 = vmatprep.mubr.msk.f32.mxu1 %vm11354_vm2, %v11353_v52  ;;  %2558 = vmatpush1.msra.mxu1 %v8614_v9  ;;  %v12360_v34 = vpop.f32.mrb[106].mxu0  ;;  %v8652_v9 = vld [vmem:[%s14490_s2 + $0x438] sm:$0xff] }
 0x262   :  { %9979 = vmatprep.subr.bf16.mxu1 %v11352_v0  ;;  %v824_v26 = vpop.f32.mrb[107].mxu0  ;;  %v10001_v23 = vpack.c.bf16 %v8655_v14, %v8652_v9  ;;  %v8679_v9 = vld [vmem:[%s14490_s2 + $0x4c0] sm:$0xff]  ;;  %v8682_v14 = vld [vmem:[%s14490_s2 + $0x4d8] sm:$0xff] }
 0x264   :  { %9459 = vmatmul.mubr.msk.f32.gmra.mrb[16].mxu1 %vm962_vm1, %v11972_v29  ;;  %v9980_v29 = vpack.c.bf16 %v8607_v25, %v8604_v27  ;;  %v8659_v27 = vld [vmem:[%s14490_s2 + $0x470] sm:$0xff]  ;;  %v8662_v25 = vld [vmem:[%s14490_s2 + $0x488] sm:$0xff] }
 0x265   :  { %9461 = vmatprep.mubr.msk.f32.mxu1 %vm11354_vm2, %v11353_v52 }
 0x268   :  { %9462 = vmatmul.mubr.msk.f32.gmra.mrb[18].mxu1 %vm962_vm1, %v11988_v30  ;;  %v9983_v30 = vpack.c.bf16 %v8613_v28, %v8610_v24  ;;  %v8658_v24 = vld [vmem:[%s14490_s2 + $0x468] sm:$0xff]  ;;  %v8661_v28 = vld [vmem:[%s14490_s2 + $0x480] sm:$0xff] }
 0x269   :  { %2613 = vmatprep.mubr.f32.mxu1 %v11353_v52  ;;  %v10005_v31 = vpack.c.bf16 %v8661_v28, %v8658_v24 }
 0x26c   :  { %8617 = vmatmul.mubr.msk.f32.vlgmr.msra.gmra.mrb[0].mxu1 %vm962_vm1, %v12039_v39 }
 0x26d   :  { %9981 = vmatpush3.bf16.msra.mxu1 %v9980_v29  ;;  %2619 = vmatprep.mubr.f32.mxu1 %v11353_v52  ;;  %v10003_v29 = vpack.c.bf16 %v8662_v25, %v8659_v27 }
 0x26e   :  { %9982 = vmatprep.subr.bf16.mxu1 %v11352_v0  ;;  %v12375_v44 = vpop.f32.mrb[108].mxu0 }
 0x26f   :  { %v829_v46 = vpop.f32.mrb[109].mxu0 }
 0x270   :  { %8618 = vmatmul.mubr.msk.f32.gmra.mrb[2].mxu1 %vm962_vm1, %v12047_v43  ;;  %v8663_v46 = vld [vmem:[%s14490_s2 + $0x490] sm:$0xff] }
 0x271   :  { %2625 = vmatprep.mubr.f32.mxu1 %v11353_v52  ;;  %9984 = vmatpush3.bf16.msra.mxu1 %v9983_v30  ;;  %v8665_v30 = vld [vmem:[%s14490_s2 + $0x4a0] sm:$0xff] }
 0x272   :  { %9472 = vmatprep.subr.mxu1 %v11353_v52  ;;  %v12423_v58 = vpop.f32.mrb[110].mxu0 }
 0x274   :  { %8619 = vmatmul.mubr.msk.f32.gmra.mrb[4].mxu1 %vm962_vm1, %v12059_v5 }
 0x275   :  { %2631 = vmatprep.mubr.f32.mxu1 %v11353_v52  ;;  %9473 = vmatpush3.msra.mxu1 %v8616_v40 }
 0x276   :  { %9986 = vmatprep.subr.bf16.mxu1 %v9985_v42  ;;  %v8660_v42 = vld [vmem:[%s14490_s2 + $0x478] sm:$0xff] }
 0x278   :  { %8620 = vmatmul.mubr.msk.f32.gmra.mrb[6].mxu1 %vm962_vm1, %v12070_v10 }
 0x279   :  { %2637 = vmatprep.mubr.f32.mxu1 %v11353_v52 }
 0x27c   :  { %8621 = vmatmul.mubr.msk.f32.gmra.mrb[8].mxu1 %vm962_vm1, %v12086_v18 }
 0x27d   :  { %9474 = vmatprep.mubr.msk.f32.mxu1 %vm11354_vm2, %v11353_v52 }
 0x280   :  { %9475 = vmatmul.mubr.msk.f32.vlgmr.msra.gmra.mrb[10].mxu1 %vm962_vm1, %v12039_v39  ;;  %v8639_v39 = vld [vmem:[%s14490_s2 + $0x420] sm:$0xff] }
 0x281   :  { %9988 = vmatpush1.bf16.msra.mxu1 %v9987_v53  ;;  %9477 = vmatprep.mubr.msk.f32.mxu1 %vm11354_vm2, %v11353_v52  ;;  %v8681_v53 = vld [vmem:[%s14490_s2 + $0x4d0] sm:$0xff] }
 0x282   :  { %9990 = vmatprep.subr.bf16.mxu1 %v9989_v41  ;;  %v10013_v55 = vpack.c.bf16 %v8681_v53, %v8678_v60 }
 0x284   :  { %9478 = vmatmul.mubr.msk.f32.gmra.mrb[12].mxu1 %vm962_vm1, %v12047_v43  ;;  %v834_v43 = vpop.f32.mrb[111].mxu0 }
 0x285   :  { %9480 = vmatprep.mubr.msk.f32.mxu1 %vm11354_vm2, %v11353_v52  ;;  %9992 = vmatpush1.bf16.msra.mxu1 %v9991_v57  ;;  %v12436_v12 = vpop.f32.mrb[112].mxu0  ;;  %v8680_v43 = vld [vmem:[%s14490_s2 + $0x4c8] sm:$0xff] }
 0x286   :  { %2788 = vmatprep.subr.mxu1 %v8640_v49  ;;  %v839_v62 = vpop.f32.mrb[113].mxu0 }
 0x288   :  { %9481 = vmatmul.mubr.msk.f32.gmra.mrb[14].mxu1 %vm962_vm1, %v12059_v5  ;;  %v8632_v5 = vld [vmem:[%s14490_s2 + $0x3e8] sm:$0xff] }
 0x289   :  { %9483 = vmatprep.mubr.msk.f32.mxu1 %vm11354_vm2, %v11353_v52  ;;  %2789 = vmatpush1.msra.mxu1 %v8639_v39  ;;  %v8677_v39 = vld [vmem:[%s14490_s2 + $0x4b0] sm:$0xff] }
 0x28a   :  { %9993 = vmatprep.subr.bf16.mxu1 %v11352_v0  ;;  %v10015_v62 = vpack.c.bf16 %v8680_v43, %v8677_v39  ;;  %v4470_v39 = vld [vmem:[%s14491_s3 + $0x90] sm:$0xff] }
 0x28c   :  { %9484 = vmatmul.mubr.msk.f32.gmra.mrb[16].mxu1 %vm962_vm1, %v12070_v10  ;;  %v9994_v10 = vpack.c.bf16 %v8632_v5, %v8629_v59  ;;  %v8684_v59 = vld [vmem:[%s14490_s2 + $0x4e8] sm:$0xff]  ;;  %v8687_v5 = vld [vmem:[%s14490_s2 + $0x500] sm:$0xff] }
 0x28d   :  { %9486 = vmatprep.mubr.msk.f32.mxu1 %vm11354_vm2, %v11353_v52  ;;  %v12447_v2 = vpop.f32.mrb[114].mxu0 }
 0x28e   :  { %v844_v17 = vpop.f32.mrb[115].mxu0 }
 0x290   :  { %9487 = vmatmul.mubr.msk.f32.gmra.mrb[18].mxu1 %vm962_vm1, %v12086_v18  ;;  %v9997_v18 = vpack.c.bf16 %v8638_v20, %v8635_v63  ;;  %v8683_v63 = vld [vmem:[%s14490_s2 + $0x4e0] sm:$0xff]  ;;  %v8686_v20 = vld [vmem:[%s14490_s2 + $0x4f8] sm:$0xff] }
 0x291   :  { %2844 = vmatprep.mubr.f32.mxu1 %v11353_v52  ;;  %v12453_v45 = vpop.f32.mrb[116].mxu0  ;;  %v10019_v17 = vpack.c.bf16 %v8686_v20, %v8683_v63  ;;  %v8707_v20 = vld [vmem:[%s14490_s2 + $0x550] sm:$0xff] }
 0x292   :  { %v849_v51 = vpop.f32.mrb[117].mxu0 }
 0x294   :  { %8642 = vmatmul.mubr.msk.f32.vlgmr.msra.gmra.mrb[0].mxu1 %vm962_vm1, %v12137_v4 }
 0x295   :  { %9995 = vmatpush3.bf16.msra.mxu1 %v9994_v10  ;;  %2850 = vmatprep.mubr.f32.mxu1 %v11353_v52  ;;  %v12468_v19 = vpop.f32.mrb[118].mxu0  ;;  %v10017_v10 = vpack.c.bf16 %v8687_v5, %v8684_v59  ;;  %v4454_v59 = vld [vmem:[%s14491_s3 + $0x10] sm:$0xff]  ;;  %v8714_v5 = vld [vmem:[%s14490_s2 + $0x588] sm:$0xff] }
 0x296   :  { %9996 = vmatprep.subr.bf16.mxu1 %v11352_v0  ;;  %v854_v15 = vpop.f32.mrb[119].mxu0 }
 0x298   :  { %8643 = vmatmul.mubr.msk.f32.gmra.mrb[2].mxu1 %vm962_vm1, %v12145_v8 }
 0x299   :  { %2856 = vmatprep.mubr.f32.mxu1 %v11353_v52  ;;  %9998 = vmatpush3.bf16.msra.mxu1 %v9997_v18  ;;  %v12516_v36 = vpop.f32.mrb[120].mxu0  ;;  %v8690_v18 = vld [vmem:[%s14490_s2 + $0x518] sm:$0xff] }
 0x29a   :  { %9497 = vmatprep.subr.mxu1 %v11353_v52 }
 0x29c   :  { %8644 = vmatmul.mubr.msk.f32.gmra.mrb[4].mxu1 %vm962_vm1, %v12157_v61 }
 0x29d   :  { %2862 = vmatprep.mubr.f32.mxu1 %v11353_v52  ;;  %9498 = vmatpush3.msra.mxu1 %v8641_v11  ;;  %v4453_v11 = vld [vmem:[%s14491_s3 + $0x8] sm:$0xff] }
 0x29e   :  { %10000 = vmatprep.subr.bf16.mxu1 %v9999_v13 }
 0x2a0   :  { %8645 = vmatmul.mubr.msk.f32.gmra.mrb[6].mxu1 %vm962_vm1, %v12168_v3 }
 0x2a1   :  { %2868 = vmatprep.mubr.f32.mxu1 %v11353_v52 }
 0x2a4   :  { %8646 = vmatmul.mubr.msk.f32.gmra.mrb[8].mxu1 %vm962_vm1, %v12184_v21 }
 0x2a5   :  { %9499 = vmatprep.mubr.msk.f32.mxu1 %vm11354_vm2, %v11353_v52 }
 0x2a8   :  { %9500 = vmatmul.mubr.msk.f32.vlgmr.msra.gmra.mrb[10].mxu1 %vm962_vm1, %v12137_v4  ;;  %v8664_v4 = vld [vmem:[%s14490_s2 + $0x498] sm:$0xff] }
 0x2a9   :  { %10002 = vmatpush1.bf16.msra.mxu1 %v10001_v23  ;;  %9502 = vmatprep.mubr.msk.f32.mxu1 %vm11354_vm2, %v11353_v52  ;;  %v8685_v23 = vld [vmem:[%s14490_s2 + $0x4f0] sm:$0xff] }
 0x2aa   :  { %10004 = vmatprep.subr.bf16.mxu1 %v10003_v29  ;;  %v8688_v29 = vld [vmem:[%s14490_s2 + $0x508] sm:$0xff] }
 0x2ac   :  { %9503 = vmatmul.mubr.msk.f32.gmra.mrb[12].mxu1 %vm962_vm1, %v12145_v8  ;;  %v859_v8 = vpop.f32.mrb[121].mxu0 }
 0x2ad   :  { %9505 = vmatprep.mubr.msk.f32.mxu1 %vm11354_vm2, %v11353_v52  ;;  %10006 = vmatpush1.bf16.msra.mxu1 %v10005_v31  ;;  %v12529_v26 = vpop.f32.mrb[122].mxu0 }
 0x2ae   :  { %3019 = vmatprep.subr.mxu1 %v8665_v30  ;;  %v864_v40 = vpop.f32.mrb[123].mxu0  ;;  %v8703_v30 = vld [vmem:[%s14490_s2 + $0x530] sm:$0xff] }
 0x2b0   :  { %9506 = vmatmul.mubr.msk.f32.gmra.mrb[14].mxu1 %vm962_vm1, %v12157_v61  ;;  %v8657_v61 = vld [vmem:[%s14490_s2 + $0x460] sm:$0xff] }
 0x2b1   :  { %9508 = vmatprep.mubr.msk.f32.mxu1 %vm11354_vm2, %v11353_v52  ;;  %3020 = vmatpush1.msra.mxu1 %v8664_v4  ;;  %v8706_v4 = vld [vmem:[%s14490_s2 + $0x548] sm:$0xff] }
 0x2b2   :  { %10007 = vmatprep.subr.bf16.mxu1 %v11352_v0 }
 0x2b4   :  { %9509 = vmatmul.mubr.msk.f32.gmra.mrb[16].mxu1 %vm962_vm1, %v12168_v3  ;;  %v10008_v3 = vpack.c.bf16 %v8657_v61, %v8654_v37  ;;  %v8691_v37 = vld [vmem:[%s14490_s2 + $0x520] sm:$0xff]  ;;  %v10027_v61 = vpack.c.bf16 %v8706_v4, %v8703_v30  ;;  %v8734_v30 = vld [vmem:[%s14490_s2 + $0x5d8] sm:$0xff]  ;;  %v8737_v4 = vld [vmem:[%s14490_s2 + $0x5f0] sm:$0xff] }
 0x2b5   :  { %9511 = vmatprep.mubr.msk.f32.mxu1 %vm11354_vm2, %v11353_v52  ;;  %v12540_v38 = vpop.f32.mrb[124].mxu0 }
 0x2b6   :  { %v869_v47 = vpop.f32.mrb[125].mxu0 }
 0x2b7   :  { %v8709_v47 = vld [vmem:[%s14490_s2 + $0x560] sm:$0xff] }
 0x2b8   :  { %9512 = vmatmul.mubr.msk.f32.gmra.mrb[18].mxu1 %vm962_vm1, %v12184_v21  ;;  %v10011_v21 = vpack.c.bf16 %v8663_v46, %v8660_v42  ;;  %v8702_v42 = vld [vmem:[%s14490_s2 + $0x528] sm:$0xff]  ;;  %v8705_v46 = vld [vmem:[%s14490_s2 + $0x540] sm:$0xff] }
 0x2b9   :  { %3075 = vmatprep.mubr.f32.mxu1 %v11353_v52  ;;  %v12546_v48 = vpop.f32.mrb[126].mxu0  ;;  %v10029_v60 = vpack.c.bf16 %v8705_v46, %v8702_v42  ;;  %v4472_v42 = vld [vmem:[%s14491_s3 + $0xa0] sm:$0xff]  ;;  %v4473_v46 = vld [vmem:[%s14491_s3 + $0xa8] sm:$0xff] }
 0x2ba   :  { %v874_v41 = vpop.f32.mrb[127].mxu0 }
 0x2bb   :  { %v8708_v41 = vld [vmem:[%s14490_s2 + $0x558] sm:$0xff] }
 0x2bc   :  { %8667 = vmatmul.mubr.msk.f32.vlgmr.msra.gmra.mrb[0].mxu1 %vm962_vm1, %v12235_v32 }
 0x2bd   :  { %10009 = vmatpush3.bf16.msra.mxu1 %v10008_v3  ;;  %3081 = vmatprep.mubr.f32.mxu1 %v11353_v52  ;;  %v12561_v57 = vpop.f32.mrb[128].mxu0 }
 0x2be   :  { %10010 = vmatprep.subr.bf16.mxu1 %v11352_v0  ;;  %v879_v49 = vpop.f32.mrb[129].mxu0 }
 0x2bf   :  { %v8715_v49 = vld [vmem:[%s14490_s2 + $0x590] sm:$0xff] }
 0x2c0   :  { %8668 = vmatmul.mubr.msk.f32.gmra.mrb[2].mxu1 %vm962_vm1, %v12249_v50 }
 0x2c1   :  { %3087 = vmatprep.mubr.f32.mxu1 %v11353_v52  ;;  %10012 = vmatpush3.bf16.msra.mxu1 %v10011_v21  ;;  %v12626_v15 = vpop.f32.mrb[130].mxu0  ;;  %v8712_v21 = vld [vmem:[%s14490_s2 + $0x578] sm:$0xff] }
 0x2c2   :  { %9522 = vmatprep.subr.mxu1 %v11353_v52  ;;  %v10031_v53 = vpack.c.bf16 %v8712_v21, %v8709_v47  ;;  %v12823_v21 = vpack.c.bf16 %v4473_v46, %v4472_v42  ;;  %v8752_v42 = vld [vmem:[%s14490_s2 + $0x618] sm:$0xff]  ;;  %v8755_v46 = vld [vmem:[%s14490_s2 + $0x630] sm:$0xff] }
 0x2c4   :  { %8669 = vmatmul.mubr.msk.f32.gmra.mrb[4].mxu1 %vm962_vm1, %v12261_v56 }
 0x2c5   :  { %3093 = vmatprep.mubr.f32.mxu1 %v11353_v52  ;;  %9523 = vmatpush3.msra.mxu1 %v8666_v54  ;;  %v8711_v54 = vld [vmem:[%s14490_s2 + $0x570] sm:$0xff] }
 0x2c6   :  { %10014 = vmatprep.subr.bf16.mxu1 %v10013_v55  ;;  %v10033_v55 = vpack.c.bf16 %v8711_v54, %v8708_v41  ;;  %v8740_v41 = vld [vmem:[%s14490_s2 + $0x608] sm:$0xff]  ;;  %v8739_v54 = vld [vmem:[%s14490_s2 + $0x600] sm:$0xff] }
 0x2c8   :  { %8670 = vmatmul.mubr.msk.f32.gmra.mrb[6].mxu1 %vm962_vm1, %v12267_v33 }
 0x2c9   :  { %3099 = vmatprep.mubr.f32.mxu1 %v11353_v52 }
 0x2cc   :  { %8671 = vmatmul.mubr.msk.f32.gmra.mrb[8].mxu1 %vm962_vm1, %v12282_v1 }
 0x2cd   :  { %9524 = vmatprep.mubr.msk.f32.mxu1 %vm11354_vm2, %v11353_v52 }
 0x2d0   :  { %9525 = vmatmul.mubr.msk.f32.vlgmr.msra.gmra.mrb[10].mxu1 %vm962_vm1, %v12235_v32  ;;  %v4468_v32 = vld [vmem:[%s14491_s3 + $0x80] sm:$0xff] }
 0x2d1   :  { %10016 = vmatpush1.bf16.msra.mxu1 %v10015_v62  ;;  %9527 = vmatprep.mubr.msk.f32.mxu1 %vm11354_vm2, %v11353_v52  ;;  %v12611_v51 = vpack.c.bf16 %v4469_v6, %v4468_v32  ;;  %v8710_v32 = vld [vmem:[%s14490_s2 + $0x568] sm:$0xff]  ;;  %v8713_v6 = vld [vmem:[%s14490_s2 + $0x580] sm:$0xff] }
 0x2d2   :  { %10018 = vmatprep.subr.bf16.mxu1 %v10017_v10 }
 0x2d3   :  { %10084 = vmatprep.subr.bf16.mxu0 %v12611_v51 }
 0x2d4   :  { %9528 = vmatmul.mubr.msk.f32.gmra.mrb[12].mxu1 %vm962_vm1, %v12249_v50  ;;  %v4452_v50 = vld [vmem:[%s14491_s3] sm:$0xff] }
 0x2d5   :  { %9530 = vmatprep.mubr.msk.f32.mxu1 %vm11354_vm2, %v11353_v52  ;;  %10020 = vmatpush1.bf16.msra.mxu1 %v10019_v17  ;;  %v12624_v13 = vpack.c.bf16 %v4453_v11, %v4452_v50 }
 0x2d6   :  { %3250 = vmatprep.subr.mxu1 %v8690_v18 }
 0x2d7   :  { %10086 = vmatpush3.bf16.msra.mxu0 %v12624_v13 }
 0x2d8   :  { %9531 = vmatmul.mubr.msk.f32.gmra.mrb[14].mxu1 %vm962_vm1, %v12261_v56  ;;  %v884_v56 = vpop.f32.mrb[131].mxu0 }
 0x2d9   :  { %9533 = vmatprep.mubr.msk.f32.mxu1 %vm11354_vm2, %v11353_v52  ;;  %3251 = vmatpush1.msra.mxu1 %v8689_v7  ;;  %v12640_v27 = vpop.f32.mrb[132].mxu0  ;;  %v8728_v56 = vld [vmem:[%s14490_s2 + $0x5a8] sm:$0xff] }
 0x2da   :  { %10021 = vmatprep.subr.bf16.mxu1 %v11352_v0  ;;  %v889_v25 = vpop.f32.mrb[133].mxu0 }
 0x2db   :  { %v8716_v25 = vld [vmem:[%s14490_s2 + $0x598] sm:$0xff] }
 0x2dc   :  { %9534 = vmatmul.mubr.msk.f32.gmra.mrb[16].mxu1 %vm962_vm1, %v12267_v33  ;;  %v10022_v33 = vpack.c.bf16 %v8682_v14, %v8679_v9  ;;  %v8731_v9 = vld [vmem:[%s14490_s2 + $0x5c0] sm:$0xff] }
 0x2dd   :  { %9536 = vmatprep.mubr.msk.f32.mxu1 %vm11354_vm2, %v11353_v52  ;;  %v12651_v24 = vpop.f32.mrb[134].mxu0 }
 0x2de   :  { %v894_v28 = vpop.f32.mrb[135].mxu0 }
 0x2df   :  { %v8727_v28 = vld [vmem:[%s14490_s2 + $0x5a0] sm:$0xff] }
 0x2e0   :  { %9537 = vmatmul.mubr.msk.f32.gmra.mrb[18].mxu1 %vm962_vm1, %v12282_v1  ;;  %v10025_v1 = vpack.c.bf16 %v8688_v29, %v8685_v23 }
 0x2e1   :  { %3306 = vmatprep.mubr.f32.mxu1 %v11353_v52  ;;  %v12657_v31 = vpop.f32.mrb[136].mxu0 }
 0x2e2   :  { %v899_v8 = vpop.f32.mrb[137].mxu0 }
 0x2e4   :  { %8692 = vmatmul.mubr.msk.f32.vlgmr.msra.gmra.mrb[0].mxu1 %vm962_vm1, %v12330_v16 }
 0x2e5   :  { %10023 = vmatpush3.bf16.msra.mxu1 %v10022_v33  ;;  %3312 = vmatprep.mubr.f32.mxu1 %v11353_v52  ;;  %v12672_v40 = vpop.f32.mrb[138].mxu0  ;;  %v10041_v33 = vpack.c.bf16 %v8731_v9, %v8728_v56  ;;  %v4480_v56 = vld [vmem:[%s14491_s3 + $0xe0] sm:$0xff]  ;;  %v4481_v9 = vld [vmem:[%s14491_s3 + $0xe8] sm:$0xff] }
 0x2e6   :  { %10024 = vmatprep.subr.bf16.mxu1 %v11352_v0  ;;  %v904_v3 = vpop.f32.mrb[139].mxu0 }
 0x2e7   :  { %v8736_v3 = vld [vmem:[%s14490_s2 + $0x5e8] sm:$0xff] }
 0x2e8   :  { %8693 = vmatmul.mubr.msk.f32.gmra.mrb[2].mxu1 %vm962_vm1, %v12343_v22 }
 0x2e9   :  { %3318 = vmatprep.mubr.f32.mxu1 %v11353_v52  ;;  %10026 = vmatpush3.bf16.msra.mxu1 %v10025_v1  ;;  %v12738_v10 = vpop.f32.mrb[140].mxu0  ;;  %v8730_v1 = vld [vmem:[%s14490_s2 + $0x5b8] sm:$0xff] }
 0x2ea   :  { %9547 = vmatprep.subr.mxu1 %v11353_v52  ;;  %v909_v63 = vpop.f32.mrb[141].mxu0  ;;  %v10043_v8 = vpack.c.bf16 %v8730_v1, %v8727_v28  ;;  %v8738_v28 = vld [vmem:[%s14490_s2 + $0x5f8] sm:$0xff]  ;;  %v12934_v1 = vpack.c.bf16 %v4481_v9, %v4480_v56  ;;  %v8783_v9 = vld [vmem:[%s14490_s2 + $0x6c0] sm:$0xff] }
 0x2eb   :  { %v4460_v63 = vld [vmem:[%s14491_s3 + $0x40] sm:$0xff] }
 0x2ec   :  { %8694 = vmatmul.mubr.msk.f32.gmra.mrb[4].mxu1 %vm962_vm1, %v12354_v35 }
 0x2ed   :  { %3324 = vmatprep.mubr.f32.mxu1 %v11353_v52  ;;  %9548 = vmatpush3.msra.mxu1 %v8691_v37  ;;  %v12751_v17 = vpop.f32.mrb[142].mxu0  ;;  %v10045_v37 = vpack.c.bf16 %v8737_v4, %v8734_v30 }
 0x2ee   :  { %10028 = vmatprep.subr.bf16.mxu1 %v10027_v61  ;;  %v914_v18 = vpop.f32.mrb[143].mxu0  ;;  %v8733_v61 = vld [vmem:[%s14490_s2 + $0x5d0] sm:$0xff] }
 0x2ef   :  { %v10047_v47 = vpack.c.bf16 %v8736_v3, %v8733_v61  ;;  %v4479_v18 = vld [vmem:[%s14491_s3 + $0xd8] sm:$0xff]  ;;  %v8741_v61 = vld [vmem:[%s14490_s2 + $0x610] sm:$0xff] }
 0x2f0   :  { %8695 = vmatmul.mubr.msk.f32.gmra.mrb[6].mxu1 %vm962_vm1, %v12360_v34 }
 0x2f1   :  { %3330 = vmatprep.mubr.f32.mxu1 %v11353_v52 }
 0x2f4   :  { %8696 = vmatmul.mubr.msk.f32.gmra.mrb[8].mxu1 %vm962_vm1, %v12375_v44 }
 0x2f5   :  { %9549 = vmatprep.mubr.msk.f32.mxu1 %vm11354_vm2, %v11353_v52 }
 0x2f8   :  { %9550 = vmatmul.mubr.msk.f32.vlgmr.msra.gmra.mrb[10].mxu1 %vm962_vm1, %v12330_v16  ;;  %v4471_v16 = vld [vmem:[%s14491_s3 + $0x98] sm:$0xff] }
 0x2f9   :  { %10030 = vmatpush1.bf16.msra.mxu1 %v10029_v60  ;;  %9552 = vmatprep.mubr.msk.f32.mxu1 %vm11354_vm2, %v11353_v52  ;;  %v12719_v43 = vpack.c.bf16 %v4471_v16, %v4470_v39  ;;  %v4456_v60 = vld [vmem:[%s14491_s3 + $0x20] sm:$0xff] }
 0x2fa   :  { %10032 = vmatprep.subr.bf16.mxu1 %v10031_v53  ;;  %v4476_v16 = vld [vmem:[%s14491_s3 + $0xc0] sm:$0xff] }
 0x2fb   :  { %10088 = vmatprep.subr.bf16.mxu0 %v12719_v43 }
 0x2fc   :  { %9553 = vmatmul.mubr.msk.f32.gmra.mrb[12].mxu1 %vm962_vm1, %v12343_v22  ;;  %v4455_v22 = vld [vmem:[%s14491_s3 + $0x18] sm:$0xff] }
 0x2fd   :  { %9555 = vmatprep.mubr.msk.f32.mxu1 %vm11354_vm2, %v11353_v52  ;;  %10034 = vmatpush1.bf16.msra.mxu1 %v10033_v55  ;;  %v12730_v62 = vpack.c.bf16 %v4455_v22, %v4454_v59  ;;  %v4474_v55 = vld [vmem:[%s14491_s3 + $0xb0] sm:$0xff]  ;;  %v4477_v59 = vld [vmem:[%s14491_s3 + $0xc8] sm:$0xff] }
 0x2fe   :  { %3481 = vmatprep.subr.mxu1 %v8715_v49  ;;  %v4458_v49 = vld [vmem:[%s14491_s3 + $0x30] sm:$0xff] }
 0x2ff   :  { %10090 = vmatpush3.bf16.msra.mxu0 %v12730_v62 }
 0x300   :  { %9556 = vmatmul.mubr.msk.f32.gmra.mrb[14].mxu1 %vm962_vm1, %v12354_v35  ;;  %v8704_v35 = vld [vmem:[%s14490_s2 + $0x538] sm:$0xff]  ;;  %10092 = vmatprep.subr.bf16.mxu0 %v12823_v21 }
 0x301   :  { %9558 = vmatprep.mubr.msk.f32.mxu1 %vm11354_vm2, %v11353_v52  ;;  %3482 = vmatpush1.msra.mxu1 %v8714_v5  ;;  %v12872_v5 = vpack.c.bf16 %v4477_v59, %v4476_v16  ;;  %v8763_v16 = vld [vmem:[%s14490_s2 + $0x670] sm:$0xff] }
 0x302   :  { %10035 = vmatprep.subr.bf16.mxu1 %v11352_v0 }
 0x304   :  { %9559 = vmatmul.mubr.msk.f32.gmra.mrb[16].mxu1 %vm962_vm1, %v12360_v34  ;;  %v10036_v34 = vpack.c.bf16 %v8707_v20, %v8704_v35  ;;  %v4461_v35 = vld [vmem:[%s14491_s3 + $0x48] sm:$0xff]  ;;  %v4478_v20 = vld [vmem:[%s14491_s3 + $0xd0] sm:$0xff] }
 0x305   :  { %9561 = vmatprep.mubr.msk.f32.mxu1 %vm11354_vm2, %v11353_v52  ;;  %v12762_v7 = vpop.f32.mrb[144].mxu0 }
 0x306   :  { %v919_v50 = vpop.f32.mrb[145].mxu0 }
 0x307   :  { %v4463_v50 = vld [vmem:[%s14491_s3 + $0x58] sm:$0xff] }
 0x308   :  { %9562 = vmatmul.mubr.msk.f32.gmra.mrb[18].mxu1 %vm962_vm1, %v12375_v44  ;;  %v10039_v44 = vpack.c.bf16 %v8713_v6, %v8710_v32  ;;  %v12895_v32 = vpack.c.bf16 %v4479_v18, %v4478_v20  ;;  %v4462_v6 = vld [vmem:[%s14491_s3 + $0x50] sm:$0xff] }
 0x309   :  { %3537 = vmatprep.mubr.f32.mxu1 %v11353_v52  ;;  %v12768_v11 = vpop.f32.mrb[146].mxu0  ;;  %v8777_v18 = vld [vmem:[%s14490_s2 + $0x690] sm:$0xff] }
 0x30a   :  { %v924_v14 = vpop.f32.mrb[147].mxu0 }
 0x30b   :  { %v12918_v14 = vpack.c.bf16 %v4463_v50, %v4462_v6  ;;  %v8780_v6 = vld [vmem:[%s14490_s2 + $0x6a8] sm:$0xff] }
 0x30c   :  { %8717 = vmatmul.mubr.msk.f32.vlgmr.msra.gmra.mrb[0].mxu1 %vm962_vm1, %v12423_v58  ;;  %v8784_v50 = vld [vmem:[%s14490_s2 + $0x6c8] sm:$0xff] }
 0x30d   :  { %10037 = vmatpush3.bf16.msra.mxu1 %v10036_v34  ;;  %3543 = vmatprep.mubr.f32.mxu1 %v11353_v52  ;;  %v12890_v34 = vpack.c.bf16 %v4461_v35, %v4460_v63  ;;  %v8781_v63 = vld [vmem:[%s14490_s2 + $0x6b0] sm:$0xff]  ;;  %v8766_v35 = vld [vmem:[%s14490_s2 + $0x688] sm:$0xff] }
 0x30e   :  { %10038 = vmatprep.subr.bf16.mxu1 %v11352_v0  ;;  %v12783_v23 = vpop.f32.mrb[148].mxu0 }
 0x30f   :  { %v929_v29 = vpop.f32.mrb[149].mxu0 }
 0x310   :  { %8718 = vmatmul.mubr.msk.f32.gmra.mrb[2].mxu1 %vm962_vm1, %v12436_v12  ;;  %v4465_v29 = vld [vmem:[%s14491_s3 + $0x68] sm:$0xff] }
 0x311   :  { %3549 = vmatprep.mubr.f32.mxu1 %v11353_v52  ;;  %10040 = vmatpush3.bf16.msra.mxu1 %v10039_v44  ;;  %v8732_v44 = vld [vmem:[%s14490_s2 + $0x5c8] sm:$0xff] }
 0x312   :  { %9572 = vmatprep.subr.mxu1 %v11353_v52 }
 0x314   :  { %8719 = vmatmul.mubr.msk.f32.gmra.mrb[4].mxu1 %vm962_vm1, %v12447_v2 }
 0x315   :  { %3555 = vmatprep.mubr.f32.mxu1 %v11353_v52  ;;  %9573 = vmatpush3.msra.mxu1 %v8716_v25 }
 0x316   :  { %10042 = vmatprep.subr.bf16.mxu1 %v10041_v33  ;;  %v4464_v33 = vld [vmem:[%s14491_s3 + $0x60] sm:$0xff] }
 0x317   :  { %v12939_v30 = vpack.c.bf16 %v4465_v29, %v4464_v33  ;;  %v8790_v29 = vld [vmem:[%s14490_s2 + $0x6f8] sm:$0xff] }
 0x318   :  { %8720 = vmatmul.mubr.msk.f32.gmra.mrb[6].mxu1 %vm962_vm1, %v12453_v45 }
 0x319   :  { %3561 = vmatprep.mubr.f32.mxu1 %v11353_v52 }
 0x31c   :  { %8721 = vmatmul.mubr.msk.f32.gmra.mrb[8].mxu1 %vm962_vm1, %v12468_v19 }
 0x31d   :  { %9574 = vmatprep.mubr.msk.f32.mxu1 %vm11354_vm2, %v11353_v52 }
 0x320   :  { %9575 = vmatmul.mubr.msk.f32.vlgmr.msra.gmra.mrb[10].mxu1 %vm962_vm1, %v12423_v58  ;;  %v4457_v58 = vld [vmem:[%s14491_s3 + $0x28] sm:$0xff] }
 0x321   :  { %10044 = vmatpush1.bf16.msra.mxu1 %v10043_v8  ;;  %9577 = vmatprep.mubr.msk.f32.mxu1 %vm11354_vm2, %v11353_v52  ;;  %v12831_v53 = vpack.c.bf16 %v4457_v58, %v4456_v60  ;;  %v8753_v8 = vld [vmem:[%s14490_s2 + $0x620] sm:$0xff]  ;;  %v8762_v60 = vld [vmem:[%s14490_s2 + $0x668] sm:$0xff]  ;;  %v10057_v58 = vpack.c.bf16 %v8755_v46, %v8752_v42 }
 0x322   :  { %10046 = vmatprep.subr.bf16.mxu1 %v10045_v37  ;;  %v8756_v37 = vld [vmem:[%s14490_s2 + $0x638] sm:$0xff] }
 0x323   :  { %10094 = vmatpush3.bf16.msra.mxu0 %v12831_v53  ;;  %v10055_v3 = vpack.c.bf16 %v8756_v37, %v8753_v8 }
 0x324   :  { %9578 = vmatmul.mubr.msk.f32.gmra.mrb[12].mxu1 %vm962_vm1, %v12436_v12  ;;  %v4475_v12 = vld [vmem:[%s14491_s3 + $0xb8] sm:$0xff] }
 0x325   :  { %9580 = vmatprep.mubr.msk.f32.mxu1 %vm11354_vm2, %v11353_v52  ;;  %10048 = vmatpush1.bf16.msra.mxu1 %v10047_v47  ;;  %v12858_v39 = vpack.c.bf16 %v4475_v12, %v4474_v55  ;;  %v8759_v47 = vld [vmem:[%s14490_s2 + $0x650] sm:$0xff]  ;;  %v8761_v55 = vld [vmem:[%s14490_s2 + $0x660] sm:$0xff] }
 0x326   :  { %3712 = vmatprep.subr.mxu1 %v8740_v41  ;;  %v10059_v41 = vpack.c.bf16 %v8762_v60, %v8759_v47 }
 0x327   :  { %10096 = vmatprep.subr.bf16.mxu0 %v12858_v39 }
 0x328   :  { %9581 = vmatmul.mubr.msk.f32.gmra.mrb[14].mxu1 %vm962_vm1, %v12447_v2  ;;  %v4459_v2 = vld [vmem:[%s14491_s3 + $0x38] sm:$0xff] }
 0x329   :  { %9583 = vmatprep.mubr.msk.f32.mxu1 %vm11354_vm2, %v11353_v52  ;;  %3713 = vmatpush1.msra.mxu1 %v8739_v54  ;;  %v12870_v22 = vpack.c.bf16 %v4459_v2, %v4458_v49  ;;  %v8758_v54 = vld [vmem:[%s14490_s2 + $0x648] sm:$0xff]  ;;  %v8765_v49 = vld [vmem:[%s14490_s2 + $0x680] sm:$0xff] }
 0x32a   :  { %10049 = vmatprep.subr.bf16.mxu1 %v11352_v0  ;;  %v10061_v12 = vpack.c.bf16 %v8761_v55, %v8758_v54 }
 0x32b   :  { %10098 = vmatpush3.bf16.msra.mxu0 %v12870_v22 }
 0x32c   :  { %9584 = vmatmul.mubr.msk.f32.gmra.mrb[16].mxu1 %vm962_vm1, %v12453_v45  ;;  %10100 = vmatprep.subr.bf16.mxu0 %v12872_v5  ;;  %v8729_v45 = vld [vmem:[%s14490_s2 + $0x5b0] sm:$0xff] }
 0x32d   :  { %9586 = vmatprep.mubr.msk.f32.mxu1 %vm11354_vm2, %v11353_v52  ;;  %v10050_v25 = vpack.c.bf16 %v8732_v44, %v8729_v45  ;;  %v8787_v45 = vld [vmem:[%s14490_s2 + $0x6e0] sm:$0xff]  ;;  %v10071_v44 = vpack.c.bf16 %v8780_v6, %v8777_v18 }
 0x32e   :  { %v10073_v56 = vpack.c.bf16 %v8787_v45, %v8784_v50 }
 0x32f   :  { %10102 = vmatpush3.bf16.msra.mxu0 %v12890_v34 }
 0x330   :  { %9587 = vmatmul.mubr.msk.f32.gmra.mrb[18].mxu1 %vm962_vm1, %v12468_v19  ;;  %10104 = vmatprep.subr.bf16.mxu0 %v12895_v32  ;;  %v8735_v19 = vld [vmem:[%s14490_s2 + $0x5e0] sm:$0xff] }
 0x331   :  { %3768 = vmatprep.mubr.f32.mxu1 %v11353_v52  ;;  %v10053_v4 = vpack.c.bf16 %v8738_v28, %v8735_v19  ;;  %v8788_v28 = vld [vmem:[%s14490_s2 + $0x6e8] sm:$0xff] }
 0x333   :  { %10106 = vmatpush3.bf16.msra.mxu0 %v12918_v14 }
 0x334   :  { %8742 = vmatmul.mubr.msk.f32.vlgmr.msra.gmra.mrb[0].mxu1 %vm962_vm1, %v12516_v36  ;;  %10108 = vmatprep.subr.bf16.mxu0 %v12934_v1 }
 0x335   :  { %10051 = vmatpush3.bf16.msra.mxu1 %v10050_v25  ;;  %3774 = vmatprep.mubr.f32.mxu1 %v11353_v52  ;;  %v8786_v25 = vld [vmem:[%s14490_s2 + $0x6d8] sm:$0xff] }
 0x336   :  { %10052 = vmatprep.subr.bf16.mxu1 %v11352_v0  ;;  %v10075_v33 = vpack.c.bf16 %v8786_v25, %v8783_v9 }
 0x337   :  { %10110 = vmatpush3.bf16.msra.mxu0 %v12939_v30 }
 0x338   :  { %8743 = vmatmul.mubr.msk.f32.gmra.mrb[2].mxu1 %vm962_vm1, %v12529_v26 }
 0x339   :  { %3780 = vmatprep.mubr.f32.mxu1 %v11353_v52  ;;  %10054 = vmatpush3.bf16.msra.mxu1 %v10053_v4 }
 0x33a   :  { %9597 = vmatprep.subr.mxu1 %v11353_v52 }
 0x33c   :  { %8744 = vmatmul.mubr.msk.f32.gmra.mrb[4].mxu1 %vm962_vm1, %v12540_v38 }
 0x33d   :  { %3786 = vmatprep.mubr.f32.mxu1 %v11353_v52  ;;  %9598 = vmatpush3.msra.mxu1 %v8741_v61 }
 0x33e   :  { %10056 = vmatprep.subr.bf16.mxu1 %v10055_v3 }
 0x340   :  { %8745 = vmatmul.mubr.msk.f32.gmra.mrb[6].mxu1 %vm962_vm1, %v12546_v48 }
 0x341   :  { %3792 = vmatprep.mubr.f32.mxu1 %v11353_v52 }
 0x344   :  { %8746 = vmatmul.mubr.msk.f32.gmra.mrb[8].mxu1 %vm962_vm1, %v12561_v57 }
 0x345   :  { %9599 = vmatprep.mubr.msk.f32.mxu1 %vm11354_vm2, %v11353_v52 }
 0x348   :  { %9600 = vmatmul.mubr.msk.f32.vlgmr.msra.gmra.mrb[10].mxu1 %vm962_vm1, %v12516_v36  ;;  %v8764_v36 = vld [vmem:[%s14490_s2 + $0x678] sm:$0xff] }
 0x349   :  { %10058 = vmatpush1.bf16.msra.mxu1 %v10057_v58  ;;  %9602 = vmatprep.mubr.msk.f32.mxu1 %vm11354_vm2, %v11353_v52 }
 0x34a   :  { %10060 = vmatprep.subr.bf16.mxu1 %v10059_v41 }
 0x34c   :  { %9603 = vmatmul.mubr.msk.f32.gmra.mrb[12].mxu1 %vm962_vm1, %v12529_v26  ;;  %v8754_v26 = vld [vmem:[%s14490_s2 + $0x628] sm:$0xff] }
 0x34d   :  { %9605 = vmatprep.mubr.msk.f32.mxu1 %vm11354_vm2, %v11353_v52  ;;  %10062 = vmatpush1.bf16.msra.mxu1 %v10061_v12 }
 0x34e   :  { %3943 = vmatprep.subr.mxu1 %v8765_v49 }
 0x350   :  { %9606 = vmatmul.mubr.msk.f32.gmra.mrb[14].mxu1 %vm962_vm1, %v12540_v38  ;;  %v8757_v38 = vld [vmem:[%s14490_s2 + $0x640] sm:$0xff] }
 0x351   :  { %9608 = vmatprep.mubr.msk.f32.mxu1 %vm11354_vm2, %v11353_v52  ;;  %3944 = vmatpush1.msra.mxu1 %v8764_v36  ;;  %v10064_v2 = vpack.c.bf16 %v8757_v38, %v8754_v26 }
 0x352   :  { %10063 = vmatprep.subr.bf16.mxu1 %v11352_v0 }
 0x354   :  { %9609 = vmatmul.mubr.msk.f32.gmra.mrb[16].mxu1 %vm962_vm1, %v12546_v48  ;;  %v8760_v48 = vld [vmem:[%s14490_s2 + $0x658] sm:$0xff] }
 0x355   :  { %9611 = vmatprep.mubr.msk.f32.mxu1 %vm11354_vm2, %v11353_v52  ;;  %v10067_v59 = vpack.c.bf16 %v8763_v16, %v8760_v48 }
 0x358   :  { %9612 = vmatmul.mubr.msk.f32.gmra.mrb[18].mxu1 %vm962_vm1, %v12561_v57  ;;  %v8778_v57 = vld [vmem:[%s14490_s2 + $0x698] sm:$0xff] }
 0x359   :  { %3999 = vmatprep.mubr.f32.mxu1 %v11353_v52  ;;  %v10069_v20 = vpack.c.bf16 %v8781_v63, %v8778_v57 }
 0x35c   :  { %8767 = vmatmul.mubr.msk.f32.vlgmr.msra.gmra.mrb[0].mxu1 %vm962_vm1, %v12626_v15 }
 0x35d   :  { %10065 = vmatpush3.bf16.msra.mxu1 %v10064_v2  ;;  %4005 = vmatprep.mubr.f32.mxu1 %v11353_v52 }
 0x35e   :  { %10066 = vmatprep.subr.bf16.mxu1 %v11352_v0 }
 0x360   :  { %8768 = vmatmul.mubr.msk.f32.gmra.mrb[2].mxu1 %vm962_vm1, %v12640_v27 }
 0x361   :  { %4011 = vmatprep.mubr.f32.mxu1 %v11353_v52  ;;  %10068 = vmatpush3.bf16.msra.mxu1 %v10067_v59 }
 0x362   :  { %9622 = vmatprep.subr.mxu1 %v11353_v52 }
 0x364   :  { %8769 = vmatmul.mubr.msk.f32.gmra.mrb[4].mxu1 %vm962_vm1, %v12651_v24 }
 0x365   :  { %4017 = vmatprep.mubr.f32.mxu1 %v11353_v52  ;;  %9623 = vmatpush3.msra.mxu1 %v8766_v35 }
 0x366   :  { %10070 = vmatprep.subr.bf16.mxu1 %v10069_v20 }
 0x368   :  { %8770 = vmatmul.mubr.msk.f32.gmra.mrb[6].mxu1 %vm962_vm1, %v12657_v31 }
 0x369   :  { %4023 = vmatprep.mubr.f32.mxu1 %v11353_v52 }
 0x36c   :  { %8771 = vmatmul.mubr.msk.f32.gmra.mrb[8].mxu1 %vm962_vm1, %v12672_v40 }
 0x36d   :  { %9624 = vmatprep.mubr.msk.f32.mxu1 %vm11354_vm2, %v11353_v52 }
 0x370   :  { %9625 = vmatmul.mubr.msk.f32.vlgmr.msra.gmra.mrb[10].mxu1 %vm962_vm1, %v12626_v15  ;;  %v8789_v15 = vld [vmem:[%s14490_s2 + $0x6f0] sm:$0xff] }
 0x371   :  { %10072 = vmatpush1.bf16.msra.mxu1 %v10071_v44  ;;  %9627 = vmatprep.mubr.msk.f32.mxu1 %vm11354_vm2, %v11353_v52 }
 0x372   :  { %10074 = vmatprep.subr.bf16.mxu1 %v10073_v56 }
 0x374   :  { %9628 = vmatmul.mubr.msk.f32.gmra.mrb[12].mxu1 %vm962_vm1, %v12640_v27  ;;  %v8779_v27 = vld [vmem:[%s14490_s2 + $0x6a0] sm:$0xff] }
 0x375   :  { %9630 = vmatprep.mubr.msk.f32.mxu1 %vm11354_vm2, %v11353_v52  ;;  %10076 = vmatpush1.bf16.msra.mxu1 %v10075_v33 }
 0x376   :  { %4174 = vmatprep.subr.mxu1 %v8790_v29 }
 0x378   :  { %9631 = vmatmul.mubr.msk.f32.gmra.mrb[14].mxu1 %vm962_vm1, %v12651_v24  ;;  %v8782_v24 = vld [vmem:[%s14490_s2 + $0x6b8] sm:$0xff] }
 0x379   :  { %9633 = vmatprep.mubr.msk.f32.mxu1 %vm11354_vm2, %v11353_v52  ;;  %4175 = vmatpush1.msra.mxu1 %v8789_v15  ;;  %v10078_v19 = vpack.c.bf16 %v8782_v24, %v8779_v27 }
 0x37a   :  { %10077 = vmatprep.subr.bf16.mxu1 %v11352_v0 }
 0x37c   :  { %9634 = vmatmul.mubr.msk.f32.gmra.mrb[16].mxu1 %vm962_vm1, %v12657_v31  ;;  %v8785_v31 = vld [vmem:[%s14490_s2 + $0x6d0] sm:$0xff] }
 0x37d   :  { %9636 = vmatprep.mubr.msk.f32.mxu1 %vm11354_vm2, %v11353_v52  ;;  %v10081_v4 = vpack.c.bf16 %v8788_v28, %v8785_v31 }
 0x380   :  { %9637 = vmatmul.mubr.msk.f32.gmra.mrb[18].mxu1 %vm962_vm1, %v12672_v40  ;;  %v8791_v40 = vld [vmem:[%s14490_s2 + $0x700] sm:$0xff] }
 0x381   :  { %4230 = vmatprep.mubr.f32.mxu1 %v11353_v52 }
 0x384   :  { %8792 = vmatmul.mubr.msk.f32.vlgmr.msra.gmra.mrb[0].mxu1 %vm962_vm1, %v12738_v10 }
 0x385   :  { %10079 = vmatpush3.bf16.msra.mxu1 %v10078_v19  ;;  %4236 = vmatprep.mubr.f32.mxu1 %v11353_v52 }
 0x386   :  { %10080 = vmatprep.subr.bf16.mxu1 %v11352_v0 }
 0x388   :  { %8793 = vmatmul.mubr.msk.f32.gmra.mrb[2].mxu1 %vm962_vm1, %v12751_v17 }
 0x389   :  { %4242 = vmatprep.mubr.f32.mxu1 %v11353_v52  ;;  %10082 = vmatpush3.bf16.msra.mxu1 %v10081_v4 }
 0x38a   :  { %9647 = vmatprep.subr.mxu1 %v11353_v52 }
 0x38c   :  { %8794 = vmatmul.mubr.msk.f32.gmra.mrb[4].mxu1 %vm962_vm1, %v12762_v7 }
 0x38d   :  { %4248 = vmatprep.mubr.f32.mxu1 %v11353_v52  ;;  %9648 = vmatpush3.msra.mxu1 %v8791_v40 }
 0x38e   :  { %10591 = vmatprep.subr.bf16.mxu1 %v11352_v0 }
 0x390   :  { %8795 = vmatmul.mubr.msk.f32.gmra.mrb[6].mxu1 %vm962_vm1, %v12768_v11 }
 0x391   :  { %4254 = vmatprep.mubr.f32.mxu1 %v11353_v52 }
 0x394   :  { %8796 = vmatmul.mubr.msk.f32.gmra.mrb[8].mxu1 %vm962_vm1, %v12783_v23 }
 0x395   :  { %9649 = vmatprep.mubr.msk.f32.mxu1 %vm11354_vm2, %v11353_v52 }
 0x398   :  { %9650 = vmatmul.mubr.msk.f32.vlgmr.msra.gmra.mrb[10].mxu1 %vm962_vm1, %v12738_v10  ;;  %v4482_v10 = vld [vmem:[%s14491_s3 + $0xf0] sm:$0xff] }
 0x399   :  { %9652 = vmatprep.mubr.msk.f32.mxu1 %vm11354_vm2, %v11353_v52 }
 0x39c   :  { %9653 = vmatmul.mubr.msk.f32.gmra.mrb[12].mxu1 %vm962_vm1, %v12751_v17  ;;  %v4483_v17 = vld [vmem:[%s14491_s3 + $0xf8] sm:$0xff] }
 0x39d   :  { %9655 = vmatprep.mubr.msk.f32.mxu1 %vm11354_vm2, %v11353_v52 }
 0x3a0   :  { %9656 = vmatmul.mubr.msk.f32.gmra.mrb[14].mxu1 %vm962_vm1, %v12762_v7  ;;  %v13153_v7 = vpack.c.bf16 %v4483_v17, %v4482_v10 }
 0x3a1   :  { %9658 = vmatprep.mubr.msk.f32.mxu1 %vm11354_vm2, %v11353_v52 }
 0x3a2   :  { %10112 = vmatprep.subr.bf16.mxu0 %v13153_v7 }
 0x3a4   :  { %9659 = vmatmul.mubr.msk.f32.gmra.mrb[16].mxu1 %vm962_vm1, %v12768_v11  ;;  %v4466_v11 = vld [vmem:[%s14491_s3 + $0x70] sm:$0xff] }
 0x3a5   :  { %9661 = vmatprep.mubr.msk.f32.mxu1 %vm11354_vm2, %v11353_v52 }
 0x3a8   :  { %9662 = vmatmul.mubr.msk.f32.gmra.mrb[18].mxu1 %vm962_vm1, %v12783_v23  ;;  %v4467_v23 = vld [vmem:[%s14491_s3 + $0x78] sm:$0xff] }
 0x3a9   :  { %v13162_v8 = vpack.c.bf16 %v4467_v23, %v4466_v11 }
 0x3ab   :  { %10114 = vmatpush3.bf16.msra.mxu0 %v13162_v8 }
 0x3ac   :  { %10115 = vmatprep.subr.bf16.mxu0 %v11352_v0 }
 0x457   :  { %v13166_v37 = vpop.f32.mrb[0].mxu1 }
 0x458   :  { %v13168_v61 = vpop.f32.mrb[1].mxu1  ;;  %v4402_v42 = vmul.f32 %v13166_v37, %v13166_v37 }
 0x459   :  { %v4403_v58 = vmul.f32 %v13168_v61, %v13168_v61 }
 0x45b   :  { %v13170_v3 = vpop.f32.mrb[2].mxu1 }
 0x45c   :  { %v4366_v46 = vadd.f32 %v13170_v3, %v13166_v37  ;;  %v4405_v47 = vmul.f32 %v13170_v3, %v13170_v3  ;;  %v13178_v60 = vpop.f32.mrb[3].mxu1 }
 0x45d   :  { %v4376_v41 = vadd.f32 %v13178_v60, %v13168_v61  ;;  %v4406_v54 = vmul.f32 %v13178_v60, %v13178_v60 }
 0x45e   :  { %v4417_v55 = vadd.f32 %v4405_v47, %v4402_v42 }
 0x45f   :  { %v4427_v12 = vadd.f32 %v4406_v54, %v4403_v58  ;;  %v13186_v49 = vpop.f32.mrb[4].mxu1 }
 0x460   :  { %v4367_v36 = vadd.f32 %v4366_v46, %v13186_v49  ;;  %v4408_v26 = vmul.f32 %v13186_v49, %v13186_v49  ;;  %v13191_v38 = vpop.f32.mrb[5].mxu1 }
 0x461   :  { %v4377_v2 = vadd.f32 %v4376_v41, %v13191_v38  ;;  %v4409_v48 = vmul.f32 %v13191_v38, %v13191_v38 }
 0x462   :  { %v4418_v16 = vadd.f32 %v4417_v55, %v4408_v26 }
 0x463   :  { %v4428_v59 = vadd.f32 %v4427_v12, %v4409_v48  ;;  %v13196_v57 = vpop.f32.mrb[6].mxu1  ;;  %v4485_v48 = vld [vmem:[%s14491_s3 + $0x108] sm:$0xff] }
 0x464   :  { %v4368_v63 = vadd.f32 %v4367_v36, %v13196_v57  ;;  %v4411_v35 = vmul.f32 %v13196_v57, %v13196_v57  ;;  %v13201_v20 = vpop.f32.mrb[7].mxu1 }
 0x465   :  { %v4378_v18 = vadd.f32 %v4377_v2, %v13201_v20  ;;  %v4412_v6 = vmul.f32 %v13201_v20, %v13201_v20  ;;  %v4484_v2 = vld [vmem:[%s14491_s3 + $0x100] sm:$0xff] }
 0x466   :  { %v4419_v50 = vadd.f32 %v4418_v16, %v4411_v35 }
 0x467   :  { %v4429_v45 = vadd.f32 %v4428_v59, %v4412_v6  ;;  %v13206_v44 = vpop.f32.mrb[8].mxu1 }
 0x468   :  { %v4369_v56 = vadd.f32 %v4368_v63, %v13206_v44  ;;  %v4414_v9 = vmul.f32 %v13206_v44, %v13206_v44  ;;  %v13211_v25 = vpop.f32.mrb[9].mxu1 }
 0x469   :  { %v4379_v33 = vadd.f32 %v4378_v18, %v13211_v25  ;;  %v4415_v29 = vmul.f32 %v13211_v25, %v13211_v25 }
 0x46a   :  { %v4370_v15 = vrot.slane %v4369_v56, 4  ;;  %v13216_v27 = vadd.f32 %v4419_v50, %v4414_v9 }
 0x46b   :  { %v4380_v24 = vrot.slane %v4379_v33, 4  ;;  %v4430_v19 = vadd.f32 %v4429_v45, %v4415_v29  ;;  %v13218_v31 = vpop.f32.mrb[10].mxu1 }
 0x46c   :  { %v4371_v28 = vadd.f32 %v4370_v15, %v4369_v56  ;;  %v9651_v4 = vpop.f32.mrb[11].mxu1  ;;  %v4404_v17 = vmul.f32 %v13218_v31, %v13218_v31  ;;  %v4387_v46 = vsel %vm4386_vm3, %v13218_v31, 0.0  ;;  %v13244_v56 = vpack.c.bf16 %v4485_v48, %v4484_v2  ;;  %v4486_v15 = vld [vmem:[%s14491_s3 + $0x110] sm:$0xff] }
 0x46d   :  { %v4381_v40 = vadd.f32 %v4380_v24, %v4379_v33  ;;  %v4431_v33 = vrot.slane %v4430_v19, 4  ;;  %v4487_v24 = vld [vmem:[%s14491_s3 + $0x118] sm:$0xff] }
 0x46e   :  { %v4372_v10 = vrot.slane %v4371_v28, 2  ;;  %v4437_v36 = vsel %vm4386_vm3, %v4404_v17, 0.0 }
 0x46f   :  { %v4382_v11 = vrot.slane %v4381_v40, 2  ;;  %v13222_v23 = vpop.f32.mrb[12].mxu1 }
 0x470   :  { %v4373_v42 = vadd.f32 %v4372_v10, %v4371_v28  ;;  %v4388_v47 = vsel %vm4386_vm3, %v13222_v23, 0.0  ;;  %v4407_v58 = vmul.f32 %v13222_v23, %v13222_v23  ;;  %v9654_v41 = vpop.f32.mrb[13].mxu1 }
 0x471   :  { %v4389_v54 = vadd.f32 %v4388_v47, %v4387_v46  ;;  %v4383_v55 = vadd.f32 %v4382_v11, %v4381_v40  ;;  %v4432_v46 = vadd.f32 %v4431_v33, %v4430_v19 }
 0x472   :  { %v4374_v12 = vrot.slane %v4373_v42, 1  ;;  %v4438_v26 = vsel %vm4386_vm3, %v4407_v58, 0.0 }
 0x473   :  { %v4439_v16 = vadd.f32 %v4438_v26, %v4437_v36  ;;  %v13238_v59 = vpop.f32.mrb[14].mxu1  ;;  %v4384_v63 = vrot.slane %v4383_v55, 1  ;;  %v4433_v19 = vrot.slane %v4432_v46, 2 }
 0x474   :  { %v4390_v35 = vsel %vm4386_vm3, %v13238_v59, 0.0  ;;  %v4410_v18 = vmul.f32 %v13238_v59, %v13238_v59  ;;  %v9657_v6 = vpop.f32.mrb[15].mxu1  ;;  %v4375_v9 = vadd.f32 %v4374_v12, %v4373_v42  ;;  %v10119_v42 = vpack.c.bf16 %v4487_v24, %v4486_v15 }
 0x475   :  { %v4391_v50 = vadd.f32 %v4390_v35, %v4389_v54  ;;  %v4385_v45 = vadd.f32 %v4384_v63, %v4383_v55  ;;  %v4434_v63 = vadd.f32 %v4433_v19, %v4432_v46  ;;  %v4783_v19 = vld [vmem:[%s14492_s4 + $0x10] sm:$0xff] }
 0x476   :  { %v4440_v29 = vsel %vm4386_vm3, %v4410_v18, 0.0 }
 0x477   :  { %v4441_v28 = vadd.f32 %v4440_v29, %v4439_v16  ;;  %v13253_v4 = vpop.f32.mrb[16].mxu1  ;;  %4555 = vmatprep.mubr.f32.mxu0 %v4385_v45  ;;  %v4435_v6 = vrot.slane %v4434_v63, 1 }
 0x478   :  { %v4392_v40 = vsel %vm4386_vm3, %v13253_v4, 0.0  ;;  %v4413_v10 = vmul.f32 %v13253_v4, %v13253_v4  ;;  %v9660_v17 = vpop.f32.mrb[17].mxu1  ;;  %4556 = vmatmul.mubr.f32.vlgmr.msra.gmra.mrb[150].mxu0 %v4375_v9 }
 0x479   :  { %v4393_v11 = vadd.f32 %v4392_v40, %v4391_v50  ;;  %10117 = vmatpush3.bf16.msra.mxu0 %v13244_v56  ;;  %9672 = vmatprep.mubr.msk.f32.mxu0 %vm11354_vm2, %v11353_v52  ;;  %v4436_v9 = vadd.f32 %v4435_v6, %v4434_v63 }
 0x47a   :  { %v4442_v47 = vsel %vm4386_vm3, %v4413_v10, 0.0  ;;  %10118 = vmatprep.subr.bf16.mxu0 %v11352_v0 }
 0x47b   :  { %v4443_v58 = vadd.f32 %v4442_v47, %v4441_v28  ;;  %v13264_v41 = vpop.f32.mrb[18].mxu1 }
 0x47c   :  { %v4394_v54 = vsel %vm4386_vm3, %v13264_v41, 0.0  ;;  %v4416_v55 = vmul.f32 %v13264_v41, %v13264_v41  ;;  %v9663_v12 = vpop.f32.mrb[19].mxu1 }
 0x47d   :  { %v4395_v36 = vadd.f32 %v4394_v54, %v4393_v11  ;;  %10120 = vmatpush3.bf16.msra.mxu0 %v10119_v42 }
 0x47e   :  { %v4444_v26 = vsel %vm4386_vm3, %v4416_v55, 0.0  ;;  %10122 = vmatprep.subr.bf16.mxu0 %v12611_v51  ;;  %v4421_v51 = vrot.slane %v13216_v27, 4 }
 0x47f   :  { %v4396_v2 = vrot.slane %v4395_v36, 4  ;;  %v4445_v48 = vadd.f32 %v4444_v26, %v4443_v58 }
 0x480   :  { %v4422_v33 = vadd.f32 %v4421_v51, %v13216_v27 }
 0x481   :  { %v4397_v16 = vadd.f32 %v4396_v2, %v4395_v36  ;;  %v4786_v2 = vld [vmem:[%s14492_s4 + $0x28] sm:$0xff] }
 0x483   :  { %v4398_v35 = vrot.slane %v4397_v16, 2 }
 0x485   :  { %v4399_v18 = vadd.f32 %v4398_v35, %v4397_v16  ;;  %v5080_v35 = vlaneseq }
 0x487   :  { %v4400_v50 = vrot.slane %v4399_v18, 1 }
 0x489   :  { %v4401_v45 = vadd.f32 %v4400_v50, %v4399_v18  ;;  %v13327_v18 = vshrl.u32 %v5080_v35, 7 }
 0x48b   :  { %9673 = vmatmul.mubr.msk.f32.vlgmr.msra.gmra.mrb[152].mxu0 %vm4386_vm3, %v4401_v45  ;;  %v13330_v6 = vsub.s32 0, %v13327_v18 }
 0x48c   :  { %10124 = vmatpush3.bf16.msra.mxu0 %v12624_v13  ;;  %4699 = vmatprep.mubr.f32.mxu0 %v4436_v9  ;;  %v4423_v13 = vrot.slane %v4422_v33, 2 }
 0x48d   :  { %10126 = vmatprep.subr.bf16.mxu0 %v12719_v43  ;;  %v4446_v43 = vrot.slane %v4445_v48, 4 }
 0x490   :  { %10128 = vmatpush3.bf16.msra.mxu0 %v12730_v62  ;;  %v4447_v62 = vadd.f32 %v4446_v43, %v4445_v48  ;;  %v10164_v48 = vpack.c.bf16 %v4786_v2, %v4783_v19 }
 0x491   :  { %10130 = vmatprep.subr.bf16.mxu0 %v12823_v21  ;;  %v4424_v21 = vadd.f32 %v4423_v13, %v4422_v33 }
 0x494   :  { %10132 = vmatpush3.bf16.msra.mxu0 %v12831_v53  ;;  %v4448_v53 = vrot.slane %v4447_v62, 2 }
 0x495   :  { %10134 = vmatprep.subr.bf16.mxu0 %v12858_v39  ;;  %v4425_v39 = vrot.slane %v4424_v21, 1 }
 0x498   :  { %10136 = vmatpush3.bf16.msra.mxu0 %v12870_v22  ;;  %v4449_v22 = vadd.f32 %v4448_v53, %v4447_v62 }
 0x499   :  { %10138 = vmatprep.subr.bf16.mxu0 %v12872_v5  ;;  %v4426_v5 = vadd.f32 %v4425_v39, %v4424_v21 }
 0x49c   :  { %10140 = vmatpush3.bf16.msra.mxu0 %v12890_v34  ;;  %v4450_v34 = vrot.slane %v4449_v22, 1 }
 0x49d   :  { %10142 = vmatprep.subr.bf16.mxu0 %v12895_v32 }
 0x49e   :  { %v4451_v32 = vadd.f32 %v4450_v34, %v4449_v22 }
 0x4a0   :  { %10144 = vmatpush3.bf16.msra.mxu0 %v12918_v14  ;;  %v4782_v14 = vld [vmem:[%s14492_s4 + $0x8] sm:$0xff] }
 0x4a1   :  { %10146 = vmatprep.subr.bf16.mxu0 %v12934_v1  ;;  %v4785_v1 = vld [vmem:[%s14492_s4 + $0x20] sm:$0xff] }
 0x4a4   :  { %10148 = vmatpush3.bf16.msra.mxu0 %v12939_v30  ;;  %v4781_v30 = vld [vmem:[%s14492_s4] sm:$0xff] }
 0x4a5   :  { %10150 = vmatprep.subr.bf16.mxu0 %v13153_v7  ;;  %v10159_v7 = vpack.c.bf16 %v4785_v1, %v4782_v14 }
 0x4a8   :  { %10152 = vmatpush3.bf16.msra.mxu0 %v13162_v8  ;;  %v4784_v8 = vld [vmem:[%s14492_s4 + $0x18] sm:$0xff] }
 0x4a9   :  { %10153 = vmatprep.subr.bf16.mxu0 %v11352_v0  ;;  %v10161_v27 = vpack.c.bf16 %v4784_v8, %v4781_v30 }
 0x4ab   :  { %4700 = vmatmul.mubr.f32.vlgmr.msra.gmra.mrb[154].mxu0 %v4426_v5 }
 0x4ac   :  { %10155 = vmatpush3.bf16.msra.mxu0 %v13244_v56  ;;  %9683 = vmatprep.mubr.msk.f32.mxu0 %vm11354_vm2, %v11353_v52 }
 0x4ad   :  { %10156 = vmatprep.subr.bf16.mxu0 %v11352_v0 }
 0x4b0   :  { %10158 = vmatpush3.bf16.msra.mxu0 %v10119_v42 }
 0x4b1   :  { %10160 = vmatprep.subr.bf16.mxu0 %v10159_v7 }
 0x4b3   :  { %9684 = vmatmul.mubr.msk.f32.vlgmr.msra.gmra.mrb[156].mxu0 %vm4386_vm3, %v4451_v32 }
 0x4b4   :  { %4855 = vmatprep.mubr.f32.mxu0 %v11353_v52  ;;  %10162 = vmatpush1.bf16.msra.mxu0 %v10161_v27 }
 0x4b5   :  { %10163 = vmatprep.subr.bf16.mxu0 %v11352_v0 }
 0x54b   :  { %v9172_v56 = vpop.f32.mrb[150].mxu0 }
 0x54c   :  { %v9173_v29 = vpop.f32.mrb[151].mxu0 }
 0x54d   :  { %v9174_v15 = vadd.f32 %v9173_v29, %v9172_v56 }
 0x55e   :  { %v4627_v24 = vpop.f32.mrb[152].mxu0 }
 0x55f   :  { %v4628_v28 = vadd.f32 %v9174_v15, %v4627_v24  ;;  %v9674_v40 = vpop.f32.mrb[153].mxu0 }
 0x561   :  { %v4631_v42 = vmul.f32 0.0015432099, %v4628_v28 }
 0x563   :  { %v4776_v54 = vmul.f32 %v4631_v42, %v4631_v42 }
 0x57e   :  { %v9212_v10 = vpop.f32.mrb[154].mxu0 }
 0x57f   :  { %v9213_v17 = vpop.f32.mrb[155].mxu0 }
 0x580   :  { %v9214_v11 = vadd.f32 %v9213_v17, %v9212_v10 }
 0x586   :  { %v4771_v46 = vpop.f32.mrb[156].mxu0 }
 0x587   :  { %v4772_v47 = vadd.f32 %v9214_v11, %v4771_v46  ;;  %v9685_v58 = vpop.f32.mrb[157].mxu0 }
 0x589   :  { %v4775_v55 = vmul.f32 0.0015432099, %v4772_v47 }
 0x58b   :  { %v4777_v12 = vsub.f32 %v4775_v55, %v4776_v54 }
 0x58d   :  { %v4778_v36 = vmax.f32 %v4777_v12, 0.0 }
 0x58f   :  { %v4779_v26 = vadd.f32 1e-05, %v4778_v36 }
 0x591   :  { %11263 = vrsqrt.f32 %v4779_v26 }
 0x59b   :  { %v11264_v16 = vpop.eup %11263 }
 0x59c   :  { %8804 = vmatmul.mubr.msk.f32.vlgmr.msra.gmra.mrb[158].mxu0 %vm4787_vm4, %v11264_v16  ;;  %v4932_v63 = vmul.f32 %v11264_v16, %v4631_v42 }
 0x59d   :  { %10165 = vmatpush3.bf16.msra.mxu0 %v10164_v48  ;;  %9690 = vmatprep.mubr.msk.f32.mxu0 %vm11354_vm2, %v11353_v52 }
 0x59e   :  { %10167 = vmatprep.subr.bf16.mxu0 %v10159_v7  ;;  %v84_v7 = vld [vmem:[%s14503_s15 + $0x10] sm:$0xff] }
 0x5a0   :  { %9691 = vmatmul.mubr.msk.f32.vlgmr.msra.gmra.mrb[160].mxu0 %vm4787_vm4, %v11264_v16 }
 0x5a1   :  { %10169 = vmatpush1.bf16.msra.mxu0 %v10161_v27  ;;  %5000 = vmatprep.mubr.f32.mxu0 %v11353_v52 }
 0x5a2   :  { %10170 = vmatprep.subr.bf16.mxu0 %v11352_v0 }
 0x5a4   :  { %8806 = vmatmul.mubr.msk.f32.vlgmr.msra.gmra.mrb[162].mxu0 %vm4787_vm4, %v4932_v63 }
 0x5a5   :  { %10172 = vmatpush3.bf16.msra.mxu0 %v10164_v48  ;;  %9697 = vmatprep.mubr.msk.f32.mxu0 %vm11354_vm2, %v11353_v52 }
 0x5a8   :  { %9698 = vmatmul.mubr.msk.f32.vlgmr.msra.gmra.mrb[164].mxu0 %vm4787_vm4, %v4932_v63 }
 0x5a9   :  { %5253 = vmatprep.mubr.f32.mxu0 %v11353_v52 }
 0x66f   :  { %v4857_v50 = vpop.f32.mrb[158].mxu0 }
 0x670   :  { %v5083_v45 = vrot.slane %v4857_v50, %v13330_v6  ;;  %v4859_v9 = vpop.f32.mrb[159].mxu0 }
 0x671   :  { %v5087_v51 = vrot.slane %v4859_v9, %v13330_v6 }
 0x672   :  { %v5092_v33 = vmul.f32 %v5083_v45, %v13166_v37  ;;  %v5095_v13 = vmul.f32 %v5083_v45, %v13170_v3  ;;  %v5098_v43 = vmul.f32 %v5083_v45, %v13186_v49  ;;  %v5101_v62 = vmul.f32 %v5083_v45, %v13196_v57  ;;  %v82_v49 = vld [vmem:[%s14503_s15] sm:$0xff] }
 0x673   :  { %v4928_v21 = vpop.f32.mrb[160].mxu0  ;;  %v5093_v53 = vmul.f32 %v5087_v51, %v13168_v61  ;;  %v5096_v39 = vmul.f32 %v5087_v51, %v13178_v60  ;;  %v5099_v22 = vmul.f32 %v5087_v51, %v13191_v38  ;;  %v5102_v5 = vmul.f32 %v5087_v51, %v13201_v20  ;;  %v83_v61 = vld [vmem:[%s14503_s15 + $0x8] sm:$0xff] }
 0x674   :  { %v5091_v34 = vrot.slane %v4928_v21, %v13330_v6  ;;  %v9692_v32 = vpop.f32.mrb[161].mxu0  ;;  %v5105_v37 = vmul.f32 %v5087_v51, %v13211_v25  ;;  %v5104_v3 = vmul.f32 %v5083_v45, %v13206_v44 }
 0x676   :  { %v5094_v60 = vmul.f32 %v5091_v34, %v13218_v31  ;;  %v5097_v38 = vmul.f32 %v5091_v34, %v13222_v23  ;;  %v5100_v57 = vmul.f32 %v5091_v34, %v13238_v59  ;;  %v5103_v20 = vmul.f32 %v5091_v34, %v13253_v4 }
 0x677   :  { %v5002_v14 = vpop.f32.mrb[162].mxu0  ;;  %v5106_v25 = vmul.f32 %v5091_v34, %v13264_v41  ;;  %v5505_v34 = vld [vmem:[#allocation5 + $0x258] sm:$0xff] }
 0x678   :  { %v5077_v44 = vsub.f32 %v82_v49, %v5002_v14  ;;  %v5004_v1 = vpop.f32.mrb[163].mxu0  ;;  %v5152_v49 = vld [vmem:[%s14493_s5 + $0x18] sm:$0xff]  ;;  %v5158_v14 = vld [vmem:[%s14493_s5 + $0x48] sm:$0xff] }
 0x679   :  { %v5078_v30 = vsub.f32 %v83_v61, %v5004_v1  ;;  %v5153_v61 = vld [vmem:[%s14493_s5 + $0x20] sm:$0xff]  ;;  %v5507_v1 = vld [vmem:[#allocation5 + $0x268] sm:$0xff] }
 0x67a   :  { %v5110_v8 = vrot.slane %v5077_v44, %v13330_v6  ;;  %v5504_v44 = vld [vmem:[#allocation5 + $0x250] sm:$0xff] }
 0x67b   :  { %v5114_v31 = vrot.slane %v5078_v30, %v13330_v6  ;;  %v5073_v27 = vpop.f32.mrb[164].mxu0  ;;  %v5509_v30 = vld [vmem:[#allocation5 + $0x278] sm:$0xff] }
 0x67c   :  { %v5079_v23 = vsub.f32 %v84_v7, %v5073_v27  ;;  %v9699_v56 = vpop.f32.mrb[165].mxu0  ;;  %v5119_v59 = vadd.f32 %v5110_v8, %v5092_v33  ;;  %v5122_v29 = vadd.f32 %v5110_v8, %v5095_v13  ;;  %v5125_v4 = vadd.f32 %v5110_v8, %v5098_v43  ;;  %v5508_v27 = vld [vmem:[#allocation5 + $0x270] sm:$0xff] }
 0x67d   :  { %v5120_v15 = vadd.f32 %v5114_v31, %v5093_v53  ;;  %v5123_v24 = vadd.f32 %v5114_v31, %v5096_v39  ;;  %v5126_v41 = vadd.f32 %v5114_v31, %v5099_v22  ;;  %v5129_v28 = vadd.f32 %v5114_v31, %v5102_v5  ;;  %v5149_v39 = vld [vmem:[%s14493_s5] sm:$0xff]  ;;  %v5150_v22 = vld [vmem:[%s14493_s5 + $0x8] sm:$0xff]  ;;  %v5503_v5 = vld [vmem:[#allocation5 + $0x248] sm:$0xff] }
 0x67e   :  { %v5118_v40 = vrot.slane %v5079_v23, %v13330_v6  ;;  %v5134_v10 = vmax.f32 %v5119_v59, 0.0  ;;  %v5137_v17 = vmax.f32 %v5122_v29, 0.0  ;;  %v5128_v11 = vadd.f32 %v5110_v8, %v5101_v62  ;;  %v5511_v23 = vld [vmem:[#allocation5 + $0x288] sm:$0xff]  ;;  %v5513_v56 = vld [vmem:[#allocation5 + $0x298] sm:$0xff] }
 0x67f   :  { %v5135_v42 = vmax.f32 %v5120_v15, 0.0  ;;  %v5138_v46 = vmax.f32 %v5123_v24, 0.0  ;;  %v5141_v47 = vmax.f32 %v5126_v41, 0.0  ;;  %v5144_v58 = vmax.f32 %v5129_v28, 0.0  ;;  %v5512_v15 = vld [vmem:[#allocation5 + $0x290] sm:$0xff]  ;;  %v5515_v24 = vld [vmem:[#allocation5 + $0x2a8] sm:$0xff] }
 0x680   :  { %v10175_v54 = vpack.c.bf16 %v5137_v17, %v5134_v10  ;;  %v5140_v55 = vmax.f32 %v5125_v4, 0.0  ;;  %v5143_v12 = vmax.f32 %v5128_v11, 0.0  ;;  %v5132_v36 = vadd.f32 %v5114_v31, %v5105_v37  ;;  %v5151_v37 = vld [vmem:[%s14493_s5 + $0x10] sm:$0xff]  ;;  %v5517_v41 = vld [vmem:[#allocation5 + $0x2b8] sm:$0xff]  ;;  %v5516_v17 = vld [vmem:[#allocation5 + $0x2b0] sm:$0xff] }
 0x681   :  { %v10173_v26 = vpack.c.bf16 %v5138_v46, %v5135_v42  ;;  %v10177_v19 = vpack.c.bf16 %v5144_v58, %v5141_v47  ;;  %v5131_v2 = vadd.f32 %v5110_v8, %v5104_v3  ;;  %v5121_v48 = vadd.f32 %v5118_v40, %v5094_v60  ;;  %v5154_v60 = vld [vmem:[%s14493_s5 + $0x28] sm:$0xff]  ;;  %v5506_v31 = vld [vmem:[#allocation5 + $0x260] sm:$0xff]  ;;  %v5519_v11 = vld [vmem:[#allocation5 + $0x2c8] sm:$0xff] }
 0x682   :  { %v10179_v16 = vpack.c.bf16 %v5143_v12, %v5140_v55  ;;  %v5124_v63 = vadd.f32 %v5118_v40, %v5097_v38  ;;  %v5127_v35 = vadd.f32 %v5118_v40, %v5100_v57  ;;  %v5130_v45 = vadd.f32 %v5118_v40, %v5103_v20  ;;  %v5155_v38 = vld [vmem:[%s14493_s5 + $0x30] sm:$0xff]  ;;  %v5156_v57 = vld [vmem:[%s14493_s5 + $0x38] sm:$0xff]  ;;  %v5157_v20 = vld [vmem:[%s14493_s5 + $0x40] sm:$0xff] }
 0x683   :  { %10174 = vmatprep.subr.bf16.mxu0 %v10173_v26  ;;  %v5136_v50 = vmax.f32 %v5121_v48, 0.0  ;;  %v5133_v9 = vadd.f32 %v5118_v40, %v5106_v25  ;;  %v5147_v62 = vmax.f32 %v5132_v36, 0.0  ;;  %v5146_v53 = vmax.f32 %v5131_v2, 0.0  ;;  %v5502_v25 = vld [vmem:[#allocation5 + $0x240] sm:$0xff]  ;;  %v5521_v42 = vld [vmem:[#allocation5 + $0x2d8] sm:$0xff]  ;;  %v5523_v55 = vld [vmem:[#allocation5 + $0x2e8] sm:$0xff] }
 0x684   :  { %10176 = vmatpush1.bf16.msra.mxu0 %v10175_v54  ;;  %v5139_v51 = vmax.f32 %v5124_v63, 0.0  ;;  %v5142_v33 = vmax.f32 %v5127_v35, 0.0  ;;  %v5145_v13 = vmax.f32 %v5130_v45, 0.0  ;;  %v10189_v3 = vpack.c.bf16 %v5505_v34, %v5503_v5  ;;  %v5510_v4 = vld [vmem:[#allocation5 + $0x280] sm:$0xff]  ;;  %v5520_v54 = vld [vmem:[#allocation5 + $0x2d0] sm:$0xff]  ;;  %v5525_v12 = vld [vmem:[#allocation5 + $0x2f8] sm:$0xff] }
 0x685   :  { %10178 = vmatprep.subr.bf16.mxu0 %v10177_v19  ;;  %v5148_v32 = vmax.f32 %v5133_v9, 0.0  ;;  %v10191_v7 = vpack.c.bf16 %v5504_v44, %v5502_v25  ;;  %v10193_v8 = vpack.c.bf16 %v5509_v30, %v5507_v1  ;;  %v10195_v59 = vpack.c.bf16 %v5508_v27, %v5506_v31  ;;  %v5514_v10 = vld [vmem:[#allocation5 + $0x2a0] sm:$0xff]  ;;  %v5524_v2 = vld [vmem:[#allocation5 + $0x2f0] sm:$0xff]  ;;  %v5527_v48 = vld [vmem:[#allocation5 + $0x308] sm:$0xff] }
 0x686   :  { %v10181_v43 = vpack.c.bf16 %v5139_v51, %v5136_v50  ;;  %v10185_v21 = vpack.c.bf16 %v5145_v13, %v5142_v33  ;;  %v10197_v29 = vpack.c.bf16 %v5513_v56, %v5511_v23  ;;  %v10199_v28 = vpack.c.bf16 %v5512_v15, %v5510_v4  ;;  %v5518_v58 = vld [vmem:[#allocation5 + $0x2c0] sm:$0xff]  ;;  %v5528_v45 = vld [vmem:[#allocation5 + $0x310] sm:$0xff]  ;;  %v5531_v9 = vld [vmem:[#allocation5 + $0x328] sm:$0xff] }
 0x687   :  { %v10201_v40 = vpack.c.bf16 %v5517_v41, %v5515_v24  ;;  %v10203_v46 = vpack.c.bf16 %v5516_v17, %v5514_v10  ;;  %v10205_v47 = vpack.c.bf16 %v5521_v42, %v5519_v11  ;;  %v10207_v36 = vpack.c.bf16 %v5520_v54, %v5518_v58  ;;  %v5522_v19 = vld [vmem:[#allocation5 + $0x2e0] sm:$0xff]  ;;  %v5533_v51 = vld [vmem:[#allocation5 + $0x338] sm:$0xff]  ;;  %v5536_v34 = vld [vmem:[#allocation5 + $0x350] sm:$0xff] }
 0x688   :  { %10180 = vmatpush1.bf16.msra.mxu0 %v10179_v16  ;;  %v10209_v26 = vpack.c.bf16 %v5525_v12, %v5523_v55  ;;  %v5529_v16 = vld [vmem:[#allocation5 + $0x318] sm:$0xff]  ;;  %v10211_v63 = vpack.c.bf16 %v5524_v2, %v5522_v19  ;;  %v5526_v50 = vld [vmem:[#allocation5 + $0x300] sm:$0xff]  ;;  %v10217_v13 = vpack.c.bf16 %v5533_v51, %v5531_v9  ;;  %v5544_v44 = vld [vmem:[#allocation5 + $0x390] sm:$0xff] }
 0x689   :  { %5197 = vmatprep.subr.mxu0 %v5147_v62  ;;  %v10213_v35 = vpack.c.bf16 %v5529_v16, %v5527_v48  ;;  %v10215_v33 = vpack.c.bf16 %v5528_v45, %v5526_v50  ;;  %v5532_v62 = vld [vmem:[#allocation5 + $0x330] sm:$0xff]  ;;  %v5534_v5 = vld [vmem:[#allocation5 + $0x340] sm:$0xff]  ;;  %v5547_v1 = vld [vmem:[#allocation5 + $0x3a8] sm:$0xff] }
 0x68a   :  { %v5542_v25 = vld [vmem:[#allocation5 + $0x380] sm:$0xff]  ;;  %v5549_v30 = vld [vmem:[#allocation5 + $0x3b8] sm:$0xff]  ;;  %v5548_v27 = vld [vmem:[#allocation5 + $0x3b0] sm:$0xff] }
 0x68b   :  { %v5546_v31 = vld [vmem:[#allocation5 + $0x3a0] sm:$0xff]  ;;  %v5551_v23 = vld [vmem:[#allocation5 + $0x3c8] sm:$0xff]  ;;  %v5553_v56 = vld [vmem:[#allocation5 + $0x3d8] sm:$0xff] }
 0x68c   :  { %5198 = vmatpush1.msra.mxu0 %v5146_v53  ;;  %v5537_v53 = vld [vmem:[#allocation5 + $0x358] sm:$0xff]  ;;  %v5550_v4 = vld [vmem:[#allocation5 + $0x3c0] sm:$0xff]  ;;  %v5552_v15 = vld [vmem:[#allocation5 + $0x3d0] sm:$0xff] }
 0x68d   :  { %8808 = vmatmul.mubr.msk.f32.vlgmr.msra.gmra.mrb[166].mxu0 %vm962_vm1, %v5149_v39  ;;  %10182 = vmatprep.subr.bf16.mxu0 %v10181_v43  ;;  %v5555_v24 = vld [vmem:[#allocation5 + $0x3e8] sm:$0xff]  ;;  %v5557_v41 = vld [vmem:[#allocation5 + $0x3f8] sm:$0xff]  ;;  %v5554_v10 = vld [vmem:[#allocation5 + $0x3e0] sm:$0xff] }
 0x68e   :  { %10184 = vmatpush3.bf16.msra.mxu0 %v10181_v43  ;;  %5259 = vmatprep.mubr.f32.mxu0 %v11353_v52  ;;  %v5530_v43 = vld [vmem:[#allocation5 + $0x320] sm:$0xff]  ;;  %v5556_v17 = vld [vmem:[#allocation5 + $0x3f0] sm:$0xff]  ;;  %v5559_v11 = vld [vmem:[#allocation5 + $0x408] sm:$0xff] }
 0x68f   :  { %10186 = vmatprep.subr.bf16.mxu0 %v10185_v21  ;;  %v5561_v42 = vld [vmem:[#allocation5 + $0x418] sm:$0xff]  ;;  %v5558_v58 = vld [vmem:[#allocation5 + $0x400] sm:$0xff]  ;;  %v5560_v54 = vld [vmem:[#allocation5 + $0x410] sm:$0xff] }
 0x690   :  { %v5563_v55 = vld [vmem:[#allocation5 + $0x428] sm:$0xff]  ;;  %v5565_v12 = vld [vmem:[#allocation5 + $0x438] sm:$0xff]  ;;  %v5562_v19 = vld [vmem:[#allocation5 + $0x420] sm:$0xff] }
 0x691   :  { %8809 = vmatmul.mubr.msk.f32.gmra.mrb[168].mxu0 %vm962_vm1, %v5150_v22  ;;  %v5564_v2 = vld [vmem:[#allocation5 + $0x430] sm:$0xff]  ;;  %v5567_v16 = vld [vmem:[#allocation5 + $0x448] sm:$0xff] }
 0x692   :  { %10188 = vmatpush3.bf16.msra.mxu0 %v10185_v21  ;;  %5265 = vmatprep.mubr.f32.mxu0 %v11353_v52  ;;  %v5535_v21 = vld [vmem:[#allocation5 + $0x348] sm:$0xff]  ;;  %v10251_v48 = vpack.c.bf16 %v5564_v2, %v5562_v19  ;;  %v5441_v19 = vld [vmem:[#allocation5 + $0x60] sm:$0xff]  ;;  %v5443_v2 = vld [vmem:[#allocation5 + $0x70] sm:$0xff] }
 0x693   :  { %9708 = vmatprep.subr.mxu0 %v5148_v32 }
 0x695   :  { %8810 = vmatmul.mubr.msk.f32.gmra.mrb[170].mxu0 %vm962_vm1, %v5151_v37 }
 0x696   :  { %9709 = vmatpush3.msra.mxu0 %v5148_v32  ;;  %5271 = vmatprep.mubr.f32.mxu0 %v11353_v52  ;;  %v5539_v32 = vld [vmem:[#allocation5 + $0x368] sm:$0xff] }
 0x697   :  { %10190 = vmatprep.subr.bf16.mxu0 %v10189_v3  ;;  %v10223_v3 = vpack.c.bf16 %v5536_v34, %v5534_v5  ;;  %v5570_v5 = vld [vmem:[#allocation5 + $0x460] sm:$0xff]  ;;  %v5572_v34 = vld [vmem:[#allocation5 + $0x470] sm:$0xff] }
 0x699   :  { %8811 = vmatmul.mubr.msk.f32.gmra.mrb[172].mxu0 %vm962_vm1, %v5152_v49 }
 0x69a   :  { %5277 = vmatprep.mubr.f32.mxu0 %v11353_v52 }
 0x69d   :  { %8812 = vmatmul.mubr.msk.f32.gmra.mrb[174].mxu0 %vm962_vm1, %v5153_v61 }
 0x69e   :  { %5283 = vmatprep.mubr.f32.mxu0 %v11353_v52 }
 0x6a1   :  { %8813 = vmatmul.mubr.msk.f32.gmra.mrb[176].mxu0 %vm962_vm1, %v5154_v60 }
 0x6a2   :  { %5289 = vmatprep.mubr.f32.mxu0 %v11353_v52 }
 0x6a5   :  { %8814 = vmatmul.mubr.msk.f32.gmra.mrb[178].mxu0 %vm962_vm1, %v5155_v38 }
 0x6a6   :  { %5295 = vmatprep.mubr.f32.mxu0 %v11353_v52 }
 0x6a9   :  { %8815 = vmatmul.mubr.msk.f32.gmra.mrb[180].mxu0 %vm962_vm1, %v5156_v57 }
 0x6aa   :  { %5301 = vmatprep.mubr.f32.mxu0 %v11353_v52 }
 0x6ad   :  { %8816 = vmatmul.mubr.msk.f32.gmra.mrb[182].mxu0 %vm962_vm1, %v5157_v20 }
 0x6ae   :  { %5307 = vmatprep.mubr.f32.mxu0 %v11353_v52 }
 0x6b1   :  { %8817 = vmatmul.mubr.msk.f32.gmra.mrb[184].mxu0 %vm962_vm1, %v5158_v14 }
 0x6b2   :  { %9710 = vmatprep.mubr.msk.f32.mxu0 %vm962_vm1, %v5149_v39  ;;  %v10219_v39 = vpack.c.bf16 %v5532_v62, %v5530_v43  ;;  %v5571_v43 = vld [vmem:[#allocation5 + $0x468] sm:$0xff]  ;;  %v5573_v62 = vld [vmem:[#allocation5 + $0x478] sm:$0xff] }
 0x6b5   :  { %9711 = vmatmul.mubr.msk.f32.vlgmr.msra.gmra.mrb[186].mxu0 %vm962_vm1, %v5150_v22  ;;  %v10221_v22 = vpack.c.bf16 %v5537_v53, %v5535_v21 }
 0x6b6   :  { %9713 = vmatprep.mubr.msk.f32.mxu0 %vm962_vm1, %v5151_v37  ;;  %10192 = vmatpush1.bf16.msra.mxu0 %v10191_v7  ;;  %v5541_v37 = vld [vmem:[#allocation5 + $0x378] sm:$0xff]  ;;  %v10231_v7 = vpack.c.bf16 %v5544_v44, %v5542_v25 }
 0x6b7   :  { %10194 = vmatprep.subr.bf16.mxu0 %v10193_v8  ;;  %v10233_v8 = vpack.c.bf16 %v5549_v30, %v5547_v1 }
 0x6b9   :  { %9714 = vmatmul.mubr.msk.f32.gmra.mrb[188].mxu0 %vm962_vm1, %v5152_v49  ;;  %v10225_v49 = vpack.c.bf16 %v5541_v37, %v5539_v32  ;;  %v5430_v32 = vld [vmem:[#allocation5 + $0x8] sm:$0xff]  ;;  %v5432_v37 = vld [vmem:[#allocation5 + $0x18] sm:$0xff] }
 0x6ba   :  { %10196 = vmatpush1.bf16.msra.mxu0 %v10195_v59  ;;  %9716 = vmatprep.mubr.msk.f32.mxu0 %vm962_vm1, %v5153_v61  ;;  %v5538_v61 = vld [vmem:[#allocation5 + $0x360] sm:$0xff]  ;;  %v10235_v59 = vpack.c.bf16 %v5548_v27, %v5546_v31 }
 0x6bb   :  { %10198 = vmatprep.subr.bf16.mxu0 %v10197_v29  ;;  %v10237_v29 = vpack.c.bf16 %v5553_v56, %v5551_v23  ;;  %v5429_v56 = vld [vmem:[#allocation5] sm:$0xff] }
 0x6bd   :  { %9717 = vmatmul.mubr.msk.f32.gmra.mrb[190].mxu0 %vm962_vm1, %v5154_v60  ;;  %v5540_v60 = vld [vmem:[#allocation5 + $0x370] sm:$0xff] }
 0x6be   :  { %10200 = vmatpush1.bf16.msra.mxu0 %v10199_v28  ;;  %9719 = vmatprep.mubr.msk.f32.mxu0 %vm962_vm1, %v5155_v38  ;;  %v5543_v38 = vld [vmem:[#allocation5 + $0x388] sm:$0xff]  ;;  %v10239_v28 = vpack.c.bf16 %v5552_v15, %v5550_v4  ;;  %v5436_v15 = vld [vmem:[#allocation5 + $0x38] sm:$0xff] }
 0x6bf   :  { %10202 = vmatprep.subr.bf16.mxu0 %v10201_v40  ;;  %v10241_v40 = vpack.c.bf16 %v5557_v41, %v5555_v24  ;;  %v5434_v4 = vld [vmem:[#allocation5 + $0x28] sm:$0xff] }
 0x6c1   :  { %9720 = vmatmul.mubr.msk.f32.gmra.mrb[192].mxu0 %vm962_vm1, %v5156_v57  ;;  %v5545_v57 = vld [vmem:[#allocation5 + $0x398] sm:$0xff] }
 0x6c2   :  { %10204 = vmatpush1.bf16.msra.mxu0 %v10203_v46  ;;  %9722 = vmatprep.mubr.msk.f32.mxu0 %vm962_vm1, %v5157_v20  ;;  %v10227_v20 = vpack.c.bf16 %v5540_v60, %v5538_v61  ;;  %v10243_v46 = vpack.c.bf16 %v5556_v17, %v5554_v10  ;;  %v10261_v60 = vpack.c.bf16 %v5432_v37, %v5430_v32  ;;  %v5435_v10 = vld [vmem:[#allocation5 + $0x30] sm:$0xff]  ;;  %v5456_v32 = vld [vmem:[#allocation5 + $0xd8] sm:$0xff] }
 0x6c3   :  { %10206 = vmatprep.subr.bf16.mxu0 %v10205_v47  ;;  %v10245_v47 = vpack.c.bf16 %v5561_v42, %v5559_v11  ;;  %v5438_v11 = vld [vmem:[#allocation5 + $0x48] sm:$0xff]  ;;  %v5440_v42 = vld [vmem:[#allocation5 + $0x58] sm:$0xff] }
 0x6c5   :  { %9723 = vmatmul.mubr.msk.f32.gmra.mrb[194].mxu0 %vm962_vm1, %v5158_v14  ;;  %v10229_v14 = vpack.c.bf16 %v5545_v57, %v5543_v38 }
 0x6c6   :  { %10208 = vmatpush1.bf16.msra.mxu0 %v10207_v36  ;;  %v10247_v36 = vpack.c.bf16 %v5560_v54, %v5558_v58  ;;  %v5437_v58 = vld [vmem:[#allocation5 + $0x40] sm:$0xff]  ;;  %v5439_v54 = vld [vmem:[#allocation5 + $0x50] sm:$0xff] }
 0x6c7   :  { %10210 = vmatprep.subr.bf16.mxu0 %v10209_v26  ;;  %v10249_v26 = vpack.c.bf16 %v5565_v12, %v5563_v55  ;;  %v5442_v55 = vld [vmem:[#allocation5 + $0x68] sm:$0xff]  ;;  %v5444_v12 = vld [vmem:[#allocation5 + $0x78] sm:$0xff] }
 0x6ca   :  { %10212 = vmatpush1.bf16.msra.mxu0 %v10211_v63  ;;  %v5569_v63 = vld [vmem:[#allocation5 + $0x458] sm:$0xff] }
 0x6cb   :  { %10214 = vmatprep.subr.bf16.mxu0 %v10213_v35  ;;  %v10253_v35 = vpack.c.bf16 %v5569_v63, %v5567_v16  ;;  %v5448_v16 = vld [vmem:[#allocation5 + $0x98] sm:$0xff]  ;;  %v10275_v63 = vpack.c.bf16 %v5443_v2, %v5441_v19  ;;  %v5469_v2 = vld [vmem:[#allocation5 + $0x140] sm:$0xff] }
 0x6ce   :  { %10216 = vmatpush1.bf16.msra.mxu0 %v10215_v33  ;;  %v5566_v33 = vld [vmem:[#allocation5 + $0x440] sm:$0xff] }
 0x6cf   :  { %10218 = vmatprep.subr.bf16.mxu0 %v10217_v13  ;;  %v5568_v13 = vld [vmem:[#allocation5 + $0x450] sm:$0xff] }
 0x6d0   :  { %v10255_v53 = vpack.c.bf16 %v5568_v13, %v5566_v33  ;;  %v5445_v33 = vld [vmem:[#allocation5 + $0x80] sm:$0xff]  ;;  %v5447_v13 = vld [vmem:[#allocation5 + $0x90] sm:$0xff] }
 0x6d2   :  { %10220 = vmatpush1.bf16.msra.mxu0 %v10219_v39 }
 0x6d3   :  { %10222 = vmatprep.subr.bf16.mxu0 %v10221_v22  ;;  %v10257_v22 = vpack.c.bf16 %v5573_v62, %v5571_v43  ;;  %v5450_v43 = vld [vmem:[#allocation5 + $0xa8] sm:$0xff]  ;;  %v5452_v62 = vld [vmem:[#allocation5 + $0xb8] sm:$0xff] }
 0x6d6   :  { %10224 = vmatpush1.bf16.msra.mxu0 %v10223_v3 }
 0x6d7   :  { %10226 = vmatprep.subr.bf16.mxu0 %v10225_v49  ;;  %v10259_v49 = vpack.c.bf16 %v5572_v34, %v5570_v5  ;;  %v5454_v34 = vld [vmem:[#allocation5 + $0xc8] sm:$0xff] }
 0x6da   :  { %10228 = vmatpush1.bf16.msra.mxu0 %v10227_v20 }
 0x6db   :  { %10230 = vmatprep.subr.bf16.mxu0 %v10229_v14 }
 0x6de   :  { %10232 = vmatpush1.bf16.msra.mxu0 %v10231_v7 }
 0x6df   :  { %10234 = vmatprep.subr.bf16.mxu0 %v10233_v8 }
 0x6e2   :  { %10236 = vmatpush1.bf16.msra.mxu0 %v10235_v59  ;;  %v5431_v59 = vld [vmem:[#allocation5 + $0x10] sm:$0xff] }
 0x6e3   :  { %10238 = vmatprep.subr.bf16.mxu0 %v10237_v29  ;;  %v10263_v24 = vpack.c.bf16 %v5431_v59, %v5429_v56  ;;  %v5460_v56 = vld [vmem:[#allocation5 + $0xf8] sm:$0xff] }
 0x6e6   :  { %10240 = vmatpush1.bf16.msra.mxu0 %v10239_v28  ;;  %v10265_v28 = vpack.c.bf16 %v5436_v15, %v5434_v4  ;;  %v5457_v15 = vld [vmem:[#allocation5 + $0xe0] sm:$0xff] }
 0x6e7   :  { %10242 = vmatprep.subr.bf16.mxu0 %v10241_v40  ;;  %v5433_v40 = vld [vmem:[#allocation5 + $0x20] sm:$0xff] }
 0x6ea   :  { %10244 = vmatpush1.bf16.msra.mxu0 %v10243_v46  ;;  %v10267_v46 = vpack.c.bf16 %v5435_v10, %v5433_v40 }
 0x6eb   :  { %10246 = vmatprep.subr.bf16.mxu0 %v10245_v47  ;;  %v10269_v47 = vpack.c.bf16 %v5440_v42, %v5438_v11  ;;  %v5463_v11 = vld [vmem:[#allocation5 + $0x110] sm:$0xff]  ;;  %v5466_v42 = vld [vmem:[#allocation5 + $0x128] sm:$0xff] }
 0x6ee   :  { %10248 = vmatpush1.bf16.msra.mxu0 %v10247_v36  ;;  %v10271_v36 = vpack.c.bf16 %v5439_v54, %v5437_v58  ;;  %v5465_v54 = vld [vmem:[#allocation5 + $0x120] sm:$0xff] }
 0x6ef   :  { %10250 = vmatprep.subr.bf16.mxu0 %v10249_v26  ;;  %v10273_v26 = vpack.c.bf16 %v5444_v12, %v5442_v55  ;;  %v5467_v55 = vld [vmem:[#allocation5 + $0x130] sm:$0xff]  ;;  %v5470_v12 = vld [vmem:[#allocation5 + $0x148] sm:$0xff] }
 0x6f2   :  { %10252 = vmatpush1.bf16.msra.mxu0 %v10251_v48  ;;  %v5446_v48 = vld [vmem:[#allocation5 + $0x88] sm:$0xff] }
 0x6f3   :  { %10254 = vmatprep.subr.bf16.mxu0 %v10253_v35  ;;  %v10277_v35 = vpack.c.bf16 %v5448_v16, %v5446_v48  ;;  %v5471_v48 = vld [vmem:[#allocation5 + $0x150] sm:$0xff]  ;;  %v5474_v16 = vld [vmem:[#allocation5 + $0x168] sm:$0xff] }
 0x760   :  { %v13421_v50 = vpop.f32.mrb[166].mxu0 }
 0x761   :  { %v13423_v45 = vpop.f32.mrb[167].mxu0 }
 0x764   :  { %v13425_v9 = vpop.f32.mrb[168].mxu0 }
 0x765   :  { %v13427_v51 = vpop.f32.mrb[169].mxu0 }
 0x768   :  { %v5267_v21 = vpop.f32.mrb[170].mxu0 }
 0x769   :  { %v5269_v39 = vpop.f32.mrb[171].mxu0 }
 0x76a   :  { %5644 = vmatprep.mubr.f32.mxu0 %v5269_v39  ;;  %v5449_v39 = vld [vmem:[#allocation5 + $0xa0] sm:$0xff] }
 0x76b   :  { %5645 = vmatmul.mubr.f32.vlgmr.msra.gmra.mrb[196].mxu0 %v5267_v21  ;;  %v10279_v21 = vpack.c.bf16 %v5447_v13, %v5445_v33  ;;  %v5473_v13 = vld [vmem:[#allocation5 + $0x160] sm:$0xff] }
 0x76c   :  { %v5273_v3 = vpop.f32.mrb[172].mxu0  ;;  %10256 = vmatpush1.bf16.msra.mxu0 %v10255_v53 }
 0x76d   :  { %v5275_v61 = vpop.f32.mrb[173].mxu0  ;;  %10258 = vmatprep.subr.bf16.mxu0 %v10257_v22  ;;  %v5451_v22 = vld [vmem:[#allocation5 + $0xb0] sm:$0xff] }
 0x76e   :  { %5650 = vmatprep.mubr.f32.mxu0 %v5275_v61  ;;  %v10283_v37 = vpack.c.bf16 %v5451_v22, %v5449_v39  ;;  %v5455_v61 = vld [vmem:[#allocation5 + $0xd0] sm:$0xff]  ;;  %v5477_v22 = vld [vmem:[#allocation5 + $0x180] sm:$0xff] }
 0x76f   :  { %5651 = vmatmul.mubr.f32.gmra.mrb[198].mxu0 %v5273_v3  ;;  %v10285_v3 = vpack.c.bf16 %v5456_v32, %v5454_v34  ;;  %v5479_v34 = vld [vmem:[#allocation5 + $0x190] sm:$0xff]  ;;  %v5482_v32 = vld [vmem:[#allocation5 + $0x1a8] sm:$0xff] }
 0x770   :  { %v13429_v38 = vpop.f32.mrb[174].mxu0  ;;  %10260 = vmatpush1.bf16.msra.mxu0 %v10259_v49  ;;  %5721 = vmatprep.mubr.f32.mxu0 %v11353_v52  ;;  %v5453_v49 = vld [vmem:[#allocation5 + $0xc0] sm:$0xff] }
 0x771   :  { %v13432_v57 = vpop.f32.mrb[175].mxu0  ;;  %10262 = vmatprep.subr.bf16.mxu0 %v10261_v60  ;;  %v5458_v60 = vld [vmem:[#allocation5 + $0xe8] sm:$0xff]  ;;  %v10287_v59 = vpack.c.bf16 %v5455_v61, %v5453_v49  ;;  %v5481_v61 = vld [vmem:[#allocation5 + $0x1a0] sm:$0xff] }
 0x772   :  { %v10289_v4 = vpack.c.bf16 %v5460_v56, %v5458_v60  ;;  %v5483_v60 = vld [vmem:[#allocation5 + $0x1b0] sm:$0xff]  ;;  %v5486_v56 = vld [vmem:[#allocation5 + $0x1c8] sm:$0xff] }
 0x774   :  { %v13434_v20 = vpop.f32.mrb[176].mxu0 }
 0x775   :  { %v13436_v14 = vpop.f32.mrb[177].mxu0 }
 0x778   :  { %v13438_v25 = vpop.f32.mrb[178].mxu0 }
 0x779   :  { %v13440_v44 = vpop.f32.mrb[179].mxu0 }
 0x77c   :  { %v13442_v1 = vpop.f32.mrb[180].mxu0 }
 0x77d   :  { %v13444_v30 = vpop.f32.mrb[181].mxu0 }
 0x780   :  { %v13446_v7 = vpop.f32.mrb[182].mxu0 }
 0x781   :  { %v13448_v8 = vpop.f32.mrb[183].mxu0 }
 0x784   :  { %v13450_v31 = vpop.f32.mrb[184].mxu0 }
 0x785   :  { %v13452_v27 = vpop.f32.mrb[185].mxu0 }
 0x788   :  { %v13454_v23 = vpop.f32.mrb[186].mxu0 }
 0x789   :  { %v13456_v29 = vpop.f32.mrb[187].mxu0 }
 0x78c   :  { %v9715_v41 = vpop.f32.mrb[188].mxu0 }
 0x78d   :  { %v5390_v17 = vpop.f32.mrb[189].mxu0 }
 0x78e   :  { %8828 = vmatmul.mubr.msk.f32.vlgmr.msra.gmra.mrb[196].mxu0 %vm4386_vm3, %v5390_v17  ;;  %v5461_v17 = vld [vmem:[#allocation5 + $0x100] sm:$0xff] }
 0x78f   :  { %10264 = vmatpush1.bf16.msra.mxu0 %v10263_v24  ;;  %5727 = vmatprep.mubr.f32.mxu0 %v11353_v52  ;;  %v5459_v24 = vld [vmem:[#allocation5 + $0xf0] sm:$0xff] }
 0x790   :  { %10266 = vmatprep.subr.bf16.mxu0 %v10265_v28  ;;  %v13462_v53 = vpop.f32.mrb[190].mxu0  ;;  %v5464_v28 = vld [vmem:[#allocation5 + $0x118] sm:$0xff]  ;;  %v10291_v40 = vpack.c.bf16 %v5459_v24, %v5457_v15  ;;  %v5485_v24 = vld [vmem:[#allocation5 + $0x1c0] sm:$0xff] }
 0x791   :  { %v13464_v5 = vpop.f32.mrb[191].mxu0 }
 0x792   :  { %8829 = vmatmul.mubr.msk.f32.gmra.mrb[198].mxu0 %vm4386_vm3, %v9715_v41  ;;  %v5462_v41 = vld [vmem:[#allocation5 + $0x108] sm:$0xff] }
 0x793   :  { %10268 = vmatpush1.bf16.msra.mxu0 %v10267_v46  ;;  %5804 = vmatprep.mubr.f32.mxu0 %v13423_v45  ;;  %v10281_v45 = vpack.c.bf16 %v5452_v62, %v5450_v43  ;;  %v10293_v10 = vpack.c.bf16 %v5464_v28, %v5462_v41  ;;  %v5468_v46 = vld [vmem:[#allocation5 + $0x138] sm:$0xff]  ;;  %v5475_v43 = vld [vmem:[#allocation5 + $0x170] sm:$0xff]  ;;  %v5478_v62 = vld [vmem:[#allocation5 + $0x188] sm:$0xff] }
 0x794   :  { %10270 = vmatprep.subr.bf16.mxu0 %v10269_v47  ;;  %v10295_v47 = vpack.c.bf16 %v5463_v11, %v5461_v17  ;;  %v10297_v58 = vpack.c.bf16 %v5468_v46, %v5466_v42  ;;  %v5487_v41 = vld [vmem:[#allocation5 + $0x1d0] sm:$0xff]  ;;  %v5490_v28 = vld [vmem:[#allocation5 + $0x1e8] sm:$0xff]  ;;  %v5489_v11 = vld [vmem:[#allocation5 + $0x1e0] sm:$0xff] }
 0x795   :  { %v5491_v42 = vld [vmem:[#allocation5 + $0x1f0] sm:$0xff]  ;;  %v5494_v46 = vld [vmem:[#allocation5 + $0x208] sm:$0xff] }
 0x797   :  { %10272 = vmatpush1.bf16.msra.mxu0 %v10271_v36  ;;  %v5472_v36 = vld [vmem:[#allocation5 + $0x158] sm:$0xff] }
 0x798   :  { %10274 = vmatprep.subr.bf16.mxu0 %v10273_v26  ;;  %v10299_v26 = vpack.c.bf16 %v5467_v55, %v5465_v54  ;;  %v10301_v19 = vpack.c.bf16 %v5472_v36, %v5470_v12  ;;  %v5493_v55 = vld [vmem:[#allocation5 + $0x200] sm:$0xff]  ;;  %v5495_v12 = vld [vmem:[#allocation5 + $0x210] sm:$0xff]  ;;  %v5498_v36 = vld [vmem:[#allocation5 + $0x228] sm:$0xff] }
 0x79b   :  { %10276 = vmatpush1.bf16.msra.mxu0 %v10275_v63  ;;  %v5476_v63 = vld [vmem:[#allocation5 + $0x178] sm:$0xff] }
 0x79c   :  { %10278 = vmatprep.subr.bf16.mxu0 %v10277_v35  ;;  %v10303_v35 = vpack.c.bf16 %v5471_v48, %v5469_v2  ;;  %v10305_v33 = vpack.c.bf16 %v5476_v63, %v5474_v16  ;;  %v5497_v48 = vld [vmem:[#allocation5 + $0x220] sm:$0xff]  ;;  %v5499_v16 = vld [vmem:[#allocation5 + $0x230] sm:$0xff]  ;;  %v5896_v63 = vld [vmem:[#allocation5 + $0x488] sm:$0xff] }
 0x79f   :  { %10280 = vmatpush1.bf16.msra.mxu0 %v10279_v21  ;;  %v5480_v21 = vld [vmem:[#allocation5 + $0x198] sm:$0xff] }
 0x7a0   :  { %10282 = vmatprep.subr.bf16.mxu0 %v10281_v45  ;;  %v10307_v45 = vpack.c.bf16 %v5475_v43, %v5473_v13  ;;  %v10309_v39 = vpack.c.bf16 %v5480_v21, %v5478_v62  ;;  %v13468_v13 = vpop.f32.mrb[192].mxu0  ;;  %v5895_v62 = vld [vmem:[#allocation5 + $0x480] sm:$0xff]  ;;  %v5897_v21 = vld [vmem:[#allocation5 + $0x490] sm:$0xff] }
 0x7a3   :  { %10284 = vmatpush1.bf16.msra.mxu0 %v10283_v37  ;;  %v5484_v37 = vld [vmem:[#allocation5 + $0x1b8] sm:$0xff] }
 0x7a4   :  { %10286 = vmatprep.subr.bf16.mxu0 %v10285_v3  ;;  %v10311_v3 = vpack.c.bf16 %v5479_v34, %v5477_v22  ;;  %v10313_v49 = vpack.c.bf16 %v5484_v37, %v5482_v32  ;;  %v5902_v22 = vld [vmem:[#allocation5 + $0x4b8] sm:$0xff]  ;;  %v5899_v32 = vld [vmem:[#allocation5 + $0x4a0] sm:$0xff]  ;;  %v5901_v37 = vld [vmem:[#allocation5 + $0x4b0] sm:$0xff] }
 0x7a7   :  { %10288 = vmatpush1.bf16.msra.mxu0 %v10287_v59  ;;  %v5488_v59 = vld [vmem:[#allocation5 + $0x1d8] sm:$0xff] }
 0x7a8   :  { %10290 = vmatprep.subr.bf16.mxu0 %v10289_v4  ;;  %v10315_v4 = vpack.c.bf16 %v5483_v60, %v5481_v61  ;;  %v10317_v15 = vpack.c.bf16 %v5488_v59, %v5486_v56  ;;  %v5906_v61 = vld [vmem:[#allocation5 + $0x4d8] sm:$0xff]  ;;  %v5903_v56 = vld [vmem:[#allocation5 + $0x4c0] sm:$0xff]  ;;  %v5905_v59 = vld [vmem:[#allocation5 + $0x4d0] sm:$0xff] }
 0x7ab   :  { %10292 = vmatpush1.bf16.msra.mxu0 %v10291_v40  ;;  %v5492_v40 = vld [vmem:[#allocation5 + $0x1f8] sm:$0xff] }
 0x7ac   :  { %10294 = vmatprep.subr.bf16.mxu0 %v10293_v10  ;;  %v10319_v10 = vpack.c.bf16 %v5487_v41, %v5485_v24  ;;  %v10321_v17 = vpack.c.bf16 %v5492_v40, %v5490_v28  ;;  %v10343_v24 = vpack.c.bf16 %v5905_v59, %v5903_v56  ;;  %v5909_v28 = vld [vmem:[#allocation5 + $0x4f0] sm:$0xff]  ;;  %v5912_v40 = vld [vmem:[#allocation5 + $0x508] sm:$0xff] }
 0x7ad   :  { %v5933_v56 = vld [vmem:[#allocation5 + $0x5b0] sm:$0xff]  ;;  %v5936_v59 = vld [vmem:[#allocation5 + $0x5c8] sm:$0xff] }
 0x7af   :  { %10296 = vmatpush1.bf16.msra.mxu0 %v10295_v47  ;;  %v5496_v47 = vld [vmem:[#allocation5 + $0x218] sm:$0xff] }
 0x7b0   :  { %10298 = vmatprep.subr.bf16.mxu0 %v10297_v58  ;;  %v10323_v58 = vpack.c.bf16 %v5491_v42, %v5489_v11  ;;  %v10325_v54 = vpack.c.bf16 %v5496_v47, %v5494_v46  ;;  %v5911_v42 = vld [vmem:[#allocation5 + $0x500] sm:$0xff]  ;;  %v5913_v46 = vld [vmem:[#allocation5 + $0x510] sm:$0xff]  ;;  %v5916_v47 = vld [vmem:[#allocation5 + $0x528] sm:$0xff] }
 0x7b3   :  { %10300 = vmatpush1.bf16.msra.mxu0 %v10299_v26  ;;  %v5500_v26 = vld [vmem:[#allocation5 + $0x238] sm:$0xff] }
 0x7b4   :  { %10302 = vmatprep.subr.bf16.mxu0 %v10301_v19  ;;  %v10327_v19 = vpack.c.bf16 %v5495_v12, %v5493_v55  ;;  %v10329_v2 = vpack.c.bf16 %v5500_v26, %v5498_v36  ;;  %v5917_v55 = vld [vmem:[#allocation5 + $0x530] sm:$0xff]  ;;  %v5920_v12 = vld [vmem:[#allocation5 + $0x548] sm:$0xff]  ;;  %v5922_v36 = vld [vmem:[#allocation5 + $0x558] sm:$0xff] }
 0x7b7   :  { %10304 = vmatpush1.bf16.msra.mxu0 %v10303_v35  ;;  %v5898_v35 = vld [vmem:[#allocation5 + $0x498] sm:$0xff] }
 0x7b8   :  { %10306 = vmatprep.subr.bf16.mxu0 %v10305_v33  ;;  %v10331_v33 = vpack.c.bf16 %v5499_v16, %v5497_v48  ;;  %v10333_v43 = vpack.c.bf16 %v5898_v35, %v5896_v63  ;;  %v5921_v48 = vld [vmem:[#allocation5 + $0x550] sm:$0xff]  ;;  %v5924_v16 = vld [vmem:[#allocation5 + $0x568] sm:$0xff]  ;;  %v5926_v63 = vld [vmem:[#allocation5 + $0x578] sm:$0xff] }
 0x7bb   :  { %10308 = vmatpush1.bf16.msra.mxu0 %v10307_v45  ;;  %v13470_v45 = vpop.f32.mrb[193].mxu0 }
 0x7bc   :  { %10310 = vmatprep.subr.bf16.mxu0 %v10309_v39  ;;  %v5900_v39 = vld [vmem:[#allocation5 + $0x4a8] sm:$0xff]  ;;  %v13474_v34 = vpop.f32.mrb[194].mxu0 }
 0x7bf   :  { %10312 = vmatpush1.bf16.msra.mxu0 %v10311_v3  ;;  %v13476_v3 = vpop.f32.mrb[195].mxu0 }
 0x7c0   :  { %10314 = vmatprep.subr.bf16.mxu0 %v10313_v49  ;;  %v5904_v49 = vld [vmem:[#allocation5 + $0x4c8] sm:$0xff] }
 0x7c1   :  { %v10341_v60 = vpack.c.bf16 %v5906_v61, %v5904_v49  ;;  %v5934_v49 = vld [vmem:[#allocation5 + $0x5b8] sm:$0xff] }
 0x7c3   :  { %10316 = vmatpush1.bf16.msra.mxu0 %v10315_v4  ;;  %v5908_v4 = vld [vmem:[#allocation5 + $0x4e8] sm:$0xff] }
 0x7c4   :  { %10318 = vmatprep.subr.bf16.mxu0 %v10317_v15  ;;  %v5910_v15 = vld [vmem:[#allocation5 + $0x4f8] sm:$0xff] }
 0x7c5   :  { %v10345_v41 = vpack.c.bf16 %v5910_v15, %v5908_v4  ;;  %v5938_v4 = vld [vmem:[#allocation5 + $0x5d8] sm:$0xff] }
 0x7c7   :  { %10320 = vmatpush1.bf16.msra.mxu0 %v10319_v10  ;;  %v5914_v10 = vld [vmem:[#allocation5 + $0x518] sm:$0xff] }
 0x7c8   :  { %10322 = vmatprep.subr.bf16.mxu0 %v10321_v17  ;;  %v10349_v11 = vpack.c.bf16 %v5914_v10, %v5912_v40  ;;  %v5942_v40 = vld [vmem:[#allocation5 + $0x5f8] sm:$0xff] }
 0x7cb   :  { %10324 = vmatpush1.bf16.msra.mxu0 %v10323_v58  ;;  %v5918_v58 = vld [vmem:[#allocation5 + $0x538] sm:$0xff] }
 0x7cc   :  { %10326 = vmatprep.subr.bf16.mxu0 %v10325_v54  ;;  %v10353_v54 = vpack.c.bf16 %v5918_v58, %v5916_v47  ;;  %v5946_v47 = vld [vmem:[#allocation5 + $0x618] sm:$0xff] }
 0x7ce   :  { %5805 = vmatmul.mubr.f32.vlgmr.msra.gmra.mrb[196].mxu0 %v13421_v50  ;;  %v10335_v50 = vpack.c.bf16 %v5897_v21, %v5895_v62  ;;  %v5925_v62 = vld [vmem:[#allocation5 + $0x570] sm:$0xff]  ;;  %v5928_v21 = vld [vmem:[#allocation5 + $0x588] sm:$0xff] }
 0x7cf   :  { %5810 = vmatprep.mubr.f32.mxu0 %v13427_v51  ;;  %10328 = vmatpush1.bf16.msra.mxu0 %v10327_v19  ;;  %v10337_v51 = vpack.c.bf16 %v5902_v22, %v5900_v39  ;;  %v10357_v19 = vpack.c.bf16 %v5922_v36, %v5920_v12  ;;  %v5930_v39 = vld [vmem:[#allocation5 + $0x598] sm:$0xff] }
 0x7d0   :  { %10330 = vmatprep.subr.bf16.mxu0 %v10329_v2  ;;  %v5919_v2 = vld [vmem:[#allocation5 + $0x540] sm:$0xff]  ;;  %v5950_v12 = vld [vmem:[#allocation5 + $0x638] sm:$0xff] }
 0x7d1   :  { %v10359_v35 = vpack.c.bf16 %v5921_v48, %v5919_v2  ;;  %v5949_v2 = vld [vmem:[#allocation5 + $0x630] sm:$0xff]  ;;  %v5952_v48 = vld [vmem:[#allocation5 + $0x648] sm:$0xff] }
 0x7d2   :  { %5811 = vmatmul.mubr.f32.gmra.mrb[198].mxu0 %v13425_v9  ;;  %v10339_v9 = vpack.c.bf16 %v5901_v37, %v5899_v32  ;;  %v5929_v32 = vld [vmem:[#allocation5 + $0x590] sm:$0xff]  ;;  %v5932_v37 = vld [vmem:[#allocation5 + $0x5a8] sm:$0xff] }
 0x7d3   :  { %10332 = vmatpush1.bf16.msra.mxu0 %v10331_v33  ;;  %5881 = vmatprep.mubr.f32.mxu0 %v11353_v52  ;;  %v10361_v33 = vpack.c.bf16 %v5926_v63, %v5924_v16  ;;  %v5954_v16 = vld [vmem:[#allocation5 + $0x658] sm:$0xff] }
 0x7d4   :  { %10334 = vmatprep.subr.bf16.mxu0 %v10333_v43  ;;  %v5923_v43 = vld [vmem:[#allocation5 + $0x560] sm:$0xff] }
 0x7d5   :  { %v10363_v22 = vpack.c.bf16 %v5925_v62, %v5923_v43  ;;  %v5953_v43 = vld [vmem:[#allocation5 + $0x650] sm:$0xff]  ;;  %v5956_v62 = vld [vmem:[#allocation5 + $0x668] sm:$0xff] }
 0x7d6   :  { %8830 = vmatmul.mubr.msk.f32.vlgmr.msra.gmra.mrb[196].mxu0 %vm4386_vm3, %v13456_v29  ;;  %v5907_v29 = vld [vmem:[#allocation5 + $0x4e0] sm:$0xff] }
 0x7d7   :  { %10336 = vmatpush1.bf16.msra.mxu0 %v10335_v50  ;;  %5887 = vmatprep.mubr.f32.mxu0 %v11353_v52  ;;  %v10347_v17 = vpack.c.bf16 %v5909_v28, %v5907_v29  ;;  %v10365_v50 = vpack.c.bf16 %v5930_v39, %v5928_v21  ;;  %v5937_v29 = vld [vmem:[#allocation5 + $0x5d0] sm:$0xff]  ;;  %v5940_v28 = vld [vmem:[#allocation5 + $0x5e8] sm:$0xff]  ;;  %v5958_v21 = vld [vmem:[#allocation5 + $0x678] sm:$0xff] }
 0x7d8   :  { %10338 = vmatprep.subr.bf16.mxu0 %v10337_v51  ;;  %v5927_v51 = vld [vmem:[#allocation5 + $0x580] sm:$0xff] }
 0x7d9   :  { %v10367_v61 = vpack.c.bf16 %v5929_v32, %v5927_v51  ;;  %v5957_v51 = vld [vmem:[#allocation5 + $0x670] sm:$0xff]  ;;  %v5960_v32 = vld [vmem:[#allocation5 + $0x688] sm:$0xff] }
 0x7da   :  { %8831 = vmatmul.mubr.msk.f32.gmra.mrb[198].mxu0 %vm4386_vm3, %v13454_v23  ;;  %v10351_v23 = vpack.c.bf16 %v5913_v46, %v5911_v42  ;;  %v5941_v42 = vld [vmem:[#allocation5 + $0x5f0] sm:$0xff]  ;;  %v5944_v46 = vld [vmem:[#allocation5 + $0x608] sm:$0xff] }
 0x7db   :  { %10340 = vmatpush1.bf16.msra.mxu0 %v10339_v9  ;;  %6037 = vmatprep.mubr.f32.mxu0 %v13432_v57  ;;  %v5915_v57 = vld [vmem:[#allocation5 + $0x520] sm:$0xff]  ;;  %v10369_v9 = vpack.c.bf16 %v5934_v49, %v5932_v37  ;;  %v5962_v37 = vld [vmem:[#allocation5 + $0x698] sm:$0xff] }
 0x7dc   :  { %10342 = vmatprep.subr.bf16.mxu0 %v10341_v60  ;;  %v10355_v26 = vpack.c.bf16 %v5917_v55, %v5915_v57  ;;  %v5931_v60 = vld [vmem:[#allocation5 + $0x5a0] sm:$0xff]  ;;  %v5945_v57 = vld [vmem:[#allocation5 + $0x610] sm:$0xff]  ;;  %v5948_v55 = vld [vmem:[#allocation5 + $0x628] sm:$0xff] }
 0x7dd   :  { %v10371_v15 = vpack.c.bf16 %v5933_v56, %v5931_v60  ;;  %v5961_v60 = vld [vmem:[#allocation5 + $0x690] sm:$0xff]  ;;  %v5964_v56 = vld [vmem:[#allocation5 + $0x6a8] sm:$0xff] }
 0x7df   :  { %10344 = vmatpush1.bf16.msra.mxu0 %v10343_v24  ;;  %v10373_v24 = vpack.c.bf16 %v5938_v4, %v5936_v59  ;;  %v5966_v59 = vld [vmem:[#allocation5 + $0x6b8] sm:$0xff] }
 0x7e0   :  { %10346 = vmatprep.subr.bf16.mxu0 %v10345_v41  ;;  %v5935_v41 = vld [vmem:[#allocation5 + $0x5c0] sm:$0xff] }
 0x7e1   :  { %v10375_v10 = vpack.c.bf16 %v5937_v29, %v5935_v41  ;;  %v5965_v41 = vld [vmem:[#allocation5 + $0x6b0] sm:$0xff]  ;;  %v6133_v29 = vld [vmem:[#allocation5 + $0x6c8] sm:$0xff] }
 0x7e3   :  { %10348 = vmatpush1.bf16.msra.mxu0 %v10347_v17  ;;  %v10377_v17 = vpack.c.bf16 %v5942_v40, %v5940_v28  ;;  %v6135_v28 = vld [vmem:[#allocation5 + $0x6d8] sm:$0xff] }
 0x7e4   :  { %10350 = vmatprep.subr.bf16.mxu0 %v10349_v11  ;;  %v5939_v11 = vld [vmem:[#allocation5 + $0x5e0] sm:$0xff] }
 0x7e5   :  { %v10379_v58 = vpack.c.bf16 %v5941_v42, %v5939_v11  ;;  %v6134_v11 = vld [vmem:[#allocation5 + $0x6d0] sm:$0xff]  ;;  %v6137_v42 = vld [vmem:[#allocation5 + $0x6e8] sm:$0xff] }
 0x7e7   :  { %10352 = vmatpush1.bf16.msra.mxu0 %v10351_v23  ;;  %v10381_v23 = vpack.c.bf16 %v5946_v47, %v5944_v46  ;;  %v6139_v46 = vld [vmem:[#allocation5 + $0x6f8] sm:$0xff] }
 0x7e8   :  { %10354 = vmatprep.subr.bf16.mxu0 %v10353_v54  ;;  %v5943_v54 = vld [vmem:[#allocation5 + $0x600] sm:$0xff] }
 0x7e9   :  { %v10383_v36 = vpack.c.bf16 %v5945_v57, %v5943_v54  ;;  %v6141_v54 = vld [vmem:[#allocation5 + $0x708] sm:$0xff] }
 0x7eb   :  { %10356 = vmatpush1.bf16.msra.mxu0 %v10355_v26  ;;  %v10385_v26 = vpack.c.bf16 %v5950_v12, %v5948_v55  ;;  %v6142_v12 = vld [vmem:[#allocation5 + $0x710] sm:$0xff] }
 0x7ec   :  { %10358 = vmatprep.subr.bf16.mxu0 %v10357_v19  ;;  %v5947_v19 = vld [vmem:[#allocation5 + $0x620] sm:$0xff] }
 0x7ed   :  { %v10387_v63 = vpack.c.bf16 %v5949_v2, %v5947_v19 }
 0x7ef   :  { %10360 = vmatpush1.bf16.msra.mxu0 %v10359_v35  ;;  %v10389_v35 = vpack.c.bf16 %v5954_v16, %v5952_v48  ;;  %v6146_v48 = vld [vmem:[#allocation5 + $0x730] sm:$0xff]  ;;  %v6149_v16 = vld [vmem:[#allocation5 + $0x748] sm:$0xff] }
 0x7f0   :  { %10362 = vmatprep.subr.bf16.mxu0 %v10361_v33  ;;  %v5951_v33 = vld [vmem:[#allocation5 + $0x640] sm:$0xff] }
 0x7f1   :  { %v10391_v39 = vpack.c.bf16 %v5953_v43, %v5951_v33  ;;  %v6148_v43 = vld [vmem:[#allocation5 + $0x740] sm:$0xff] }
 0x7f3   :  { %10364 = vmatpush1.bf16.msra.mxu0 %v10363_v22  ;;  %v10393_v22 = vpack.c.bf16 %v5958_v21, %v5956_v62  ;;  %v6150_v62 = vld [vmem:[#allocation5 + $0x750] sm:$0xff]  ;;  %v6153_v21 = vld [vmem:[#allocation5 + $0x768] sm:$0xff] }
 0x7f4   :  { %10366 = vmatprep.subr.bf16.mxu0 %v10365_v50  ;;  %v5955_v50 = vld [vmem:[#allocation5 + $0x660] sm:$0xff] }
 0x7f5   :  { %v10395_v49 = vpack.c.bf16 %v5957_v51, %v5955_v50  ;;  %v6154_v50 = vld [vmem:[#allocation5 + $0x770] sm:$0xff]  ;;  %v6157_v51 = vld [vmem:[#allocation5 + $0x788] sm:$0xff] }
 0x7f7   :  { %10368 = vmatpush1.bf16.msra.mxu0 %v10367_v61  ;;  %v10397_v61 = vpack.c.bf16 %v5962_v37, %v5960_v32  ;;  %v6159_v32 = vld [vmem:[#allocation5 + $0x798] sm:$0xff] }
 0x7f8   :  { %10370 = vmatprep.subr.bf16.mxu0 %v10369_v9  ;;  %v5959_v9 = vld [vmem:[#allocation5 + $0x680] sm:$0xff] }
 0x7f9   :  { %v10399_v4 = vpack.c.bf16 %v5961_v60, %v5959_v9  ;;  %v6158_v9 = vld [vmem:[#allocation5 + $0x790] sm:$0xff]  ;;  %v6161_v60 = vld [vmem:[#allocation5 + $0x7a8] sm:$0xff] }
 0x7fb   :  { %10372 = vmatpush1.bf16.msra.mxu0 %v10371_v15  ;;  %v10401_v15 = vpack.c.bf16 %v5966_v59, %v5964_v56  ;;  %v6163_v56 = vld [vmem:[#allocation5 + $0x7b8] sm:$0xff]  ;;  %v6642_v59 = vld [vmem:[%s14495_s7] sm:$0xff] }
 0x7fc   :  { %10374 = vmatprep.subr.bf16.mxu0 %v10373_v24  ;;  %v5963_v24 = vld [vmem:[#allocation5 + $0x6a0] sm:$0xff] }
 0x7fd   :  { %v10403_v40 = vpack.c.bf16 %v5965_v41, %v5963_v24  ;;  %v6160_v24 = vld [vmem:[#allocation5 + $0x7a0] sm:$0xff] }
 0x7ff   :  { %10376 = vmatpush1.bf16.msra.mxu0 %v10375_v10  ;;  %v10405_v10 = vpack.c.bf16 %v6135_v28, %v6133_v29  ;;  %v10433_v29 = vpack.c.bf16 %v6163_v56, %v6161_v60  ;;  %v6162_v28 = vld [vmem:[#allocation5 + $0x7b0] sm:$0xff]  ;;  %v6180_v56 = vld [vmem:[#allocation5 + $0x840] sm:$0xff] }
 0x800   :  { %10378 = vmatprep.subr.bf16.mxu0 %v10377_v17  ;;  %v6132_v17 = vld [vmem:[#allocation5 + $0x6c0] sm:$0xff] }
 0x801   :  { %v10407_v47 = vpack.c.bf16 %v6134_v11, %v6132_v17  ;;  %v6165_v17 = vld [vmem:[#allocation5 + $0x7c8] sm:$0xff]  ;;  %v6167_v11 = vld [vmem:[#allocation5 + $0x7d8] sm:$0xff] }
 0x803   :  { %10380 = vmatpush1.bf16.msra.mxu0 %v10379_v58  ;;  %v10409_v58 = vpack.c.bf16 %v6139_v46, %v6137_v42  ;;  %v10435_v42 = vpack.c.bf16 %v6162_v28, %v6160_v24  ;;  %v6164_v46 = vld [vmem:[#allocation5 + $0x7c0] sm:$0xff]  ;;  %v6654_v24 = vld [vmem:[%s14495_s7 + $0x60] sm:$0xff]  ;;  %v6185_v28 = vld [vmem:[#allocation5 + $0x868] sm:$0xff] }
 0x804   :  { %10382 = vmatprep.subr.bf16.mxu0 %v10381_v23  ;;  %v6136_v23 = vld [vmem:[#allocation5 + $0x6e0] sm:$0xff] }
 0x807   :  { %10384 = vmatpush1.bf16.msra.mxu0 %v10383_v36  ;;  %v6145_v36 = vld [vmem:[#allocation5 + $0x728] sm:$0xff] }
 0x808   :  { %10386 = vmatprep.subr.bf16.mxu0 %v10385_v26  ;;  %v6147_v26 = vld [vmem:[#allocation5 + $0x738] sm:$0xff] }
 0x809   :  { %v10417_v2 = vpack.c.bf16 %v6147_v26, %v6145_v36  ;;  %v6170_v26 = vld [vmem:[#allocation5 + $0x7f0] sm:$0xff] }
 0x80b   :  { %10388 = vmatpush1.bf16.msra.mxu0 %v10387_v63  ;;  %v6151_v63 = vld [vmem:[#allocation5 + $0x758] sm:$0xff] }
 0x80c   :  { %10390 = vmatprep.subr.bf16.mxu0 %v10389_v35  ;;  %v10421_v33 = vpack.c.bf16 %v6151_v63, %v6149_v16  ;;  %v6172_v63 = vld [vmem:[#allocation5 + $0x800] sm:$0xff] }
 0x80f   :  { %10392 = vmatpush1.bf16.msra.mxu0 %v10391_v39  ;;  %v6155_v39 = vld [vmem:[#allocation5 + $0x778] sm:$0xff] }
 0x810   :  { %10394 = vmatprep.subr.bf16.mxu0 %v10393_v22  ;;  %v10425_v22 = vpack.c.bf16 %v6155_v39, %v6153_v21  ;;  %v6651_v21 = vld [vmem:[%s14495_s7 + $0x48] sm:$0xff]  ;;  %v6177_v39 = vld [vmem:[#allocation5 + $0x828] sm:$0xff] }
 0x813   :  { %10396 = vmatpush1.bf16.msra.mxu0 %v10395_v49  ;;  %v10429_v49 = vpack.c.bf16 %v6159_v32, %v6157_v51  ;;  %v6178_v32 = vld [vmem:[#allocation5 + $0x830] sm:$0xff] }
 0x814   :  { %10398 = vmatprep.subr.bf16.mxu0 %v10397_v61  ;;  %v6156_v61 = vld [vmem:[#allocation5 + $0x780] sm:$0xff] }
 0x816   :  { %6038 = vmatmul.mubr.f32.vlgmr.msra.gmra.mrb[196].mxu0 %v13429_v38  ;;  %v6138_v38 = vld [vmem:[#allocation5 + $0x6f0] sm:$0xff] }
 0x817   :  { %6043 = vmatprep.mubr.f32.mxu0 %v13436_v14  ;;  %10400 = vmatpush1.bf16.msra.mxu0 %v10399_v4  ;;  %v6143_v14 = vld [vmem:[#allocation5 + $0x718] sm:$0xff]  ;;  %v10411_v57 = vpack.c.bf16 %v6138_v38, %v6136_v23  ;;  %v6166_v23 = vld [vmem:[#allocation5 + $0x7d0] sm:$0xff] }
 0x818   :  { %10402 = vmatprep.subr.bf16.mxu0 %v10401_v15  ;;  %v10413_v55 = vpack.c.bf16 %v6143_v14, %v6141_v54  ;;  %v6643_v4 = vld [vmem:[%s14495_s7 + $0x8] sm:$0xff]  ;;  %v10431_v15 = vpack.c.bf16 %v6158_v9, %v6156_v61  ;;  %v6646_v38 = vld [vmem:[%s14495_s7 + $0x20] sm:$0xff]  ;;  %v6169_v14 = vld [vmem:[#allocation5 + $0x7e8] sm:$0xff] }
 0x819   :  { %v13500_v41 = vpack.c.bf16 %v6643_v4, %v6642_v59  ;;  %v6647_v54 = vld [vmem:[%s14495_s7 + $0x28] sm:$0xff]  ;;  %v6181_v61 = vld [vmem:[#allocation5 + $0x848] sm:$0xff] }
 0x81a   :  { %6044 = vmatmul.mubr.f32.gmra.mrb[198].mxu0 %v13434_v20  ;;  %v6140_v20 = vld [vmem:[#allocation5 + $0x700] sm:$0xff]  ;;  %v6183_v9 = vld [vmem:[#allocation5 + $0x858] sm:$0xff] }
 0x81b   :  { %10404 = vmatpush1.bf16.msra.mxu0 %v10403_v40  ;;  %6114 = vmatprep.mubr.f32.mxu0 %v11353_v52  ;;  %v10415_v19 = vpack.c.bf16 %v6142_v12, %v6140_v20  ;;  %v6644_v40 = vld [vmem:[%s14495_s7 + $0x10] sm:$0xff]  ;;  %v13520_v12 = vpack.c.bf16 %v6647_v54, %v6646_v38  ;;  %v10453_v4 = vpack.c.bf16 %v6183_v9, %v6181_v61  ;;  %v6189_v38 = vld [vmem:[#allocation5 + $0x888] sm:$0xff]  ;;  %v6191_v54 = vld [vmem:[#allocation5 + $0x898] sm:$0xff] }
 0x81c   :  { %10406 = vmatprep.subr.bf16.mxu0 %v10405_v10  ;;  %v6645_v10 = vld [vmem:[%s14495_s7 + $0x18] sm:$0xff]  ;;  %10593 = vmatpush1.bf16.msra.mxu1 %v13500_v41  ;;  %v6168_v20 = vld [vmem:[#allocation5 + $0x7e0] sm:$0xff]  ;;  %v6202_v9 = vld [vmem:[#allocation5 + $0x8f0] sm:$0xff] }
 0x81d   :  { %10594 = vmatprep.subr.bf16.mxu1 %v11352_v0  ;;  %v10443_v16 = vpack.c.bf16 %v6170_v26, %v6168_v20  ;;  %v10461_v20 = vpack.c.bf16 %v6191_v54, %v6189_v38  ;;  %v6658_v26 = vld [vmem:[%s14495_s7 + $0x80] sm:$0xff]  ;;  %v6200_v61 = vld [vmem:[#allocation5 + $0x8e0] sm:$0xff]  ;;  %v6382_v54 = vld [vmem:[#allocation5 + $0x968] sm:$0xff] }
 0x81e   :  { %8832 = vmatmul.mubr.msk.f32.vlgmr.msra.gmra.mrb[196].mxu0 %vm4386_vm3, %v13464_v5  ;;  %v6144_v5 = vld [vmem:[#allocation5 + $0x720] sm:$0xff]  ;;  %v6379_v38 = vld [vmem:[#allocation5 + $0x950] sm:$0xff] }
 0x81f   :  { %10408 = vmatpush1.bf16.msra.mxu0 %v10407_v47  ;;  %6120 = vmatprep.mubr.f32.mxu0 %v11353_v52  ;;  %v10419_v35 = vpack.c.bf16 %v6146_v48, %v6144_v5  ;;  %v13510_v47 = vpack.c.bf16 %v6645_v10, %v6644_v40  ;;  %v6173_v5 = vld [vmem:[#allocation5 + $0x808] sm:$0xff]  ;;  %v6175_v48 = vld [vmem:[#allocation5 + $0x818] sm:$0xff] }
 0x820   :  { %10410 = vmatprep.subr.bf16.mxu0 %v10409_v58  ;;  %v10437_v58 = vpack.c.bf16 %v6167_v11, %v6165_v17  ;;  %v6187_v40 = vld [vmem:[#allocation5 + $0x878] sm:$0xff]  ;;  %v6184_v17 = vld [vmem:[#allocation5 + $0x860] sm:$0xff] }
 0x821   :  { %10596 = vmatpush1.bf16.msra.mxu1 %v13510_v47 }
 0x822   :  { %8833 = vmatmul.mubr.msk.f32.gmra.mrb[198].mxu0 %vm4386_vm3, %v13462_v53  ;;  %v10423_v53 = vpack.c.bf16 %v6150_v62, %v6148_v43  ;;  %10597 = vmatprep.subr.bf16.mxu1 %v11352_v0  ;;  %v6174_v43 = vld [vmem:[#allocation5 + $0x810] sm:$0xff] }
 0x823   :  { %10412 = vmatpush1.bf16.msra.mxu0 %v10411_v57  ;;  %6274 = vmatprep.mubr.f32.mxu0 %v13440_v44  ;;  %v6152_v44 = vld [vmem:[#allocation5 + $0x760] sm:$0xff]  ;;  %v6171_v57 = vld [vmem:[#allocation5 + $0x7f8] sm:$0xff]  ;;  %v6650_v62 = vld [vmem:[%s14495_s7 + $0x40] sm:$0xff] }
 0x824   :  { %10414 = vmatprep.subr.bf16.mxu0 %v10413_v55  ;;  %v10427_v37 = vpack.c.bf16 %v6154_v50, %v6152_v44  ;;  %v10439_v55 = vpack.c.bf16 %v6166_v23, %v6164_v46  ;;  %v10441_v36 = vpack.c.bf16 %v6171_v57, %v6169_v14  ;;  %v6176_v44 = vld [vmem:[#allocation5 + $0x820] sm:$0xff]  ;;  %v13540_v50 = vpack.c.bf16 %v6651_v21, %v6650_v62  ;;  %v6186_v46 = vld [vmem:[#allocation5 + $0x870] sm:$0xff]  ;;  %v6657_v23 = vld [vmem:[%s14495_s7 + $0x78] sm:$0xff] }
 0x825   :  { %10599 = vmatpush1.bf16.msra.mxu1 %v13520_v12  ;;  %v10451_v60 = vpack.c.bf16 %v6178_v32, %v6176_v44  ;;  %v10459_v14 = vpack.c.bf16 %v6186_v46, %v6184_v17  ;;  %v6188_v57 = vld [vmem:[#allocation5 + $0x880] sm:$0xff]  ;;  %v6197_v62 = vld [vmem:[#allocation5 + $0x8c8] sm:$0xff]  ;;  %v6199_v21 = vld [vmem:[#allocation5 + $0x8d8] sm:$0xff] }
 0x826   :  { %10600 = vmatprep.subr.bf16.mxu1 %v11352_v0  ;;  %v6198_v44 = vld [vmem:[#allocation5 + $0x8d0] sm:$0xff]  ;;  %v6203_v32 = vld [vmem:[#allocation5 + $0x8f8] sm:$0xff]  ;;  %v6378_v46 = vld [vmem:[#allocation5 + $0x948] sm:$0xff] }
 0x827   :  { %10416 = vmatpush1.bf16.msra.mxu0 %v10415_v19  ;;  %v6648_v19 = vld [vmem:[%s14495_s7 + $0x30] sm:$0xff] }
 0x828   :  { %10418 = vmatprep.subr.bf16.mxu0 %v10417_v2  ;;  %v6649_v2 = vld [vmem:[%s14495_s7 + $0x38] sm:$0xff] }
 0x82b   :  { %10420 = vmatpush1.bf16.msra.mxu0 %v10419_v35  ;;  %v13530_v35 = vpack.c.bf16 %v6649_v2, %v6648_v19  ;;  %v6659_v19 = vld [vmem:[%s14495_s7 + $0x88] sm:$0xff]  ;;  %v6193_v2 = vld [vmem:[#allocation5 + $0x8a8] sm:$0xff] }
 0x82c   :  { %10422 = vmatprep.subr.bf16.mxu0 %v10421_v33  ;;  %v10445_v33 = vpack.c.bf16 %v6175_v48, %v6173_v5  ;;  %v6195_v5 = vld [vmem:[#allocation5 + $0x8b8] sm:$0xff] }
 0x82d   :  { %10602 = vmatpush1.bf16.msra.mxu1 %v13530_v35 }
 0x82e   :  { %10603 = vmatprep.subr.bf16.mxu1 %v11352_v0 }
 0x82f   :  { %10424 = vmatpush1.bf16.msra.mxu0 %v10423_v53  ;;  %v6179_v53 = vld [vmem:[#allocation5 + $0x838] sm:$0xff] }
 0x830   :  { %10426 = vmatprep.subr.bf16.mxu0 %v10425_v22  ;;  %v10447_v22 = vpack.c.bf16 %v6174_v43, %v6172_v63  ;;  %v10449_v51 = vpack.c.bf16 %v6179_v53, %v6177_v39  ;;  %v10465_v63 = vpack.c.bf16 %v6195_v5, %v6193_v2  ;;  %v6194_v43 = vld [vmem:[#allocation5 + $0x8b0] sm:$0xff]  ;;  %v10469_v53 = vpack.c.bf16 %v6199_v21, %v6197_v62 }
 0x831   :  { %10605 = vmatpush1.bf16.msra.mxu1 %v13540_v50  ;;  %v6391_v21 = vld [vmem:[#allocation5 + $0x9b0] sm:$0xff] }
 0x832   :  { %10606 = vmatprep.subr.bf16.mxu1 %v11352_v0 }
 0x833   :  { %10428 = vmatpush1.bf16.msra.mxu0 %v10427_v37  ;;  %v6652_v37 = vld [vmem:[%s14495_s7 + $0x50] sm:$0xff] }
 0x834   :  { %10430 = vmatprep.subr.bf16.mxu0 %v10429_v49  ;;  %v6653_v49 = vld [vmem:[%s14495_s7 + $0x58] sm:$0xff] }
 0x835   :  { %v13550_v59 = vpack.c.bf16 %v6653_v49, %v6652_v37 }
 0x837   :  { %10432 = vmatpush1.bf16.msra.mxu0 %v10431_v15  ;;  %v6182_v15 = vld [vmem:[#allocation5 + $0x850] sm:$0xff]  ;;  %10608 = vmatpush1.bf16.msra.mxu1 %v13550_v59 }
 0x838   :  { %10434 = vmatprep.subr.bf16.mxu0 %v10433_v29  ;;  %v6655_v29 = vld [vmem:[%s14495_s7 + $0x68] sm:$0xff]  ;;  %10609 = vmatprep.subr.bf16.mxu1 %v11352_v0  ;;  %v10455_v10 = vpack.c.bf16 %v6182_v15, %v6180_v56 }
 0x839   :  { %v13560_v11 = vpack.c.bf16 %v6655_v29, %v6654_v24  ;;  %v6372_v56 = vld [vmem:[#allocation5 + $0x918] sm:$0xff]  ;;  %v6369_v24 = vld [vmem:[#allocation5 + $0x900] sm:$0xff]  ;;  %v6371_v29 = vld [vmem:[#allocation5 + $0x910] sm:$0xff] }
 0x83b   :  { %10436 = vmatpush1.bf16.msra.mxu0 %v10435_v42  ;;  %v10457_v42 = vpack.c.bf16 %v6187_v40, %v6185_v28  ;;  %10611 = vmatpush1.bf16.msra.mxu1 %v13560_v11  ;;  %v6374_v28 = vld [vmem:[#allocation5 + $0x928] sm:$0xff]  ;;  %v6376_v40 = vld [vmem:[#allocation5 + $0x938] sm:$0xff] }
 0x83c   :  { %10438 = vmatprep.subr.bf16.mxu0 %v10437_v58  ;;  %v6656_v58 = vld [vmem:[%s14495_s7 + $0x70] sm:$0xff]  ;;  %10612 = vmatprep.subr.bf16.mxu1 %v11352_v0  ;;  %v10481_v17 = vpack.c.bf16 %v6376_v40, %v6374_v28  ;;  %v6403_v40 = vld [vmem:[#allocation5 + $0xa10] sm:$0xff] }
 0x83d   :  { %v6401_v28 = vld [vmem:[#allocation5 + $0xa00] sm:$0xff] }
 0x83f   :  { %10440 = vmatpush1.bf16.msra.mxu0 %v10439_v55  ;;  %v13570_v55 = vpack.c.bf16 %v6657_v23, %v6656_v58 }
 0x840   :  { %10442 = vmatprep.subr.bf16.mxu0 %v10441_v36  ;;  %v6190_v36 = vld [vmem:[#allocation5 + $0x890] sm:$0xff] }
 0x841   :  { %10614 = vmatpush1.bf16.msra.mxu1 %v13570_v55  ;;  %v10463_v48 = vpack.c.bf16 %v6190_v36, %v6188_v57  ;;  %v6383_v36 = vld [vmem:[#allocation5 + $0x970] sm:$0xff] }
 0x842   :  { %10615 = vmatprep.subr.bf16.mxu1 %v11352_v0 }
 0x843   :  { %10444 = vmatpush1.bf16.msra.mxu0 %v10443_v16  ;;  %v13580_v16 = vpack.c.bf16 %v6659_v19, %v6658_v26  ;;  %v6386_v26 = vld [vmem:[#allocation5 + $0x988] sm:$0xff]  ;;  %v6388_v19 = vld [vmem:[#allocation5 + $0x998] sm:$0xff] }
 0x844   :  { %10446 = vmatprep.subr.bf16.mxu0 %v10445_v33  ;;  %v6192_v33 = vld [vmem:[#allocation5 + $0x8a0] sm:$0xff]  ;;  %v10493_v5 = vpack.c.bf16 %v6388_v19, %v6386_v26  ;;  %v6415_v19 = vld [vmem:[#allocation5 + $0xa70] sm:$0xff] }
 0x845   :  { %10617 = vmatpush1.bf16.msra.mxu1 %v13580_v16  ;;  %v10467_v39 = vpack.c.bf16 %v6194_v43, %v6192_v33  ;;  %v6390_v33 = vld [vmem:[#allocation5 + $0x9a8] sm:$0xff]  ;;  %v6392_v43 = vld [vmem:[#allocation5 + $0x9b8] sm:$0xff]  ;;  %v6413_v26 = vld [vmem:[#allocation5 + $0xa60] sm:$0xff] }
 0x846   :  { %10618 = vmatprep.subr.bf16.mxu1 %v11352_v0  ;;  %v10497_v62 = vpack.c.bf16 %v6392_v43, %v6390_v33  ;;  %v6417_v33 = vld [vmem:[#allocation5 + $0xa80] sm:$0xff]  ;;  %v6419_v43 = vld [vmem:[#allocation5 + $0xa90] sm:$0xff] }
 0x847   :  { %10448 = vmatpush1.bf16.msra.mxu0 %v10447_v22  ;;  %v6196_v22 = vld [vmem:[#allocation5 + $0x8c0] sm:$0xff] }
 0x848   :  { %10450 = vmatprep.subr.bf16.mxu0 %v10449_v51  ;;  %v6201_v51 = vld [vmem:[#allocation5 + $0x8e8] sm:$0xff]  ;;  %v10471_v37 = vpack.c.bf16 %v6198_v44, %v6196_v22 }
 0x849   :  { %v10473_v49 = vpack.c.bf16 %v6203_v32, %v6201_v51  ;;  %v6393_v51 = vld [vmem:[#allocation5 + $0x9c0] sm:$0xff]  ;;  %v6395_v32 = vld [vmem:[#allocation5 + $0x9d0] sm:$0xff] }
 0x84b   :  { %10452 = vmatpush1.bf16.msra.mxu0 %v10451_v60  ;;  %v6370_v60 = vld [vmem:[#allocation5 + $0x908] sm:$0xff] }
 0x84c   :  { %10454 = vmatprep.subr.bf16.mxu0 %v10453_v4  ;;  %v10475_v4 = vpack.c.bf16 %v6202_v9, %v6200_v61  ;;  %v10477_v15 = vpack.c.bf16 %v6372_v56, %v6370_v60  ;;  %v10503_v61 = vpack.c.bf16 %v6395_v32, %v6393_v51  ;;  %v6397_v60 = vld [vmem:[#allocation5 + $0x9e0] sm:$0xff]  ;;  %v6399_v56 = vld [vmem:[#allocation5 + $0x9f0] sm:$0xff] }
 0x84f   :  { %10456 = vmatpush1.bf16.msra.mxu0 %v10455_v10  ;;  %v10479_v10 = vpack.c.bf16 %v6371_v29, %v6369_v24  ;;  %v10507_v24 = vpack.c.bf16 %v6399_v56, %v6397_v60 }
 0x850   :  { %10458 = vmatprep.subr.bf16.mxu0 %v10457_v42  ;;  %v6373_v42 = vld [vmem:[#allocation5 + $0x920] sm:$0xff] }
 0x853   :  { %10460 = vmatpush1.bf16.msra.mxu0 %v10459_v14  ;;  %v6384_v14 = vld [vmem:[#allocation5 + $0x978] sm:$0xff] }
 0x854   :  { %10462 = vmatprep.subr.bf16.mxu0 %v10461_v20  ;;  %v10489_v20 = vpack.c.bf16 %v6384_v14, %v6382_v54  ;;  %v6409_v54 = vld [vmem:[#allocation5 + $0xa40] sm:$0xff]  ;;  %v6411_v14 = vld [vmem:[#allocation5 + $0xa50] sm:$0xff] }
 0x857   :  { %10464 = vmatpush1.bf16.msra.mxu0 %v10463_v48  ;;  %v6385_v48 = vld [vmem:[#allocation5 + $0x980] sm:$0xff] }
 0x858   :  { %10466 = vmatprep.subr.bf16.mxu0 %v10465_v63  ;;  %v6387_v63 = vld [vmem:[#allocation5 + $0x990] sm:$0xff] }
 0x85b   :  { %10468 = vmatpush1.bf16.msra.mxu0 %v10467_v39  ;;  %v6394_v39 = vld [vmem:[#allocation5 + $0x9c8] sm:$0xff] }
 0x85c   :  { %10470 = vmatprep.subr.bf16.mxu0 %v10469_v53  ;;  %v6396_v53 = vld [vmem:[#allocation5 + $0x9d8] sm:$0xff] }
 0x85d   :  { %v10501_v44 = vpack.c.bf16 %v6396_v53, %v6394_v39  ;;  %v6421_v39 = vld [vmem:[#allocation5 + $0xaa0] sm:$0xff]  ;;  %v6423_v53 = vld [vmem:[#allocation5 + $0xab0] sm:$0xff] }
 0x85e   :  { %6275 = vmatmul.mubr.f32.vlgmr.msra.gmra.mrb[196].mxu0 %v13438_v25  ;;  %v6375_v25 = vld [vmem:[#allocation5 + $0x930] sm:$0xff]  ;;  %v10531_v51 = vpack.c.bf16 %v6423_v53, %v6421_v39 }
 0x85f   :  { %6280 = vmatprep.mubr.f32.mxu0 %v13444_v30  ;;  %10472 = vmatpush1.bf16.msra.mxu0 %v10471_v37  ;;  %v6380_v30 = vld [vmem:[#allocation5 + $0x958] sm:$0xff]  ;;  %v10483_v58 = vpack.c.bf16 %v6375_v25, %v6373_v42  ;;  %v6398_v37 = vld [vmem:[#allocation5 + $0x9e8] sm:$0xff]  ;;  %v10511_v42 = vpack.c.bf16 %v6403_v40, %v6401_v28 }
 0x860   :  { %10474 = vmatprep.subr.bf16.mxu0 %v10473_v49  ;;  %v10485_v23 = vpack.c.bf16 %v6380_v30, %v6378_v46  ;;  %v6400_v49 = vld [vmem:[#allocation5 + $0x9f8] sm:$0xff]  ;;  %v6405_v46 = vld [vmem:[#allocation5 + $0xa20] sm:$0xff]  ;;  %v6407_v30 = vld [vmem:[#allocation5 + $0xa30] sm:$0xff] }
 0x861   :  { %v10505_v9 = vpack.c.bf16 %v6400_v49, %v6398_v37  ;;  %v6425_v37 = vld [vmem:[#allocation5 + $0xac0] sm:$0xff]  ;;  %v6427_v49 = vld [vmem:[#allocation5 + $0xad0] sm:$0xff] }
 0x862   :  { %6281 = vmatmul.mubr.f32.gmra.mrb[198].mxu0 %v13442_v1  ;;  %v6377_v1 = vld [vmem:[#allocation5 + $0x940] sm:$0xff]  ;;  %v10535_v60 = vpack.c.bf16 %v6427_v49, %v6425_v37 }
 0x863   :  { %10476 = vmatpush1.bf16.msra.mxu0 %v10475_v4  ;;  %6351 = vmatprep.mubr.f32.mxu0 %v11353_v52  ;;  %v10487_v57 = vpack.c.bf16 %v6379_v38, %v6377_v1  ;;  %v6402_v4 = vld [vmem:[#allocation5 + $0xa08] sm:$0xff]  ;;  %v10515_v1 = vpack.c.bf16 %v6407_v30, %v6405_v46 }
 0x864   :  { %10478 = vmatprep.subr.bf16.mxu0 %v10477_v15  ;;  %v6404_v15 = vld [vmem:[#allocation5 + $0xa18] sm:$0xff] }
 0x865   :  { %v10509_v29 = vpack.c.bf16 %v6404_v15, %v6402_v4  ;;  %v6429_v4 = vld [vmem:[#allocation5 + $0xae0] sm:$0xff]  ;;  %v6431_v15 = vld [vmem:[#allocation5 + $0xaf0] sm:$0xff] }
 0x866   :  { %8834 = vmatmul.mubr.msk.f32.vlgmr.msra.gmra.mrb[196].mxu0 %vm4386_vm3, %v13470_v45  ;;  %v6381_v45 = vld [vmem:[#allocation5 + $0x960] sm:$0xff]  ;;  %v10539_v28 = vpack.c.bf16 %v6431_v15, %v6429_v4 }
 0x867   :  { %10480 = vmatpush1.bf16.msra.mxu0 %v10479_v10  ;;  %6357 = vmatprep.mubr.f32.mxu0 %v11353_v52  ;;  %v10491_v2 = vpack.c.bf16 %v6383_v36, %v6381_v45  ;;  %v6406_v10 = vld [vmem:[#allocation5 + $0xa28] sm:$0xff]  ;;  %v10519_v45 = vpack.c.bf16 %v6411_v14, %v6409_v54 }
 0x868   :  { %10482 = vmatprep.subr.bf16.mxu0 %v10481_v17  ;;  %v6408_v17 = vld [vmem:[#allocation5 + $0xa38] sm:$0xff] }
 0x869   :  { %v10513_v25 = vpack.c.bf16 %v6408_v17, %v6406_v10  ;;  %v6433_v10 = vld [vmem:[#allocation5 + $0xb00] sm:$0xff]  ;;  %v6435_v17 = vld [vmem:[#allocation5 + $0xb10] sm:$0xff] }
 0x86a   :  { %8835 = vmatmul.mubr.msk.f32.gmra.mrb[198].mxu0 %vm4386_vm3, %v13468_v13  ;;  %v10495_v13 = vpack.c.bf16 %v6387_v63, %v6385_v48  ;;  %v10523_v48 = vpack.c.bf16 %v6415_v19, %v6413_v26  ;;  %v10543_v46 = vpack.c.bf16 %v6435_v17, %v6433_v10 }
 0x86b   :  { %10484 = vmatpush1.bf16.msra.mxu0 %v10483_v58  ;;  %6511 = vmatprep.mubr.f32.mxu0 %v13448_v8  ;;  %v6389_v8 = vld [vmem:[#allocation5 + $0x9a0] sm:$0xff]  ;;  %v6410_v58 = vld [vmem:[#allocation5 + $0xa48] sm:$0xff] }
 0x86c   :  { %10486 = vmatprep.subr.bf16.mxu0 %v10485_v23  ;;  %v10499_v22 = vpack.c.bf16 %v6391_v21, %v6389_v8  ;;  %v6412_v23 = vld [vmem:[#allocation5 + $0xa58] sm:$0xff]  ;;  %v10527_v8 = vpack.c.bf16 %v6419_v43, %v6417_v33 }
 0x86d   :  { %v10517_v38 = vpack.c.bf16 %v6412_v23, %v6410_v58  ;;  %v6437_v58 = vld [vmem:[#allocation5 + $0xb20] sm:$0xff]  ;;  %v6439_v23 = vld [vmem:[#allocation5 + $0xb30] sm:$0xff] }
 0x86f   :  { %10488 = vmatpush1.bf16.msra.mxu0 %v10487_v57  ;;  %v6414_v57 = vld [vmem:[#allocation5 + $0xa68] sm:$0xff] }
 0x870   :  { %10490 = vmatprep.subr.bf16.mxu0 %v10489_v20  ;;  %v6416_v20 = vld [vmem:[#allocation5 + $0xa78] sm:$0xff] }
 0x871   :  { %v10521_v36 = vpack.c.bf16 %v6416_v20, %v6414_v57 }
 0x873   :  { %10492 = vmatpush1.bf16.msra.mxu0 %v10491_v2  ;;  %v6418_v2 = vld [vmem:[#allocation5 + $0xa88] sm:$0xff] }
 0x874   :  { %10494 = vmatprep.subr.bf16.mxu0 %v10493_v5  ;;  %v6420_v5 = vld [vmem:[#allocation5 + $0xa98] sm:$0xff] }
 0x875   :  { %v10525_v63 = vpack.c.bf16 %v6420_v5, %v6418_v2 }
 0x877   :  { %10496 = vmatpush1.bf16.msra.mxu0 %v10495_v13  ;;  %v6422_v13 = vld [vmem:[#allocation5 + $0xaa8] sm:$0xff] }
 0x878   :  { %10498 = vmatprep.subr.bf16.mxu0 %v10497_v62  ;;  %v6424_v62 = vld [vmem:[#allocation5 + $0xab8] sm:$0xff] }
 0x879   :  { %v10529_v21 = vpack.c.bf16 %v6424_v62, %v6422_v13 }
 0x87b   :  { %10500 = vmatpush1.bf16.msra.mxu0 %v10499_v22  ;;  %v6426_v22 = vld [vmem:[#allocation5 + $0xac8] sm:$0xff] }
 0x87c   :  { %10502 = vmatprep.subr.bf16.mxu0 %v10501_v44  ;;  %v6428_v44 = vld [vmem:[#allocation5 + $0xad8] sm:$0xff] }
 0x87d   :  { %v10533_v32 = vpack.c.bf16 %v6428_v44, %v6426_v22 }
 0x87f   :  { %10504 = vmatpush1.bf16.msra.mxu0 %v10503_v61  ;;  %v6430_v61 = vld [vmem:[#allocation5 + $0xae8] sm:$0xff] }
 0x880   :  { %10506 = vmatprep.subr.bf16.mxu0 %v10505_v9  ;;  %v6432_v9 = vld [vmem:[#allocation5 + $0xaf8] sm:$0xff] }
 0x881   :  { %v10537_v56 = vpack.c.bf16 %v6432_v9, %v6430_v61 }
 0x883   :  { %10508 = vmatpush1.bf16.msra.mxu0 %v10507_v24  ;;  %v6434_v24 = vld [vmem:[#allocation5 + $0xb08] sm:$0xff] }
 0x884   :  { %10510 = vmatprep.subr.bf16.mxu0 %v10509_v29  ;;  %v6436_v29 = vld [vmem:[#allocation5 + $0xb18] sm:$0xff] }
 0x885   :  { %v10541_v40 = vpack.c.bf16 %v6436_v29, %v6434_v24 }
 0x887   :  { %10512 = vmatpush1.bf16.msra.mxu0 %v10511_v42  ;;  %v6438_v42 = vld [vmem:[#allocation5 + $0xb28] sm:$0xff] }
 0x888   :  { %10514 = vmatprep.subr.bf16.mxu0 %v10513_v25  ;;  %v6440_v25 = vld [vmem:[#allocation5 + $0xb38] sm:$0xff] }
 0x889   :  { %v10545_v30 = vpack.c.bf16 %v6440_v25, %v6438_v42 }
 0x88b   :  { %10516 = vmatpush1.bf16.msra.mxu0 %v10515_v1  ;;  %v10547_v1 = vpack.c.bf16 %v6439_v23, %v6437_v58  ;;  %v6823_v58 = vld [vmem:[%s14496_s8] sm:$0xff] }
 0x88c   :  { %10518 = vmatprep.subr.bf16.mxu0 %v10517_v38 }
 0x88f   :  { %10520 = vmatpush1.bf16.msra.mxu0 %v10519_v45 }
 0x890   :  { %10522 = vmatprep.subr.bf16.mxu0 %v10521_v36 }
 0x893   :  { %10524 = vmatpush1.bf16.msra.mxu0 %v10523_v48 }
 0x894   :  { %10526 = vmatprep.subr.bf16.mxu0 %v10525_v63 }
 0x897   :  { %10528 = vmatpush1.bf16.msra.mxu0 %v10527_v8 }
 0x898   :  { %10530 = vmatprep.subr.bf16.mxu0 %v10529_v21 }
 0x89b   :  { %10532 = vmatpush1.bf16.msra.mxu0 %v10531_v51 }
 0x89c   :  { %10534 = vmatprep.subr.bf16.mxu0 %v10533_v32 }
 0x89f   :  { %10536 = vmatpush1.bf16.msra.mxu0 %v10535_v60 }
 0x8a0   :  { %10538 = vmatprep.subr.bf16.mxu0 %v10537_v56 }
 0x8a3   :  { %10540 = vmatpush1.bf16.msra.mxu0 %v10539_v28 }
 0x8a4   :  { %10542 = vmatprep.subr.bf16.mxu0 %v10541_v40 }
 0x8a6   :  { %6512 = vmatmul.mubr.f32.vlgmr.msra.gmra.mrb[196].mxu0 %v13446_v7  ;;  %v6660_v7 = vld [vmem:[%s14495_s7 + $0x90] sm:$0xff] }
 0x8a7   :  { %6517 = vmatprep.mubr.f32.mxu0 %v13452_v27  ;;  %10544 = vmatpush1.bf16.msra.mxu0 %v10543_v46  ;;  %v6824_v46 = vld [vmem:[%s14496_s8 + $0x8] sm:$0xff] }
 0x8a8   :  { %10546 = vmatprep.subr.bf16.mxu0 %v10545_v30  ;;  %v6826_v30 = vld [vmem:[%s14496_s8 + $0x18] sm:$0xff] }
 0x8a9   :  { %v10633_v23 = vpack.c.bf16 %v6826_v30, %v6824_v46  ;;  %v8856_v30 = vld [vmem:[%s14498_s10 + $0x100] sm:$0xff] }
 0x8aa   :  { %6518 = vmatmul.mubr.f32.gmra.mrb[198].mxu0 %v13450_v31  ;;  %v6661_v31 = vld [vmem:[%s14495_s7 + $0x98] sm:$0xff] }
 0x8ab   :  { %10548 = vmatpush1.bf16.msra.mxu0 %v10547_v1  ;;  %6588 = vmatprep.mubr.f32.mxu0 %v11353_v52  ;;  %v10577_v27 = vpack.c.bf16 %v6661_v31, %v6660_v7  ;;  %v6825_v1 = vld [vmem:[%s14496_s8 + $0x10] sm:$0xff]  ;;  %v6828_v7 = vld [vmem:[%s14496_s8 + $0x28] sm:$0xff]  ;;  %v6830_v31 = vld [vmem:[%s14496_s8 + $0x38] sm:$0xff] }
 0x8ac   :  { %10549 = vmatprep.subr.bf16.mxu0 %v11352_v0 }
 0x8ad   :  { %10620 = vmatpush1.bf16.msra.mxu1 %v10577_v27 }
 0x8ae   :  { %8836 = vmatmul.mubr.msk.f32.vlgmr.msra.gmra.mrb[196].mxu0 %vm4386_vm3, %v13476_v3  ;;  %v6663_v3 = vld [vmem:[%s14495_s7 + $0xa8] sm:$0xff]  ;;  %10621 = vmatprep.subr.bf16.mxu1 %v11352_v0 }
 0x8af   :  { %6594 = vmatprep.mubr.f32.mxu0 %v11353_v52  ;;  %10551 = vmatpush1.bf16.msra.mxu0 %v13500_v41 }
 0x8b0   :  { %10552 = vmatprep.subr.bf16.mxu0 %v11352_v0 }
 0x8b2   :  { %8837 = vmatmul.mubr.msk.f32.gmra.mrb[198].mxu0 %vm4386_vm3, %v13474_v34  ;;  %v6662_v34 = vld [vmem:[%s14495_s7 + $0xa0] sm:$0xff] }
 0x8b3   :  { %10554 = vmatpush1.bf16.msra.mxu0 %v13510_v47  ;;  %v10580_v41 = vpack.c.bf16 %v6663_v3, %v6662_v34  ;;  %v6664_v47 = vld [vmem:[%s14495_s7 + $0xb0] sm:$0xff]  ;;  %v10637_v34 = vpack.c.bf16 %v6830_v31, %v6828_v7  ;;  %v6827_v3 = vld [vmem:[%s14496_s8 + $0x20] sm:$0xff]  ;;  %v8859_v31 = vld [vmem:[%s14498_s10 + $0x118] sm:$0xff] }
 0x8b4   :  { %10555 = vmatprep.subr.bf16.mxu0 %v11352_v0  ;;  %v8858_v7 = vld [vmem:[%s14498_s10 + $0x110] sm:$0xff] }
 0x8b5   :  { %10623 = vmatpush1.bf16.msra.mxu1 %v10580_v41 }
 0x8b6   :  { %10624 = vmatprep.subr.bf16.mxu1 %v11352_v0 }
 0x8b7   :  { %10557 = vmatpush1.bf16.msra.mxu0 %v13520_v12  ;;  %v6665_v12 = vld [vmem:[%s14495_s7 + $0xb8] sm:$0xff] }
 0x8b8   :  { %10558 = vmatprep.subr.bf16.mxu0 %v11352_v0 }
 0x8bb   :  { %10560 = vmatpush1.bf16.msra.mxu0 %v13530_v35  ;;  %v10583_v35 = vpack.c.bf16 %v6665_v12, %v6664_v47 }
 0x8bc   :  { %10561 = vmatprep.subr.bf16.mxu0 %v11352_v0 }
 0x8bd   :  { %10626 = vmatpush1.bf16.msra.mxu1 %v10583_v35 }
 0x8be   :  { %10627 = vmatprep.subr.bf16.mxu1 %v11352_v0 }
 0x8bf   :  { %10563 = vmatpush1.bf16.msra.mxu0 %v13540_v50  ;;  %v6666_v50 = vld [vmem:[%s14495_s7 + $0xc0] sm:$0xff] }
 0x8c0   :  { %10564 = vmatprep.subr.bf16.mxu0 %v11352_v0 }
 0x8c3   :  { %10566 = vmatpush1.bf16.msra.mxu0 %v13550_v59  ;;  %v6667_v59 = vld [vmem:[%s14495_s7 + $0xc8] sm:$0xff] }
 0x8c4   :  { %10567 = vmatprep.subr.bf16.mxu0 %v11352_v0 }
 0x8c7   :  { %10569 = vmatpush1.bf16.msra.mxu0 %v13560_v11  ;;  %v10586_v11 = vpack.c.bf16 %v6667_v59, %v6666_v50 }
 0x8c8   :  { %10570 = vmatprep.subr.bf16.mxu0 %v11352_v0 }
 0x8c9   :  { %10629 = vmatpush1.bf16.msra.mxu1 %v10586_v11 }
 0x8ca   :  { %10630 = vmatprep.subr.bf16.mxu1 %v11352_v0 }
 0x8cb   :  { %10572 = vmatpush1.bf16.msra.mxu0 %v13570_v55  ;;  %v6668_v55 = vld [vmem:[%s14495_s7 + $0xd0] sm:$0xff] }
 0x8cc   :  { %10573 = vmatprep.subr.bf16.mxu0 %v11352_v0 }
 0x8cf   :  { %10575 = vmatpush1.bf16.msra.mxu0 %v13580_v16  ;;  %v6669_v16 = vld [vmem:[%s14495_s7 + $0xd8] sm:$0xff] }
 0x8d0   :  { %10576 = vmatprep.subr.bf16.mxu0 %v11352_v0  ;;  %v10589_v38 = vpack.c.bf16 %v6669_v16, %v6668_v55 }
 0x8d2   :  { %10632 = vmatpush1.bf16.msra.mxu1 %v10589_v38 }
 0x8d3   :  { %10578 = vmatpush1.bf16.msra.mxu0 %v10577_v27  ;;  %v10635_v27 = vpack.c.bf16 %v6825_v1, %v6823_v58  ;;  %10634 = vmatprep.subr.bf16.mxu1 %v10633_v23  ;;  %v8857_v58 = vld [vmem:[%s14498_s10 + $0x108] sm:$0xff] }
 0x8d4   :  { %10579 = vmatprep.subr.bf16.mxu0 %v11352_v0  ;;  %v10660_v1 = vpack.c.bf16 %v8857_v58, %v8856_v30 }
 0x8d7   :  { %10581 = vmatpush1.bf16.msra.mxu0 %v10580_v41  ;;  %v6829_v41 = vld [vmem:[%s14496_s8 + $0x30] sm:$0xff] }
 0x8d8   :  { %10582 = vmatprep.subr.bf16.mxu0 %v11352_v0  ;;  %v10639_v47 = vpack.c.bf16 %v6829_v41, %v6827_v3  ;;  %v8860_v3 = vld [vmem:[%s14498_s10 + $0x120] sm:$0xff]  ;;  %v8861_v41 = vld [vmem:[%s14498_s10 + $0x128] sm:$0xff] }
 0x8db   :  { %10584 = vmatpush1.bf16.msra.mxu0 %v10583_v35 }
 0x8dc   :  { %10585 = vmatprep.subr.bf16.mxu0 %v11352_v0 }
 0x8df   :  { %10587 = vmatpush1.bf16.msra.mxu0 %v10586_v11 }
 0x8e0   :  { %10588 = vmatprep.subr.bf16.mxu0 %v11352_v0 }
 0x8e3   :  { %10590 = vmatpush1.bf16.msra.mxu0 %v10589_v38 }
 0x8e4   :  { %10875 = vmatprep.subr.bf16.mxu0 %v11352_v0 }
 0x981   :  { %v13661_v54 = vpop.f32.mrb[196].mxu0 }
 0x982   :  { %v13663_v14 = vpop.f32.mrb[197].mxu0  ;;  %v6622_v45 = vmul.f32 %v13661_v54, %v13661_v54 }
 0x983   :  { %v6623_v57 = vmul.f32 %v13663_v14, %v13663_v14  ;;  %v6613_v2 = vsel %vm6612_vm5, %v13663_v14, 0.0 }
 0x985   :  { %v13667_v20 = vpop.f32.mrb[198].mxu0  ;;  %v6633_v13 = vsel %vm6612_vm5, %v6623_v57, 0.0 }
 0x986   :  { %v6605_v36 = vadd.f32 %v13667_v20, %v13661_v54  ;;  %v6624_v26 = vmul.f32 %v13667_v20, %v13667_v20  ;;  %v13675_v19 = vpop.f32.mrb[199].mxu0 }
 0x987   :  { %v6614_v5 = vsel %vm6612_vm5, %v13675_v19, 0.0  ;;  %v6625_v48 = vmul.f32 %v13675_v19, %v13675_v19 }
 0x988   :  { %v6606_v63 = vrot.slane %v6605_v36, 4  ;;  %v6626_v33 = vadd.f32 %v6624_v26, %v6622_v45  ;;  %v6615_v43 = vadd.f32 %v6614_v5, %v6613_v2 }
 0x989   :  { %v6634_v62 = vsel %vm6612_vm5, %v6625_v48, 0.0 }
 0x98a   :  { %v6607_v8 = vadd.f32 %v6606_v63, %v6605_v36  ;;  %v6627_v21 = vrot.slane %v6626_v33, 4  ;;  %v6616_v39 = vrot.slane %v6615_v43, 4  ;;  %v6635_v53 = vadd.f32 %v6634_v62, %v6633_v13 }
 0x98c   :  { %v6608_v22 = vrot.slane %v6607_v8, 2  ;;  %v6628_v44 = vadd.f32 %v6627_v21, %v6626_v33  ;;  %v6617_v51 = vadd.f32 %v6616_v39, %v6615_v43  ;;  %v6636_v32 = vrot.slane %v6635_v53, 4 }
 0x98d   :  { %v7002_v39 = vsub.s32 1, %v13327_v18 }
 0x98e   :  { %v6609_v37 = vadd.f32 %v6608_v22, %v6607_v8  ;;  %v6629_v49 = vrot.slane %v6628_v44, 2  ;;  %v6618_v61 = vrot.slane %v6617_v51, 2  ;;  %v6637_v9 = vadd.f32 %v6636_v32, %v6635_v53 }
 0x990   :  { %v6630_v60 = vadd.f32 %v6629_v49, %v6628_v44  ;;  %v6619_v56 = vadd.f32 %v6618_v61, %v6617_v51  ;;  %v6638_v4 = vrot.slane %v6637_v9, 2  ;;  %v6610_v15 = vrot.slane %v6609_v37, 1  ;;  %v11273_v44 = vld [vmem:[%s14503_s15] sm:$0xff] }
 0x992   :  { %v6620_v24 = vrot.slane %v6619_v56, 1  ;;  %v6639_v29 = vadd.f32 %v6638_v4, %v6637_v9  ;;  %v6631_v28 = vrot.slane %v6630_v60, 1  ;;  %v6611_v17 = vadd.f32 %v6610_v15, %v6609_v37 }
 0x994   :  { %v6621_v40 = vadd.f32 %v6620_v24, %v6619_v56  ;;  %v6640_v10 = vrot.slane %v6639_v29, 1  ;;  %v6632_v25 = vadd.f32 %v6631_v28, %v6630_v60  ;;  %v8853_v28 = vld [vmem:[%s14498_s10 + $0xe8] sm:$0xff] }
 0x996   :  { %8838 = vmatprep.mubr.msk.f32.mxu0 %vm6612_vm5, %v6621_v40  ;;  %v6641_v42 = vadd.f32 %v6640_v10, %v6639_v29  ;;  %v8852_v29 = vld [vmem:[%s14498_s10 + $0xe0] sm:$0xff] }
 0x997   :  { %6738 = vmatmul.mubr.f32.vlgmr.msra.gmra.mrb[200].mxu0 %v6611_v17  ;;  %v7016_v40 = vld [vmem:[%s14497_s9] sm:$0xff]  ;;  %v10654_v10 = vpack.c.bf16 %v8853_v28, %v8852_v29  ;;  %v8854_v17 = vld [vmem:[%s14498_s10 + $0xf0] sm:$0xff] }
 0x998   :  { %8839 = vmatprep.mubr.msk.f32.mxu1 %vm6612_vm5, %v6641_v42  ;;  %9760 = vmatprep.mubr.msk.f32.mxu0 %vm11354_vm2, %v11353_v52  ;;  %v8855_v42 = vld [vmem:[%s14498_s10 + $0xf8] sm:$0xff]  ;;  %v7183_v28 = vld [vmem:[%s14498_s10 + $0x10] sm:$0xff] }
 0x999   :  { %6812 = vmatmul.mubr.f32.vlgmr.msra.gmra.mrb[20].mxu1 %v6632_v25  ;;  %v7017_v25 = vld [vmem:[%s14497_s9 + $0x8] sm:$0xff]  ;;  %v10657_v46 = vpack.c.bf16 %v8855_v42, %v8854_v17 }
 0x99a   :  { %6898 = vmatprep.mubr.f32.mxu1 %v11353_v52  ;;  %10636 = vmatpush1.bf16.msra.mxu1 %v10635_v27 }
 0x99b   :  { %10638 = vmatprep.subr.bf16.mxu1 %v10637_v34 }
 0x99e   :  { %10640 = vmatpush1.bf16.msra.mxu1 %v10639_v47 }
 0x99f   :  { %10642 = vmatprep.subr.bf16.mxu1 %v10633_v23  ;;  %v7018_v23 = vld [vmem:[%s14497_s9 + $0x10] sm:$0xff] }
 0xa6a   :  { %v6739_v12 = vpop.f32.mrb[200].mxu0 }
 0xa6b   :  { %v6743_v35 = vmul.f32 0.010204081, %v6739_v12  ;;  %v6741_v50 = vpop.f32.mrb[201].mxu0  ;;  %v10666_v12 = vpack.c.bf16 %v8861_v41, %v8860_v3  ;;  %v7191_v41 = vld [vmem:[%s14498_s10 + $0x50] sm:$0xff] }
 0xa6c   :  { %v6813_v59 = vpop.f32.mrb[20].mxu1  ;;  %v8863_v50 = vld [vmem:[%s14498_s10 + $0x138] sm:$0xff] }
 0xa6d   :  { %v6818_v11 = vmul.f32 %v6743_v35, %v6743_v35  ;;  %v6817_v55 = vmul.f32 0.010204081, %v6813_v59  ;;  %v6815_v16 = vpop.f32.mrb[21].mxu1  ;;  %v7021_v59 = vld [vmem:[%s14497_s9 + $0x28] sm:$0xff] }
 0xa6e   :  { %v8865_v16 = vld [vmem:[%s14498_s10 + $0x148] sm:$0xff] }
 0xa6f   :  { %v6819_v38 = vsub.f32 %v6817_v55, %v6818_v11  ;;  %v8864_v55 = vld [vmem:[%s14498_s10 + $0x140] sm:$0xff] }
 0xa71   :  { %v6820_v57 = vmax.f32 %v6819_v38, 0.0  ;;  %v7022_v38 = vld [vmem:[%s14497_s9 + $0x30] sm:$0xff] }
 0xa73   :  { %v6821_v45 = vadd.f32 1e-05, %v6820_v57  ;;  %v10672_v57 = vpack.c.bf16 %v8865_v16, %v8864_v55  ;;  %v7196_v55 = vld [vmem:[%s14498_s10 + $0x78] sm:$0xff] }
 0xa75   :  { %11265 = vrsqrt.f32 %v6821_v45  ;;  %v8866_v45 = vld [vmem:[%s14498_s10 + $0x150] sm:$0xff] }
 0xa7f   :  { %v11266_v36 = vpop.eup %11265 }
 0xa80   :  { %8840 = vmatmul.mubr.msk.f32.vlgmr.msra.gmra.mrb[22].mxu1 %vm4386_vm3, %v11266_v36  ;;  %v6905_v26 = vmul.f32 %v11266_v36, %v6743_v35  ;;  %v8862_v35 = vld [vmem:[%s14498_s10 + $0x130] sm:$0xff]  ;;  %v8867_v36 = vld [vmem:[%s14498_s10 + $0x158] sm:$0xff] }
 0xa81   :  { %10644 = vmatpush1.bf16.msra.mxu1 %v10635_v27  ;;  %6973 = vmatprep.mubr.f32.mxu1 %v11353_v52  ;;  %v7019_v27 = vld [vmem:[%s14497_s9 + $0x18] sm:$0xff]  ;;  %v10669_v11 = vpack.c.bf16 %v8863_v50, %v8862_v35  ;;  %v7193_v35 = vld [vmem:[%s14498_s10 + $0x60] sm:$0xff]  ;;  %v7194_v50 = vld [vmem:[%s14498_s10 + $0x68] sm:$0xff] }
 0xa82   :  { %10646 = vmatprep.subr.bf16.mxu1 %v10637_v34  ;;  %v10663_v34 = vpack.c.bf16 %v8859_v31, %v8858_v7 }
 0xa85   :  { %10648 = vmatpush1.bf16.msra.mxu1 %v10639_v47  ;;  %v7020_v47 = vld [vmem:[%s14497_s9 + $0x20] sm:$0xff] }
 0xa88   :  { %8841 = vmatmul.mubr.msk.f32.vlgmr.msra.gmra.mrb[24].mxu1 %vm4386_vm3, %v6905_v26  ;;  %v10675_v26 = vpack.c.bf16 %v8867_v36, %v8866_v45  ;;  %v7199_v36 = vld [vmem:[%s14498_s10 + $0x90] sm:$0xff] }
 0xa89   :  { %7120 = vmatprep.mubr.f32.mxu1 %v11353_v52 }
 0xb53   :  { %v6900_v2 = vpop.f32.mrb[22].mxu1 }
 0xb54   :  { %v6991_v5 = vrot.slane %v6900_v2, %v13330_v6  ;;  %v6902_v48 = vpop.f32.mrb[23].mxu1  ;;  %v7023_v2 = vld [vmem:[%s14497_s9 + $0x38] sm:$0xff] }
 0xb55   :  { %v6995_v63 = vrot.slane %v6902_v48, %v13330_v6  ;;  %v8869_v48 = vld [vmem:[%s14498_s10 + $0x168] sm:$0xff] }
 0xb56   :  { %v6996_v33 = vmul.f32 %v6991_v5, %v13661_v54  ;;  %v6998_v43 = vmul.f32 %v6991_v5, %v13667_v20  ;;  %v11274_v54 = vld [vmem:[%s14503_s15 + $0x8] sm:$0xff]  ;;  %v8868_v5 = vld [vmem:[%s14498_s10 + $0x160] sm:$0xff] }
 0xb57   :  { %v6997_v13 = vmul.f32 %v6995_v63, %v13663_v14  ;;  %v6999_v62 = vmul.f32 %v6995_v63, %v13675_v19  ;;  %v10678_v63 = vpack.c.bf16 %v8869_v48, %v8868_v5 }
 0xb5b   :  { %v6975_v8 = vpop.f32.mrb[24].mxu1 }
 0xb5c   :  { %v6982_v21 = vrot.slane %v6975_v8, 7  ;;  %v6977_v53 = vpop.f32.mrb[25].mxu1  ;;  %v8873_v8 = vld [vmem:[%s14498_s10 + $0x188] sm:$0xff] }
 0xb5d   :  { %v6983_v22 = vrot.slane %v6977_v53, 7  ;;  %v8875_v53 = vld [vmem:[%s14498_s10 + $0x198] sm:$0xff] }
 0xb5e   :  { %v6986_v51 = vsub.f32 %v11273_v44, %v6982_v21  ;;  %v7024_v44 = vld [vmem:[%s14497_s9 + $0x40] sm:$0xff] }
 0xb5f   :  { %v6987_v20 = vsub.f32 %v11274_v54, %v6983_v22  ;;  %v8877_v54 = vld [vmem:[%s14498_s10 + $0x1a8] sm:$0xff] }
 0xb60   :  { %v7003_v32 = vrot.slane %v6986_v51, %v7002_v39  ;;  %v8876_v51 = vld [vmem:[%s14498_s10 + $0x1a0] sm:$0xff] }
 0xb61   :  { %v7007_v14 = vrot.slane %v6987_v20, %v7002_v39  ;;  %v8874_v39 = vld [vmem:[%s14498_s10 + $0x190] sm:$0xff]  ;;  %v10690_v20 = vpack.c.bf16 %v8877_v54, %v8876_v51  ;;  %v7208_v54 = vld [vmem:[%s14498_s10 + $0xd8] sm:$0xff] }
 0xb62   :  { %v7008_v37 = vadd.f32 %v7003_v32, %v6996_v33  ;;  %v7010_v19 = vadd.f32 %v7003_v32, %v6998_v43  ;;  %v8870_v33 = vld [vmem:[%s14498_s10 + $0x170] sm:$0xff]  ;;  %v8871_v43 = vld [vmem:[%s14498_s10 + $0x178] sm:$0xff]  ;;  %v10687_v22 = vpack.c.bf16 %v8875_v53, %v8874_v39  ;;  %v7025_v32 = vld [vmem:[%s14497_s9 + $0x48] sm:$0xff] }
 0xb63   :  { %v7009_v49 = vadd.f32 %v7007_v14, %v6997_v13  ;;  %v7011_v61 = vadd.f32 %v7007_v14, %v6999_v62  ;;  %v10681_v13 = vpack.c.bf16 %v8871_v43, %v8870_v33  ;;  %v8872_v62 = vld [vmem:[%s14498_s10 + $0x180] sm:$0xff]  ;;  %v8878_v14 = vld [vmem:[%s14498_s10 + $0x1b0] sm:$0xff]  ;;  %v7202_v33 = vld [vmem:[%s14498_s10 + $0xa8] sm:$0xff] }
 0xb64   :  { %v7012_v9 = vmax.f32 %v7008_v37, 0.0  ;;  %v7014_v60 = vmax.f32 %v7010_v19, 0.0  ;;  %v10684_v21 = vpack.c.bf16 %v8873_v8, %v8872_v62  ;;  %v8879_v37 = vld [vmem:[%s14498_s10 + $0x1b8] sm:$0xff]  ;;  %v7203_v8 = vld [vmem:[%s14498_s10 + $0xb0] sm:$0xff]  ;;  %v7205_v53 = vld [vmem:[%s14498_s10 + $0xc0] sm:$0xff] }
 0xb65   :  { %v7013_v56 = vmax.f32 %v7009_v49, 0.0  ;;  %v7015_v4 = vmax.f32 %v7011_v61, 0.0  ;;  %v10693_v19 = vpack.c.bf16 %v8879_v37, %v8878_v14  ;;  %v7207_v51 = vld [vmem:[%s14498_s10 + $0xd0] sm:$0xff]  ;;  %v8885_v14 = vld [vmem:[%s14498_s10 + $0x1c8] sm:$0xff] }
 0xb66   :  { %v10651_v15 = vpack.c.bf16 %v7014_v60, %v7012_v9 }
 0xb67   :  { %v10649_v24 = vpack.c.bf16 %v7015_v4, %v7013_v56  ;;  %v7181_v56 = vld [vmem:[%s14498_s10] sm:$0xff]  ;;  %v7182_v4 = vld [vmem:[%s14498_s10 + $0x8] sm:$0xff] }
 0xb69   :  { %10650 = vmatprep.subr.bf16.mxu1 %v10649_v24  ;;  %v10696_v24 = vpack.c.bf16 %v7182_v4, %v7181_v56  ;;  %v8888_v4 = vld [vmem:[%s14498_s10 + $0x1e0] sm:$0xff] }
 0xb6a   :  { %10652 = vmatpush1.bf16.msra.mxu1 %v10651_v15 }
 0xb6b   :  { %10653 = vmatprep.subr.bf16.mxu1 %v11352_v0 }
 0xb6d   :  { %8842 = vmatmul.mubr.msk.f32.vlgmr.msra.gmra.mrb[26].mxu1 %vm4787_vm4, %v7016_v40  ;;  %v7184_v40 = vld [vmem:[%s14498_s10 + $0x18] sm:$0xff] }
 0xb6e   :  { %7126 = vmatprep.mubr.f32.mxu1 %v11353_v52  ;;  %10655 = vmatpush1.bf16.msra.mxu1 %v10654_v10  ;;  %v10699_v17 = vpack.c.bf16 %v7184_v40, %v7183_v28  ;;  %v8893_v28 = vld [vmem:[%s14498_s10 + $0x208] sm:$0xff] }
 0xb6f   :  { %10656 = vmatprep.subr.bf16.mxu1 %v11352_v0 }
 0xb71   :  { %8843 = vmatmul.mubr.msk.f32.gmra.mrb[28].mxu1 %vm4787_vm4, %v7017_v25  ;;  %v7185_v25 = vld [vmem:[%s14498_s10 + $0x20] sm:$0xff] }
 0xb72   :  { %7132 = vmatprep.mubr.f32.mxu1 %v11353_v52  ;;  %10658 = vmatpush1.bf16.msra.mxu1 %v10657_v46  ;;  %v7186_v46 = vld [vmem:[%s14498_s10 + $0x28] sm:$0xff] }
 0xb73   :  { %10659 = vmatprep.subr.bf16.mxu1 %v11352_v0  ;;  %v10702_v30 = vpack.c.bf16 %v7186_v46, %v7185_v25 }
 0xb75   :  { %8844 = vmatmul.mubr.msk.f32.gmra.mrb[30].mxu1 %vm4787_vm4, %v7018_v23  ;;  %v7187_v23 = vld [vmem:[%s14498_s10 + $0x30] sm:$0xff] }
 0xb76   :  { %7138 = vmatprep.mubr.f32.mxu1 %v11353_v52  ;;  %10661 = vmatpush1.bf16.msra.mxu1 %v10660_v1  ;;  %v7188_v1 = vld [vmem:[%s14498_s10 + $0x38] sm:$0xff] }
 0xb77   :  { %10662 = vmatprep.subr.bf16.mxu1 %v11352_v0  ;;  %v10705_v31 = vpack.c.bf16 %v7188_v1, %v7187_v23  ;;  %v8897_v23 = vld [vmem:[%s14498_s10 + $0x228] sm:$0xff] }
 0xb79   :  { %8845 = vmatmul.mubr.msk.f32.gmra.mrb[32].mxu1 %vm4787_vm4, %v7019_v27  ;;  %v7189_v27 = vld [vmem:[%s14498_s10 + $0x40] sm:$0xff] }
 0xb7a   :  { %7144 = vmatprep.mubr.f32.mxu1 %v11353_v52  ;;  %10664 = vmatpush1.bf16.msra.mxu1 %v10663_v34  ;;  %v7190_v34 = vld [vmem:[%s14498_s10 + $0x48] sm:$0xff] }
 0xb7b   :  { %10665 = vmatprep.subr.bf16.mxu1 %v11352_v0  ;;  %v10708_v3 = vpack.c.bf16 %v7190_v34, %v7189_v27  ;;  %v8898_v27 = vld [vmem:[%s14498_s10 + $0x230] sm:$0xff]  ;;  %v8899_v34 = vld [vmem:[%s14498_s10 + $0x238] sm:$0xff] }
 0xb7d   :  { %8846 = vmatmul.mubr.msk.f32.gmra.mrb[34].mxu1 %vm4787_vm4, %v7020_v47  ;;  %v7192_v47 = vld [vmem:[%s14498_s10 + $0x58] sm:$0xff] }
 0xb7e   :  { %7150 = vmatprep.mubr.f32.mxu1 %v11353_v52  ;;  %10667 = vmatpush1.bf16.msra.mxu1 %v10666_v12  ;;  %v10711_v12 = vpack.c.bf16 %v7192_v47, %v7191_v41  ;;  %v10759_v47 = vpack.c.bf16 %v8899_v34, %v8898_v27  ;;  %v8936_v34 = vld [vmem:[%s14498_s10 + $0x350] sm:$0xff] }
 0xb7f   :  { %10668 = vmatprep.subr.bf16.mxu1 %v11352_v0 }
 0xb81   :  { %8847 = vmatmul.mubr.msk.f32.gmra.mrb[36].mxu1 %vm4787_vm4, %v7021_v59  ;;  %v10714_v59 = vpack.c.bf16 %v7194_v50, %v7193_v35  ;;  %v8901_v35 = vld [vmem:[%s14498_s10 + $0x248] sm:$0xff] }
 0xb82   :  { %7156 = vmatprep.mubr.f32.mxu1 %v11353_v52  ;;  %10670 = vmatpush1.bf16.msra.mxu1 %v10669_v11  ;;  %v7195_v11 = vld [vmem:[%s14498_s10 + $0x70] sm:$0xff] }
 0xb83   :  { %10671 = vmatprep.subr.bf16.mxu1 %v11352_v0  ;;  %v10717_v16 = vpack.c.bf16 %v7196_v55, %v7195_v11  ;;  %v8903_v11 = vld [vmem:[%s14498_s10 + $0x258] sm:$0xff] }
 0xb85   :  { %8848 = vmatmul.mubr.msk.f32.gmra.mrb[38].mxu1 %vm4787_vm4, %v7022_v38  ;;  %v7197_v38 = vld [vmem:[%s14498_s10 + $0x80] sm:$0xff] }
 0xb86   :  { %10673 = vmatpush1.bf16.msra.mxu1 %v10672_v57  ;;  %7162 = vmatprep.mubr.f32.mxu1 %v11353_v52  ;;  %v7198_v57 = vld [vmem:[%s14498_s10 + $0x88] sm:$0xff] }
 0xb87   :  { %10674 = vmatprep.subr.bf16.mxu1 %v11352_v0  ;;  %v10720_v45 = vpack.c.bf16 %v7198_v57, %v7197_v38  ;;  %v8905_v38 = vld [vmem:[%s14498_s10 + $0x268] sm:$0xff] }
 0xb89   :  { %8849 = vmatmul.mubr.msk.f32.gmra.mrb[40].mxu1 %vm4787_vm4, %v7023_v2 }
 0xb8a   :  { %10676 = vmatpush1.bf16.msra.mxu1 %v10675_v26  ;;  %7168 = vmatprep.mubr.f32.mxu1 %v11353_v52  ;;  %v7200_v26 = vld [vmem:[%s14498_s10 + $0x98] sm:$0xff] }
 0xb8b   :  { %10677 = vmatprep.subr.bf16.mxu1 %v11352_v0  ;;  %v10723_v5 = vpack.c.bf16 %v7200_v26, %v7199_v36  ;;  %v8907_v36 = vld [vmem:[%s14498_s10 + $0x278] sm:$0xff] }
 0xb8d   :  { %8850 = vmatmul.mubr.msk.f32.gmra.mrb[42].mxu1 %vm4787_vm4, %v7024_v44 }
 0xb8e   :  { %10679 = vmatpush1.bf16.msra.mxu1 %v10678_v63  ;;  %7174 = vmatprep.mubr.f32.mxu1 %v11353_v52  ;;  %v7201_v63 = vld [vmem:[%s14498_s10 + $0xa0] sm:$0xff] }
 0xb8f   :  { %10680 = vmatprep.subr.bf16.mxu1 %v11352_v0 }
 0xb91   :  { %8851 = vmatmul.mubr.msk.f32.gmra.mrb[44].mxu1 %vm4787_vm4, %v7025_v32  ;;  %v8884_v32 = vld [vmem:[%s14498_s10 + $0x1c0] sm:$0xff] }
 0xb92   :  { %10682 = vmatpush1.bf16.msra.mxu1 %v10681_v13  ;;  %v10726_v13 = vpack.c.bf16 %v7202_v33, %v7201_v63  ;;  %v10738_v37 = vpack.c.bf16 %v8885_v14, %v8884_v32  ;;  %v8909_v63 = vld [vmem:[%s14498_s10 + $0x288] sm:$0xff] }
 0xb93   :  { %10683 = vmatprep.subr.bf16.mxu1 %v11352_v0  ;;  %v8919_v32 = vld [vmem:[%s14498_s10 + $0x2c8] sm:$0xff] }
 0xb96   :  { %10685 = vmatpush1.bf16.msra.mxu1 %v10684_v21  ;;  %v7204_v21 = vld [vmem:[%s14498_s10 + $0xb8] sm:$0xff] }
 0xb97   :  { %10686 = vmatprep.subr.bf16.mxu1 %v11352_v0  ;;  %v10729_v39 = vpack.c.bf16 %v7204_v21, %v7203_v8  ;;  %v8911_v8 = vld [vmem:[%s14498_s10 + $0x298] sm:$0xff] }
 0xb9a   :  { %10688 = vmatpush1.bf16.msra.mxu1 %v10687_v22  ;;  %v7206_v22 = vld [vmem:[%s14498_s10 + $0xc8] sm:$0xff] }
 0xb9b   :  { %10689 = vmatprep.subr.bf16.mxu1 %v11352_v0  ;;  %v10732_v44 = vpack.c.bf16 %v7206_v22, %v7205_v53  ;;  %v8915_v53 = vld [vmem:[%s14498_s10 + $0x2a8] sm:$0xff] }
 0xb9e   :  { %10691 = vmatpush1.bf16.msra.mxu1 %v10690_v20  ;;  %v10735_v20 = vpack.c.bf16 %v7208_v54, %v7207_v51  ;;  %v8917_v51 = vld [vmem:[%s14498_s10 + $0x2b8] sm:$0xff] }
 0xb9f   :  { %10692 = vmatprep.subr.bf16.mxu1 %v11352_v0 }
 0xba2   :  { %10694 = vmatpush1.bf16.msra.mxu1 %v10693_v19  ;;  %v8886_v19 = vld [vmem:[%s14498_s10 + $0x1d0] sm:$0xff] }
 0xba3   :  { %10695 = vmatprep.subr.bf16.mxu1 %v11352_v0 }
 0xc40   :  { %v13879_v49 = vpop.f32.mrb[26].mxu1 }
 0xc41   :  { %v7124_v61 = vpop.f32.mrb[27].mxu1 }
 0xc44   :  { %v13881_v9 = vpop.f32.mrb[28].mxu1 }
 0xc45   :  { %v13883_v60 = vpop.f32.mrb[29].mxu1 }
 0xc48   :  { %v7134_v15 = vpop.f32.mrb[30].mxu1 }
 0xc49   :  { %v7136_v29 = vpop.f32.mrb[31].mxu1 }
 0xc4a   :  { %8880 = vmatprep.mubr.msk.f32.mxu1 %vm6612_vm5, %v7136_v29 }
 0xc4b   :  { %7309 = vmatmul.mubr.f32.vlgmr.msra.gmra.mrb[46].mxu1 %v7134_v15  ;;  %v8889_v15 = vld [vmem:[%s14498_s10 + $0x1e8] sm:$0xff] }
 0xc4c   :  { %10697 = vmatpush1.bf16.msra.mxu1 %v10696_v24  ;;  %v7140_v10 = vpop.f32.mrb[32].mxu1  ;;  %v10744_v24 = vpack.c.bf16 %v8889_v15, %v8888_v4  ;;  %v8926_v15 = vld [vmem:[%s14498_s10 + $0x300] sm:$0xff] }
 0xc4d   :  { %v7142_v42 = vpop.f32.mrb[33].mxu1  ;;  %10698 = vmatprep.subr.bf16.mxu1 %v11352_v0 }
 0xc4e   :  { %8881 = vmatprep.mubr.msk.f32.mxu1 %vm6612_vm5, %v7142_v42  ;;  %v8895_v42 = vld [vmem:[%s14498_s10 + $0x218] sm:$0xff] }
 0xc4f   :  { %7314 = vmatmul.mubr.f32.gmra.mrb[48].mxu1 %v7140_v10 }
 0xc50   :  { %10700 = vmatpush1.bf16.msra.mxu1 %v10699_v17  ;;  %8882 = vmatprep.mubr.msk.f32.mxu1 %vm6612_vm5, %v7124_v61  ;;  %v13907_v58 = vpop.f32.mrb[34].mxu1  ;;  %v8887_v61 = vld [vmem:[%s14498_s10 + $0x1d8] sm:$0xff]  ;;  %v8894_v17 = vld [vmem:[%s14498_s10 + $0x210] sm:$0xff] }
 0xc51   :  { %10701 = vmatprep.subr.bf16.mxu1 %v11352_v0  ;;  %v13916_v7 = vpop.f32.mrb[35].mxu1  ;;  %v10741_v56 = vpack.c.bf16 %v8887_v61, %v8886_v19  ;;  %v10753_v46 = vpack.c.bf16 %v8895_v42, %v8894_v17  ;;  %v8924_v61 = vld [vmem:[%s14498_s10 + $0x2f0] sm:$0xff] }
 0xc52   :  { %v8932_v42 = vld [vmem:[%s14498_s10 + $0x330] sm:$0xff] }
 0xc54   :  { %10703 = vmatpush1.bf16.msra.mxu1 %v10702_v30  ;;  %v13960_v2 = vpop.f32.mrb[36].mxu1  ;;  %v8896_v30 = vld [vmem:[%s14498_s10 + $0x220] sm:$0xff] }
 0xc55   :  { %10704 = vmatprep.subr.bf16.mxu1 %v11352_v0  ;;  %v13962_v48 = vpop.f32.mrb[37].mxu1 }
 0xc58   :  { %10706 = vmatpush1.bf16.msra.mxu1 %v10705_v31  ;;  %v13971_v43 = vpop.f32.mrb[38].mxu1  ;;  %v10756_v31 = vpack.c.bf16 %v8897_v23, %v8896_v30  ;;  %v8934_v23 = vld [vmem:[%s14498_s10 + $0x340] sm:$0xff] }
 0xc59   :  { %10707 = vmatprep.subr.bf16.mxu1 %v11352_v0  ;;  %v13973_v62 = vpop.f32.mrb[39].mxu1 }
 0xc5c   :  { %10709 = vmatpush1.bf16.msra.mxu1 %v10708_v3  ;;  %v14037_v10 = vpop.f32.mrb[40].mxu1 }
 0xc5d   :  { %10710 = vmatprep.subr.bf16.mxu1 %v11352_v0  ;;  %v14046_v25 = vpop.f32.mrb[41].mxu1 }
 0xc60   :  { %10712 = vmatpush1.bf16.msra.mxu1 %v10711_v12  ;;  %v14055_v1 = vpop.f32.mrb[42].mxu1  ;;  %v8900_v12 = vld [vmem:[%s14498_s10 + $0x240] sm:$0xff] }
 0xc61   :  { %10713 = vmatprep.subr.bf16.mxu1 %v11352_v0  ;;  %v10762_v50 = vpack.c.bf16 %v8901_v35, %v8900_v12  ;;  %v8938_v35 = vld [vmem:[%s14498_s10 + $0x360] sm:$0xff] }
 0xc64   :  { %10715 = vmatpush1.bf16.msra.mxu1 %v10714_v59  ;;  %v8902_v59 = vld [vmem:[%s14498_s10 + $0x250] sm:$0xff] }
 0xc65   :  { %10716 = vmatprep.subr.bf16.mxu1 %v11352_v0  ;;  %v10765_v55 = vpack.c.bf16 %v8903_v11, %v8902_v59  ;;  %v8940_v11 = vld [vmem:[%s14498_s10 + $0x370] sm:$0xff] }
 0xc68   :  { %10718 = vmatpush1.bf16.msra.mxu1 %v10717_v16  ;;  %v8904_v16 = vld [vmem:[%s14498_s10 + $0x260] sm:$0xff] }
 0xc69   :  { %10719 = vmatprep.subr.bf16.mxu1 %v11352_v0  ;;  %v10768_v57 = vpack.c.bf16 %v8905_v38, %v8904_v16  ;;  %v8944_v38 = vld [vmem:[%s14498_s10 + $0x380] sm:$0xff] }
 0xc6c   :  { %10721 = vmatpush1.bf16.msra.mxu1 %v10720_v45  ;;  %v8906_v45 = vld [vmem:[%s14498_s10 + $0x270] sm:$0xff] }
 0xc6d   :  { %10722 = vmatprep.subr.bf16.mxu1 %v11352_v0  ;;  %v10771_v26 = vpack.c.bf16 %v8907_v36, %v8906_v45  ;;  %v8946_v36 = vld [vmem:[%s14498_s10 + $0x390] sm:$0xff] }
 0xc70   :  { %10724 = vmatpush1.bf16.msra.mxu1 %v10723_v5  ;;  %v8908_v5 = vld [vmem:[%s14498_s10 + $0x280] sm:$0xff] }
 0xc71   :  { %10725 = vmatprep.subr.bf16.mxu1 %v11352_v0  ;;  %v10774_v33 = vpack.c.bf16 %v8909_v63, %v8908_v5  ;;  %v8948_v63 = vld [vmem:[%s14498_s10 + $0x3a0] sm:$0xff] }
 0xc74   :  { %10727 = vmatpush1.bf16.msra.mxu1 %v10726_v13  ;;  %v8910_v13 = vld [vmem:[%s14498_s10 + $0x290] sm:$0xff] }
 0xc75   :  { %10728 = vmatprep.subr.bf16.mxu1 %v11352_v0  ;;  %v10777_v21 = vpack.c.bf16 %v8911_v8, %v8910_v13 }
 0xc78   :  { %10730 = vmatpush1.bf16.msra.mxu1 %v10729_v39  ;;  %v8914_v39 = vld [vmem:[%s14498_s10 + $0x2a0] sm:$0xff] }
 0xc79   :  { %10731 = vmatprep.subr.bf16.mxu1 %v11352_v0  ;;  %v10780_v22 = vpack.c.bf16 %v8915_v53, %v8914_v39  ;;  %v8954_v39 = vld [vmem:[%s14498_s10 + $0x3d0] sm:$0xff]  ;;  %v8955_v53 = vld [vmem:[%s14498_s10 + $0x3d8] sm:$0xff] }
 0xc7c   :  { %10733 = vmatpush1.bf16.msra.mxu1 %v10732_v44  ;;  %v8916_v44 = vld [vmem:[%s14498_s10 + $0x2b0] sm:$0xff] }
 0xc7d   :  { %10734 = vmatprep.subr.bf16.mxu1 %v11352_v0  ;;  %v10783_v54 = vpack.c.bf16 %v8917_v51, %v8916_v44  ;;  %v8956_v44 = vld [vmem:[%s14498_s10 + $0x3e0] sm:$0xff]  ;;  %v8957_v51 = vld [vmem:[%s14498_s10 + $0x3e8] sm:$0xff] }
 0xc80   :  { %10736 = vmatpush1.bf16.msra.mxu1 %v10735_v20  ;;  %v8918_v20 = vld [vmem:[%s14498_s10 + $0x2c0] sm:$0xff] }
 0xc81   :  { %10737 = vmatprep.subr.bf16.mxu1 %v11352_v0  ;;  %v10786_v14 = vpack.c.bf16 %v8919_v32, %v8918_v20  ;;  %v8958_v20 = vld [vmem:[%s14498_s10 + $0x3f0] sm:$0xff]  ;;  %v8959_v32 = vld [vmem:[%s14498_s10 + $0x3f8] sm:$0xff] }
 0xc83   :  { %7390 = vmatmul.mubr.f32.vlgmr.msra.gmra.mrb[46].mxu1 %v13879_v49  ;;  %v8890_v49 = vld [vmem:[%s14498_s10 + $0x1f0] sm:$0xff] }
 0xc84   :  { %8883 = vmatprep.mubr.msk.f32.mxu1 %vm6612_vm5, %v13883_v60  ;;  %10739 = vmatpush1.bf16.msra.mxu1 %v10738_v37  ;;  %v8891_v60 = vld [vmem:[%s14498_s10 + $0x1f8] sm:$0xff] }
 0xc85   :  { %10740 = vmatprep.subr.bf16.mxu1 %v11352_v0  ;;  %v10747_v29 = vpack.c.bf16 %v8891_v60, %v8890_v49  ;;  %v8928_v60 = vld [vmem:[%s14498_s10 + $0x310] sm:$0xff] }
 0xc87   :  { %7395 = vmatmul.mubr.f32.gmra.mrb[48].mxu1 %v13881_v9  ;;  %v8892_v9 = vld [vmem:[%s14498_s10 + $0x200] sm:$0xff] }
 0xc88   :  { %10742 = vmatpush1.bf16.msra.mxu1 %v10741_v56  ;;  %8912 = vmatprep.mubr.msk.f32.mxu1 %vm6612_vm5, %v13916_v7  ;;  %v10750_v40 = vpack.c.bf16 %v8893_v28, %v8892_v9  ;;  %v14057_v7 = vpop.f32.mrb[43].mxu1  ;;  %v8925_v56 = vld [vmem:[%s14498_s10 + $0x2f8] sm:$0xff]  ;;  %v8930_v28 = vld [vmem:[%s14498_s10 + $0x320] sm:$0xff] }
 0xc89   :  { %10743 = vmatprep.subr.bf16.mxu1 %v11352_v0  ;;  %v14066_v3 = vpop.f32.mrb[44].mxu1  ;;  %v10795_v4 = vpack.c.bf16 %v8925_v56, %v8924_v61  ;;  %v8964_v61 = vld [vmem:[%s14498_s10 + $0x420] sm:$0xff]  ;;  %v8965_v56 = vld [vmem:[%s14498_s10 + $0x428] sm:$0xff] }
 0xc8a   :  { %v14068_v41 = vpop.f32.mrb[45].mxu1 }
 0xc8c   :  { %10745 = vmatpush1.bf16.msra.mxu1 %v10744_v24  ;;  %v8927_v24 = vld [vmem:[%s14498_s10 + $0x308] sm:$0xff] }
 0xc8d   :  { %10746 = vmatprep.subr.bf16.mxu1 %v11352_v0  ;;  %v10798_v49 = vpack.c.bf16 %v8927_v24, %v8926_v15  ;;  %v8966_v15 = vld [vmem:[%s14498_s10 + $0x430] sm:$0xff]  ;;  %v8967_v24 = vld [vmem:[%s14498_s10 + $0x438] sm:$0xff] }
 0xc90   :  { %10748 = vmatpush1.bf16.msra.mxu1 %v10747_v29  ;;  %v8929_v29 = vld [vmem:[%s14498_s10 + $0x318] sm:$0xff] }
 0xc91   :  { %10749 = vmatprep.subr.bf16.mxu1 %v11352_v0  ;;  %v10801_v9 = vpack.c.bf16 %v8929_v29, %v8928_v60  ;;  %v8968_v60 = vld [vmem:[%s14498_s10 + $0x440] sm:$0xff]  ;;  %v8969_v29 = vld [vmem:[%s14498_s10 + $0x448] sm:$0xff] }
 0xc94   :  { %10751 = vmatpush1.bf16.msra.mxu1 %v10750_v40  ;;  %v8931_v40 = vld [vmem:[%s14498_s10 + $0x328] sm:$0xff] }
 0xc95   :  { %10752 = vmatprep.subr.bf16.mxu1 %v11352_v0  ;;  %v10804_v17 = vpack.c.bf16 %v8931_v40, %v8930_v28  ;;  %v8970_v28 = vld [vmem:[%s14498_s10 + $0x450] sm:$0xff]  ;;  %v8971_v40 = vld [vmem:[%s14498_s10 + $0x458] sm:$0xff] }
 0xc98   :  { %10754 = vmatpush1.bf16.msra.mxu1 %v10753_v46  ;;  %v8933_v46 = vld [vmem:[%s14498_s10 + $0x338] sm:$0xff] }
 0xc99   :  { %10755 = vmatprep.subr.bf16.mxu1 %v11352_v0  ;;  %v10807_v30 = vpack.c.bf16 %v8933_v46, %v8932_v42  ;;  %v7757_v42 = vld [vmem:[%s14499_s11] sm:$0xff]  ;;  %v7758_v46 = vld [vmem:[%s14499_s11 + $0x8] sm:$0xff] }
 0xc9c   :  { %10757 = vmatpush1.bf16.msra.mxu1 %v10756_v31  ;;  %v8935_v31 = vld [vmem:[%s14498_s10 + $0x348] sm:$0xff] }
 0xc9d   :  { %10758 = vmatprep.subr.bf16.mxu1 %v11352_v0  ;;  %v10810_v27 = vpack.c.bf16 %v8935_v31, %v8934_v23  ;;  %v7761_v23 = vld [vmem:[%s14499_s11 + $0x20] sm:$0xff]  ;;  %v7762_v31 = vld [vmem:[%s14499_s11 + $0x28] sm:$0xff] }
 0xca0   :  { %10760 = vmatpush1.bf16.msra.mxu1 %v10759_v47  ;;  %v8937_v47 = vld [vmem:[%s14498_s10 + $0x358] sm:$0xff] }
 0xca1   :  { %10761 = vmatprep.subr.bf16.mxu1 %v11352_v0  ;;  %v10813_v12 = vpack.c.bf16 %v8937_v47, %v8936_v34  ;;  %v7763_v34 = vld [vmem:[%s14499_s11 + $0x30] sm:$0xff]  ;;  %v7764_v47 = vld [vmem:[%s14499_s11 + $0x38] sm:$0xff] }
 0xca4   :  { %10763 = vmatpush1.bf16.msra.mxu1 %v10762_v50  ;;  %v8939_v50 = vld [vmem:[%s14498_s10 + $0x368] sm:$0xff] }
 0xca5   :  { %10764 = vmatprep.subr.bf16.mxu1 %v11352_v0  ;;  %v10816_v59 = vpack.c.bf16 %v8939_v50, %v8938_v35 }
 0xca8   :  { %10766 = vmatpush1.bf16.msra.mxu1 %v10765_v55  ;;  %v8941_v55 = vld [vmem:[%s14498_s10 + $0x378] sm:$0xff] }
 0xca9   :  { %10767 = vmatprep.subr.bf16.mxu1 %v11352_v0  ;;  %v10819_v16 = vpack.c.bf16 %v8941_v55, %v8940_v11 }
 0xcac   :  { %10769 = vmatpush1.bf16.msra.mxu1 %v10768_v57  ;;  %v8945_v57 = vld [vmem:[%s14498_s10 + $0x388] sm:$0xff] }
 0xcad   :  { %10770 = vmatprep.subr.bf16.mxu1 %v11352_v0  ;;  %v10822_v45 = vpack.c.bf16 %v8945_v57, %v8944_v38 }
 0xcb0   :  { %10772 = vmatpush1.bf16.msra.mxu1 %v10771_v26  ;;  %v8947_v26 = vld [vmem:[%s14498_s10 + $0x398] sm:$0xff] }
 0xcb1   :  { %10773 = vmatprep.subr.bf16.mxu1 %v11352_v0  ;;  %v10825_v5 = vpack.c.bf16 %v8947_v26, %v8946_v36 }
 0xcb4   :  { %10775 = vmatpush1.bf16.msra.mxu1 %v10774_v33  ;;  %v8949_v33 = vld [vmem:[%s14498_s10 + $0x3a8] sm:$0xff] }
 0xcb5   :  { %10776 = vmatprep.subr.bf16.mxu1 %v11352_v0  ;;  %v10828_v13 = vpack.c.bf16 %v8949_v33, %v8948_v63 }
 0xcb8   :  { %10778 = vmatpush1.bf16.msra.mxu1 %v10777_v21 }
 0xcb9   :  { %10779 = vmatprep.subr.bf16.mxu1 %v11352_v0 }
 0xcbb   :  { %7500 = vmatmul.mubr.f32.vlgmr.msra.gmra.mrb[46].mxu1 %v13907_v58  ;;  %v8920_v58 = vld [vmem:[%s14498_s10 + $0x2d0] sm:$0xff] }
 0xcbc   :  { %10781 = vmatpush1.bf16.msra.mxu1 %v10780_v22  ;;  %8913 = vmatprep.mubr.msk.f32.mxu1 %vm6612_vm5, %v13962_v48  ;;  %v8921_v48 = vld [vmem:[%s14498_s10 + $0x2d8] sm:$0xff]  ;;  %v10837_v22 = vpack.c.bf16 %v8955_v53, %v8954_v39 }
 0xcbd   :  { %10782 = vmatprep.subr.bf16.mxu1 %v11352_v0  ;;  %v10789_v37 = vpack.c.bf16 %v8921_v48, %v8920_v58  ;;  %v8960_v58 = vld [vmem:[%s14498_s10 + $0x400] sm:$0xff]  ;;  %v8961_v48 = vld [vmem:[%s14498_s10 + $0x408] sm:$0xff] }
 0xcbf   :  { %7505 = vmatmul.mubr.f32.gmra.mrb[48].mxu1 %v13960_v2  ;;  %v8922_v2 = vld [vmem:[%s14498_s10 + $0x2e0] sm:$0xff] }
 0xcc0   :  { %10784 = vmatpush1.bf16.msra.mxu1 %v10783_v54  ;;  %8942 = vmatprep.mubr.msk.f32.mxu1 %vm6612_vm5, %v13973_v62  ;;  %v8923_v62 = vld [vmem:[%s14498_s10 + $0x2e8] sm:$0xff]  ;;  %v10840_v54 = vpack.c.bf16 %v8957_v51, %v8956_v44  ;;  %v7918_v44 = vld [vmem:[%s14500_s12] sm:$0xff] }
 0xcc1   :  { %10785 = vmatprep.subr.bf16.mxu1 %v11352_v0  ;;  %v10792_v19 = vpack.c.bf16 %v8923_v62, %v8922_v2  ;;  %v8962_v2 = vld [vmem:[%s14498_s10 + $0x410] sm:$0xff]  ;;  %v8963_v62 = vld [vmem:[%s14498_s10 + $0x418] sm:$0xff]  ;;  %v7919_v51 = vld [vmem:[%s14500_s12 + $0x8] sm:$0xff] }
 0xcc4   :  { %10787 = vmatpush1.bf16.msra.mxu1 %v10786_v14  ;;  %v10843_v14 = vpack.c.bf16 %v8959_v32, %v8958_v20  ;;  %v10888_v20 = vpack.c.bf16 %v7919_v51, %v7918_v44  ;;  %v7921_v32 = vld [vmem:[%s14500_s12 + $0x18] sm:$0xff]  ;;  %v8252_v44 = vsub.s32 3, %v13327_v18 }
 0xcc5   :  { %10788 = vmatprep.subr.bf16.mxu1 %v11352_v0 }
 0xcc8   :  { %10790 = vmatpush1.bf16.msra.mxu1 %v10789_v37  ;;  %v10846_v37 = vpack.c.bf16 %v8961_v48, %v8960_v58 }
 0xcc9   :  { %10791 = vmatprep.subr.bf16.mxu1 %v11352_v0 }
 0xccc   :  { %10793 = vmatpush1.bf16.msra.mxu1 %v10792_v19  ;;  %v10849_v19 = vpack.c.bf16 %v8963_v62, %v8962_v2 }
 0xccd   :  { %10794 = vmatprep.subr.bf16.mxu1 %v11352_v0 }
 0xcd0   :  { %10796 = vmatpush1.bf16.msra.mxu1 %v10795_v4  ;;  %v10852_v4 = vpack.c.bf16 %v8965_v56, %v8964_v61 }
 0xcd1   :  { %10797 = vmatprep.subr.bf16.mxu1 %v11352_v0 }
 0xcd4   :  { %10799 = vmatpush1.bf16.msra.mxu1 %v10798_v49  ;;  %v10855_v49 = vpack.c.bf16 %v8967_v24, %v8966_v15 }
 0xcd5   :  { %10800 = vmatprep.subr.bf16.mxu1 %v11352_v0 }
 0xcd8   :  { %10802 = vmatpush1.bf16.msra.mxu1 %v10801_v9  ;;  %v10858_v9 = vpack.c.bf16 %v8969_v29, %v8968_v60  ;;  %v8978_v60 = vld [vmem:[%s14501_s13 + $0x40] sm:$0xff]  ;;  %v8979_v29 = vld [vmem:[%s14501_s13 + $0x48] sm:$0xff] }
 0xcd9   :  { %10803 = vmatprep.subr.bf16.mxu1 %v11352_v0 }
 0xcdc   :  { %10805 = vmatpush1.bf16.msra.mxu1 %v10804_v17  ;;  %v10861_v17 = vpack.c.bf16 %v8971_v40, %v8970_v28  ;;  %v8980_v28 = vld [vmem:[%s14501_s13 + $0x50] sm:$0xff]  ;;  %v8981_v40 = vld [vmem:[%s14501_s13 + $0x58] sm:$0xff] }
 0xcdd   :  { %10806 = vmatprep.subr.bf16.mxu1 %v11352_v0 }
 0xce0   :  { %10808 = vmatpush1.bf16.msra.mxu1 %v10807_v30  ;;  %v10864_v30 = vpack.c.bf16 %v7758_v46, %v7757_v42  ;;  %v8982_v42 = vld [vmem:[%s14501_s13 + $0x60] sm:$0xff]  ;;  %v8983_v46 = vld [vmem:[%s14501_s13 + $0x68] sm:$0xff] }
 0xce1   :  { %10809 = vmatprep.subr.bf16.mxu1 %v11352_v0 }
 0xce2   :  { %10877 = vmatpush3.bf16.msra.mxu0 %v10864_v30 }
 0xce3   :  { %10878 = vmatprep.subr.bf16.mxu0 %v11352_v0 }
 0xce4   :  { %10811 = vmatpush1.bf16.msra.mxu1 %v10810_v27  ;;  %v10870_v27 = vpack.c.bf16 %v7762_v31, %v7761_v23 }
 0xce5   :  { %10812 = vmatprep.subr.bf16.mxu1 %v11352_v0 }
 0xce8   :  { %10814 = vmatpush1.bf16.msra.mxu1 %v10813_v12  ;;  %v10873_v12 = vpack.c.bf16 %v7764_v47, %v7763_v34 }
 0xce9   :  { %10815 = vmatprep.subr.bf16.mxu1 %v11352_v0 }
 0xcec   :  { %10817 = vmatpush1.bf16.msra.mxu1 %v10816_v59 }
 0xced   :  { %10818 = vmatprep.subr.bf16.mxu1 %v11352_v0 }
 0xcf0   :  { %10820 = vmatpush1.bf16.msra.mxu1 %v10819_v16 }
 0xcf1   :  { %10821 = vmatprep.subr.bf16.mxu1 %v11352_v0 }
 0xcf3   :  { %7612 = vmatmul.mubr.f32.vlgmr.msra.gmra.mrb[46].mxu1 %v13971_v43  ;;  %v8950_v43 = vld [vmem:[%s14498_s10 + $0x3b0] sm:$0xff] }
 0xcf4   :  { %10823 = vmatpush1.bf16.msra.mxu1 %v10822_v45  ;;  %8943 = vmatprep.mubr.msk.f32.mxu1 %vm6612_vm5, %v14046_v25  ;;  %v8951_v25 = vld [vmem:[%s14498_s10 + $0x3b8] sm:$0xff] }
 0xcf5   :  { %10824 = vmatprep.subr.bf16.mxu1 %v11352_v0  ;;  %v10831_v8 = vpack.c.bf16 %v8951_v25, %v8950_v43 }
 0xcf7   :  { %7617 = vmatmul.mubr.f32.gmra.mrb[48].mxu1 %v14037_v10  ;;  %v8952_v10 = vld [vmem:[%s14498_s10 + $0x3c0] sm:$0xff] }
 0xcf8   :  { %10826 = vmatpush1.bf16.msra.mxu1 %v10825_v5  ;;  %8972 = vmatprep.mubr.msk.f32.mxu1 %vm6612_vm5, %v14057_v7  ;;  %v8953_v7 = vld [vmem:[%s14498_s10 + $0x3c8] sm:$0xff] }
 0xcf9   :  { %10827 = vmatprep.subr.bf16.mxu1 %v11352_v0  ;;  %v10834_v21 = vpack.c.bf16 %v8953_v7, %v8952_v10 }
 0xcfc   :  { %10829 = vmatpush1.bf16.msra.mxu1 %v10828_v13 }
 0xcfd   :  { %10830 = vmatprep.subr.bf16.mxu1 %v11352_v0 }
 0xd00   :  { %10832 = vmatpush1.bf16.msra.mxu1 %v10831_v8 }
 0xd01   :  { %10833 = vmatprep.subr.bf16.mxu1 %v11352_v0 }
 0xd04   :  { %10835 = vmatpush1.bf16.msra.mxu1 %v10834_v21 }
 0xd05   :  { %10836 = vmatprep.subr.bf16.mxu1 %v11352_v0 }
 0xd08   :  { %10838 = vmatpush1.bf16.msra.mxu1 %v10837_v22 }
 0xd09   :  { %10839 = vmatprep.subr.bf16.mxu1 %v11352_v0 }
 0xd0c   :  { %10841 = vmatpush1.bf16.msra.mxu1 %v10840_v54  ;;  %v7920_v54 = vld [vmem:[%s14500_s12 + $0x10] sm:$0xff] }
 0xd0d   :  { %10842 = vmatprep.subr.bf16.mxu1 %v11352_v0 }
 0xd10   :  { %10844 = vmatpush1.bf16.msra.mxu1 %v10843_v14  ;;  %v10891_v14 = vpack.c.bf16 %v7921_v32, %v7920_v54 }
 0xd11   :  { %10845 = vmatprep.subr.bf16.mxu1 %v11352_v0 }
 0xd14   :  { %10847 = vmatpush1.bf16.msra.mxu1 %v10846_v37 }
 0xd15   :  { %10848 = vmatprep.subr.bf16.mxu1 %v11352_v0 }
 0xd18   :  { %10850 = vmatpush1.bf16.msra.mxu1 %v10849_v19 }
 0xd19   :  { %10851 = vmatprep.subr.bf16.mxu1 %v11352_v0 }
 0xd1c   :  { %10853 = vmatpush1.bf16.msra.mxu1 %v10852_v4 }
 0xd1d   :  { %10854 = vmatprep.subr.bf16.mxu1 %v11352_v0 }
 0xd20   :  { %10856 = vmatpush1.bf16.msra.mxu1 %v10855_v49 }
 0xd21   :  { %10857 = vmatprep.subr.bf16.mxu1 %v11352_v0 }
 0xd24   :  { %10859 = vmatpush1.bf16.msra.mxu1 %v10858_v9  ;;  %v10900_v9 = vpack.c.bf16 %v8979_v29, %v8978_v60 }
 0xd25   :  { %10860 = vmatprep.subr.bf16.mxu1 %v11352_v0 }
 0xd28   :  { %10862 = vmatpush1.bf16.msra.mxu1 %v10861_v17  ;;  %v10903_v17 = vpack.c.bf16 %v8981_v40, %v8980_v28 }
 0xd29   :  { %10863 = vmatprep.subr.bf16.mxu1 %v11352_v0 }
 0xd2b   :  { %7724 = vmatmul.mubr.f32.vlgmr.msra.gmra.mrb[46].mxu1 %v14055_v1  ;;  %v7759_v1 = vld [vmem:[%s14499_s11 + $0x10] sm:$0xff] }
 0xd2c   :  { %8973 = vmatprep.mubr.msk.f32.mxu1 %vm6612_vm5, %v14068_v41  ;;  %10865 = vmatpush3.bf16.msra.mxu1 %v10864_v30  ;;  %v10906_v30 = vpack.c.bf16 %v8983_v46, %v8982_v42 }
 0xd2d   :  { %10866 = vmatprep.subr.bf16.mxu1 %v11352_v0 }
 0xd2f   :  { %7729 = vmatmul.mubr.f32.gmra.mrb[48].mxu1 %v14066_v3  ;;  %v7760_v3 = vld [vmem:[%s14499_s11 + $0x18] sm:$0xff] }
 0xd30   :  { %9741 = vmatprep.mubr.msk.f32.mxu1 %vm11354_vm2, %v11353_v52  ;;  %v10867_v41 = vpack.c.bf16 %v7760_v3, %v7759_v1  ;;  %v8984_v1 = vld [vmem:[%s14501_s13 + $0x70] sm:$0xff]  ;;  %v8985_v3 = vld [vmem:[%s14501_s13 + $0x78] sm:$0xff] }
 0xd32   :  { %10868 = vmatpush3.bf16.msra.mxu1 %v10867_v41  ;;  %10880 = vmatpush3.bf16.msra.mxu0 %v10867_v41  ;;  %v10909_v41 = vpack.c.bf16 %v8985_v3, %v8984_v1 }
 0xd33   :  { %10869 = vmatprep.subr.bf16.mxu1 %v11352_v0  ;;  %10881 = vmatprep.subr.bf16.mxu0 %v11352_v0 }
 0xd36   :  { %10871 = vmatpush3.bf16.msra.mxu1 %v10870_v27  ;;  %10883 = vmatpush3.bf16.msra.mxu0 %v10870_v27 }
 0xd37   :  { %10872 = vmatprep.subr.bf16.mxu1 %v11352_v0  ;;  %10884 = vmatprep.subr.bf16.mxu0 %v11352_v0 }
 0xd3a   :  { %10874 = vmatpush3.bf16.msra.mxu1 %v10873_v12  ;;  %10886 = vmatpush3.bf16.msra.mxu0 %v10873_v12 }
 0xd3b   :  { %10887 = vmatprep.subr.bf16.mxu0 %v11352_v0 }
 0xdfe   :  { %v14359_v35 = vpop.f32.mrb[46].mxu1 }
 0xdff   :  { %v7727_v50 = vpop.f32.mrb[47].mxu1  ;;  %v7746_v59 = vmul.f32 %v14359_v35, %v14359_v35  ;;  %v7737_v55 = vsel %vm7736_vm6, %v14359_v35, 0.0 }
 0xe01   :  { %v7748_v36 = vsel %vm7736_vm6, %v7746_v59, 0.0  ;;  %v8081_v59 = vsub.s32 2, %v13327_v18 }
 0xe02   :  { %v14363_v11 = vpop.f32.mrb[48].mxu1 }
 0xe03   :  { %v7738_v16 = vsel %vm7736_vm6, %v14363_v11, 0.0  ;;  %v7747_v38 = vmul.f32 %v14363_v11, %v14363_v11  ;;  %v7732_v57 = vpop.f32.mrb[49].mxu1 }
 0xe04   :  { %v7739_v45 = vadd.f32 %v7738_v16, %v7737_v55  ;;  %v11275_v16 = vld [vmem:[%s14503_s15] sm:$0xff] }
 0xe05   :  { %v7749_v26 = vsel %vm7736_vm6, %v7747_v38, 0.0 }
 0xe06   :  { %v7740_v5 = vrot.slane %v7739_v45, 4  ;;  %v7750_v63 = vadd.f32 %v7749_v26, %v7748_v36 }
 0xe08   :  { %v7741_v33 = vadd.f32 %v7740_v5, %v7739_v45  ;;  %v7751_v13 = vrot.slane %v7750_v63, 4  ;;  %v8089_v5 = vld [vmem:[%s14501_s13 + $0x10] sm:$0xff] }
 0xe0a   :  { %v7742_v43 = vrot.slane %v7741_v33, 2  ;;  %v7752_v25 = vadd.f32 %v7751_v13, %v7750_v63  ;;  %v8090_v63 = vld [vmem:[%s14501_s13 + $0x18] sm:$0xff]  ;;  %v8091_v13 = vld [vmem:[%s14501_s13 + $0x20] sm:$0xff] }
 0xe0c   :  { %v7743_v8 = vadd.f32 %v7742_v43, %v7741_v33  ;;  %v7753_v10 = vrot.slane %v7752_v25, 2  ;;  %v10915_v33 = vpack.c.bf16 %v8090_v63, %v8089_v5  ;;  %v8092_v43 = vld [vmem:[%s14501_s13 + $0x28] sm:$0xff] }
 0xe0e   :  { %v7744_v7 = vrot.slane %v7743_v8, 1  ;;  %v7754_v21 = vadd.f32 %v7753_v10, %v7752_v25  ;;  %v10918_v25 = vpack.c.bf16 %v8092_v43, %v8091_v13  ;;  %v8094_v10 = vld [vmem:[%s14501_s13 + $0x38] sm:$0xff] }
 0xe10   :  { %v7745_v39 = vadd.f32 %v7744_v7, %v7743_v8  ;;  %v7755_v53 = vrot.slane %v7754_v21, 1  ;;  %v8093_v8 = vld [vmem:[%s14501_s13 + $0x30] sm:$0xff] }
 0xe11   :  { %v10921_v7 = vpack.c.bf16 %v8094_v10, %v8093_v8 }
 0xe12   :  { %9742 = vmatmul.mubr.msk.f32.vlgmr.msra.gmra.mrb[50].mxu1 %vm7736_vm6, %v7745_v39  ;;  %v7756_v22 = vadd.f32 %v7755_v53, %v7754_v21  ;;  %v8255_v39 = vld [vmem:[%s14502_s14] sm:$0xf] }
 0xe14   :  { %9761 = vmatmul.mubr.msk.f32.vlgmr.msra.gmra.mrb[202].mxu0 %vm7736_vm6, %v7756_v22 }
 0xe15   :  { %9771 = vmatprep.mubr.msk.f32.mxu0 %vm11354_vm2, %v11353_v52  ;;  %10889 = vmatpush3.bf16.msra.mxu0 %v10888_v20 }
 0xe16   :  { %10890 = vmatprep.subr.bf16.mxu0 %v11352_v0 }
 0xe19   :  { %10892 = vmatpush3.bf16.msra.mxu0 %v10891_v14 }
 0xe1a   :  { %10893 = vmatprep.subr.bf16.mxu0 %v11352_v0 }
 0xee5   :  { %v7834_v58 = vpop.f32.mrb[50].mxu1 }
 0xee6   :  { %v7838_v48 = vmul.f32 0.125, %v7834_v58  ;;  %v9743_v37 = vpop.f32.mrb[51].mxu1 }
 0xee7   :  { %v7908_v2 = vpop.f32.mrb[202].mxu0 }
 0xee8   :  { %v7913_v62 = vmul.f32 %v7838_v48, %v7838_v48  ;;  %v7912_v19 = vmul.f32 0.125, %v7908_v2  ;;  %v9762_v61 = vpop.f32.mrb[203].mxu0 }
 0xeea   :  { %v7914_v56 = vsub.f32 %v7912_v19, %v7913_v62 }
 0xeec   :  { %v7915_v4 = vmax.f32 %v7914_v56, 0.0 }
 0xeee   :  { %v7916_v15 = vadd.f32 1e-05, %v7915_v4 }
 0xef0   :  { %11267 = vrsqrt.f32 %v7916_v15 }
 0xefa   :  { %v11268_v24 = vpop.eup %11267 }
 0xefb   :  { %9772 = vmatmul.mubr.msk.f32.vlgmr.msra.gmra.mrb[204].mxu0 %vm4386_vm3, %v11268_v24  ;;  %v7995_v49 = vmul.f32 %v11268_v24, %v7838_v48 }
 0xefc   :  { %10895 = vmatpush3.bf16.msra.mxu0 %v10888_v20  ;;  %9782 = vmatprep.mubr.msk.f32.mxu0 %vm11354_vm2, %v11353_v52 }
 0xefd   :  { %10896 = vmatprep.subr.bf16.mxu0 %v11352_v0 }
 0xf00   :  { %10898 = vmatpush3.bf16.msra.mxu0 %v10891_v14  ;;  %v8258_v14 = vsub.s32 4, %v13327_v18 }
 0xf01   :  { %10899 = vmatprep.subr.bf16.mxu0 %v11352_v0 }
 0xf03   :  { %9783 = vmatmul.mubr.msk.f32.vlgmr.msra.gmra.mrb[206].mxu0 %vm4386_vm3, %v7995_v49 }
 0xf04   :  { %9801 = vmatprep.mubr.msk.f32.mxu0 %vm11354_vm2, %v11353_v52  ;;  %10901 = vmatpush3.bf16.msra.mxu0 %v10900_v9 }
 0xf05   :  { %10902 = vmatprep.subr.bf16.mxu0 %v11352_v0 }
 0xf08   :  { %10904 = vmatpush3.bf16.msra.mxu0 %v10903_v17 }
 0xf09   :  { %10905 = vmatprep.subr.bf16.mxu0 %v11352_v0 }
 0xf0c   :  { %10907 = vmatpush3.bf16.msra.mxu0 %v10906_v30 }
 0xf0d   :  { %10908 = vmatprep.subr.bf16.mxu0 %v11352_v0 }
 0xf10   :  { %10910 = vmatpush3.bf16.msra.mxu0 %v10909_v41 }
 0xf11   :  { %10911 = vmatprep.subr.bf16.mxu0 %v11352_v0 }
 0xfce   :  { %v7991_v23 = vpop.f32.mrb[204].mxu0 }
 0xfcf   :  { %v8076_v31 = vrot.slane %v7991_v23, %v13330_v6  ;;  %v9773_v27 = vpop.f32.mrb[205].mxu0  ;;  %v8087_v6 = vld [vmem:[%s14501_s13] sm:$0xff] }
 0xfd1   :  { %v8077_v34 = vmul.f32 %v8076_v31, %v14359_v35  ;;  %v8078_v47 = vmul.f32 %v8076_v31, %v14363_v11  ;;  %v8088_v35 = vld [vmem:[%s14501_s13 + $0x8] sm:$0xff]  ;;  %s11355_s13 = smov [#allocation7]  }
 0xfd2   :  { %v10912_v36 = vpack.c.bf16 %v8088_v35, %v8087_v6  ;;  %s8357_s14 = sshll.u32 %s11355_s13, 4  ;;  %s8358_s14 = int_to_ptr.vmem [resolvable:$true] %s8357_s14 }
 0xfd3   :  { %s11320_s17 = scalar_lea.vmem %s8358_s14, 32  ;;  %p11325_p3 = scmp.lt.s32.totalorder %s8358_s14, %s8358_s14 }
 0xfd4   :  { %p11321_p2 = scmp.ne.s32.totalorder %s8358_s14, %s11320_s17  ;;  %p11326_p4 = scmp.lt.s32.totalorder %s11320_s17, %s11320_s17 }
 0xfd6   :  { %v8065_v12 = vpop.f32.mrb[206].mxu0  ;;  %p11327_p5 = por %p11326_p4, %p11325_p3 }
 0xfd7   :  { %v8070_v50 = vrot.slane %v8065_v12, 6  ;;  %v9784_v55 = vpop.f32.mrb[207].mxu0 }
 0xfd8   :  { %p11328_p6 = pnand %p11327_p5, %p11321_p2 }
 0xfd9   :  { %v8072_v38 = vsub.f32 %v11275_v16, %v8070_v50 }
 0xfdb   :  { %v8082_v57 = vrot.slane %v8072_v38, %v8081_v59 }
 0xfdd   :  { %v8083_v11 = vadd.f32 %v8082_v57, %v8077_v34  ;;  %v8084_v45 = vadd.f32 %v8082_v57, %v8078_v47 }
 0xfdf   :  { %v8086_v26 = vmax.f32 %v8084_v45, 0.0  ;;  %v8085_v21 = vmax.f32 %v8083_v11, 0.0 }
 0xfe1   :  { %9802 = vmatmul.mubr.msk.f32.vlgmr.msra.gmra.mrb[208].mxu0 %vm7736_vm6, %v8086_v26 }
 0xfe2   :  { %10913 = vmatpush3.bf16.msra.mxu0 %v10912_v36  ;;  %9820 = vmatprep.mubr.msk.f32.mxu0 %vm11354_vm2, %v11353_v52 }
 0xfe3   :  { %10914 = vmatprep.subr.bf16.mxu0 %v11352_v0 }
 0xfe6   :  { %10916 = vmatpush3.bf16.msra.mxu0 %v10915_v33 }
 0xfe7   :  { %10917 = vmatprep.subr.bf16.mxu0 %v11352_v0 }
 0xfea   :  { %10919 = vmatpush3.bf16.msra.mxu0 %v10918_v25 }
 0xfeb   :  { %10920 = vmatprep.subr.bf16.mxu0 %v11352_v0  ;;  %v8253_v0 = vrot.slane %v11275_v16, %v8252_v44 }
 0xfee   :  { %10922 = vmatpush3.bf16.msra.mxu0 %v10921_v7 }
 0xfef   :  { %9823 = vmatprep.subr.mxu0 %v11353_v52 }
 0xff1   :  { %9821 = vmatmul.mubr.msk.f32.vlgmr.msra.gmra.mrb[210].mxu0 %vm7736_vm6, %v8085_v21 }
 0xff2   :  { %9825 = vmatprep.mubr.msk.f32.mxu0 %vm11354_vm2, %v11353_v52  ;;  %9824 = vmatpush3.msk.msra.mxu0 %vm8264_vm7, %v8255_v39  ;;  %v8259_v52 = vrot.slane %v11275_v16, %v8258_v14 }
0x10b4   :  { %v8173_v53 = vpop.f32.mrb[208].mxu0 }
0x10b5   :  { %v9803_v22 = vpop.f32.mrb[209].mxu0 }
0x10c4   :  { %v8246_v51 = vpop.f32.mrb[210].mxu0 }
0x10c5   :  { %v8247_v54 = vadd.f32 %v8246_v51, %v8173_v53  ;;  %v9822_v20 = vpop.f32.mrb[211].mxu0 }
0x10c7   :  { %v8254_v32 = vadd.f32 %v8253_v0, %v8247_v54 }
0x10c9   :  { %9826 = vmatmul.mubr.msk.f32.vlgmr.msra.gmra.mrb[212].mxu0 %vm8260_vm8, %v8254_v32 }
0x119c   :  { %v8334_v58 = vpop.f32.mrb[212].mxu0 }
0x119d   :  { %v8335_v48 = vadd.f32 %v8334_v58, %v8259_v52  ;;  %v9827_v37 = vpop.f32.mrb[213].mxu0 }
0x119f   :  { %v8339_v2 = vsel %vm8338_vm9, %v8335_v48, -inf }
0x11a0   :  { %8340 = vmax.xlane.f32.xlu0 %v8339_v2 }
0x122d   :  { %v8341_v62 = vpop.xlane.xlu0 %8340 }
0x122e   :  { %v8342_v19 = vsub.f32 %v8335_v48, %v8341_v62 }
0x1230   :  { %v8343_v61 = vmul.f32 1.442695, %v8342_v19 }
0x1232   :  { %11269 = vpow2.f32 %v8343_v61 }
0x123c   :  { %v11270_v56 = vpop.eup %11269 }
0x123d   :  { %v8345_v4 = vsel %vm8338_vm9, %v11270_v56, 0.0 }
0x123e   :  { %8346 = vadd.xlane.f32.xlu0 %v8345_v4 }
0x12cb   :  { %v8347_v15 = vpop.xlane.xlu0 %8346 }
0x12cc   :  { %11271 = vrcp.f32 %v8347_v15 }
0x12d6   :  { %v11272_v18 = vpop.eup %11271 }
0x12d7   :  { %v8349_v24 = vmul.f32 %v11272_v18, %v11270_v56 }
0x12d9   :  { %8350 = vst.msk [vmem:[#allocation7] sm:$0x3] %vm8338_vm9, %v8349_v24 }
0x12da   :  { %11331 = shalt.err (!%p11328_p6)
}
0x12db   :  { %s11332_s27 = scalar_lea.hbm %s14504_s16, 32 }
0x12dc   :  { %p11333_p7 = scmp.ne.s32.totalorder %s14504_s16, %s11332_s27  ;;  %p11336_p8 = scmp.lt.u32.totalorder %s11332_s27, %s14504_s16 }
0x12de   :  { %p11338_p9 = pnand %p11336_p8, %p11333_p7 }
0x12e0   :  { %11341 = shalt.err (!%p11338_p9)
}
0x12e1   :  { %8360 = dma.vmem_to_hbm [thread:$0]  %s8358_s14, 32, %s14504_s16, [#allocation4]  }
0x12e2   :  { %11346 = dma.done.wait [#allocation4], 32  }
0x12e3   :  { %11347 = vsyncadd [#allocation4], 4294967264 }
0x12e4   :  { %8364 = vsyncpa [#allocation3], 1 }
0x12e5   :  { %8365 = vsyncpa [#allocation6], 1 }
0x12e6   :  { %8366 = vsyncpa [#allocation4], 1 }

</bundles_post_ra>
